<compile_context>
chip_gen: v6e
topology: v6e:2x2x1
jax: 0.10.0
libtpu: 0.0.40
codegen_flags: <defaults>
</compile_context>

<pallas_src>
import functools
import math

import jax
import jax.numpy as jnp
from jax.experimental import pallas as pl
from jax.experimental.pallas import tpu as pltpu

LANES = 128

CFG = dict(
    vocab_size=100,
    max_pos=64,
    hidden=32,
    n_layers=2,
    n_heads=4,
    ffn=64,
    n_classes=3,
)


# ----------------------------------------------------------------------------
# Fused encoder + pooler + classifier kernel (Bt batch elements per grid step)
# ----------------------------------------------------------------------------
def _encoder_kernel(x_ref, bias_ref, eg_ref, eb_ref,
                    wqkv_ref, bqkv_ref, wo_ref, bo_ref, ln1g_ref, ln1b_ref,
                    w1_ref, b1_ref, w2_ref, b2_ref, ln2g_ref, ln2b_ref,
                    pw_ref, pb_ref, cw_ref, cb_ref, o_ref,
                    *, n_layers, n_heads, head_dim, hidden, batch_tile,
                    seq_len, eps):
    bf16, f32 = jnp.bfloat16, jnp.float32
    H, nh, hd, Bt, S = hidden, n_heads, head_dim, batch_tile, seq_len
    M = Bt * S                                   # flattened tokens in this tile

    def layer_norm(v, g, b):
        mu = jnp.mean(v, axis=-1, keepdims=True)
        var = jnp.mean((v - mu) * (v - mu), axis=-1, keepdims=True)
        return (v - mu) * jax.lax.rsqrt(var + eps) * g + b

    def mm(a_bf, w_bf, b=None):
        # bf16 MXU operands, f32 accumulation.
        y = jnp.dot(a_bf, w_bf, preferred_element_type=f32)
        return y if b is None else y + b

    def split_heads(z_bf, off):
        # [M, *] lane slices -> stack heads on a leading batch axis.  Uses a
        # leading-axis concat (cheap) instead of a minor-dim transpose.
        return jnp.concatenate(
            [z_bf[:, off + h * hd: off + (h + 1) * hd].reshape(Bt, S, hd)
             for h in range(nh)], axis=0)        # [nh*Bt, S, hd]

    # Embedding LayerNorm on the flattened [Bt*S, H] token stream (f32).
    x = layer_norm(x_ref[...].reshape(M, H), eg_ref[...], eb_ref[...])

    # Additive key mask, replicated per head ONCE (hoisted out of layer loop).
    bias_h = jnp.concatenate([bias_ref[...]] * nh, axis=0)       # [nh*Bt, 1, S]

    for l in range(n_layers):
        # ---- Self-attention ------------------------------------------------
        # Fused Q|K|V projection (1/sqrt(hd) pre-folded into the Q columns);
        # single bf16 cast of the projection output.
        qkv = mm(x.astype(bf16), wqkv_ref[l], bqkv_ref[l]).astype(bf16)  # [M, 3H]
        q = split_heads(qkv, 0)
        k = split_heads(qkv, H)
        v = split_heads(qkv, 2 * H)

        # One batched score matmul + one softmax chain per layer (all heads).
        s = jnp.einsum('bqd,bkd->bqk', q, k,
                       preferred_element_type=f32) + bias_h      # [nh*Bt, S, S]
        s = s - jnp.max(s, axis=-1, keepdims=True)
        p = jnp.exp(s)
        p = p * pl.reciprocal(jnp.sum(p, axis=-1, keepdims=True), approx=True)
        ctx = jnp.einsum('bqk,bkd->bqd', p.astype(bf16), v,
                         preferred_element_type=f32)             # [nh*Bt, S, hd]

        # Head merge folded into the output projection: head-batched
        # [M,hd]x[hd,H] matmul + head-sum (no lane-wise concatenate of heads).
        proj = jnp.einsum('nmd,ndh->nmh',
                          ctx.astype(bf16).reshape(nh, M, hd), wo_ref[l],
                          preferred_element_type=f32)            # [nh, M, H]
        attn = proj[0]
        for n in range(1, nh):
            attn = attn + proj[n]
        x = layer_norm(attn + bo_ref[l] + x, ln1g_ref[l], ln1b_ref[l])

        # ---- FFN (GELU stats in f32) ----------------------------------------
        # TODO(synk): HF RoBERTa uses exact erf-GELU; tanh approximation here.
        hmid = jax.nn.gelu(mm(x.astype(bf16), w1_ref[l], b1_ref[l]),
                           approximate=True)
        x = layer_norm(mm(hmid.astype(bf16), w2_ref[l], b2_ref[l]) + x,
                       ln2g_ref[l], ln2b_ref[l])

    # ---- Pooler + classifier ------------------------------------------------
    # Gather the <s>/[CLS] row of every batch element in the tile with a tiny
    # one-hot matmul (MXU) instead of a strided sublane gather.
    col = jax.lax.broadcasted_iota(jnp.int32, (Bt, M), 1)
    tgt = jax.lax.broadcasted_iota(jnp.int32, (Bt, M), 0) * S
    sel = (col == tgt).astype(bf16)                              # [Bt, M]
    cls = jnp.dot(sel, x.astype(bf16), preferred_element_type=f32)   # [Bt, H]
    pooled = jnp.tanh(mm(cls.astype(bf16), pw_ref[...], pb_ref[...]))

    # nn.Dropout(p=0.3) is the identity at inference.
    # TODO(synk): training-mode stochastic dropout (pltpu.prng_*) not emitted.
    logits = mm(pooled.astype(bf16), cw_ref[...], cb_ref[...])   # [Bt, 128] lane-dense
    o_ref[...] = logits.astype(o_ref.dtype)


# ----------------------------------------------------------------------------
# Model params
# ----------------------------------------------------------------------------
def init_params(key, cfg):
    H, F, V, P, C, L = (cfg["hidden"], cfg["ffn"], cfg["vocab_size"],
                        cfg["max_pos"], cfg["n_classes"], cfg["n_layers"])

    def dense(k, shape):
        return 0.02 * jax.random.normal(k, shape, dtype=jnp.float32)

    ks = jax.random.split(key, 8)
    return {
        "word_emb": dense(ks[0], (V, H)),
        "pos_emb": dense(ks[1], (P, H)),
        "emb_ln_g": jnp.ones((H,), jnp.float32),
        "emb_ln_b": jnp.zeros((H,), jnp.float32),
        "wqkv": dense(ks[2], (L, H, 3 * H)), "bqkv": jnp.zeros((L, 3 * H), jnp.float32),
        "wo": dense(ks[3], (L, H, H)), "bo": jnp.zeros((L, H), jnp.float32),
        "ln1_g": jnp.ones((L, H), jnp.float32), "ln1_b": jnp.zeros((L, H), jnp.float32),
        "w1": dense(ks[4], (L, H, F)), "b1": jnp.zeros((L, F), jnp.float32),
        "w2": dense(ks[5], (L, F, H)), "b2": jnp.zeros((L, H), jnp.float32),
        "ln2_g": jnp.ones((L, H), jnp.float32), "ln2_b": jnp.zeros((L, H), jnp.float32),
        "pool_w": dense(ks[6], (H, H)), "pool_b": jnp.zeros((H,), jnp.float32),
        "cls_w": dense(ks[7], (H, C)), "cls_b": jnp.zeros((C,), jnp.float32),
    }


# ----------------------------------------------------------------------------
# Forward: glue (embedding lookup, weight prep, dtype casts) + one pallas_call
# ----------------------------------------------------------------------------
def text_classifier_forward(params, input_ids, attention_mask, cfg, batch_tile=8):
    B, S = input_ids.shape
    H, F, L, nh, C = (cfg["hidden"], cfg["ffn"], cfg["n_layers"],
                      cfg["n_heads"], cfg["n_classes"])
    hd = H // nh
    Bt = min(batch_tile, B)
    assert B % Bt == 0, "batch must be divisible by the batch tile"
    bf16 = jnp.bfloat16

    # Embedding lookup stays in plain JAX.
    # TODO(synk): at real sizes, gather word_emb rows in-kernel (scalar-prefetched
    # token ids + per-row DMA) to avoid the [B,S,H] HBM round trip.
    # TODO(synk): RoBERTa offsets position ids by padding_idx+1; toy model uses 0..S-1.
    x_emb = (params["word_emb"][input_ids]
             + params["pos_emb"][jnp.arange(S)][None, :, :])          # [B, S, H] f32

    # Additive key mask, kept in f32 (bf16 would lose the -1e9).
    bias = ((1.0 - attention_mask.astype(jnp.float32)) * -1e9).reshape(B, 1, S)

    # One-time weight prep (outside the hot path): fold 1/sqrt(hd) into the Q
    # columns of the fused QKV weight/bias, reshape the output projection to a
    # per-head layout, cast matmul weights to bf16 (LN params / biases stay f32).
    scale = 1.0 / math.sqrt(hd)
    wqkv = params["wqkv"].at[:, :, :H].multiply(scale).astype(bf16)   # [L, H, 3H]
    bqkv = params["bqkv"].at[:, :H].multiply(scale).reshape(L, 1, 3 * H)
    wo = params["wo"].reshape(L, nh, hd, H).astype(bf16)              # [L, nh, hd, H]
    w1 = params["w1"].astype(bf16)
    w2 = params["w2"].astype(bf16)
    pool_w = params["pool_w"].astype(bf16)

    # Pad classifier output to 128 lanes for a lane-dense final store.
    cls_w_pad = jnp.zeros((H, LANES), jnp.float32).at[:, :C].set(params["cls_w"]).astype(bf16)
    cls_b_pad = jnp.zeros((1, LANES), jnp.float32).at[0, :C].set(params["cls_b"])

    eg = params["emb_ln_g"].reshape(1, H)
    eb = params["emb_ln_b"].reshape(1, H)
    bo = params["bo"].reshape(L, 1, H)
    ln1g = params["ln1_g"].reshape(L, 1, H)
    ln1b = params["ln1_b"].reshape(L, 1, H)
    b1 = params["b1"].reshape(L, 1, F)
    b2 = params["b2"].reshape(L, 1, H)
    ln2g = params["ln2_g"].reshape(L, 1, H)
    ln2b = params["ln2_b"].reshape(L, 1, H)
    pool_b = params["pool_b"].reshape(1, H)

    kernel = functools.partial(
        _encoder_kernel, n_layers=L, n_heads=nh, head_dim=hd, hidden=H,
        batch_tile=Bt, seq_len=S, eps=1e-5)

    per_batch = lambda i: (i, 0, 0)       # batch-tiled operands
    const2 = lambda i: (0, 0)             # resident weights (2-D)
    const3 = lambda i: (0, 0, 0)          # resident weights (3-D)
    const4 = lambda i: (0, 0, 0, 0)       # resident weights (4-D)

    out = pl.pallas_call(
        kernel,
        out_shape=jax.ShapeDtypeStruct((B, LANES), jnp.float32),
        grid=(B // Bt,),
        in_specs=[
            pl.BlockSpec((Bt, S, H), per_batch),       # token embeddings
            pl.BlockSpec((Bt, 1, S), per_batch),       # attention-mask bias
            pl.BlockSpec((1, H), const2),              # emb_ln_g
            pl.BlockSpec((1, H), const2),              # emb_ln_b
            pl.BlockSpec((L, H, 3 * H), const3),       # wqkv (bf16, Q pre-scaled)
            pl.BlockSpec((L, 1, 3 * H), const3),       # bqkv (Q pre-scaled)
            pl.BlockSpec((L, nh, hd, H), const4),      # wo per head (bf16)
            pl.BlockSpec((L, 1, H), const3),           # bo
            pl.BlockSpec((L, 1, H), const3),           # ln1_g
            pl.BlockSpec((L, 1, H), const3),           # ln1_b
            pl.BlockSpec((L, H, F), const3),           # w1 (bf16)
            pl.BlockSpec((L, 1, F), const3),           # b1
            pl.BlockSpec((L, F, H), const3),           # w2 (bf16)
            pl.BlockSpec((L, 1, H), const3),           # b2
            pl.BlockSpec((L, 1, H), const3),           # ln2_g
            pl.BlockSpec((L, 1, H), const3),           # ln2_b
            pl.BlockSpec((H, H), const2),              # pool_w (bf16)
            pl.BlockSpec((1, H), const2),              # pool_b
            pl.BlockSpec((H, LANES), const2),          # classifier W (padded, bf16)
            pl.BlockSpec((1, LANES), const2),          # classifier b (padded)
        ],
        out_specs=pl.BlockSpec((Bt, LANES), lambda i: (i, 0)),
        compiler_params=pltpu.CompilerParams(
            dimension_semantics=("parallel",),          # megacore: batch tiles across TCs
            vmem_limit_bytes=32 * 1024 * 1024),         # safe on v5e/v6e/v7x
    )(x_emb, bias, eg, eb, wqkv, bqkv, wo, bo, ln1g, ln1b,
      w1, b1, w2, b2, ln2g, ln2b, pool_w, pool_b, cls_w_pad, cls_b_pad)

    return out[:, :C]                                   # [B, n_classes]


# ----------------------------------------------------------------------------
# Pure-JAX f32 reference (mirrors the kernel semantics)
# ----------------------------------------------------------------------------
def reference_forward(params, input_ids, attention_mask, cfg):
    H, L, nh, C = cfg["hidden"], cfg["n_layers"], cfg["n_heads"], cfg["n_classes"]
    hd = H // nh
    B, S = input_ids.shape

    def ln(v, g, b):
        mu = jnp.mean(v, -1, keepdims=True)
        var = jnp.mean((v - mu) ** 2, -1, keepdims=True)
        return (v - mu) * jax.lax.rsqrt(var + 1e-5) * g + b

    x = params["word_emb"][input_ids] + params["pos_emb"][jnp.arange(S)][None]
    x = ln(x, params["emb_ln_g"], params["emb_ln_b"])
    mask = ((1.0 - attention_mask.astype(jnp.float32)) * -1e9)[:, None, None, :]
    for l in range(L):
        qkv = x @ params["wqkv"][l] + params["bqkv"][l]
        q, k, v = qkv[..., :H], qkv[..., H:2 * H], qkv[..., 2 * H:]
        q = q.reshape(B, S, nh, hd).transpose(0, 2, 1, 3)
        k = k.reshape(B, S, nh, hd).transpose(0, 2, 1, 3)
        v = v.reshape(B, S, nh, hd).transpose(0, 2, 1, 3)
        s = jnp.einsum('bhqd,bhkd->bhqk', q, k) / math.sqrt(hd) + mask
        p = jax.nn.softmax(s, axis=-1)
        ctx = jnp.einsum('bhqk,bhkd->bhqd', p, v).transpose(0, 2, 1, 3).reshape(B, S, H)
        x = ln(ctx @ params["wo"][l] + params["bo"][l] + x,
               params["ln1_g"][l], params["ln1_b"][l])
        h1 = jax.nn.gelu(x @ params["w1"][l] + params["b1"][l], approximate=True)
        x = ln(h1 @ params["w2"][l] + params["b2"][l] + x,
               params["ln2_g"][l], params["ln2_b"][l])
    pooled = jnp.tanh(x[:, 0, :] @ params["pool_w"] + params["pool_b"])
    return pooled @ params["cls_w"] + params["cls_b"]


if __name__ == "__main__":
    key = jax.random.PRNGKey(0)
    pkey, ikey = jax.random.split(key)
    params = init_params(pkey, CFG)

    B, S = 16, 8
    input_ids = jax.random.randint(ikey, (B, S), 0, CFG["vocab_size"], dtype=jnp.int32)
    attention_mask = (jnp.ones((B, S), dtype=jnp.int32)
                      .at[1, 6:].set(0).at[9, 5:].set(0))      # pad tails of two rows

    fwd = jax.jit(lambda ids, mask: text_classifier_forward(params, ids, mask, CFG))
    logits = jax.block_until_ready(fwd(input_ids, attention_mask))

    assert logits.shape == (B, CFG["n_classes"])
    assert bool(jnp.all(jnp.isfinite(logits)))

    # f32 reference check; generous tolerance covers bf16 MXU operands, the
    # approximate softmax reciprocal and the tanh-GELU.
    ref = reference_forward(params, input_ids, attention_mask, CFG)
    assert bool(jnp.allclose(logits, ref, rtol=2e-2, atol=2e-2)), \
        float(jnp.max(jnp.abs(logits - ref)))

    print("KERNEL_OK")
</pallas_src>

<mosaic_0001>
module attributes {stable_mosaic.version = 11 : i64} {
  func.func @_encoder_kernel(%arg0: i32, %arg1: memref<8x8x32xf32, #tpu.memory_space<vmem>>, %arg2: memref<8x1x8xf32, #tpu.memory_space<vmem>>, %arg3: memref<1x32xf32, #tpu.memory_space<vmem>>, %arg4: memref<1x32xf32, #tpu.memory_space<vmem>>, %arg5: memref<2x32x96xbf16, #tpu.memory_space<vmem>>, %arg6: memref<2x1x96xf32, #tpu.memory_space<vmem>>, %arg7: memref<2x4x8x32xbf16, #tpu.memory_space<vmem>>, %arg8: memref<2x1x32xf32, #tpu.memory_space<vmem>>, %arg9: memref<2x1x32xf32, #tpu.memory_space<vmem>>, %arg10: memref<2x1x32xf32, #tpu.memory_space<vmem>>, %arg11: memref<2x32x64xbf16, #tpu.memory_space<vmem>>, %arg12: memref<2x1x64xf32, #tpu.memory_space<vmem>>, %arg13: memref<2x64x32xbf16, #tpu.memory_space<vmem>>, %arg14: memref<2x1x32xf32, #tpu.memory_space<vmem>>, %arg15: memref<2x1x32xf32, #tpu.memory_space<vmem>>, %arg16: memref<2x1x32xf32, #tpu.memory_space<vmem>>, %arg17: memref<32x32xbf16, #tpu.memory_space<vmem>>, %arg18: memref<1x32xf32, #tpu.memory_space<vmem>>, %arg19: memref<32x128xbf16, #tpu.memory_space<vmem>>, %arg20: memref<1x128xf32, #tpu.memory_space<vmem>>, %arg21: memref<8x128xf32, #tpu.memory_space<vmem>>) attributes {dimension_semantics = [#tpu.dimension_semantics<parallel>], iteration_bounds = array<i64: 2>, scalar_prefetch = 0 : i64, scratch_operands = 0 : i64, tpu.core_type = #tpu.core_type<tc>, window_params = [{transform_indices = @transform_0, window_bounds = array<i64: 8, 8, 32>}, {transform_indices = @transform_1, window_bounds = array<i64: 8, 1, 8>}, {pipeline_mode = #tpu.pipeline_mode<synchronous>, transform_indices = @transform_2, window_bounds = array<i64: 1, 32>}, {pipeline_mode = #tpu.pipeline_mode<synchronous>, transform_indices = @transform_3, window_bounds = array<i64: 1, 32>}, {pipeline_mode = #tpu.pipeline_mode<synchronous>, transform_indices = @transform_4, window_bounds = array<i64: 2, 32, 96>}, {pipeline_mode = #tpu.pipeline_mode<synchronous>, transform_indices = @transform_5, window_bounds = array<i64: 2, 1, 96>}, {pipeline_mode = #tpu.pipeline_mode<synchronous>, transform_indices = @transform_6, window_bounds = array<i64: 2, 4, 8, 32>}, {pipeline_mode = #tpu.pipeline_mode<synchronous>, transform_indices = @transform_7, window_bounds = array<i64: 2, 1, 32>}, {pipeline_mode = #tpu.pipeline_mode<synchronous>, transform_indices = @transform_8, window_bounds = array<i64: 2, 1, 32>}, {pipeline_mode = #tpu.pipeline_mode<synchronous>, transform_indices = @transform_9, window_bounds = array<i64: 2, 1, 32>}, {pipeline_mode = #tpu.pipeline_mode<synchronous>, transform_indices = @transform_10, window_bounds = array<i64: 2, 32, 64>}, {pipeline_mode = #tpu.pipeline_mode<synchronous>, transform_indices = @transform_11, window_bounds = array<i64: 2, 1, 64>}, {pipeline_mode = #tpu.pipeline_mode<synchronous>, transform_indices = @transform_12, window_bounds = array<i64: 2, 64, 32>}, {pipeline_mode = #tpu.pipeline_mode<synchronous>, transform_indices = @transform_13, window_bounds = array<i64: 2, 1, 32>}, {pipeline_mode = #tpu.pipeline_mode<synchronous>, transform_indices = @transform_14, window_bounds = array<i64: 2, 1, 32>}, {pipeline_mode = #tpu.pipeline_mode<synchronous>, transform_indices = @transform_15, window_bounds = array<i64: 2, 1, 32>}, {pipeline_mode = #tpu.pipeline_mode<synchronous>, transform_indices = @transform_16, window_bounds = array<i64: 32, 32>}, {pipeline_mode = #tpu.pipeline_mode<synchronous>, transform_indices = @transform_17, window_bounds = array<i64: 1, 32>}, {pipeline_mode = #tpu.pipeline_mode<synchronous>, transform_indices = @transform_18, window_bounds = array<i64: 32, 128>}, {pipeline_mode = #tpu.pipeline_mode<synchronous>, transform_indices = @transform_19, window_bounds = array<i64: 1, 128>}, {transform_indices = @transform_20, window_bounds = array<i64: 8, 128>}]} {
    %c0 = arith.constant 0 : index
    %c0_0 = arith.constant 0 : index
    %c0_1 = arith.constant 0 : index
    %0 = vector.load %arg1[%c0, %c0_0, %c0_1] : memref<8x8x32xf32, #tpu.memory_space<vmem>>, vector<8x8x32xf32>
    %1 = vector.shape_cast %0 : vector<8x8x32xf32> to vector<64x32xf32>
    %c0_2 = arith.constant 0 : index
    %c0_3 = arith.constant 0 : index
    %2 = vector.load %arg3[%c0_2, %c0_3] : memref<1x32xf32, #tpu.memory_space<vmem>>, vector<1x32xf32>
    %c0_4 = arith.constant 0 : index
    %c0_5 = arith.constant 0 : index
    %3 = vector.load %arg4[%c0_4, %c0_5] : memref<1x32xf32, #tpu.memory_space<vmem>>, vector<1x32xf32>
    %cst = arith.constant dense<0.000000e+00> : vector<64xf32>
    %4 = vector.multi_reduction <add>, %1, %cst [1] : vector<64x32xf32> to vector<64xf32>
    %5 = vector.shape_cast %4 : vector<64xf32> to vector<64x1xf32>
    %cst_6 = arith.constant 3.200000e+01 : f32
    %6 = vector.broadcast %cst_6 : f32 to vector<64x1xf32>
    %7 = arith.divf %5, %6 : vector<64x1xf32>
    %8 = vector.broadcast %7 : vector<64x1xf32> to vector<64x32xf32>
    %9 = arith.subf %1, %8 : vector<64x32xf32>
    %10 = vector.broadcast %7 : vector<64x1xf32> to vector<64x32xf32>
    %11 = arith.subf %1, %10 : vector<64x32xf32>
    %12 = arith.mulf %9, %11 : vector<64x32xf32>
    %cst_7 = arith.constant dense<0.000000e+00> : vector<64xf32>
    %13 = vector.multi_reduction <add>, %12, %cst_7 [1] : vector<64x32xf32> to vector<64xf32>
    %14 = vector.shape_cast %13 : vector<64xf32> to vector<64x1xf32>
    %cst_8 = arith.constant 3.200000e+01 : f32
    %15 = vector.broadcast %cst_8 : f32 to vector<64x1xf32>
    %16 = arith.divf %14, %15 : vector<64x1xf32>
    %17 = vector.broadcast %7 : vector<64x1xf32> to vector<64x32xf32>
    %18 = arith.subf %1, %17 : vector<64x32xf32>
    %cst_9 = arith.constant 9.99999974E-6 : f32
    %19 = vector.broadcast %cst_9 : f32 to vector<64x1xf32>
    %20 = arith.addf %16, %19 : vector<64x1xf32>
    %21 = math.rsqrt %20 : vector<64x1xf32>
    %22 = vector.broadcast %21 : vector<64x1xf32> to vector<64x32xf32>
    %23 = arith.mulf %18, %22 : vector<64x32xf32>
    %24 = vector.broadcast %2 : vector<1x32xf32> to vector<64x32xf32>
    %25 = arith.mulf %23, %24 : vector<64x32xf32>
    %26 = vector.broadcast %3 : vector<1x32xf32> to vector<64x32xf32>
    %27 = arith.addf %25, %26 : vector<64x32xf32>
    %c0_10 = arith.constant 0 : index
    %c0_11 = arith.constant 0 : index
    %c0_12 = arith.constant 0 : index
    %28 = vector.load %arg2[%c0_10, %c0_11, %c0_12] : memref<8x1x8xf32, #tpu.memory_space<vmem>>, vector<8x1x8xf32>
    %29 = tpu.concatenate %28, %28, %28, %28 in 0 : vector<8x1x8xf32>, vector<8x1x8xf32>, vector<8x1x8xf32>, vector<8x1x8xf32> -> vector<32x1x8xf32>
    %30 = arith.truncf %27 : vector<64x32xf32> to vector<64x32xbf16>
    %c0_13 = arith.constant 0 : index
    %c0_14 = arith.constant 0 : index
    %c0_15 = arith.constant 0 : index
    %31 = vector.load %arg5[%c0_13, %c0_14, %c0_15] : memref<2x32x96xbf16, #tpu.memory_space<vmem>>, vector<1x32x96xbf16>
    %32 = vector.shape_cast %31 : vector<1x32x96xbf16> to vector<32x96xbf16>
    %c0_16 = arith.constant 0 : index
    %c0_17 = arith.constant 0 : index
    %c0_18 = arith.constant 0 : index
    %33 = vector.load %arg6[%c0_16, %c0_17, %c0_18] : memref<2x1x96xf32, #tpu.memory_space<vmem>>, vector<1x1x96xf32>
    %34 = vector.shape_cast %33 : vector<1x1x96xf32> to vector<1x96xf32>
    %cst_19 = arith.constant dense<0.000000e+00> : vector<64x96xf32>
    %35 = tpu.matmul %30, %32, %cst_19 {dimension_numbers = #tpu.dot_dimension_numbers<[1], [0], [0], [1], [0, 0, 1, 1], [], []>} : vector<64x32xbf16>, vector<32x96xbf16>, vector<64x96xf32> -> vector<64x96xf32>
    %36 = vector.broadcast %34 : vector<1x96xf32> to vector<64x96xf32>
    %37 = arith.addf %35, %36 : vector<64x96xf32>
    %38 = arith.truncf %37 : vector<64x96xf32> to vector<64x96xbf16>
    %39 = vector.extract_strided_slice %38 {offsets = [0, 0], sizes = [64, 8], strides = [1, 1]} : vector<64x96xbf16> to vector<64x8xbf16>
    %40 = vector.shape_cast %39 : vector<64x8xbf16> to vector<8x8x8xbf16>
    %41 = vector.extract_strided_slice %38 {offsets = [0, 8], sizes = [64, 8], strides = [1, 1]} : vector<64x96xbf16> to vector<64x8xbf16>
    %42 = vector.shape_cast %41 : vector<64x8xbf16> to vector<8x8x8xbf16>
    %43 = vector.extract_strided_slice %38 {offsets = [0, 16], sizes = [64, 8], strides = [1, 1]} : vector<64x96xbf16> to vector<64x8xbf16>
    %44 = vector.shape_cast %43 : vector<64x8xbf16> to vector<8x8x8xbf16>
    %45 = vector.extract_strided_slice %38 {offsets = [0, 24], sizes = [64, 8], strides = [1, 1]} : vector<64x96xbf16> to vector<64x8xbf16>
    %46 = vector.shape_cast %45 : vector<64x8xbf16> to vector<8x8x8xbf16>
    %47 = tpu.concatenate %40, %42, %44, %46 in 0 : vector<8x8x8xbf16>, vector<8x8x8xbf16>, vector<8x8x8xbf16>, vector<8x8x8xbf16> -> vector<32x8x8xbf16>
    %48 = vector.extract_strided_slice %38 {offsets = [0, 32], sizes = [64, 8], strides = [1, 1]} : vector<64x96xbf16> to vector<64x8xbf16>
    %49 = vector.shape_cast %48 : vector<64x8xbf16> to vector<8x8x8xbf16>
    %50 = vector.extract_strided_slice %38 {offsets = [0, 40], sizes = [64, 8], strides = [1, 1]} : vector<64x96xbf16> to vector<64x8xbf16>
    %51 = vector.shape_cast %50 : vector<64x8xbf16> to vector<8x8x8xbf16>
    %52 = vector.extract_strided_slice %38 {offsets = [0, 48], sizes = [64, 8], strides = [1, 1]} : vector<64x96xbf16> to vector<64x8xbf16>
    %53 = vector.shape_cast %52 : vector<64x8xbf16> to vector<8x8x8xbf16>
    %54 = vector.extract_strided_slice %38 {offsets = [0, 56], sizes = [64, 8], strides = [1, 1]} : vector<64x96xbf16> to vector<64x8xbf16>
    %55 = vector.shape_cast %54 : vector<64x8xbf16> to vector<8x8x8xbf16>
    %56 = tpu.concatenate %49, %51, %53, %55 in 0 : vector<8x8x8xbf16>, vector<8x8x8xbf16>, vector<8x8x8xbf16>, vector<8x8x8xbf16> -> vector<32x8x8xbf16>
    %57 = vector.extract_strided_slice %38 {offsets = [0, 64], sizes = [64, 8], strides = [1, 1]} : vector<64x96xbf16> to vector<64x8xbf16>
    %58 = vector.shape_cast %57 : vector<64x8xbf16> to vector<8x8x8xbf16>
    %59 = vector.extract_strided_slice %38 {offsets = [0, 72], sizes = [64, 8], strides = [1, 1]} : vector<64x96xbf16> to vector<64x8xbf16>
    %60 = vector.shape_cast %59 : vector<64x8xbf16> to vector<8x8x8xbf16>
    %61 = vector.extract_strided_slice %38 {offsets = [0, 80], sizes = [64, 8], strides = [1, 1]} : vector<64x96xbf16> to vector<64x8xbf16>
    %62 = vector.shape_cast %61 : vector<64x8xbf16> to vector<8x8x8xbf16>
    %63 = vector.extract_strided_slice %38 {offsets = [0, 88], sizes = [64, 8], strides = [1, 1]} : vector<64x96xbf16> to vector<64x8xbf16>
    %64 = vector.shape_cast %63 : vector<64x8xbf16> to vector<8x8x8xbf16>
    %65 = tpu.concatenate %58, %60, %62, %64 in 0 : vector<8x8x8xbf16>, vector<8x8x8xbf16>, vector<8x8x8xbf16>, vector<8x8x8xbf16> -> vector<32x8x8xbf16>
    "tpu.trace_start"() <{level = 10 : i32, message = "bqd,bkd->bqk"}> : () -> ()
    %cst_20 = arith.constant dense<0.000000e+00> : vector<32x8x8xf32>
    %66 = tpu.matmul %47, %56, %cst_20 {dimension_numbers = #tpu.dot_dimension_numbers<[2], [2], [1], [1], [0, 0, 0, 1, 1, 1], [0], [0]>} : vector<32x8x8xbf16>, vector<32x8x8xbf16>, vector<32x8x8xf32> -> vector<32x8x8xf32>
    "tpu.trace_stop"() : () -> ()
    %67 = vector.broadcast %29 : vector<32x1x8xf32> to vector<32x8x8xf32>
    %68 = arith.addf %66, %67 : vector<32x8x8xf32>
    %cst_21 = arith.constant dense<0xFF800000> : vector<32x8xf32>
    %69 = vector.multi_reduction <maximumf>, %68, %cst_21 [2] : vector<32x8x8xf32> to vector<32x8xf32>
    %70 = vector.shape_cast %69 : vector<32x8xf32> to vector<32x8x1xf32>
    %71 = vector.broadcast %70 : vector<32x8x1xf32> to vector<32x8x8xf32>
    %72 = arith.subf %68, %71 : vector<32x8x8xf32>
    %73 = math.exp %72 : vector<32x8x8xf32>
    %cst_22 = arith.constant dense<0.000000e+00> : vector<32x8xf32>
    %74 = vector.multi_reduction <add>, %73, %cst_22 [2] : vector<32x8x8xf32> to vector<32x8xf32>
    %75 = vector.shape_cast %74 : vector<32x8xf32> to vector<32x8x1xf32>
    %76 = tpu.reciprocal %75 {approx = true} : vector<32x8x1xf32> -> vector<32x8x1xf32>
    %77 = vector.broadcast %76 : vector<32x8x1xf32> to vector<32x8x8xf32>
    %78 = arith.mulf %73, %77 : vector<32x8x8xf32>
    %79 = arith.truncf %78 : vector<32x8x8xf32> to vector<32x8x8xbf16>
    "tpu.trace_start"() <{level = 10 : i32, message = "bqk,bkd->bqd"}> : () -> ()
    %cst_23 = arith.constant dense<0.000000e+00> : vector<32x8x8xf32>
    %80 = tpu.matmul %79, %65, %cst_23 {dimension_numbers = #tpu.dot_dimension_numbers<[2], [1], [1], [2], [0, 0, 0, 1, 1, 2], [0], [0]>} : vector<32x8x8xbf16>, vector<32x8x8xbf16>, vector<32x8x8xf32> -> vector<32x8x8xf32>
    "tpu.trace_stop"() : () -> ()
    %81 = arith.truncf %80 : vector<32x8x8xf32> to vector<32x8x8xbf16>
    %82 = vector.shape_cast %81 : vector<32x8x8xbf16> to vector<4x64x8xbf16>
    %c0_24 = arith.constant 0 : index
    %c0_25 = arith.constant 0 : index
    %c0_26 = arith.constant 0 : index
    %c0_27 = arith.constant 0 : index
    %83 = vector.load %arg7[%c0_24, %c0_25, %c0_26, %c0_27] : memref<2x4x8x32xbf16, #tpu.memory_space<vmem>>, vector<1x4x8x32xbf16>
    %84 = vector.shape_cast %83 : vector<1x4x8x32xbf16> to vector<4x8x32xbf16>
    "tpu.trace_start"() <{level = 10 : i32, message = "nmd,ndh->nmh"}> : () -> ()
    %cst_28 = arith.constant dense<0.000000e+00> : vector<4x64x32xf32>
    %85 = tpu.matmul %82, %84, %cst_28 {dimension_numbers = #tpu.dot_dimension_numbers<[2], [1], [1], [2], [0, 0, 0, 1, 1, 2], [0], [0]>} : vector<4x64x8xbf16>, vector<4x8x32xbf16>, vector<4x64x32xf32> -> vector<4x64x32xf32>
    "tpu.trace_stop"() : () -> ()
    %86 = vector.extract_strided_slice %85 {offsets = [0, 0, 0], sizes = [1, 64, 32], strides = [1, 1, 1]} : vector<4x64x32xf32> to vector<1x64x32xf32>
    %87 = vector.shape_cast %86 : vector<1x64x32xf32> to vector<64x32xf32>
    %88 = vector.extract_strided_slice %85 {offsets = [1, 0, 0], sizes = [1, 64, 32], strides = [1, 1, 1]} : vector<4x64x32xf32> to vector<1x64x32xf32>
    %89 = vector.shape_cast %88 : vector<1x64x32xf32> to vector<64x32xf32>
    %90 = arith.addf %87, %89 : vector<64x32xf32>
    %91 = vector.extract_strided_slice %85 {offsets = [2, 0, 0], sizes = [1, 64, 32], strides = [1, 1, 1]} : vector<4x64x32xf32> to vector<1x64x32xf32>
    %92 = vector.shape_cast %91 : vector<1x64x32xf32> to vector<64x32xf32>
    %93 = arith.addf %90, %92 : vector<64x32xf32>
    %94 = vector.extract_strided_slice %85 {offsets = [3, 0, 0], sizes = [1, 64, 32], strides = [1, 1, 1]} : vector<4x64x32xf32> to vector<1x64x32xf32>
    %95 = vector.shape_cast %94 : vector<1x64x32xf32> to vector<64x32xf32>
    %96 = arith.addf %93, %95 : vector<64x32xf32>
    %c0_29 = arith.constant 0 : index
    %c0_30 = arith.constant 0 : index
    %c0_31 = arith.constant 0 : index
    %97 = vector.load %arg8[%c0_29, %c0_30, %c0_31] : memref<2x1x32xf32, #tpu.memory_space<vmem>>, vector<1x1x32xf32>
    %98 = vector.shape_cast %97 : vector<1x1x32xf32> to vector<1x32xf32>
    %99 = vector.broadcast %98 : vector<1x32xf32> to vector<64x32xf32>
    %100 = arith.addf %96, %99 : vector<64x32xf32>
    %101 = arith.addf %100, %27 : vector<64x32xf32>
    %c0_32 = arith.constant 0 : index
    %c0_33 = arith.constant 0 : index
    %c0_34 = arith.constant 0 : index
    %102 = vector.load %arg9[%c0_32, %c0_33, %c0_34] : memref<2x1x32xf32, #tpu.memory_space<vmem>>, vector<1x1x32xf32>
    %103 = vector.shape_cast %102 : vector<1x1x32xf32> to vector<1x32xf32>
    %c0_35 = arith.constant 0 : index
    %c0_36 = arith.constant 0 : index
    %c0_37 = arith.constant 0 : index
    %104 = vector.load %arg10[%c0_35, %c0_36, %c0_37] : memref<2x1x32xf32, #tpu.memory_space<vmem>>, vector<1x1x32xf32>
    %105 = vector.shape_cast %104 : vector<1x1x32xf32> to vector<1x32xf32>
    %cst_38 = arith.constant dense<0.000000e+00> : vector<64xf32>
    %106 = vector.multi_reduction <add>, %101, %cst_38 [1] : vector<64x32xf32> to vector<64xf32>
    %107 = vector.shape_cast %106 : vector<64xf32> to vector<64x1xf32>
    %cst_39 = arith.constant 3.200000e+01 : f32
    %108 = vector.broadcast %cst_39 : f32 to vector<64x1xf32>
    %109 = arith.divf %107, %108 : vector<64x1xf32>
    %110 = vector.broadcast %109 : vector<64x1xf32> to vector<64x32xf32>
    %111 = arith.subf %101, %110 : vector<64x32xf32>
    %112 = vector.broadcast %109 : vector<64x1xf32> to vector<64x32xf32>
    %113 = arith.subf %101, %112 : vector<64x32xf32>
    %114 = arith.mulf %111, %113 : vector<64x32xf32>
    %cst_40 = arith.constant dense<0.000000e+00> : vector<64xf32>
    %115 = vector.multi_reduction <add>, %114, %cst_40 [1] : vector<64x32xf32> to vector<64xf32>
    %116 = vector.shape_cast %115 : vector<64xf32> to vector<64x1xf32>
    %cst_41 = arith.constant 3.200000e+01 : f32
    %117 = vector.broadcast %cst_41 : f32 to vector<64x1xf32>
    %118 = arith.divf %116, %117 : vector<64x1xf32>
    %119 = vector.broadcast %109 : vector<64x1xf32> to vector<64x32xf32>
    %120 = arith.subf %101, %119 : vector<64x32xf32>
    %cst_42 = arith.constant 9.99999974E-6 : f32
    %121 = vector.broadcast %cst_42 : f32 to vector<64x1xf32>
    %122 = arith.addf %118, %121 : vector<64x1xf32>
    %123 = math.rsqrt %122 : vector<64x1xf32>
    %124 = vector.broadcast %123 : vector<64x1xf32> to vector<64x32xf32>
    %125 = arith.mulf %120, %124 : vector<64x32xf32>
    %126 = vector.broadcast %103 : vector<1x32xf32> to vector<64x32xf32>
    %127 = arith.mulf %125, %126 : vector<64x32xf32>
    %128 = vector.broadcast %105 : vector<1x32xf32> to vector<64x32xf32>
    %129 = arith.addf %127, %128 : vector<64x32xf32>
    %130 = arith.truncf %129 : vector<64x32xf32> to vector<64x32xbf16>
    %c0_43 = arith.constant 0 : index
    %c0_44 = arith.constant 0 : index
    %c0_45 = arith.constant 0 : index
    %131 = vector.load %arg11[%c0_43, %c0_44, %c0_45] : memref<2x32x64xbf16, #tpu.memory_space<vmem>>, vector<1x32x64xbf16>
    %132 = vector.shape_cast %131 : vector<1x32x64xbf16> to vector<32x64xbf16>
    %c0_46 = arith.constant 0 : index
    %c0_47 = arith.constant 0 : index
    %c0_48 = arith.constant 0 : index
    %133 = vector.load %arg12[%c0_46, %c0_47, %c0_48] : memref<2x1x64xf32, #tpu.memory_space<vmem>>, vector<1x1x64xf32>
    %134 = vector.shape_cast %133 : vector<1x1x64xf32> to vector<1x64xf32>
    %cst_49 = arith.constant dense<0.000000e+00> : vector<64x64xf32>
    %135 = tpu.matmul %130, %132, %cst_49 {dimension_numbers = #tpu.dot_dimension_numbers<[1], [0], [0], [1], [0, 0, 1, 1], [], []>} : vector<64x32xbf16>, vector<32x64xbf16>, vector<64x64xf32> -> vector<64x64xf32>
    %136 = vector.broadcast %134 : vector<1x64xf32> to vector<64x64xf32>
    %137 = arith.addf %135, %136 : vector<64x64xf32>
    %138 = arith.mulf %137, %137 : vector<64x64xf32>
    %139 = arith.mulf %137, %138 : vector<64x64xf32>
    %cst_50 = arith.constant 4.471500e-02 : f32
    %140 = vector.broadcast %cst_50 : f32 to vector<64x64xf32>
    %141 = arith.mulf %140, %139 : vector<64x64xf32>
    %142 = arith.addf %137, %141 : vector<64x64xf32>
    %cst_51 = arith.constant 0.797884583 : f32
    %143 = vector.broadcast %cst_51 : f32 to vector<64x64xf32>
    %144 = arith.mulf %143, %142 : vector<64x64xf32>
    %145 = math.tanh %144 : vector<64x64xf32>
    %cst_52 = arith.constant 1.000000e+00 : f32
    %146 = vector.broadcast %cst_52 : f32 to vector<64x64xf32>
    %147 = arith.addf %146, %145 : vector<64x64xf32>
    %cst_53 = arith.constant 5.000000e-01 : f32
    %148 = vector.broadcast %cst_53 : f32 to vector<64x64xf32>
    %149 = arith.mulf %148, %147 : vector<64x64xf32>
    %150 = arith.mulf %137, %149 : vector<64x64xf32>
    %151 = arith.truncf %150 : vector<64x64xf32> to vector<64x64xbf16>
    %c0_54 = arith.constant 0 : index
    %c0_55 = arith.constant 0 : index
    %c0_56 = arith.constant 0 : index
    %152 = vector.load %arg13[%c0_54, %c0_55, %c0_56] : memref<2x64x32xbf16, #tpu.memory_space<vmem>>, vector<1x64x32xbf16>
    %153 = vector.shape_cast %152 : vector<1x64x32xbf16> to vector<64x32xbf16>
    %c0_57 = arith.constant 0 : index
    %c0_58 = arith.constant 0 : index
    %c0_59 = arith.constant 0 : index
    %154 = vector.load %arg14[%c0_57, %c0_58, %c0_59] : memref<2x1x32xf32, #tpu.memory_space<vmem>>, vector<1x1x32xf32>
    %155 = vector.shape_cast %154 : vector<1x1x32xf32> to vector<1x32xf32>
    %cst_60 = arith.constant dense<0.000000e+00> : vector<64x32xf32>
    %156 = tpu.matmul %151, %153, %cst_60 {dimension_numbers = #tpu.dot_dimension_numbers<[1], [0], [0], [1], [0, 0, 1, 1], [], []>} : vector<64x64xbf16>, vector<64x32xbf16>, vector<64x32xf32> -> vector<64x32xf32>
    %157 = vector.broadcast %155 : vector<1x32xf32> to vector<64x32xf32>
    %158 = arith.addf %156, %157 : vector<64x32xf32>
    %159 = arith.addf %158, %129 : vector<64x32xf32>
    %c0_61 = arith.constant 0 : index
    %c0_62 = arith.constant 0 : index
    %c0_63 = arith.constant 0 : index
    %160 = vector.load %arg15[%c0_61, %c0_62, %c0_63] : memref<2x1x32xf32, #tpu.memory_space<vmem>>, vector<1x1x32xf32>
    %161 = vector.shape_cast %160 : vector<1x1x32xf32> to vector<1x32xf32>
    %c0_64 = arith.constant 0 : index
    %c0_65 = arith.constant 0 : index
    %c0_66 = arith.constant 0 : index
    %162 = vector.load %arg16[%c0_64, %c0_65, %c0_66] : memref<2x1x32xf32, #tpu.memory_space<vmem>>, vector<1x1x32xf32>
    %163 = vector.shape_cast %162 : vector<1x1x32xf32> to vector<1x32xf32>
    %cst_67 = arith.constant dense<0.000000e+00> : vector<64xf32>
    %164 = vector.multi_reduction <add>, %159, %cst_67 [1] : vector<64x32xf32> to vector<64xf32>
    %165 = vector.shape_cast %164 : vector<64xf32> to vector<64x1xf32>
    %cst_68 = arith.constant 3.200000e+01 : f32
    %166 = vector.broadcast %cst_68 : f32 to vector<64x1xf32>
    %167 = arith.divf %165, %166 : vector<64x1xf32>
    %168 = vector.broadcast %167 : vector<64x1xf32> to vector<64x32xf32>
    %169 = arith.subf %159, %168 : vector<64x32xf32>
    %170 = vector.broadcast %167 : vector<64x1xf32> to vector<64x32xf32>
    %171 = arith.subf %159, %170 : vector<64x32xf32>
    %172 = arith.mulf %169, %171 : vector<64x32xf32>
    %cst_69 = arith.constant dense<0.000000e+00> : vector<64xf32>
    %173 = vector.multi_reduction <add>, %172, %cst_69 [1] : vector<64x32xf32> to vector<64xf32>
    %174 = vector.shape_cast %173 : vector<64xf32> to vector<64x1xf32>
    %cst_70 = arith.constant 3.200000e+01 : f32
    %175 = vector.broadcast %cst_70 : f32 to vector<64x1xf32>
    %176 = arith.divf %174, %175 : vector<64x1xf32>
    %177 = vector.broadcast %167 : vector<64x1xf32> to vector<64x32xf32>
    %178 = arith.subf %159, %177 : vector<64x32xf32>
    %cst_71 = arith.constant 9.99999974E-6 : f32
    %179 = vector.broadcast %cst_71 : f32 to vector<64x1xf32>
    %180 = arith.addf %176, %179 : vector<64x1xf32>
    %181 = math.rsqrt %180 : vector<64x1xf32>
    %182 = vector.broadcast %181 : vector<64x1xf32> to vector<64x32xf32>
    %183 = arith.mulf %178, %182 : vector<64x32xf32>
    %184 = vector.broadcast %161 : vector<1x32xf32> to vector<64x32xf32>
    %185 = arith.mulf %183, %184 : vector<64x32xf32>
    %186 = vector.broadcast %163 : vector<1x32xf32> to vector<64x32xf32>
    %187 = arith.addf %185, %186 : vector<64x32xf32>
    %188 = arith.truncf %187 : vector<64x32xf32> to vector<64x32xbf16>
    %c1 = arith.constant 1 : index
    %c0_72 = arith.constant 0 : index
    %c0_73 = arith.constant 0 : index
    %189 = vector.load %arg5[%c1, %c0_72, %c0_73] : memref<2x32x96xbf16, #tpu.memory_space<vmem>>, vector<1x32x96xbf16>
    %190 = vector.shape_cast %189 : vector<1x32x96xbf16> to vector<32x96xbf16>
    %c1_74 = arith.constant 1 : index
    %c0_75 = arith.constant 0 : index
    %c0_76 = arith.constant 0 : index
    %191 = vector.load %arg6[%c1_74, %c0_75, %c0_76] : memref<2x1x96xf32, #tpu.memory_space<vmem>>, vector<1x1x96xf32>
    %192 = vector.shape_cast %191 : vector<1x1x96xf32> to vector<1x96xf32>
    %cst_77 = arith.constant dense<0.000000e+00> : vector<64x96xf32>
    %193 = tpu.matmul %188, %190, %cst_77 {dimension_numbers = #tpu.dot_dimension_numbers<[1], [0], [0], [1], [0, 0, 1, 1], [], []>} : vector<64x32xbf16>, vector<32x96xbf16>, vector<64x96xf32> -> vector<64x96xf32>
    %194 = vector.broadcast %192 : vector<1x96xf32> to vector<64x96xf32>
    %195 = arith.addf %193, %194 : vector<64x96xf32>
    %196 = arith.truncf %195 : vector<64x96xf32> to vector<64x96xbf16>
    %197 = vector.extract_strided_slice %196 {offsets = [0, 0], sizes = [64, 8], strides = [1, 1]} : vector<64x96xbf16> to vector<64x8xbf16>
    %198 = vector.shape_cast %197 : vector<64x8xbf16> to vector<8x8x8xbf16>
    %199 = vector.extract_strided_slice %196 {offsets = [0, 8], sizes = [64, 8], strides = [1, 1]} : vector<64x96xbf16> to vector<64x8xbf16>
    %200 = vector.shape_cast %199 : vector<64x8xbf16> to vector<8x8x8xbf16>
    %201 = vector.extract_strided_slice %196 {offsets = [0, 16], sizes = [64, 8], strides = [1, 1]} : vector<64x96xbf16> to vector<64x8xbf16>
    %202 = vector.shape_cast %201 : vector<64x8xbf16> to vector<8x8x8xbf16>
    %203 = vector.extract_strided_slice %196 {offsets = [0, 24], sizes = [64, 8], strides = [1, 1]} : vector<64x96xbf16> to vector<64x8xbf16>
    %204 = vector.shape_cast %203 : vector<64x8xbf16> to vector<8x8x8xbf16>
    %205 = tpu.concatenate %198, %200, %202, %204 in 0 : vector<8x8x8xbf16>, vector<8x8x8xbf16>, vector<8x8x8xbf16>, vector<8x8x8xbf16> -> vector<32x8x8xbf16>
    %206 = vector.extract_strided_slice %196 {offsets = [0, 32], sizes = [64, 8], strides = [1, 1]} : vector<64x96xbf16> to vector<64x8xbf16>
    %207 = vector.shape_cast %206 : vector<64x8xbf16> to vector<8x8x8xbf16>
    %208 = vector.extract_strided_slice %196 {offsets = [0, 40], sizes = [64, 8], strides = [1, 1]} : vector<64x96xbf16> to vector<64x8xbf16>
    %209 = vector.shape_cast %208 : vector<64x8xbf16> to vector<8x8x8xbf16>
    %210 = vector.extract_strided_slice %196 {offsets = [0, 48], sizes = [64, 8], strides = [1, 1]} : vector<64x96xbf16> to vector<64x8xbf16>
    %211 = vector.shape_cast %210 : vector<64x8xbf16> to vector<8x8x8xbf16>
    %212 = vector.extract_strided_slice %196 {offsets = [0, 56], sizes = [64, 8], strides = [1, 1]} : vector<64x96xbf16> to vector<64x8xbf16>
    %213 = vector.shape_cast %212 : vector<64x8xbf16> to vector<8x8x8xbf16>
    %214 = tpu.concatenate %207, %209, %211, %213 in 0 : vector<8x8x8xbf16>, vector<8x8x8xbf16>, vector<8x8x8xbf16>, vector<8x8x8xbf16> -> vector<32x8x8xbf16>
    %215 = vector.extract_strided_slice %196 {offsets = [0, 64], sizes = [64, 8], strides = [1, 1]} : vector<64x96xbf16> to vector<64x8xbf16>
    %216 = vector.shape_cast %215 : vector<64x8xbf16> to vector<8x8x8xbf16>
    %217 = vector.extract_strided_slice %196 {offsets = [0, 72], sizes = [64, 8], strides = [1, 1]} : vector<64x96xbf16> to vector<64x8xbf16>
    %218 = vector.shape_cast %217 : vector<64x8xbf16> to vector<8x8x8xbf16>
    %219 = vector.extract_strided_slice %196 {offsets = [0, 80], sizes = [64, 8], strides = [1, 1]} : vector<64x96xbf16> to vector<64x8xbf16>
    %220 = vector.shape_cast %219 : vector<64x8xbf16> to vector<8x8x8xbf16>
    %221 = vector.extract_strided_slice %196 {offsets = [0, 88], sizes = [64, 8], strides = [1, 1]} : vector<64x96xbf16> to vector<64x8xbf16>
    %222 = vector.shape_cast %221 : vector<64x8xbf16> to vector<8x8x8xbf16>
    %223 = tpu.concatenate %216, %218, %220, %222 in 0 : vector<8x8x8xbf16>, vector<8x8x8xbf16>, vector<8x8x8xbf16>, vector<8x8x8xbf16> -> vector<32x8x8xbf16>
    "tpu.trace_start"() <{level = 10 : i32, message = "bqd,bkd->bqk"}> : () -> ()
    %cst_78 = arith.constant dense<0.000000e+00> : vector<32x8x8xf32>
    %224 = tpu.matmul %205, %214, %cst_78 {dimension_numbers = #tpu.dot_dimension_numbers<[2], [2], [1], [1], [0, 0, 0, 1, 1, 1], [0], [0]>} : vector<32x8x8xbf16>, vector<32x8x8xbf16>, vector<32x8x8xf32> -> vector<32x8x8xf32>
    "tpu.trace_stop"() : () -> ()
    %225 = vector.broadcast %29 : vector<32x1x8xf32> to vector<32x8x8xf32>
    %226 = arith.addf %224, %225 : vector<32x8x8xf32>
    %cst_79 = arith.constant dense<0xFF800000> : vector<32x8xf32>
    %227 = vector.multi_reduction <maximumf>, %226, %cst_79 [2] : vector<32x8x8xf32> to vector<32x8xf32>
    %228 = vector.shape_cast %227 : vector<32x8xf32> to vector<32x8x1xf32>
    %229 = vector.broadcast %228 : vector<32x8x1xf32> to vector<32x8x8xf32>
    %230 = arith.subf %226, %229 : vector<32x8x8xf32>
    %231 = math.exp %230 : vector<32x8x8xf32>
    %cst_80 = arith.constant dense<0.000000e+00> : vector<32x8xf32>
    %232 = vector.multi_reduction <add>, %231, %cst_80 [2] : vector<32x8x8xf32> to vector<32x8xf32>
    %233 = vector.shape_cast %232 : vector<32x8xf32> to vector<32x8x1xf32>
    %234 = tpu.reciprocal %233 {approx = true} : vector<32x8x1xf32> -> vector<32x8x1xf32>
    %235 = vector.broadcast %234 : vector<32x8x1xf32> to vector<32x8x8xf32>
    %236 = arith.mulf %231, %235 : vector<32x8x8xf32>
    %237 = arith.truncf %236 : vector<32x8x8xf32> to vector<32x8x8xbf16>
    "tpu.trace_start"() <{level = 10 : i32, message = "bqk,bkd->bqd"}> : () -> ()
    %cst_81 = arith.constant dense<0.000000e+00> : vector<32x8x8xf32>
    %238 = tpu.matmul %237, %223, %cst_81 {dimension_numbers = #tpu.dot_dimension_numbers<[2], [1], [1], [2], [0, 0, 0, 1, 1, 2], [0], [0]>} : vector<32x8x8xbf16>, vector<32x8x8xbf16>, vector<32x8x8xf32> -> vector<32x8x8xf32>
    "tpu.trace_stop"() : () -> ()
    %239 = arith.truncf %238 : vector<32x8x8xf32> to vector<32x8x8xbf16>
    %240 = vector.shape_cast %239 : vector<32x8x8xbf16> to vector<4x64x8xbf16>
    %c1_82 = arith.constant 1 : index
    %c0_83 = arith.constant 0 : index
    %c0_84 = arith.constant 0 : index
    %c0_85 = arith.constant 0 : index
    %241 = vector.load %arg7[%c1_82, %c0_83, %c0_84, %c0_85] : memref<2x4x8x32xbf16, #tpu.memory_space<vmem>>, vector<1x4x8x32xbf16>
    %242 = vector.shape_cast %241 : vector<1x4x8x32xbf16> to vector<4x8x32xbf16>
    "tpu.trace_start"() <{level = 10 : i32, message = "nmd,ndh->nmh"}> : () -> ()
    %cst_86 = arith.constant dense<0.000000e+00> : vector<4x64x32xf32>
    %243 = tpu.matmul %240, %242, %cst_86 {dimension_numbers = #tpu.dot_dimension_numbers<[2], [1], [1], [2], [0, 0, 0, 1, 1, 2], [0], [0]>} : vector<4x64x8xbf16>, vector<4x8x32xbf16>, vector<4x64x32xf32> -> vector<4x64x32xf32>
    "tpu.trace_stop"() : () -> ()
    %244 = vector.extract_strided_slice %243 {offsets = [0, 0, 0], sizes = [1, 64, 32], strides = [1, 1, 1]} : vector<4x64x32xf32> to vector<1x64x32xf32>
    %245 = vector.shape_cast %244 : vector<1x64x32xf32> to vector<64x32xf32>
    %246 = vector.extract_strided_slice %243 {offsets = [1, 0, 0], sizes = [1, 64, 32], strides = [1, 1, 1]} : vector<4x64x32xf32> to vector<1x64x32xf32>
    %247 = vector.shape_cast %246 : vector<1x64x32xf32> to vector<64x32xf32>
    %248 = arith.addf %245, %247 : vector<64x32xf32>
    %249 = vector.extract_strided_slice %243 {offsets = [2, 0, 0], sizes = [1, 64, 32], strides = [1, 1, 1]} : vector<4x64x32xf32> to vector<1x64x32xf32>
    %250 = vector.shape_cast %249 : vector<1x64x32xf32> to vector<64x32xf32>
    %251 = arith.addf %248, %250 : vector<64x32xf32>
    %252 = vector.extract_strided_slice %243 {offsets = [3, 0, 0], sizes = [1, 64, 32], strides = [1, 1, 1]} : vector<4x64x32xf32> to vector<1x64x32xf32>
    %253 = vector.shape_cast %252 : vector<1x64x32xf32> to vector<64x32xf32>
    %254 = arith.addf %251, %253 : vector<64x32xf32>
    %c1_87 = arith.constant 1 : index
    %c0_88 = arith.constant 0 : index
    %c0_89 = arith.constant 0 : index
    %255 = vector.load %arg8[%c1_87, %c0_88, %c0_89] : memref<2x1x32xf32, #tpu.memory_space<vmem>>, vector<1x1x32xf32>
    %256 = vector.shape_cast %255 : vector<1x1x32xf32> to vector<1x32xf32>
    %257 = vector.broadcast %256 : vector<1x32xf32> to vector<64x32xf32>
    %258 = arith.addf %254, %257 : vector<64x32xf32>
    %259 = arith.addf %258, %187 : vector<64x32xf32>
    %c1_90 = arith.constant 1 : index
    %c0_91 = arith.constant 0 : index
    %c0_92 = arith.constant 0 : index
    %260 = vector.load %arg9[%c1_90, %c0_91, %c0_92] : memref<2x1x32xf32, #tpu.memory_space<vmem>>, vector<1x1x32xf32>
    %261 = vector.shape_cast %260 : vector<1x1x32xf32> to vector<1x32xf32>
    %c1_93 = arith.constant 1 : index
    %c0_94 = arith.constant 0 : index
    %c0_95 = arith.constant 0 : index
    %262 = vector.load %arg10[%c1_93, %c0_94, %c0_95] : memref<2x1x32xf32, #tpu.memory_space<vmem>>, vector<1x1x32xf32>
    %263 = vector.shape_cast %262 : vector<1x1x32xf32> to vector<1x32xf32>
    %cst_96 = arith.constant dense<0.000000e+00> : vector<64xf32>
    %264 = vector.multi_reduction <add>, %259, %cst_96 [1] : vector<64x32xf32> to vector<64xf32>
    %265 = vector.shape_cast %264 : vector<64xf32> to vector<64x1xf32>
    %cst_97 = arith.constant 3.200000e+01 : f32
    %266 = vector.broadcast %cst_97 : f32 to vector<64x1xf32>
    %267 = arith.divf %265, %266 : vector<64x1xf32>
    %268 = vector.broadcast %267 : vector<64x1xf32> to vector<64x32xf32>
    %269 = arith.subf %259, %268 : vector<64x32xf32>
    %270 = vector.broadcast %267 : vector<64x1xf32> to vector<64x32xf32>
    %271 = arith.subf %259, %270 : vector<64x32xf32>
    %272 = arith.mulf %269, %271 : vector<64x32xf32>
    %cst_98 = arith.constant dense<0.000000e+00> : vector<64xf32>
    %273 = vector.multi_reduction <add>, %272, %cst_98 [1] : vector<64x32xf32> to vector<64xf32>
    %274 = vector.shape_cast %273 : vector<64xf32> to vector<64x1xf32>
    %cst_99 = arith.constant 3.200000e+01 : f32
    %275 = vector.broadcast %cst_99 : f32 to vector<64x1xf32>
    %276 = arith.divf %274, %275 : vector<64x1xf32>
    %277 = vector.broadcast %267 : vector<64x1xf32> to vector<64x32xf32>
    %278 = arith.subf %259, %277 : vector<64x32xf32>
    %cst_100 = arith.constant 9.99999974E-6 : f32
    %279 = vector.broadcast %cst_100 : f32 to vector<64x1xf32>
    %280 = arith.addf %276, %279 : vector<64x1xf32>
    %281 = math.rsqrt %280 : vector<64x1xf32>
    %282 = vector.broadcast %281 : vector<64x1xf32> to vector<64x32xf32>
    %283 = arith.mulf %278, %282 : vector<64x32xf32>
    %284 = vector.broadcast %261 : vector<1x32xf32> to vector<64x32xf32>
    %285 = arith.mulf %283, %284 : vector<64x32xf32>
    %286 = vector.broadcast %263 : vector<1x32xf32> to vector<64x32xf32>
    %287 = arith.addf %285, %286 : vector<64x32xf32>
    %288 = arith.truncf %287 : vector<64x32xf32> to vector<64x32xbf16>
    %c1_101 = arith.constant 1 : index
    %c0_102 = arith.constant 0 : index
    %c0_103 = arith.constant 0 : index
    %289 = vector.load %arg11[%c1_101, %c0_102, %c0_103] : memref<2x32x64xbf16, #tpu.memory_space<vmem>>, vector<1x32x64xbf16>
    %290 = vector.shape_cast %289 : vector<1x32x64xbf16> to vector<32x64xbf16>
    %c1_104 = arith.constant 1 : index
    %c0_105 = arith.constant 0 : index
    %c0_106 = arith.constant 0 : index
    %291 = vector.load %arg12[%c1_104, %c0_105, %c0_106] : memref<2x1x64xf32, #tpu.memory_space<vmem>>, vector<1x1x64xf32>
    %292 = vector.shape_cast %291 : vector<1x1x64xf32> to vector<1x64xf32>
    %cst_107 = arith.constant dense<0.000000e+00> : vector<64x64xf32>
    %293 = tpu.matmul %288, %290, %cst_107 {dimension_numbers = #tpu.dot_dimension_numbers<[1], [0], [0], [1], [0, 0, 1, 1], [], []>} : vector<64x32xbf16>, vector<32x64xbf16>, vector<64x64xf32> -> vector<64x64xf32>
    %294 = vector.broadcast %292 : vector<1x64xf32> to vector<64x64xf32>
    %295 = arith.addf %293, %294 : vector<64x64xf32>
    %296 = arith.mulf %295, %295 : vector<64x64xf32>
    %297 = arith.mulf %295, %296 : vector<64x64xf32>
    %cst_108 = arith.constant 4.471500e-02 : f32
    %298 = vector.broadcast %cst_108 : f32 to vector<64x64xf32>
    %299 = arith.mulf %298, %297 : vector<64x64xf32>
    %300 = arith.addf %295, %299 : vector<64x64xf32>
    %cst_109 = arith.constant 0.797884583 : f32
    %301 = vector.broadcast %cst_109 : f32 to vector<64x64xf32>
    %302 = arith.mulf %301, %300 : vector<64x64xf32>
    %303 = math.tanh %302 : vector<64x64xf32>
    %cst_110 = arith.constant 1.000000e+00 : f32
    %304 = vector.broadcast %cst_110 : f32 to vector<64x64xf32>
    %305 = arith.addf %304, %303 : vector<64x64xf32>
    %cst_111 = arith.constant 5.000000e-01 : f32
    %306 = vector.broadcast %cst_111 : f32 to vector<64x64xf32>
    %307 = arith.mulf %306, %305 : vector<64x64xf32>
    %308 = arith.mulf %295, %307 : vector<64x64xf32>
    %309 = arith.truncf %308 : vector<64x64xf32> to vector<64x64xbf16>
    %c1_112 = arith.constant 1 : index
    %c0_113 = arith.constant 0 : index
    %c0_114 = arith.constant 0 : index
    %310 = vector.load %arg13[%c1_112, %c0_113, %c0_114] : memref<2x64x32xbf16, #tpu.memory_space<vmem>>, vector<1x64x32xbf16>
    %311 = vector.shape_cast %310 : vector<1x64x32xbf16> to vector<64x32xbf16>
    %c1_115 = arith.constant 1 : index
    %c0_116 = arith.constant 0 : index
    %c0_117 = arith.constant 0 : index
    %312 = vector.load %arg14[%c1_115, %c0_116, %c0_117] : memref<2x1x32xf32, #tpu.memory_space<vmem>>, vector<1x1x32xf32>
    %313 = vector.shape_cast %312 : vector<1x1x32xf32> to vector<1x32xf32>
    %cst_118 = arith.constant dense<0.000000e+00> : vector<64x32xf32>
    %314 = tpu.matmul %309, %311, %cst_118 {dimension_numbers = #tpu.dot_dimension_numbers<[1], [0], [0], [1], [0, 0, 1, 1], [], []>} : vector<64x64xbf16>, vector<64x32xbf16>, vector<64x32xf32> -> vector<64x32xf32>
    %315 = vector.broadcast %313 : vector<1x32xf32> to vector<64x32xf32>
    %316 = arith.addf %314, %315 : vector<64x32xf32>
    %317 = arith.addf %316, %287 : vector<64x32xf32>
    %c1_119 = arith.constant 1 : index
    %c0_120 = arith.constant 0 : index
    %c0_121 = arith.constant 0 : index
    %318 = vector.load %arg15[%c1_119, %c0_120, %c0_121] : memref<2x1x32xf32, #tpu.memory_space<vmem>>, vector<1x1x32xf32>
    %319 = vector.shape_cast %318 : vector<1x1x32xf32> to vector<1x32xf32>
    %c1_122 = arith.constant 1 : index
    %c0_123 = arith.constant 0 : index
    %c0_124 = arith.constant 0 : index
    %320 = vector.load %arg16[%c1_122, %c0_123, %c0_124] : memref<2x1x32xf32, #tpu.memory_space<vmem>>, vector<1x1x32xf32>
    %321 = vector.shape_cast %320 : vector<1x1x32xf32> to vector<1x32xf32>
    %cst_125 = arith.constant dense<0.000000e+00> : vector<64xf32>
    %322 = vector.multi_reduction <add>, %317, %cst_125 [1] : vector<64x32xf32> to vector<64xf32>
    %323 = vector.shape_cast %322 : vector<64xf32> to vector<64x1xf32>
    %cst_126 = arith.constant 3.200000e+01 : f32
    %324 = vector.broadcast %cst_126 : f32 to vector<64x1xf32>
    %325 = arith.divf %323, %324 : vector<64x1xf32>
    %326 = vector.broadcast %325 : vector<64x1xf32> to vector<64x32xf32>
    %327 = arith.subf %317, %326 : vector<64x32xf32>
    %328 = vector.broadcast %325 : vector<64x1xf32> to vector<64x32xf32>
    %329 = arith.subf %317, %328 : vector<64x32xf32>
    %330 = arith.mulf %327, %329 : vector<64x32xf32>
    %cst_127 = arith.constant dense<0.000000e+00> : vector<64xf32>
    %331 = vector.multi_reduction <add>, %330, %cst_127 [1] : vector<64x32xf32> to vector<64xf32>
    %332 = vector.shape_cast %331 : vector<64xf32> to vector<64x1xf32>
    %cst_128 = arith.constant 3.200000e+01 : f32
    %333 = vector.broadcast %cst_128 : f32 to vector<64x1xf32>
    %334 = arith.divf %332, %333 : vector<64x1xf32>
    %335 = vector.broadcast %325 : vector<64x1xf32> to vector<64x32xf32>
    %336 = arith.subf %317, %335 : vector<64x32xf32>
    %cst_129 = arith.constant 9.99999974E-6 : f32
    %337 = vector.broadcast %cst_129 : f32 to vector<64x1xf32>
    %338 = arith.addf %334, %337 : vector<64x1xf32>
    %339 = math.rsqrt %338 : vector<64x1xf32>
    %340 = vector.broadcast %339 : vector<64x1xf32> to vector<64x32xf32>
    %341 = arith.mulf %336, %340 : vector<64x32xf32>
    %342 = vector.broadcast %319 : vector<1x32xf32> to vector<64x32xf32>
    %343 = arith.mulf %341, %342 : vector<64x32xf32>
    %344 = vector.broadcast %321 : vector<1x32xf32> to vector<64x32xf32>
    %345 = arith.addf %343, %344 : vector<64x32xf32>
    %346 = tpu.iota {dimensions = array<i32: 1>} : vector<8x64xi32>
    %347 = tpu.iota {dimensions = array<i32: 0>} : vector<8x64xi32>
    %c8_i32 = arith.constant 8 : i32
    %348 = vector.broadcast %c8_i32 : i32 to vector<8x64xi32>
    %349 = arith.muli %347, %348 : vector<8x64xi32>
    %350 = arith.cmpi eq, %346, %349 : vector<8x64xi32>
    %351 = arith.extui %350 : vector<8x64xi1> to vector<8x64xi32>
    %352 = arith.sitofp %351 : vector<8x64xi32> to vector<8x64xf32>
    %353 = arith.truncf %352 : vector<8x64xf32> to vector<8x64xbf16>
    %354 = arith.truncf %345 : vector<64x32xf32> to vector<64x32xbf16>
    %cst_130 = arith.constant dense<0.000000e+00> : vector<8x32xf32>
    %355 = tpu.matmul %353, %354, %cst_130 {dimension_numbers = #tpu.dot_dimension_numbers<[1], [0], [0], [1], [0, 0, 1, 1], [], []>} : vector<8x64xbf16>, vector<64x32xbf16>, vector<8x32xf32> -> vector<8x32xf32>
    %356 = arith.truncf %355 : vector<8x32xf32> to vector<8x32xbf16>
    %c0_131 = arith.constant 0 : index
    %c0_132 = arith.constant 0 : index
    %357 = vector.load %arg17[%c0_131, %c0_132] : memref<32x32xbf16, #tpu.memory_space<vmem>>, vector<32x32xbf16>
    %c0_133 = arith.constant 0 : index
    %c0_134 = arith.constant 0 : index
    %358 = vector.load %arg18[%c0_133, %c0_134] : memref<1x32xf32, #tpu.memory_space<vmem>>, vector<1x32xf32>
    %cst_135 = arith.constant dense<0.000000e+00> : vector<8x32xf32>
    %359 = tpu.matmul %356, %357, %cst_135 {dimension_numbers = #tpu.dot_dimension_numbers<[1], [0], [0], [1], [0, 0, 1, 1], [], []>} : vector<8x32xbf16>, vector<32x32xbf16>, vector<8x32xf32> -> vector<8x32xf32>
    %360 = vector.broadcast %358 : vector<1x32xf32> to vector<8x32xf32>
    %361 = arith.addf %359, %360 : vector<8x32xf32>
    %362 = math.tanh %361 : vector<8x32xf32>
    %363 = arith.truncf %362 : vector<8x32xf32> to vector<8x32xbf16>
    %c0_136 = arith.constant 0 : index
    %c0_137 = arith.constant 0 : index
    %364 = vector.load %arg19[%c0_136, %c0_137] : memref<32x128xbf16, #tpu.memory_space<vmem>>, vector<32x128xbf16>
    %c0_138 = arith.constant 0 : index
    %c0_139 = arith.constant 0 : index
    %365 = vector.load %arg20[%c0_138, %c0_139] : memref<1x128xf32, #tpu.memory_space<vmem>>, vector<1x128xf32>
    %cst_140 = arith.constant dense<0.000000e+00> : vector<8x128xf32>
    %366 = tpu.matmul %363, %364, %cst_140 {dimension_numbers = #tpu.dot_dimension_numbers<[1], [0], [0], [1], [0, 0, 1, 1], [], []>} : vector<8x32xbf16>, vector<32x128xbf16>, vector<8x128xf32> -> vector<8x128xf32>
    %367 = vector.broadcast %365 : vector<1x128xf32> to vector<8x128xf32>
    %368 = arith.addf %366, %367 : vector<8x128xf32>
    %c0_141 = arith.constant 0 : index
    %c0_142 = arith.constant 0 : index
    %369 = vector.load %arg21[%c0_141, %c0_142] : memref<8x128xf32, #tpu.memory_space<vmem>>, vector<8x128xf32>
    tpu.vector_store %arg21[%c0_141, %c0_142], %368 {strides = array<i32>} : memref<8x128xf32, #tpu.memory_space<vmem>>, vector<8x128xf32>,
    return
  }
  func.func @transform_0(%arg0: i32) -> (i32, i32, i32) {
    %c0_i32 = arith.constant 0 : i32
    %c0_i32_0 = arith.constant 0 : i32
    %c0_i32_1 = arith.constant 0 : i32
    return %arg0, %c0_i32, %c0_i32_0 : i32, i32, i32
  }
  func.func @transform_1(%arg0: i32) -> (i32, i32, i32) {
    %c0_i32 = arith.constant 0 : i32
    %c0_i32_0 = arith.constant 0 : i32
    %c0_i32_1 = arith.constant 0 : i32
    return %arg0, %c0_i32, %c0_i32_0 : i32, i32, i32
  }
  func.func @transform_2(%arg0: i32) -> (i32, i32) {
    %c0_i32 = arith.constant 0 : i32
    %c0_i32_0 = arith.constant 0 : i32
    %c0_i32_1 = arith.constant 0 : i32
    return %c0_i32, %c0_i32_0 : i32, i32
  }
  func.func @transform_3(%arg0: i32) -> (i32, i32) {
    %c0_i32 = arith.constant 0 : i32
    %c0_i32_0 = arith.constant 0 : i32
    %c0_i32_1 = arith.constant 0 : i32
    return %c0_i32, %c0_i32_0 : i32, i32
  }
  func.func @transform_4(%arg0: i32) -> (i32, i32, i32) {
    %c0_i32 = arith.constant 0 : i32
    %c0_i32_0 = arith.constant 0 : i32
    %c0_i32_1 = arith.constant 0 : i32
    %c0_i32_2 = arith.constant 0 : i32
    return %c0_i32, %c0_i32_0, %c0_i32_1 : i32, i32, i32
  }
  func.func @transform_5(%arg0: i32) -> (i32, i32, i32) {
    %c0_i32 = arith.constant 0 : i32
    %c0_i32_0 = arith.constant 0 : i32
    %c0_i32_1 = arith.constant 0 : i32
    %c0_i32_2 = arith.constant 0 : i32
    return %c0_i32, %c0_i32_0, %c0_i32_1 : i32, i32, i32
  }
  func.func @transform_6(%arg0: i32) -> (i32, i32, i32, i32) {
    %c0_i32 = arith.constant 0 : i32
    %c0_i32_0 = arith.constant 0 : i32
    %c0_i32_1 = arith.constant 0 : i32
    %c0_i32_2 = arith.constant 0 : i32
    %c0_i32_3 = arith.constant 0 : i32
    return %c0_i32, %c0_i32_0, %c0_i32_1, %c0_i32_2 : i32, i32, i32, i32
  }
  func.func @transform_7(%arg0: i32) -> (i32, i32, i32) {
    %c0_i32 = arith.constant 0 : i32
    %c0_i32_0 = arith.constant 0 : i32
    %c0_i32_1 = arith.constant 0 : i32
    %c0_i32_2 = arith.constant 0 : i32
    return %c0_i32, %c0_i32_0, %c0_i32_1 : i32, i32, i32
  }
  func.func @transform_8(%arg0: i32) -> (i32, i32, i32) {
    %c0_i32 = arith.constant 0 : i32
    %c0_i32_0 = arith.constant 0 : i32
    %c0_i32_1 = arith.constant 0 : i32
    %c0_i32_2 = arith.constant 0 : i32
    return %c0_i32, %c0_i32_0, %c0_i32_1 : i32, i32, i32
  }
  func.func @transform_9(%arg0: i32) -> (i32, i32, i32) {
    %c0_i32 = arith.constant 0 : i32
    %c0_i32_0 = arith.constant 0 : i32
    %c0_i32_1 = arith.constant 0 : i32
    %c0_i32_2 = arith.constant 0 : i32
    return %c0_i32, %c0_i32_0, %c0_i32_1 : i32, i32, i32
  }
  func.func @transform_10(%arg0: i32) -> (i32, i32, i32) {
    %c0_i32 = arith.constant 0 : i32
    %c0_i32_0 = arith.constant 0 : i32
    %c0_i32_1 = arith.constant 0 : i32
    %c0_i32_2 = arith.constant 0 : i32
    return %c0_i32, %c0_i32_0, %c0_i32_1 : i32, i32, i32
  }
  func.func @transform_11(%arg0: i32) -> (i32, i32, i32) {
    %c0_i32 = arith.constant 0 : i32
    %c0_i32_0 = arith.constant 0 : i32
    %c0_i32_1 = arith.constant 0 : i32
    %c0_i32_2 = arith.constant 0 : i32
    return %c0_i32, %c0_i32_0, %c0_i32_1 : i32, i32, i32
  }
  func.func @transform_12(%arg0: i32) -> (i32, i32, i32) {
    %c0_i32 = arith.constant 0 : i32
    %c0_i32_0 = arith.constant 0 : i32
    %c0_i32_1 = arith.constant 0 : i32
    %c0_i32_2 = arith.constant 0 : i32
    return %c0_i32, %c0_i32_0, %c0_i32_1 : i32, i32, i32
  }
  func.func @transform_13(%arg0: i32) -> (i32, i32, i32) {
    %c0_i32 = arith.constant 0 : i32
    %c0_i32_0 = arith.constant 0 : i32
    %c0_i32_1 = arith.constant 0 : i32
    %c0_i32_2 = arith.constant 0 : i32
    return %c0_i32, %c0_i32_0, %c0_i32_1 : i32, i32, i32
  }
  func.func @transform_14(%arg0: i32) -> (i32, i32, i32) {
    %c0_i32 = arith.constant 0 : i32
    %c0_i32_0 = arith.constant 0 : i32
    %c0_i32_1 = arith.constant 0 : i32
    %c0_i32_2 = arith.constant 0 : i32
    return %c0_i32, %c0_i32_0, %c0_i32_1 : i32, i32, i32
  }
  func.func @transform_15(%arg0: i32) -> (i32, i32, i32) {
    %c0_i32 = arith.constant 0 : i32
    %c0_i32_0 = arith.constant 0 : i32
    %c0_i32_1 = arith.constant 0 : i32
    %c0_i32_2 = arith.constant 0 : i32
    return %c0_i32, %c0_i32_0, %c0_i32_1 : i32, i32, i32
  }
  func.func @transform_16(%arg0: i32) -> (i32, i32) {
    %c0_i32 = arith.constant 0 : i32
    %c0_i32_0 = arith.constant 0 : i32
    %c0_i32_1 = arith.constant 0 : i32
    return %c0_i32, %c0_i32_0 : i32, i32
  }
  func.func @transform_17(%arg0: i32) -> (i32, i32) {
    %c0_i32 = arith.constant 0 : i32
    %c0_i32_0 = arith.constant 0 : i32
    %c0_i32_1 = arith.constant 0 : i32
    return %c0_i32, %c0_i32_0 : i32, i32
  }
  func.func @transform_18(%arg0: i32) -> (i32, i32) {
    %c0_i32 = arith.constant 0 : i32
    %c0_i32_0 = arith.constant 0 : i32
    %c0_i32_1 = arith.constant 0 : i32
    return %c0_i32, %c0_i32_0 : i32, i32
  }
  func.func @transform_19(%arg0: i32) -> (i32, i32) {
    %c0_i32 = arith.constant 0 : i32
    %c0_i32_0 = arith.constant 0 : i32
    %c0_i32_1 = arith.constant 0 : i32
    return %c0_i32, %c0_i32_0 : i32, i32
  }
  func.func @transform_20(%arg0: i32) -> (i32, i32) {
    %c0_i32 = arith.constant 0 : i32
    %c0_i32_0 = arith.constant 0 : i32
    return %arg0, %c0_i32 : i32, i32
  }
}

</mosaic_0001>

<bundles_post_ra>
// kernel: _lambda_.1
= control target key start
LH: loop header
LB: loop body
LE: loop exit
PB: predicated region body
PF: predicated region fallthrough
CT: control target
= control target key end

     0   :  { %s15925_s0 = inlined_call_operand.vmem [shape: f32[16,8,32], index: 0, kind: input, shape index: {}]   ;;  %s15926_s1 = inlined_call_operand.vmem [shape: f32[16,1,8], index: 1, kind: input, shape index: {}]   ;;  %s15927_s2 = inlined_call_operand.vmem [shape: f32[1,32], index: 2, kind: input, shape index: {}]   ;;  %s15928_s3 = inlined_call_operand.vmem [shape: f32[1,32], index: 3, kind: input, shape index: {}, may-alias: {3,17}]   ;;  %s15929_s4 = inlined_call_operand.vmem [shape: bf16[2,32,96], index: 4, kind: input, shape index: {}]   ;;  %s15930_s5 = inlined_call_operand.vmem [shape: f32[2,1,96], index: 5, kind: input, shape index: {}]   ;;  %s15931_s6 = inlined_call_operand.vmem [shape: bf16[2,4,8,32], index: 6, kind: input, shape index: {}]   ;;  %s15932_s7 = inlined_call_operand.vmem [shape: f32[2,1,32], index: 7, kind: input, shape index: {}, may-alias: {7,9,13,15}]   ;;  %s15933_s8 = inlined_call_operand.vmem [shape: f32[2,1,32], index: 8, kind: input, shape index: {}, may-alias: {8,14}]   ;;  %s15934_s9 = inlined_call_operand.vmem [shape: f32[2,1,32], index: 9, kind: input, shape index: {}, may-alias: {7,9,13,15}]   ;;  %s15935_s10 = inlined_call_operand.vmem [shape: bf16[2,32,64], index: 10, kind: input, shape index: {}]   ;;  %s15936_s11 = inlined_call_operand.vmem [shape: f32[2,1,64], index: 11, kind: input, shape index: {}]   ;;  %s15937_s12 = inlined_call_operand.vmem [shape: bf16[2,64,32], index: 12, kind: input, shape index: {}]   ;;  %s15938_s13 = inlined_call_operand.vmem [shape: f32[2,1,32], index: 13, kind: input, shape index: {}, may-alias: {7,9,13,15}]   ;;  %s15939_s14 = inlined_call_operand.vmem [shape: f32[2,1,32], index: 14, kind: input, shape index: {}, may-alias: {8,14}]   ;;  %s15940_s15 = inlined_call_operand.vmem [shape: f32[2,1,32], index: 15, kind: input, shape index: {}, may-alias: {7,9,13,15}]   ;;  %s15941_s16 = inlined_call_operand.vmem [shape: bf16[32,32], index: 16, kind: input, shape index: {}]   ;;  %s15942_s17 = inlined_call_operand.vmem [shape: f32[1,32], index: 17, kind: input, shape index: {}, may-alias: {3,17}]   ;;  %s15943_s18 = inlined_call_operand.vmem [shape: bf16[32,128], index: 18, kind: input, shape index: {}]   ;;  %s15944_s19 = inlined_call_operand.vmem [shape: f32[1,128], index: 19, kind: input, shape index: {}]   ;;  %s15945_s20 = inlined_call_operand.vmem [shape: f32[16,128], index: 20, kind: output, shape index: {}]  }
   0x1   :  { %15973 = sst [smem:[#allocation24_spill]] %s15925_s0 }
   0x2   :  { %15974 = sst [smem:[#allocation25_spill]] %s15926_s1  ;;  %s12852_s1 = smov 0  }
   0x3   :  { %15975 = sst [smem:[#allocation26_spill]] %s15927_s2 }
   0x4   :  { %15976 = sst [smem:[#allocation27_spill]] %s15928_s3 }
   0x5   :  { %15977 = sst [smem:[#allocation28_spill]] %s15929_s4 }
   0x6 LB: > { %s12858_s22 = sadd.s32 4294967295, %s12738_s1   ;;  %p10593_p0 = scmp.ge.s32.totalorder %s12738_s1, 1  ;;  %s12738_s1 = sphi %s12852_s1, %s30_s1  }
   0x7   : > { %p573_p1 = scmp.lt.s32.totalorder %s12738_s1, 3 }
   0x9   : > { %p574_p2 = pnand %p10593_p0, %p573_p1 }
   0xb   : > { %577 = sbr.rel (%p574_p2) target bundleno = 6144 (0x1800), region = 100 }
  0x10   : > { %s10594_s23 = sshll.u32 %s12858_s22, 3  ;;  %vm660_vm0 = vcmask 261120   ;;  %s15978_s3 = sld [smem:[#allocation24_spill]]  ;;  %vm12742_vm1 = vmmov 0   ;;  %vm1028_vm2 = vcmask 64512   ;;  %vm3000_vm3 = vcmask 1043456  }
  0x11   : > { %p635_p3 = scmp.lt.s32.totalorder %s10594_s23, 15  ;;  %s15979_s4 = sld [smem:[#allocation28_spill]]  ;;  %vm5368_vm4 = vcmask 523264  }
  0x12   : > { %s12740_s28 = smov 120   ;;  %s12743_s29 = smov 96  }
  0x13   : > { %s16073_s23 = smov (!%p635_p3, %s10594_s23), 15  ;;  %s12744_s30 = smov 112  }
  0x14   : > { %s10595_s24 = sshll.u32 %s16073_s23, 3  ;;  %s15961_s0 = smov 104  }
  0x15   : > { %s15959_s21 = smov 64   ;;  %s15992_s25 = sld [smem:[#allocation25_spill]] }
  0x16   : > { %s638_s26 = scalar_lea.vmem %s15978_s3, %s10595_s24  ;;  %s15980_s24 = sld [smem:[#allocation26_spill]] }
  0x17   : > { %v650_v0 = vld [vmem:[%s638_s26] sm:$0xff]  ;;  %v652_v1 = vld [vmem:[%s638_s26 + $0x10] sm:$0xff]  ;;  %v651_v2 = vld [vmem:[%s638_s26 + $0x8] sm:$0xff]  ;;  %s15981_s3 = sld [smem:[#allocation27_spill]]  ;;  %p645_p4 = scmp.lt.s32.totalorder %s12858_s22, 1 }
  0x18   : > { %v661_v3 = vsel %vm660_vm0, %v650_v0, 0.0  ;;  %v667_v4 = vsel %vm660_vm0, %v652_v1, 0.0  ;;  %v653_v5 = vld [vmem:[%s638_s26 + $0x18] sm:$0xff]  ;;  %v654_v6 = vld [vmem:[%s638_s26 + $0x20] sm:$0xff]  ;;  %v655_v7 = vld [vmem:[%s638_s26 + $0x28] sm:$0xff]  ;;  %v664_v8 = vsel %vm660_vm0, %v651_v2, 0.0 }
  0x19   : > { %662 = vadd.xlane.f32.xlu0 %v661_v3  ;;  %668 = vadd.xlane.f32.xlu1 %v667_v4  ;;  %v670_v9 = vsel %vm660_vm0, %v653_v5, 0.0  ;;  %v673_v10 = vsel %vm660_vm0, %v654_v6, 0.0  ;;  %v676_v11 = vsel %vm660_vm0, %v655_v7, 0.0  ;;  %v656_v12 = vld [vmem:[%s638_s26 + $0x30] sm:$0xff]  ;;  %v657_v13 = vld [vmem:[%s638_s26 + $0x38] sm:$0xff]  ;;  %v12334_v56 = vld [vmem:[%s15979_s4 + $0x8] sm:$0xff]  }
  0x1a   : > { %v679_v14 = vsel %vm660_vm0, %v656_v12, 0.0  ;;  %v682_v15 = vsel %vm660_vm0, %v657_v13, 0.0  ;;  %v12335_v57 = vld [vmem:[%s15979_s4] sm:$0xff]   ;;  %11355 = vmatprep.subr.bf16.mxu0 %v12334_v56  ;;  %s16075_s22 = smov (!%p645_p4, %s12858_s22), 1 }
  0x1b   : > { %11356 = vmatpush3.bf16.msra.mxu0 %v12334_v56  ;;  %s10597_s27 = sshll.u32 %s16075_s22, 3 }
  0x1c   : > { %11357 = vmatprep.subr.bf16.mxu0 %v12335_v57 }
  0x1d   : > { %665 = vadd.xlane.f32.xlu0 %v664_v8  ;;  %671 = vadd.xlane.f32.xlu1 %v670_v9 }
  0x1f   : > { %11358 = vmatpush3.bf16.msra.mxu0 %v12335_v57 }
  0x21   : > { %674 = vadd.xlane.f32.xlu0 %v673_v10  ;;  %677 = vadd.xlane.f32.xlu1 %v676_v11 }
  0x25   : > { %680 = vadd.xlane.f32.xlu0 %v679_v14  ;;  %683 = vadd.xlane.f32.xlu1 %v682_v15 }
  0xa2   : > { %v663_v16 = vpop.xlane.xlu0 %662  ;;  %v669_v17 = vpop.xlane.xlu1 %668 }
  0xa3   : > { %v686_v18 = vmul.f32 0.03125, %v663_v16  ;;  %v688_v19 = vmul.f32 0.03125, %v669_v17 }
  0xa5   : > { %v12877_v20 = vsub.f32 %v650_v0, %v686_v18  ;;  %v12879_v21 = vsub.f32 %v652_v1, %v688_v19 }
  0xa6   : > { %v666_v22 = vpop.xlane.xlu0 %665  ;;  %v672_v23 = vpop.xlane.xlu1 %671 }
  0xa7   : > { %v687_v24 = vmul.f32 0.03125, %v666_v22  ;;  %v689_v25 = vmul.f32 0.03125, %v672_v23  ;;  %v702_v26 = vmul.f32 %v12877_v20, %v12877_v20  ;;  %v704_v27 = vmul.f32 %v12879_v21, %v12879_v21  ;;  %v10598_v22 = vld [vmem:[%s15980_s24] ss:$0 sm:$0xff] }
  0xa9   : > { %v12885_v28 = vsub.f32 %v651_v2, %v687_v24  ;;  %v12887_v29 = vsub.f32 %v653_v5, %v689_v25  ;;  %v710_v30 = vsel %vm660_vm0, %v702_v26, 0.0  ;;  %v716_v33 = vsel %vm660_vm0, %v704_v27, 0.0  ;;  %v10599_v27 = vld [vmem:[%s15981_s3] ss:$0 sm:$0xff]  ;;  %s13442_s3 = scalar_lea.vmem %s15992_s25, %s16073_s23 }
  0xaa   : > { %711 = vadd.xlane.f32.xlu0 %v710_v30  ;;  %v675_v31 = vpop.xlane.xlu0 %674  ;;  %v678_v32 = vpop.xlane.xlu1 %677 }
  0xab   : > { %v690_v34 = vmul.f32 0.03125, %v675_v31  ;;  %v691_v35 = vmul.f32 0.03125, %v678_v32  ;;  %v703_v36 = vmul.f32 %v12885_v28, %v12885_v28  ;;  %v705_v37 = vmul.f32 %v12887_v29, %v12887_v29 }
  0xad   : > { %v12895_v38 = vsub.f32 %v654_v6, %v690_v34  ;;  %v12897_v39 = vsub.f32 %v655_v7, %v691_v35  ;;  %v713_v40 = vsel %vm660_vm0, %v703_v36, 0.0  ;;  %v719_v43 = vsel %vm660_vm0, %v705_v37, 0.0 }
  0xae   : > { %717 = vadd.xlane.f32.xlu0 %v716_v33  ;;  %714 = vadd.xlane.f32.xlu1 %v713_v40  ;;  %v681_v41 = vpop.xlane.xlu0 %680  ;;  %v684_v42 = vpop.xlane.xlu1 %683 }
  0xaf   : > { %v692_v44 = vmul.f32 0.03125, %v681_v41  ;;  %v693_v45 = vmul.f32 0.03125, %v684_v42  ;;  %v706_v46 = vmul.f32 %v12895_v38, %v12895_v38  ;;  %v707_v47 = vmul.f32 %v12897_v39, %v12897_v39 }
  0xb1   : > { %v12905_v48 = vsub.f32 %v656_v12, %v692_v44  ;;  %v12907_v49 = vsub.f32 %v657_v13, %v693_v45  ;;  %v722_v50 = vsel %vm660_vm0, %v706_v46, 0.0  ;;  %v725_v51 = vsel %vm660_vm0, %v707_v47, 0.0 }
  0xb2   : > { %720 = vadd.xlane.f32.xlu1 %v719_v43  ;;  %723 = vadd.xlane.f32.xlu0 %v722_v50 }
  0xb3   : > { %v708_v52 = vmul.f32 %v12905_v48, %v12905_v48  ;;  %v709_v53 = vmul.f32 %v12907_v49, %v12907_v49 }
  0xb5   : > { %v728_v54 = vsel %vm660_vm0, %v708_v52, 0.0  ;;  %v731_v55 = vsel %vm660_vm0, %v709_v53, 0.0 }
  0xb6   : > { %726 = vadd.xlane.f32.xlu1 %v725_v51  ;;  %729 = vadd.xlane.f32.xlu0 %v728_v54 }
  0xba   : > { %732 = vadd.xlane.f32.xlu1 %v731_v55 }
 0x133   : > { %v712_v58 = vpop.xlane.xlu0 %711 }
 0x134   : > { %v734_v59 = vmul.f32 0.03125, %v712_v58 }
 0x136   : > { %v742_v60 = vadd.f32 1e-05, %v734_v59 }
 0x137   : > { %v715_v61 = vpop.xlane.xlu1 %714  ;;  %v718_v62 = vpop.xlane.xlu0 %717 }
 0x138   : > { %12354 = vrsqrt.f32 %v742_v60  ;;  %v735_v63 = vmul.f32 0.03125, %v715_v61  ;;  %v736_v0 = vmul.f32 0.03125, %v718_v62 }
 0x13a   : > { %v743_v1 = vadd.f32 1e-05, %v735_v63  ;;  %v744_v2 = vadd.f32 1e-05, %v736_v0  ;;  %v15947_v0 = vmov 0.0  }
 0x13b   : > { %v721_v3 = vpop.xlane.xlu1 %720  ;;  %v724_v4 = vpop.xlane.xlu0 %723  ;;  %11367 = vmatprep.subr.bf16.mxu1 %v15947_v0  ;;  %11379 = vmatprep.subr.bf16.mxu0 %v15947_v0 }
 0x13c   : > { %12356 = vrsqrt.f32 %v743_v1  ;;  %v737_v5 = vmul.f32 0.03125, %v721_v3  ;;  %v738_v6 = vmul.f32 0.03125, %v724_v4  ;;  %11369 = vmatprep.mubr.msk.bf16.mxu1 %vm12742_vm1, %v15947_v0 }
 0x13d   : > { %12358 = vrsqrt.f32 %v744_v2 }
 0x13e   : > { %v745_v7 = vadd.f32 1e-05, %v737_v5  ;;  %v746_v8 = vadd.f32 1e-05, %v738_v6 }
 0x13f   : > { %v727_v9 = vpop.xlane.xlu1 %726  ;;  %v730_v10 = vpop.xlane.xlu0 %729 }
 0x140   : > { %12360 = vrsqrt.f32 %v745_v7  ;;  %v739_v11 = vmul.f32 0.03125, %v727_v9  ;;  %v740_v12 = vmul.f32 0.03125, %v730_v10 }
 0x141   : > { %12362 = vrsqrt.f32 %v746_v8 }
 0x142   : > { %v747_v13 = vadd.f32 1e-05, %v739_v11  ;;  %v748_v14 = vadd.f32 1e-05, %v740_v12 }
 0x143   : > { %v733_v15 = vpop.xlane.xlu1 %732 }
 0x144   : > { %12364 = vrsqrt.f32 %v747_v13  ;;  %v741_v16 = vmul.f32 0.03125, %v733_v15 }
 0x145   : > { %v12355_v17 = vpop.eup %12354  ;;  %12366 = vrsqrt.f32 %v748_v14 }
 0x146   : > { %v749_v18 = vadd.f32 1e-05, %v741_v16  ;;  %v758_v19 = vmul.f32 %v12355_v17, %v12877_v20 }
 0x148   : > { %12368 = vrsqrt.f32 %v749_v18  ;;  %v772_v26 = vmul.f32 %v10598_v22, %v758_v19 }
 0x149   : > { %v12357_v23 = vpop.eup %12356 }
 0x14a   : > { %v12359_v24 = vpop.eup %12358  ;;  %v759_v25 = vmul.f32 %v12357_v23, %v12885_v28  ;;  %v12932_v20 = vadd.f32 %v10599_v27, %v772_v26 }
 0x14b   : > { %v760_v30 = vmul.f32 %v12359_v24, %v12879_v21 }
 0x14c   : > { %v773_v31 = vmul.f32 %v10598_v22, %v759_v25  ;;  %15982 = vst [vmem:[#allocation2_spill] sm:$0xff] %v12932_v20 }
 0x14d   : > { %v12361_v32 = vpop.eup %12360  ;;  %v774_v36 = vmul.f32 %v10598_v22, %v760_v30 }
 0x14e   : > { %v12363_v33 = vpop.eup %12362  ;;  %v12934_v34 = vadd.f32 %v10599_v27, %v773_v31  ;;  %v761_v35 = vmul.f32 %v12361_v32, %v12887_v29 }
 0x14f   : > { %v762_v37 = vmul.f32 %v12363_v33, %v12895_v38  ;;  %v12941_v21 = vadd.f32 %v10599_v27, %v774_v36 }
 0x150   : > { %15983 = vst [vmem:[#allocation3_spill] sm:$0xff] %v12934_v34  ;;  %v802_v28 = vpack.c.bf16 %v12934_v34, %v12932_v20  ;;  %v775_v40 = vmul.f32 %v10598_v22, %v761_v35 }
 0x151   : > { %v12365_v41 = vpop.eup %12364  ;;  %15984 = vst [vmem:[#allocation4_spill] sm:$0xff] %v12941_v21  ;;  %v776_v45 = vmul.f32 %v10598_v22, %v762_v37 }
 0x152   : > { %v12367_v42 = vpop.eup %12366  ;;  %11359 = vmatprep.mubr.msk.bf16.mxu0 %vm660_vm0, %v802_v28  ;;  %v12943_v43 = vadd.f32 %v10599_v27, %v775_v40  ;;  %v763_v44 = vmul.f32 %v12365_v41, %v12897_v39 }
 0x153   : > { %v764_v29 = vmul.f32 %v12367_v42, %v12905_v48  ;;  %v12950_v50 = vadd.f32 %v10599_v27, %v776_v45 }
 0x154   : > { %15985 = vst [vmem:[#allocation5_spill] sm:$0xff] %v12943_v43  ;;  %v803_v38 = vpack.c.bf16 %v12943_v43, %v12941_v21  ;;  %v777_v46 = vmul.f32 %v10598_v22, %v763_v44 }
 0x155   : > { %v12369_v47 = vpop.eup %12368  ;;  %15986 = vst [vmem:[#allocation6_spill] sm:$0xff] %v12950_v50  ;;  %v778_v53 = vmul.f32 %v10598_v22, %v764_v29 }
 0x156   : > { %11360 = vmatmul.mubr.msk.bf16.vlgmr.msra.gmra.mxu0 %vm660_vm0, %v803_v38  ;;  %v12952_v51 = vadd.f32 %v10599_v27, %v777_v46  ;;  %v765_v52 = vmul.f32 %v12369_v47, %v12907_v49  ;;  %v10600_v49 = vld [vmem:[%s15930_s5] ss:$0 sm:$0xff] }
 0x157   : > { %v12958_v48 = vadd.f32 %v10599_v27, %v778_v53 }
 0x158   : > { %15987 = vst [vmem:[#allocation7_spill] sm:$0xff] %v12952_v51  ;;  %v804_v39 = vpack.c.bf16 %v12952_v51, %v12950_v50  ;;  %v779_v54 = vmul.f32 %v10598_v22, %v765_v52 }
 0x159   : > { %15988 = vst [vmem:[#allocation8_spill] sm:$0xff] %v12958_v48 }
 0x15a   : > { %11363 = vmatprep.mubr.msk.bf16.mxu0 %vm660_vm0, %v804_v39  ;;  %v12960_v55 = vadd.f32 %v10599_v27, %v779_v54 }
 0x15c   : > { %15989 = vst [vmem:[#allocation9_spill] sm:$0xff] %v12960_v55  ;;  %v805_v56 = vpack.c.bf16 %v12960_v55, %v12958_v48 }
 0x15e   : > { %11364 = vmatmul.mubr.msk.bf16.gmra.mxu0 %vm660_vm0, %v805_v56 }
 0x15f   : > { %11381 = vmatprep.mubr.msk.bf16.mxu0 %vm12742_vm1, %v15947_v0 }
 0x216   : > { %v11361_v57 = vpop.f32.mrf.mxu0 }
 0x217   : > { %v884_v2 = vadd.f32 %v11361_v57, %v10600_v49 }
 0x218   : > { %v875_v58 = vpop.f32.mrf.mxu0 }
 0x219   : > { %v876_v59 = vadd.f32 %v10600_v49, %v875_v58  ;;  %v12978_v7 = vpack.c.bf16 %v884_v2, %v884_v2 }
 0x21a   : > { %v11362_v60 = vpop.f32.mrf.mxu0 }
 0x21b   : > { %v12968_v61 = vpack.c.bf16 %v876_v59, %v876_v59  ;;  %v887_v8 = vadd.f32 %v11362_v60, %v10600_v49 }
 0x21c   : > { %v878_v62 = vpop.f32.mrf.mxu0 }
 0x21d   : > { %v879_v63 = vadd.f32 %v10600_v49, %v878_v62  ;;  %930 = vrot.lane.b32.xlu0 %v12968_v61, %s12740_s28  ;;  %v12990_v11 = vpack.c.bf16 %v887_v8, %v887_v8 }
 0x21e   : > { %v11365_v1 = vpop.f32.mrf.mxu0 }
 0x21f   : > { %v12974_v3 = vpack.c.bf16 %v879_v63, %v879_v63  ;;  %v900_v14 = vadd.f32 %v11365_v1, %v10600_v49 }
 0x220   : > { %v891_v4 = vpop.f32.mrf.mxu0 }
 0x221   : > { %v892_v5 = vadd.f32 %v10600_v49, %v891_v4  ;;  %932 = vrot.lane.b32.xlu1 %v12974_v3, %s12740_s28  ;;  %v13004_v17 = vpack.c.bf16 %v900_v14, %v900_v14 }
 0x222   : > { %v11366_v6 = vpop.f32.mrf.mxu0 }
 0x223   : > { %v12980_v9 = vpack.c.bf16 %v892_v5, %v892_v5  ;;  %v903_v12 = vadd.f32 %v11366_v6, %v10600_v49 }
 0x224   : > { %v894_v10 = vpop.f32.mrf.mxu0 }
 0x225   : > { %934 = vrot.lane.b32.xlu1 %v12978_v7, %s12740_s28  ;;  %938 = vrot.lane.b32.xlu0 %v12980_v9, %s12740_s28  ;;  %v895_v13 = vadd.f32 %v10600_v49, %v894_v10  ;;  %v12996_v15 = vpack.c.bf16 %v903_v12, %v903_v12 }
 0x227   : > { %v12998_v16 = vpack.c.bf16 %v895_v13, %v895_v13 }
 0x229   : > { %936 = vrot.lane.b32.xlu1 %v12990_v11, %s12740_s28  ;;  %1026 = vrot.lane.b32.xlu0 %v12968_v61, %s12743_s29 }
 0x22d   : > { %940 = vrot.lane.b32.xlu1 %v12998_v16, %s12740_s28  ;;  %944 = vrot.lane.b32.xlu0 %v12996_v15, %s12740_s28 }
 0x231   : > { %942 = vrot.lane.b32.xlu1 %v13004_v17, %s12740_s28  ;;  %946 = vrot.lane.b32.xlu0 %v12968_v61, %s12744_s30 }
 0x235   : > { %1075 = vrot.lane.b32.xlu1 %v12974_v3, %s12743_s29  ;;  %1123 = vrot.lane.b32.xlu0 %v12978_v7, %s12743_s29 }
 0x239   : > { %948 = vrot.lane.b32.xlu1 %v12974_v3, %s12744_s30  ;;  %950 = vrot.lane.b32.xlu0 %v12978_v7, %s12744_s30 }
 0x23d   : > { %1171 = vrot.lane.b32.xlu1 %v12990_v11, %s12743_s29  ;;  %1219 = vrot.lane.b32.xlu0 %v12980_v9, %s12743_s29 }
 0x241   : > { %952 = vrot.lane.b32.xlu1 %v12990_v11, %s12744_s30  ;;  %954 = vrot.lane.b32.xlu0 %v12980_v9, %s12744_s30 }
 0x245   : > { %1267 = vrot.lane.b32.xlu1 %v12998_v16, %s12743_s29  ;;  %1315 = vrot.lane.b32.xlu0 %v13004_v17, %s12743_s29 }
 0x249   : > { %956 = vrot.lane.b32.xlu1 %v12998_v16, %s12744_s30  ;;  %958 = vrot.lane.b32.xlu0 %v13004_v17, %s12744_s30 }
 0x24d   : > { %1363 = vrot.lane.b32.xlu1 %v12996_v15, %s12743_s29 }
 0x251   : > { %960 = vrot.lane.b32.xlu1 %v12996_v15, %s12744_s30 }
 0x28f   : > { %v13038_v18 = vpop.permute.xlu0 %930 }
 0x290   : > { %v13042_v19 = vcombine.low %v13038_v18, %v13038_v18 }
 0x292   : > { %1413 = vrot.lane.b32.xlu0 %v13042_v19, %s12743_s29 }
 0x293   : > { %v13046_v22 = vpop.permute.xlu1 %932 }
 0x294   : > { %v13050_v23 = vcombine.low %v13046_v22, %v13046_v22 }
 0x296   : > { %1463 = vrot.lane.b32.xlu1 %v13050_v23, %s12743_s29  ;;  %962 = vrot.lane.b32.xlu0 %v12968_v61, %s15961_s0 }
 0x297   : > { %v13056_v24 = vpop.permute.xlu1 %934  ;;  %v13058_v25 = vpop.permute.xlu0 %938 }
 0x298   : > { %v13062_v26 = vcombine.low %v13056_v24, %v13056_v24  ;;  %v13086_v36 = vcombine.low %v13058_v25, %v13058_v25 }
 0x29a   : > { %964 = vrot.lane.b32.xlu1 %v12974_v3, %s15961_s0  ;;  %1513 = vrot.lane.b32.xlu0 %v13062_v26, %s12743_s29 }
 0x29b   : > { %v13068_v27 = vpop.permute.xlu1 %936  ;;  %v1027_v30 = vpop.permute.xlu0 %1026 }
 0x29c   : > { %v13072_v31 = vcombine.low %v13068_v27, %v13068_v27  ;;  %v1033_v32 = vsel %vm1028_vm2, %v1027_v30, 0 }
 0x29d   : > { %11368 = vmatpush3.bf16.xpose.msra.mxu1 %v1033_v32 }
 0x29e   : > { %1563 = vrot.lane.b32.xlu1 %v13072_v31, %s12743_s29  ;;  %966 = vrot.lane.b32.xlu0 %v12978_v7, %s15961_s0 }
 0x29f   : > { %v13079_v33 = vpop.permute.xlu1 %940  ;;  %v13081_v35 = vpop.permute.xlu0 %944  ;;  %11373 = vmatprep.subr.bf16.mxu1 %v15947_v0 }
 0x2a0   : > { %v13098_v40 = vcombine.low %v13079_v33, %v13079_v33  ;;  %v13126_v47 = vcombine.low %v13081_v35, %v13081_v35 }
 0x2a2   : > { %968 = vrot.lane.b32.xlu1 %v12990_v11, %s15961_s0  ;;  %1613 = vrot.lane.b32.xlu0 %v13086_v36, %s12743_s29 }
 0x2a3   : > { %v13092_v37 = vpop.permute.xlu1 %942  ;;  %v13094_v28 = vpop.permute.xlu0 %946 }
 0x2a4   : > { %11370 = vmatmul.mubr.msk.bf16.vlgmr.msra.gmra.mxu1 %vm1028_vm2, %v12968_v61  ;;  %v13110_v44 = vcombine.low %v13092_v37, %v13092_v37  ;;  %v13134_v39 = vcombine.low %v13094_v28, %v13094_v28 }
 0x2a5   : > { %11375 = vmatprep.mubr.msk.bf16.mxu1 %vm12742_vm1, %v15947_v0 }
 0x2a6   : > { %1663 = vrot.lane.b32.xlu1 %v13098_v40, %s12743_s29  ;;  %970 = vrot.lane.b32.xlu0 %v12980_v9, %s15961_s0 }
 0x2a7   : > { %v1076_v41 = vpop.permute.xlu1 %1075  ;;  %v1124_v42 = vpop.permute.xlu0 %1123 }
 0x2a8   : > { %v1081_v45 = vsel %vm1028_vm2, %v1076_v41, 0  ;;  %v1129_v29 = vsel %vm1028_vm2, %v1124_v42, 0 }
 0x2a9   : > { %11374 = vmatpush3.bf16.xpose.msra.mxu1 %v1081_v45  ;;  %11380 = vmatpush3.bf16.xpose.msra.mxu0 %v1129_v29 }
 0x2aa   : > { %972 = vrot.lane.b32.xlu1 %v12998_v16, %s15961_s0  ;;  %1713 = vrot.lane.b32.xlu0 %v13110_v44, %s12743_s29 }
 0x2ab   : > { %v13118_v38 = vpop.permute.xlu1 %948  ;;  %v13120_v46 = vpop.permute.xlu0 %950  ;;  %11385 = vmatprep.subr.bf16.mxu1 %v15947_v0  ;;  %11391 = vmatprep.subr.bf16.mxu0 %v15947_v0 }
 0x2ac   : > { %v13156_v58 = vcombine.low %v13118_v38, %v13118_v38  ;;  %v13160_v59 = vcombine.low %v13120_v46, %v13120_v46 }
 0x2ae   : > { %974 = vrot.lane.b32.xlu0 %v13004_v17, %s15961_s0  ;;  %1763 = vrot.lane.b32.xlu1 %v13126_v47, %s12743_s29 }
 0x2af   : > { %v1172_v52 = vpop.permute.xlu1 %1171  ;;  %v1220_v53 = vpop.permute.xlu0 %1219 }
 0x2b0   : > { %v1177_v54 = vsel %vm1028_vm2, %v1172_v52, 0  ;;  %v1225_v56 = vsel %vm1028_vm2, %v1220_v53, 0  ;;  %11376 = vmatmul.mubr.msk.bf16.vlgmr.msra.gmra.mxu1 %vm1028_vm2, %v12974_v3  ;;  %11382 = vmatmul.mubr.msk.bf16.vlgmr.msra.gmra.mxu0 %vm1028_vm2, %v12978_v7 }
 0x2b1   : > { %11386 = vmatpush3.bf16.xpose.msra.mxu1 %v1177_v54  ;;  %11392 = vmatpush3.bf16.xpose.msra.mxu0 %v1225_v56 }
 0x2b2   : > { %976 = vrot.lane.b32.xlu1 %v12996_v15, %s15961_s0  ;;  %1813 = vrot.lane.b32.xlu0 %v13134_v39, %s12743_s29 }
 0x2b3   : > { %v13146_v57 = vpop.permute.xlu1 %952  ;;  %v13148_v49 = vpop.permute.xlu0 %954  ;;  %11387 = vmatprep.mubr.msk.bf16.mxu1 %vm12742_vm1, %v15947_v0  ;;  %11393 = vmatprep.mubr.msk.bf16.mxu0 %vm12742_vm1, %v15947_v0 }
 0x2b4   : > { %11397 = vmatprep.subr.bf16.mxu1 %v15947_v0  ;;  %11403 = vmatprep.subr.bf16.mxu0 %v15947_v0  ;;  %v13170_v63 = vcombine.low %v13146_v57, %v13146_v57  ;;  %v13174_v1 = vcombine.low %v13148_v49, %v13148_v49 }
 0x2b6   : > { %1863 = vrot.lane.b32.xlu1 %v13156_v58, %s12743_s29  ;;  %1913 = vrot.lane.b32.xlu0 %v13160_v59, %s12743_s29 }
 0x2b7   : > { %v1268_v60 = vpop.permute.xlu1 %1267  ;;  %v1316_v62 = vpop.permute.xlu0 %1315 }
 0x2b8   : > { %v1273_v2 = vsel %vm1028_vm2, %v1268_v60, 0  ;;  %v1321_v4 = vsel %vm1028_vm2, %v1316_v62, 0  ;;  %11388 = vmatmul.mubr.msk.bf16.vlgmr.msra.gmra.mxu1 %vm1028_vm2, %v12990_v11  ;;  %11394 = vmatmul.mubr.msk.bf16.vlgmr.msra.gmra.mxu0 %vm1028_vm2, %v12980_v9 }
 0x2b9   : > { %11398 = vmatpush3.bf16.xpose.msra.mxu1 %v1273_v2  ;;  %11404 = vmatpush3.bf16.xpose.msra.mxu0 %v1321_v4 }
 0x2ba   : > { %1963 = vrot.lane.b32.xlu1 %v13170_v63, %s12743_s29  ;;  %2013 = vrot.lane.b32.xlu0 %v13174_v1, %s12743_s29 }
 0x2bb   : > { %v13186_v5 = vpop.permute.xlu1 %956  ;;  %v13188_v6 = vpop.permute.xlu0 %958  ;;  %11399 = vmatprep.mubr.msk.bf16.mxu1 %vm12742_vm1, %v15947_v0  ;;  %11405 = vmatprep.mubr.msk.bf16.mxu0 %vm12742_vm1, %v15947_v0 }
 0x2bc   : > { %v13196_v8 = vcombine.low %v13186_v5, %v13186_v5  ;;  %v13200_v10 = vcombine.low %v13188_v6, %v13188_v6  ;;  %11409 = vmatprep.subr.bf16.mxu1 %v15947_v0  ;;  %11415 = vmatprep.subr.bf16.mxu0 %v15947_v0 }
 0x2be   : > { %2063 = vrot.lane.b32.xlu1 %v13196_v8, %s12743_s29  ;;  %2113 = vrot.lane.b32.xlu0 %v13200_v10, %s12743_s29 }
 0x2bf   : > { %v1364_v12 = vpop.permute.xlu1 %1363 }
 0x2c0   : > { %v1369_v13 = vsel %vm1028_vm2, %v1364_v12, 0  ;;  %11400 = vmatmul.mubr.msk.bf16.vlgmr.msra.gmra.mxu1 %vm1028_vm2, %v12998_v16  ;;  %11406 = vmatmul.mubr.msk.bf16.vlgmr.msra.gmra.mxu0 %vm1028_vm2, %v13004_v17 }
 0x2c1   : > { %11410 = vmatpush3.bf16.xpose.msra.mxu1 %v1369_v13  ;;  %11411 = vmatprep.mubr.msk.bf16.mxu1 %vm12742_vm1, %v15947_v0 }
 0x2c2   : > { %11421 = vmatprep.subr.bf16.mxu1 %v15947_v0  ;;  %11417 = vmatprep.mubr.msk.bf16.mxu0 %vm12742_vm1, %v15947_v0 }
 0x2c3   : > { %v13218_v14 = vpop.permute.xlu1 %960 }
 0x2c4   : > { %v13222_v30 = vcombine.low %v13218_v14, %v13218_v14 }
 0x2c6   : > { %2163 = vrot.lane.b32.xlu1 %v13222_v30, %s12743_s29 }
 0x2c8   : > { %11412 = vmatmul.mubr.msk.bf16.vlgmr.msra.gmra.mxu1 %vm1028_vm2, %v12996_v15 }
 0x2c9   : > { %11423 = vmatprep.mubr.msk.bf16.mxu1 %vm12742_vm1, %v15947_v0 }
 0x304   : > { %v1414_v32 = vpop.permute.xlu0 %1413 }
 0x305   : > { %v1419_v41 = vsel %vm1028_vm2, %v1414_v32, 0 }
 0x306   : > { %11416 = vmatpush3.bf16.xpose.msra.mxu0 %v1419_v41 }
 0x307   : > { %11427 = vmatprep.subr.bf16.mxu0 %v15947_v0 }
 0x308   : > { %v1464_v42 = vpop.permute.xlu1 %1463  ;;  %v13232_v45 = vpop.permute.xlu0 %962 }
 0x309   : > { %v1469_v29 = vsel %vm1028_vm2, %v1464_v42, 0  ;;  %v13237_v52 = vcombine.low %v13232_v45, %v13232_v45 }
 0x30a   : > { %11422 = vmatpush3.bf16.xpose.msra.mxu1 %v1469_v29 }
 0x30b   : > { %2213 = vrot.lane.b32.xlu0 %v13237_v52, %s12743_s29  ;;  %11433 = vmatprep.subr.bf16.mxu1 %v15947_v0 }
 0x30c   : > { %v13242_v53 = vpop.permute.xlu1 %964  ;;  %v1514_v54 = vpop.permute.xlu0 %1513 }
 0x30d   : > { %v13246_v56 = vcombine.low %v13242_v53, %v13242_v53  ;;  %v1519_v60 = vsel %vm1028_vm2, %v1514_v54, 0  ;;  %11418 = vmatmul.mubr.msk.bf16.vlgmr.msra.gmra.mxu0 %vm1028_vm2, %v13038_v18 }
 0x30e   : > { %11428 = vmatpush3.bf16.xpose.msra.mxu0 %v1519_v60  ;;  %11429 = vmatprep.mubr.msk.bf16.mxu0 %vm12742_vm1, %v15947_v0 }
 0x30f   : > { %2263 = vrot.lane.b32.xlu1 %v13246_v56, %s12743_s29  ;;  %11439 = vmatprep.subr.bf16.mxu0 %v15947_v0 }
 0x310   : > { %v1564_v62 = vpop.permute.xlu1 %1563  ;;  %v13256_v2 = vpop.permute.xlu0 %966 }
 0x311   : > { %v1569_v4 = vsel %vm1028_vm2, %v1564_v62, 0  ;;  %v13261_v12 = vcombine.low %v13256_v2, %v13256_v2  ;;  %11424 = vmatmul.mubr.msk.bf16.vlgmr.msra.gmra.mxu1 %vm1028_vm2, %v13046_v22 }
 0x312   : > { %11434 = vmatpush3.bf16.xpose.msra.mxu1 %v1569_v4  ;;  %11435 = vmatprep.mubr.msk.bf16.mxu1 %vm12742_vm1, %v15947_v0 }
 0x313   : > { %2313 = vrot.lane.b32.xlu0 %v13261_v12, %s12743_s29  ;;  %11445 = vmatprep.subr.bf16.mxu1 %v15947_v0 }
 0x314   : > { %v13270_v18 = vpop.permute.xlu1 %968  ;;  %v1614_v13 = vpop.permute.xlu0 %1613 }
 0x315   : > { %v13274_v32 = vcombine.low %v13270_v18, %v13270_v18  ;;  %v1619_v41 = vsel %vm1028_vm2, %v1614_v13, 0  ;;  %11430 = vmatmul.mubr.msk.bf16.vlgmr.msra.gmra.mxu0 %vm1028_vm2, %v13056_v24 }
 0x316   : > { %11440 = vmatpush3.bf16.xpose.msra.mxu0 %v1619_v41  ;;  %11441 = vmatprep.mubr.msk.bf16.mxu0 %vm12742_vm1, %v15947_v0 }
 0x317   : > { %2363 = vrot.lane.b32.xlu1 %v13274_v32, %s12743_s29  ;;  %11451 = vmatprep.subr.bf16.mxu0 %v15947_v0 }
 0x318   : > { %v1664_v22 = vpop.permute.xlu1 %1663  ;;  %v13284_v42 = vpop.permute.xlu0 %970 }
 0x319   : > { %v1669_v29 = vsel %vm1028_vm2, %v1664_v22, 0  ;;  %v13289_v54 = vcombine.low %v13284_v42, %v13284_v42  ;;  %11436 = vmatmul.mubr.msk.bf16.vlgmr.msra.gmra.mxu1 %vm1028_vm2, %v13068_v27 }
 0x31a   : > { %11446 = vmatpush3.bf16.xpose.msra.mxu1 %v1669_v29  ;;  %11447 = vmatprep.mubr.msk.bf16.mxu1 %vm12742_vm1, %v15947_v0 }
 0x31b   : > { %2413 = vrot.lane.b32.xlu0 %v13289_v54, %s12743_s29  ;;  %11457 = vmatprep.subr.bf16.mxu1 %v15947_v0 }
 0x31c   : > { %v13298_v24 = vpop.permute.xlu1 %972  ;;  %v1714_v60 = vpop.permute.xlu0 %1713 }
 0x31d   : > { %v13302_v62 = vcombine.low %v13298_v24, %v13298_v24  ;;  %v1719_v4 = vsel %vm1028_vm2, %v1714_v60, 0  ;;  %11442 = vmatmul.mubr.msk.bf16.vlgmr.msra.gmra.mxu0 %vm1028_vm2, %v13058_v25 }
 0x31e   : > { %11452 = vmatpush3.bf16.xpose.msra.mxu0 %v1719_v4  ;;  %11453 = vmatprep.mubr.msk.bf16.mxu0 %vm12742_vm1, %v15947_v0 }
 0x31f   : > { %2463 = vrot.lane.b32.xlu1 %v13302_v62, %s12743_s29  ;;  %11463 = vmatprep.subr.bf16.mxu0 %v15947_v0 }
 0x320   : > { %v1764_v27 = vpop.permute.xlu1 %1763  ;;  %v13312_v13 = vpop.permute.xlu0 %974 }
 0x321   : > { %v1769_v41 = vsel %vm1028_vm2, %v1764_v27, 0  ;;  %v13317_v22 = vcombine.low %v13312_v13, %v13312_v13  ;;  %11448 = vmatmul.mubr.msk.bf16.vlgmr.msra.gmra.mxu1 %vm1028_vm2, %v13079_v33 }
 0x322   : > { %11458 = vmatpush3.bf16.xpose.msra.mxu1 %v1769_v41  ;;  %11459 = vmatprep.mubr.msk.bf16.mxu1 %vm12742_vm1, %v15947_v0 }
 0x323   : > { %15990 = vst [vmem:[#allocation10_spill] sm:$0xff] %v13317_v22  ;;  %2513 = vrot.lane.b32.xlu0 %v13317_v22, %s12743_s29  ;;  %11469 = vmatprep.subr.bf16.mxu1 %v15947_v0 }
 0x324   : > { %v13326_v25 = vpop.permute.xlu1 %976  ;;  %v1814_v29 = vpop.permute.xlu0 %1813 }
 0x325   : > { %v13330_v60 = vcombine.low %v13326_v25, %v13326_v25  ;;  %v1819_v4 = vsel %vm1028_vm2, %v1814_v29, 0  ;;  %11454 = vmatmul.mubr.msk.bf16.vlgmr.msra.gmra.mxu0 %vm1028_vm2, %v13092_v37 }
 0x326   : > { %11464 = vmatpush3.bf16.xpose.msra.mxu0 %v1819_v4  ;;  %11465 = vmatprep.mubr.msk.bf16.mxu0 %vm12742_vm1, %v15947_v0 }
 0x327   : > { %15991 = vst [vmem:[#allocation11_spill] sm:$0xff] %v13330_v60  ;;  %2563 = vrot.lane.b32.xlu1 %v13330_v60, %s12743_s29  ;;  %2995 = vrot.lane.b32.xlu0 %v12968_v61, %s15959_s21 }
 0x328   : > { %v1864_v33 = vpop.permute.xlu1 %1863  ;;  %11475 = vmatprep.subr.bf16.mxu0 %v15947_v0  ;;  %v1914_v37 = vpop.permute.xlu0 %1913 }
 0x329   : > { %v1869_v27 = vsel %vm1028_vm2, %v1864_v33, 0  ;;  %11460 = vmatmul.mubr.msk.bf16.vlgmr.msra.gmra.mxu1 %vm1028_vm2, %v13081_v35  ;;  %v1919_v61 = vsel %vm1028_vm2, %v1914_v37, 0 }
 0x32a   : > { %11470 = vmatpush3.bf16.xpose.msra.mxu1 %v1869_v27  ;;  %11471 = vmatprep.mubr.msk.bf16.mxu1 %vm12742_vm1, %v15947_v0 }
 0x32b   : > { %3044 = vrot.lane.b32.xlu1 %v12974_v3, %s15959_s21  ;;  %3092 = vrot.lane.b32.xlu0 %v12978_v7, %s15959_s21 }
 0x32c   : > { %11481 = vmatprep.subr.bf16.mxu1 %v15947_v0  ;;  %v1964_v41 = vpop.permute.xlu1 %1963  ;;  %v2014_v7 = vpop.permute.xlu0 %2013 }
 0x32d   : > { %11466 = vmatmul.mubr.msk.bf16.vlgmr.msra.gmra.mxu0 %vm1028_vm2, %v13094_v28  ;;  %v1969_v3 = vsel %vm1028_vm2, %v1964_v41, 0  ;;  %v13445_v28 = vld [vmem:[%s13442_s3 + $0x2] ss:$0 sm:$0xff] }
 0x32e   : > { %11476 = vmatpush3.bf16.xpose.msra.mxu0 %v1919_v61  ;;  %11477 = vmatprep.mubr.msk.bf16.mxu0 %vm12742_vm1, %v15947_v0 }
 0x32f   : > { %3140 = vrot.lane.b32.xlu1 %v12990_v11, %s15959_s21  ;;  %3188 = vrot.lane.b32.xlu0 %v12980_v9, %s15959_s21  ;;  %v2019_v9 = vsel %vm1028_vm2, %v2014_v7, 0 }
 0x330   : > { %11487 = vmatprep.subr.bf16.mxu0 %v15947_v0  ;;  %v2064_v11 = vpop.permute.xlu1 %2063 }
 0x331   : > { %11472 = vmatmul.mubr.msk.bf16.vlgmr.msra.gmra.mxu1 %vm1028_vm2, %v13118_v38 }
 0x332   : > { %11482 = vmatpush3.bf16.xpose.msra.mxu1 %v1969_v3  ;;  %11483 = vmatprep.mubr.msk.bf16.mxu1 %vm12742_vm1, %v15947_v0 }
 0x333   : > { %3236 = vrot.lane.b32.xlu1 %v12998_v16, %s15959_s21  ;;  %3284 = vrot.lane.b32.xlu0 %v13004_v17, %s15959_s21  ;;  %v2069_v16 = vsel %vm1028_vm2, %v2064_v11, 0  ;;  %v2114_v17 = vpop.permute.xlu0 %2113 }
 0x334   : > { %11493 = vmatprep.subr.bf16.mxu1 %v15947_v0 }
 0x335   : > { %11478 = vmatmul.mubr.msk.bf16.vlgmr.msra.gmra.mxu0 %vm1028_vm2, %v13120_v46 }
 0x336   : > { %11488 = vmatpush3.bf16.xpose.msra.mxu0 %v2019_v9  ;;  %11489 = vmatprep.mubr.msk.bf16.mxu0 %vm12742_vm1, %v15947_v0 }
 0x337   : > { %3332 = vrot.lane.b32.xlu1 %v12996_v15, %s15959_s21  ;;  %3380 = vrot.lane.b32.xlu0 %v13042_v19, %s15959_s21  ;;  %v2119_v15 = vsel %vm1028_vm2, %v2114_v17, 0 }
 0x338   : > { %11499 = vmatprep.subr.bf16.mxu0 %v15947_v0  ;;  %v2164_v19 = vpop.permute.xlu1 %2163 }
 0x339   : > { %11484 = vmatmul.mubr.msk.bf16.vlgmr.msra.gmra.mxu1 %vm1028_vm2, %v13146_v57 }
 0x33a   : > { %11494 = vmatpush3.bf16.xpose.msra.mxu1 %v2069_v16  ;;  %11495 = vmatprep.mubr.msk.bf16.mxu1 %vm12742_vm1, %v15947_v0 }
 0x33b   : > { %3428 = vrot.lane.b32.xlu1 %v13050_v23, %s15959_s21  ;;  %3476 = vrot.lane.b32.xlu0 %v13062_v26, %s15959_s21  ;;  %v2169_v23 = vsel %vm1028_vm2, %v2164_v19, 0  ;;  %v13487_v19 = vld [vmem:[%s13442_s3 + $0x6] ss:$0 sm:$0xff] }
 0x33c   : > { %11505 = vmatprep.subr.bf16.mxu1 %v15947_v0 }
 0x33d   : > { %11490 = vmatmul.mubr.msk.bf16.vlgmr.msra.gmra.mxu0 %vm1028_vm2, %v13148_v49  ;;  %v13457_v49 = vld [vmem:[%s13442_s3 + $0x1] ss:$0 sm:$0xff] }
 0x33e   : > { %11500 = vmatpush3.bf16.xpose.msra.mxu0 %v2119_v15  ;;  %11501 = vmatprep.mubr.msk.bf16.mxu0 %vm12742_vm1, %v15947_v0  ;;  %v13484_v15 = vld [vmem:[%s13442_s3 + $0x5] ss:$0 sm:$0xff] }
 0x33f   : > { %3524 = vrot.lane.b32.xlu1 %v13072_v31, %s15959_s21  ;;  %3572 = vrot.lane.b32.xlu0 %v13086_v36, %s15959_s21 }
 0x340   : > { %11511 = vmatprep.subr.bf16.mxu0 %v15947_v0 }
 0x341   : > { %11496 = vmatmul.mubr.msk.bf16.vlgmr.msra.gmra.mxu1 %vm1028_vm2, %v13186_v5 }
 0x342   : > { %11506 = vmatpush3.bf16.xpose.msra.mxu1 %v2169_v23  ;;  %11507 = vmatprep.mubr.msk.bf16.mxu1 %vm12742_vm1, %v15947_v0 }
 0x343   : > { %3716 = vrot.lane.b32.xlu1 %v13126_v47, %s15959_s21  ;;  %3668 = vrot.lane.b32.xlu0 %v13110_v44, %s15959_s21 }
 0x344   : > { %11517 = vmatprep.subr.bf16.mxu1 %v15947_v0 }
 0x345   : > { %11502 = vmatmul.mubr.msk.bf16.vlgmr.msra.gmra.mxu0 %vm1028_vm2, %v13188_v6 }
 0x346   : > { %11513 = vmatprep.mubr.msk.bf16.mxu0 %vm12742_vm1, %v15947_v0 }
 0x347   : > { %3812 = vrot.lane.b32.xlu1 %v13156_v58, %s15959_s21  ;;  %3764 = vrot.lane.b32.xlu0 %v13134_v39, %s15959_s21 }
 0x349   : > { %11508 = vmatmul.mubr.msk.bf16.vlgmr.msra.gmra.mxu1 %vm1028_vm2, %v13218_v14  ;;  %v13470_v14 = vld [vmem:[%s13442_s3 + $0x3] ss:$0 sm:$0xff] }
 0x34a   : > { %11519 = vmatprep.mubr.msk.bf16.mxu1 %vm12742_vm1, %v15947_v0 }
 0x34b   : > { %3908 = vrot.lane.b32.xlu1 %v13170_v63, %s15959_s21  ;;  %3860 = vrot.lane.b32.xlu0 %v13160_v59, %s15959_s21 }
 0x34f   : > { %4100 = vrot.lane.b32.xlu1 %v13222_v30, %s15959_s21  ;;  %3956 = vrot.lane.b32.xlu0 %v13174_v1, %s15959_s21 }
 0x353   : > { %3620 = vrot.lane.b32.xlu1 %v13098_v40, %s15959_s21  ;;  %4052 = vrot.lane.b32.xlu0 %v13200_v10, %s15959_s21  ;;  %v13448_v40 = vld [vmem:[%s13442_s3] ss:$0 sm:$0xff] }
 0x357   : > { %4004 = vrot.lane.b32.xlu1 %v13196_v8, %s15959_s21  ;;  %v13465_v8 = vld [vmem:[%s13442_s3 + $0x4] ss:$0 sm:$0xff] }
 0x364   : > { %v1069_v26 = vpop.f32.mrf.mxu1 }
 0x365   : > { %v13454_v57 = vadd.f32 %v13448_v40, %v1069_v26 }
 0x366   : > { %v11371_v31 = vpop.f32.mrf.mxu1 }
 0x367   : > { %v2611_v10 = vsel %vm1028_vm2, %v13454_v57, -inf }
 0x368   : > { %v1072_v35 = vpop.f32.mrf.mxu1 }
 0x36a   : > { %v11372_v36 = vpop.f32.mrf.mxu1 }
 0x370   : > { %v1117_v44 = vpop.f32.mrf.mxu1  ;;  %v1165_v38 = vpop.f32.mrf.mxu0 }
 0x371   : > { %v13451_v46 = vadd.f32 %v13445_v28, %v1165_v38  ;;  %v13462_v1 = vadd.f32 %v13457_v49, %v1117_v44 }
 0x372   : > { %v11377_v47 = vpop.f32.mrf.mxu1  ;;  %v11383_v39 = vpop.f32.mrf.mxu0 }
 0x373   : > { %v2617_v58 = vsel %vm1028_vm2, %v13451_v46, -inf  ;;  %v2614_v37 = vsel %vm1028_vm2, %v13462_v1, -inf }
 0x374   : > { %v1120_v59 = vpop.f32.mrf.mxu1  ;;  %v1168_v63 = vpop.f32.mrf.mxu0  ;;  %2618 = vmax.xlane.f32.xlu0 %v2617_v58 }
 0x376   : > { %v11378_v5 = vpop.f32.mrf.mxu1  ;;  %v11384_v6 = vpop.f32.mrf.mxu0 }
 0x378   : > { %v1213_v30 = vpop.f32.mrf.mxu1  ;;  %v1261_v29 = vpop.f32.mrf.mxu0  ;;  %2612 = vmax.xlane.f32.xlu0 %v2611_v10 }
 0x379   : > { %v13473_v4 = vadd.f32 %v13465_v8, %v1261_v29  ;;  %v13478_v61 = vadd.f32 %v13470_v14, %v1213_v30 }
 0x37a   : > { %v11389_v33 = vpop.f32.mrf.mxu1  ;;  %v11395_v27 = vpop.f32.mrf.mxu0 }
 0x37b   : > { %2615 = vmax.xlane.f32.xlu1 %v2614_v37  ;;  %v2623_v41 = vsel %vm1028_vm2, %v13473_v4, -inf  ;;  %v2620_v23 = vsel %vm1028_vm2, %v13478_v61, -inf  ;;  %v13508_v33 = vld [vmem:[%s13442_s3 + $0x7] ss:$0 sm:$0xff] }
 0x37c   : > { %v1216_v3 = vpop.f32.mrf.mxu1  ;;  %v1264_v7 = vpop.f32.mrf.mxu0  ;;  %2624 = vmax.xlane.f32.xlu0 %v2623_v41 }
 0x37d   : > { %v2214_v9 = vpop.permute.xlu0 %2213 }
 0x37e   : > { %v2219_v11 = vsel %vm1028_vm2, %v2214_v9, 0  ;;  %v11390_v16 = vpop.f32.mrf.mxu1  ;;  %v11396_v17 = vpop.f32.mrf.mxu0 }
 0x37f   : > { %11512 = vmatpush3.bf16.xpose.msra.mxu0 %v2219_v11 }
 0x380   : > { %v1309_v26 = vpop.f32.mrf.mxu1  ;;  %v1357_v31 = vpop.f32.mrf.mxu0  ;;  %2621 = vmax.xlane.f32.xlu0 %v2620_v23  ;;  %11523 = vmatprep.subr.bf16.mxu0 %v15947_v0 }
 0x381   : > { %v13493_v35 = vadd.f32 %v13484_v15, %v1309_v26  ;;  %v13496_v36 = vadd.f32 %v13487_v19, %v1357_v31  ;;  %v2264_v44 = vpop.permute.xlu1 %2263 }
 0x382   : > { %v2269_v38 = vsel %vm1028_vm2, %v2264_v44, 0  ;;  %v11401_v47 = vpop.f32.mrf.mxu1  ;;  %v11407_v39 = vpop.f32.mrf.mxu0 }
 0x383   : > { %11518 = vmatpush3.bf16.xpose.msra.mxu1 %v2269_v38  ;;  %v2626_v58 = vsel %vm1028_vm2, %v13493_v35, -inf  ;;  %v2629_v59 = vsel %vm1028_vm2, %v13496_v36, -inf }
 0x384   : > { %v1312_v63 = vpop.f32.mrf.mxu1  ;;  %2627 = vmax.xlane.f32.xlu1 %v2626_v58  ;;  %v1360_v5 = vpop.f32.mrf.mxu0  ;;  %2630 = vmax.xlane.f32.xlu0 %v2629_v59 }
 0x385   : > { %v2314_v6 = vpop.permute.xlu0 %2313  ;;  %11529 = vmatprep.subr.bf16.mxu1 %v15947_v0 }
 0x386   : > { %v2319_v10 = vsel %vm1028_vm2, %v2314_v6, 0  ;;  %v11402_v30 = vpop.f32.mrf.mxu1  ;;  %v11408_v29 = vpop.f32.mrf.mxu0  ;;  %11514 = vmatmul.mubr.msk.bf16.vlgmr.msra.gmra.mxu0 %vm1028_vm2, %v13232_v45 }
 0x387   : > { %11524 = vmatpush3.bf16.xpose.msra.mxu0 %v2319_v10  ;;  %11525 = vmatprep.mubr.msk.bf16.mxu0 %vm12742_vm1, %v15947_v0 }
 0x388   : > { %v1405_v27 = vpop.f32.mrf.mxu1  ;;  %11535 = vmatprep.subr.bf16.mxu0 %v15947_v0 }
 0x389   : > { %v13514_v37 = vadd.f32 %v13508_v33, %v1405_v27  ;;  %v2364_v41 = vpop.permute.xlu1 %2363 }
 0x38a   : > { %v2369_v3 = vsel %vm1028_vm2, %v2364_v41, 0  ;;  %v11413_v7 = vpop.f32.mrf.mxu1  ;;  %11520 = vmatmul.mubr.msk.bf16.vlgmr.msra.gmra.mxu1 %vm1028_vm2, %v13242_v53 }
 0x38b   : > { %11530 = vmatpush3.bf16.xpose.msra.mxu1 %v2369_v3  ;;  %v2632_v45 = vsel %vm1028_vm2, %v13514_v37, -inf  ;;  %11531 = vmatprep.mubr.msk.bf16.mxu1 %vm12742_vm1, %v15947_v0 }
 0x38c   : > { %v1408_v9 = vpop.f32.mrf.mxu1  ;;  %2633 = vmax.xlane.f32.xlu1 %v2632_v45  ;;  %11541 = vmatprep.subr.bf16.mxu1 %v15947_v0 }
 0x38d   : > { %v2414_v11 = vpop.permute.xlu0 %2413 }
 0x38e   : > { %v2419_v16 = vsel %vm1028_vm2, %v2414_v11, 0  ;;  %v11414_v17 = vpop.f32.mrf.mxu1  ;;  %11526 = vmatmul.mubr.msk.bf16.vlgmr.msra.gmra.mxu0 %vm1028_vm2, %v13256_v2 }
 0x38f   : > { %11536 = vmatpush3.bf16.xpose.msra.mxu0 %v2419_v16  ;;  %11537 = vmatprep.mubr.msk.bf16.mxu0 %vm12742_vm1, %v15947_v0 }
 0x390   : > { %11547 = vmatprep.subr.bf16.mxu0 %v15947_v0 }
 0x391   : > { %v2464_v53 = vpop.permute.xlu1 %2463 }
 0x392   : > { %v2469_v23 = vsel %vm1028_vm2, %v2464_v53, 0  ;;  %11532 = vmatmul.mubr.msk.bf16.vlgmr.msra.gmra.mxu1 %vm1028_vm2, %v13270_v18 }
 0x393   : > { %11542 = vmatpush3.bf16.xpose.msra.mxu1 %v2469_v23  ;;  %11543 = vmatprep.mubr.msk.bf16.mxu1 %vm12742_vm1, %v15947_v0 }
 0x394   : > { %11553 = vmatprep.subr.bf16.mxu1 %v15947_v0 }
 0x395   : > { %v2514_v26 = vpop.permute.xlu0 %2513 }
 0x396   : > { %v2519_v2 = vsel %vm1028_vm2, %v2514_v26, 0  ;;  %11538 = vmatmul.mubr.msk.bf16.vlgmr.msra.gmra.mxu0 %vm1028_vm2, %v13284_v42 }
 0x397   : > { %11548 = vmatpush3.bf16.xpose.msra.mxu0 %v2519_v2  ;;  %11549 = vmatprep.mubr.msk.bf16.mxu0 %vm12742_vm1, %v15947_v0 }
 0x398   : > { %11559 = vmatprep.subr.bf16.mxu0 %v15947_v0 }
 0x399   : > { %v2564_v31 = vpop.permute.xlu1 %2563  ;;  %v2996_v44 = vpop.permute.xlu0 %2995 }
 0x39a   : > { %v2569_v18 = vsel %vm1028_vm2, %v2564_v31, 0  ;;  %11544 = vmatmul.mubr.msk.bf16.vlgmr.msra.gmra.mxu1 %vm1028_vm2, %v13298_v24  ;;  %v3002_v42 = vsel %vm3000_vm3, %v2996_v44, 0 }
 0x39b   : > { %11554 = vmatpush3.bf16.xpose.msra.mxu1 %v2569_v18  ;;  %11555 = vmatprep.mubr.msk.bf16.mxu1 %vm12742_vm1, %v15947_v0 }
 0x39c   : > { %11565 = vmatprep.subr.bf16.mxu1 %v15947_v0 }
 0x39d   : > { %v3045_v38 = vpop.permute.xlu1 %3044  ;;  %v13560_v47 = vpop.permute.xlu0 %3092 }
 0x39e   : > { %11550 = vmatmul.mubr.msk.bf16.vlgmr.msra.gmra.mxu0 %vm1028_vm2, %v13312_v13  ;;  %v3050_v24 = vsel %vm3000_vm3, %v3045_v38, 0 }
 0x39f   : > { %11560 = vmatpush3.bf16.msra.mxu0 %v3002_v42  ;;  %11561 = vmatprep.mubr.msk.bf16.mxu0 %vm12742_vm1, %v15947_v0 }
 0x3a0   : > { %11571 = vmatprep.subr.bf16.mxu0 %v15947_v0 }
 0x3a1   : > { %v13562_v13 = vpop.permute.xlu0 %3188  ;;  %v13569_v6 = vpop.permute.xlu1 %3140 }
 0x3a2   : > { %11556 = vmatmul.mubr.msk.bf16.vlgmr.msra.gmra.mxu1 %vm1028_vm2, %v13326_v25 }
 0x3a3   : > { %11566 = vmatpush3.bf16.msra.mxu1 %v3050_v24  ;;  %11567 = vmatprep.mubr.msk.bf16.mxu1 %vm12742_vm1, %v15947_v0 }
 0x3a4   : > { %11577 = vmatprep.subr.bf16.mxu1 %v15947_v0 }
 0x3a5   : > { %v13571_v10 = vpop.permute.xlu0 %3284  ;;  %v13581_v16 = vpop.permute.xlu1 %3236 }
 0x3a9   : > { %v13583_v17 = vpop.permute.xlu0 %3380  ;;  %v13592_v24 = vpop.permute.xlu1 %3332 }
 0x3cd   : > { %v1455_v39 = vpop.f32.mrf.mxu0 }
 0x3ce   : > { %v13565_v58 = vadd.f32 %v13448_v40, %v1455_v39  ;;  %v13594_v39 = vpop.permute.xlu0 %3476 }
 0x3cf   : > { %v11419_v59 = vpop.f32.mrf.mxu0 }
 0x3d0   : > { %v2635_v63 = vsel %vm1028_vm2, %v13565_v58, -inf }
 0x3d1   : > { %v1458_v5 = vpop.f32.mrf.mxu0  ;;  %v1505_v25 = vpop.f32.mrf.mxu1  ;;  %2636 = vmax.xlane.f32.xlu0 %v2635_v63 }
 0x3d2   : > { %v13574_v30 = vadd.f32 %v13457_v49, %v1505_v25 }
 0x3d3   : > { %v11420_v29 = vpop.f32.mrf.mxu0  ;;  %v11425_v27 = vpop.f32.mrf.mxu1 }
 0x3d4   : > { %v2638_v41 = vsel %vm1028_vm2, %v13574_v30, -inf }
 0x3d5   : > { %v1508_v3 = vpop.f32.mrf.mxu1  ;;  %2639 = vmax.xlane.f32.xlu1 %v2638_v41  ;;  %v1555_v7 = vpop.f32.mrf.mxu0 }
 0x3d6   : > { %v13579_v45 = vadd.f32 %v13445_v28, %v1555_v7 }
 0x3d7   : > { %v11426_v9 = vpop.f32.mrf.mxu1  ;;  %v11431_v11 = vpop.f32.mrf.mxu0 }
 0x3d8   : > { %v2641_v53 = vsel %vm1028_vm2, %v13579_v45, -inf  ;;  %v13604_v9 = vpop.permute.xlu1 %3428  ;;  %v13606_v11 = vpop.permute.xlu0 %3572 }
 0x3d9   : > { %v1558_v23 = vpop.f32.mrf.mxu0  ;;  %v1605_v26 = vpop.f32.mrf.mxu1  ;;  %2642 = vmax.xlane.f32.xlu0 %v2641_v53 }
 0x3da   : > { %v13588_v2 = vadd.f32 %v13470_v14, %v1605_v26 }
 0x3db   : > { %v11432_v31 = vpop.f32.mrf.mxu0  ;;  %v11437_v18 = vpop.f32.mrf.mxu1 }
 0x3dc   : > { %v2644_v44 = vsel %vm1028_vm2, %v13588_v2, -inf }
 0x3dd   : > { %v1608_v42 = vpop.f32.mrf.mxu1  ;;  %2645 = vmax.xlane.f32.xlu1 %v2644_v44  ;;  %v1655_v38 = vpop.f32.mrf.mxu0 }
 0x3de   : > { %v13597_v59 = vadd.f32 %v13465_v8, %v1655_v38 }
 0x3df   : > { %v11438_v63 = vpop.f32.mrf.mxu1  ;;  %v11443_v5 = vpop.f32.mrf.mxu0 }
 0x3e0   : > { %v2647_v25 = vsel %vm1028_vm2, %v13597_v59, -inf  ;;  %v13617_v5 = vpop.permute.xlu1 %3524 }
 0x3e1   : > { %v1658_v29 = vpop.f32.mrf.mxu0  ;;  %v1705_v27 = vpop.f32.mrf.mxu1  ;;  %2648 = vmax.xlane.f32.xlu0 %v2647_v25 }
 0x3e2   : > { %v13602_v41 = vadd.f32 %v13484_v15, %v1705_v27  ;;  %v13619_v25 = vpop.permute.xlu0 %3668 }
 0x3e3   : > { %v11444_v3 = vpop.f32.mrf.mxu0  ;;  %v11449_v7 = vpop.f32.mrf.mxu1 }
 0x3e4   : > { %v2650_v53 = vsel %vm1028_vm2, %v13602_v41, -inf }
 0x3e5   : > { %v1708_v23 = vpop.f32.mrf.mxu1  ;;  %2651 = vmax.xlane.f32.xlu1 %v2650_v53  ;;  %v1755_v26 = vpop.f32.mrf.mxu0 }
 0x3e6   : > { %v13611_v31 = vadd.f32 %v13487_v19, %v1755_v26  ;;  %v13621_v26 = vpop.permute.xlu1 %3716 }
 0x3e7   : > { %v11450_v18 = vpop.f32.mrf.mxu1  ;;  %v11455_v44 = vpop.f32.mrf.mxu0 }
 0x3e8   : > { %v2653_v42 = vsel %vm1028_vm2, %v13611_v31, -inf  ;;  %v13623_v18 = vpop.permute.xlu0 %3764 }
 0x3e9   : > { %v1758_v38 = vpop.f32.mrf.mxu0  ;;  %v13615_v63 = vpop.f32.mrf.mxu1  ;;  %2654 = vmax.xlane.f32.xlu0 %v2653_v42 }
 0x3ea   : > { %v13627_v48 = vpop.permute.xlu1 %3812 }
 0x3eb   : > { %v11456_v29 = vpop.f32.mrf.mxu0  ;;  %v11461_v27 = vpop.f32.mrf.mxu1  ;;  %15993 = vst [vmem:[#allocation12_spill] sm:$0xff] %v13627_v48 }
 0x3ec   : > { %v13629_v50 = vpop.permute.xlu0 %3860 }
 0x3ed   : > { %v1808_v3 = vpop.f32.mrf.mxu1  ;;  %v1855_v7 = vpop.f32.mrf.mxu0  ;;  %15994 = vst [vmem:[#allocation13_spill] sm:$0xff] %v13629_v50 }
 0x3ef   : > { %v11462_v53 = vpop.f32.mrf.mxu1  ;;  %v11467_v23 = vpop.f32.mrf.mxu0 }
 0x3f1   : > { %v1858_v44 = vpop.f32.mrf.mxu0  ;;  %v13625_v0 = vpop.f32.mrf.mxu1 }
 0x3f3   : > { %v11468_v38 = vpop.f32.mrf.mxu0  ;;  %v11473_v55 = vpop.f32.mrf.mxu1 }
 0x3f4   : > { %v13637_v55 = vpop.permute.xlu1 %3908  ;;  %v13639_v38 = vpop.permute.xlu0 %3956 }
 0x3f5   : > { %v1908_v42 = vpop.f32.mrf.mxu1  ;;  %v1955_v51 = vpop.f32.mrf.mxu0  ;;  %15995 = vst [vmem:[#allocation14_spill] sm:$0xff] %v13637_v55  ;;  %15996 = vst [vmem:[#allocation15_spill] sm:$0xff] %v13639_v38 }
 0x3f6   : > { %4196 = vrot.lane.b32.xlu1 %v13246_v56, %s15959_s21 }
 0x3f7   : > { %v11474_v29 = vpop.f32.mrf.mxu1  ;;  %v11479_v27 = vpop.f32.mrf.mxu0 }
 0x3f9   : > { %v1958_v3 = vpop.f32.mrf.mxu0  ;;  %v13633_v53 = vpop.f32.mrf.mxu1 }
 0x3fa   : > { %4244 = vrot.lane.b32.xlu1 %v13261_v12, %s15959_s21  ;;  %v13649_v12 = vpop.permute.xlu1 %4100 }
 0x3fb   : > { %v11480_v23 = vpop.f32.mrf.mxu0  ;;  %v11485_v44 = vpop.f32.mrf.mxu1  ;;  %15997 = vst [vmem:[#allocation16_spill] sm:$0xff] %v13649_v12 }
 0x3fc   : > { %v13651_v23 = vpop.permute.xlu0 %4052 }
 0x3fd   : > { %v2008_v42 = vpop.f32.mrf.mxu1  ;;  %v13641_v43 = vpop.f32.mrf.mxu0  ;;  %15998 = vst [vmem:[#allocation17_spill] sm:$0xff] %v13651_v23 }
 0x3fe   : > { %4292 = vrot.lane.b32.xlu1 %v13274_v32, %s15959_s21 }
 0x3ff   : > { %v11486_v56 = vpop.f32.mrf.mxu1  ;;  %4148 = vrot.lane.b32.xlu0 %v13237_v52, %s15959_s21  ;;  %v11491_v29 = vpop.f32.mrf.mxu0 }
 0x400   : > { %v2619_v20 = vpop.xlane.xlu0 %2618  ;;  %v13655_v56 = vpop.permute.xlu1 %3620 }
 0x401   : > { %v2058_v27 = vpop.f32.mrf.mxu0  ;;  %v13647_v3 = vpop.f32.mrf.mxu1  ;;  %v2709_v52 = vsub.f32 %v13451_v46, %v2619_v20  ;;  %v13665_v46 = vadd.f32 %v13448_v40, %v1855_v7 }
 0x403   : > { %v11492_v44 = vpop.f32.mrf.mxu0  ;;  %v11497_v34 = vpop.f32.mrf.mxu1  ;;  %v2743_v50 = vmul.f32 1.442695, %v2709_v52 }
 0x404   : > { %v2613_v12 = vpop.xlane.xlu0 %2612  ;;  %v13660_v44 = vpop.permute.xlu1 %4004 }
 0x405   : > { %v2108_v42 = vpop.f32.mrf.mxu1  ;;  %v13653_v21 = vpop.f32.mrf.mxu0  ;;  %15999 = vst [vmem:[#allocation18_spill] sm:$0xff] %v13660_v44  ;;  %12370 = vpow2.f32 %v2743_v50 }
 0x406   : > { %v2707_v42 = vsub.f32 %v13454_v57, %v2613_v12  ;;  %v2659_v12 = vsel %vm1028_vm2, %v13665_v46, -inf }
 0x407   : > { %v11498_v55 = vpop.f32.mrf.mxu1  ;;  %v11503_v32 = vpop.f32.mrf.mxu0 }
 0x408   : > { %v2616_v55 = vpop.xlane.xlu1 %2615  ;;  %v2625_v32 = vpop.xlane.xlu0 %2624  ;;  %v2739_v22 = vmul.f32 1.442695, %v2707_v42 }
 0x409   : > { %v2158_v29 = vpop.f32.mrf.mxu0  ;;  %v13658_v27 = vpop.f32.mrf.mxu1  ;;  %v2708_v60 = vsub.f32 %v13462_v1, %v2616_v55 }
 0x40a   : > { %12372 = vpow2.f32 %v2739_v22  ;;  %v13679_v22 = vadd.f32 %v13457_v49, %v13625_v0  ;;  %v13691_v0 = vadd.f32 %v13470_v14, %v13633_v53  ;;  %v13704_v53 = vadd.f32 %v13465_v8, %v13641_v43 }
 0x40b   : > { %v11504_v38 = vpop.f32.mrf.mxu0  ;;  %v11509_v48 = vpop.f32.mrf.mxu1 }
 0x40c   : > { %v2622_v20 = vpop.xlane.xlu0 %2621  ;;  %v2741_v48 = vmul.f32 1.442695, %v2708_v60  ;;  %v2711_v38 = vsub.f32 %v13473_v4, %v2625_v32  ;;  %v13682_v60 = vadd.f32 %v13445_v28, %v1955_v51  ;;  %v2662_v51 = vsel %vm1028_vm2, %v13679_v22, -inf }
 0x40d   : > { %v2208_v23 = vpop.f32.mrf.mxu1  ;;  %v2710_v57 = vsub.f32 %v13478_v61, %v2622_v20  ;;  %v2628_v29 = vpop.xlane.xlu1 %2627  ;;  %v2668_v32 = vsel %vm1028_vm2, %v13691_v0, -inf  ;;  %v2671_v43 = vsel %vm1028_vm2, %v13704_v53, -inf }
 0x40e   : > { %v13670_v23 = vadd.f32 %v13508_v33, %v13615_v63  ;;  %12374 = vpow2.f32 %v2741_v48  ;;  %v2747_v50 = vmul.f32 1.442695, %v2711_v38  ;;  %v13712_v38 = vadd.f32 %v13484_v15, %v13647_v3 }
 0x40f   : > { %v11510_v34 = vpop.f32.mrf.mxu1  ;;  %v2745_v63 = vmul.f32 1.442695, %v2710_v57 }
 0x410   : > { %v2631_v52 = vpop.xlane.xlu0 %2630  ;;  %v2656_v4 = vsel %vm1028_vm2, %v13670_v23, -inf  ;;  %12376 = vpow2.f32 %v2747_v50  ;;  %v2712_v34 = vsub.f32 %v13493_v35, %v2628_v29 }
 0x411   : > { %v2713_v61 = vsub.f32 %v13496_v36, %v2631_v52  ;;  %12378 = vpow2.f32 %v2745_v63  ;;  %v2665_v36 = vsel %vm1028_vm2, %v13682_v60, -inf  ;;  %v2674_v52 = vsel %vm1028_vm2, %v13712_v38, -inf }
 0x412   : > { %v13675_v1 = vpop.eup %12370  ;;  %v2749_v20 = vmul.f32 1.442695, %v2712_v34  ;;  %v13732_v63 = vadd.f32 %v13508_v33, %v13658_v27 }
 0x413   : > { %v2809_v7 = vsel %vm1028_vm2, %v13675_v1, 0.0  ;;  %v2751_v42 = vmul.f32 1.442695, %v2713_v61 }
 0x414   : > { %v2680_v34 = vsel %vm1028_vm2, %v13732_v63, -inf }
 0x415   : > { %12380 = vpow2.f32 %v2751_v42  ;;  %v2634_v29 = vpop.xlane.xlu1 %2633 }
 0x416   : > { %12382 = vpow2.f32 %v2749_v20 }
 0x417   : > { %v13698_v55 = vpop.eup %12372 }
 0x418   : > { %v2803_v35 = vsel %vm1028_vm2, %v13698_v55, 0.0 }
 0x41b   : > { %v13708_v48 = vpop.eup %12374 }
 0x41c   : > { %v2806_v50 = vsel %vm1028_vm2, %v13708_v48, 0.0 }
 0x41d   : > { %v13718_v57 = vpop.eup %12376 }
 0x41e   : > { %2660 = vmax.xlane.f32.xlu0 %v2659_v12  ;;  %v13722_v12 = vadd.f32 %v13487_v19, %v13653_v21  ;;  %v2815_v3 = vsel %vm1028_vm2, %v13718_v57, 0.0 }
 0x420   : > { %v2677_v61 = vsel %vm1028_vm2, %v13722_v12, -inf }
 0x422   : > { %2657 = vmax.xlane.f32.xlu1 %v2656_v4  ;;  %2810 = vadd.xlane.f32.xlu0 %v2809_v7  ;;  %v13728_v4 = vpop.eup %12378 }
 0x423   : > { %v2812_v21 = vsel %vm1028_vm2, %v13728_v4, 0.0  ;;  %v13738_v7 = vpop.eup %12380 }
 0x424   : > { %v2821_v27 = vsel %vm1028_vm2, %v13738_v7, 0.0  ;;  %v13745_v42 = vpop.eup %12382 }
 0x426   : > { %2663 = vmax.xlane.f32.xlu1 %v2662_v51  ;;  %2666 = vmax.xlane.f32.xlu0 %v2665_v36  ;;  %v2714_v51 = vsub.f32 %v13514_v37, %v2634_v29 }
 0x428   : > { %v2753_v36 = vmul.f32 1.442695, %v2714_v51 }
 0x42a   : > { %2669 = vmax.xlane.f32.xlu1 %v2668_v32  ;;  %2804 = vadd.xlane.f32.xlu0 %v2803_v35  ;;  %v2818_v32 = vsel %vm1028_vm2, %v13745_v42, 0.0  ;;  %12384 = vpow2.f32 %v2753_v36 }
 0x42e   : > { %2807 = vadd.xlane.f32.xlu1 %v2806_v50  ;;  %2672 = vmax.xlane.f32.xlu0 %v2671_v43 }
 0x432   : > { %2675 = vmax.xlane.f32.xlu1 %v2674_v52  ;;  %2816 = vadd.xlane.f32.xlu0 %v2815_v3 }
 0x436   : > { %2678 = vmax.xlane.f32.xlu0 %v2677_v61  ;;  %2813 = vadd.xlane.f32.xlu1 %v2812_v21 }
 0x437   : > { %v13759_v51 = vpop.eup %12384 }
 0x43a   : > { %2681 = vmax.xlane.f32.xlu1 %v2680_v34  ;;  %2822 = vadd.xlane.f32.xlu0 %v2821_v27 }
 0x43e   : > { %2819 = vadd.xlane.f32.xlu1 %v2818_v32 }
 0x446   : > { %v2255_v20 = vpop.f32.mrf.mxu0 }
 0x447   : > { %v13750_v35 = vadd.f32 %v13448_v40, %v2255_v20  ;;  %v2824_v20 = vsel %vm1028_vm2, %v13759_v51, 0.0 }
 0x448   : > { %v11515_v37 = vpop.f32.mrf.mxu0 }
 0x449   : > { %v2683_v50 = vsel %vm1028_vm2, %v13750_v35, -inf }
 0x44a   : > { %v2258_v43 = vpop.f32.mrf.mxu0  ;;  %v2305_v52 = vpop.f32.mrf.mxu1  ;;  %2684 = vmax.xlane.f32.xlu0 %v2683_v50 }
 0x44b   : > { %v13755_v3 = vadd.f32 %v13457_v49, %v2305_v52 }
 0x44c   : > { %v11516_v61 = vpop.f32.mrf.mxu0  ;;  %v11521_v21 = vpop.f32.mrf.mxu1 }
 0x44d   : > { %v2686_v29 = vsel %vm1028_vm2, %v13755_v3, -inf }
 0x44e   : > { %v2308_v34 = vpop.f32.mrf.mxu1  ;;  %v2355_v40 = vpop.f32.mrf.mxu0  ;;  %2687 = vmax.xlane.f32.xlu1 %v2686_v29 }
 0x44f   : > { %v13762_v27 = vadd.f32 %v13445_v28, %v2355_v40 }
 0x450   : > { %v11522_v36 = vpop.f32.mrf.mxu1  ;;  %v11527_v32 = vpop.f32.mrf.mxu0 }
 0x451   : > { %v2689_v49 = vsel %vm1028_vm2, %v13762_v27, -inf }
 0x452   : > { %v2358_v37 = vpop.f32.mrf.mxu0  ;;  %v2405_v50 = vpop.f32.mrf.mxu1  ;;  %2825 = vadd.xlane.f32.xlu1 %v2824_v20  ;;  %2690 = vmax.xlane.f32.xlu0 %v2689_v49 }
 0x453   : > { %v13769_v43 = vadd.f32 %v13470_v14, %v2405_v50 }
 0x454   : > { %v11528_v52 = vpop.f32.mrf.mxu0  ;;  %v11533_v61 = vpop.f32.mrf.mxu1 }
 0x455   : > { %v2692_v28 = vsel %vm1028_vm2, %v13769_v43, -inf }
 0x456   : > { %v2408_v21 = vpop.f32.mrf.mxu1  ;;  %v2455_v29 = vpop.f32.mrf.mxu0  ;;  %2693 = vmax.xlane.f32.xlu1 %v2692_v28 }
 0x457   : > { %v13774_v34 = vadd.f32 %v13465_v8, %v2455_v29 }
 0x458   : > { %v11534_v40 = vpop.f32.mrf.mxu1  ;;  %v11539_v36 = vpop.f32.mrf.mxu0 }
 0x459   : > { %v2695_v32 = vsel %vm1028_vm2, %v13774_v34, -inf }
 0x45a   : > { %v2458_v20 = vpop.f32.mrf.mxu0  ;;  %v2505_v49 = vpop.f32.mrf.mxu1  ;;  %2696 = vmax.xlane.f32.xlu0 %v2695_v32 }
 0x45b   : > { %v13779_v14 = vadd.f32 %v13484_v15, %v2505_v49  ;;  %v2637_v37 = vpop.xlane.xlu0 %2636 }
 0x45c   : > { %v2715_v50 = vsub.f32 %v13565_v58, %v2637_v37  ;;  %v11540_v52 = vpop.f32.mrf.mxu0  ;;  %v11545_v61 = vpop.f32.mrf.mxu1 }
 0x45d   : > { %v2698_v8 = vsel %vm1028_vm2, %v13779_v14, -inf }
 0x45e   : > { %v2755_v28 = vmul.f32 1.442695, %v2715_v50  ;;  %v2508_v21 = vpop.f32.mrf.mxu1  ;;  %v2640_v29 = vpop.xlane.xlu1 %2639  ;;  %2699 = vmax.xlane.f32.xlu1 %v2698_v8 }
 0x45f   : > { %v2716_v40 = vsub.f32 %v13574_v30, %v2640_v29  ;;  %v2555_v36 = vpop.f32.mrf.mxu0 }
 0x460   : > { %12386 = vpow2.f32 %v2755_v28  ;;  %v13786_v32 = vadd.f32 %v13487_v19, %v2555_v36  ;;  %v11546_v15 = vpop.f32.mrf.mxu1 }
 0x461   : > { %v2757_v20 = vmul.f32 1.442695, %v2716_v40  ;;  %v11551_v49 = vpop.f32.mrf.mxu0 }
 0x462   : > { %v2605_v58 = vpop.f32.mrf.mxu1  ;;  %v2701_v37 = vsel %vm1028_vm2, %v13786_v32, -inf  ;;  %v2643_v52 = vpop.xlane.xlu0 %2642 }
 0x463   : > { %12388 = vpow2.f32 %v2757_v20  ;;  %v2558_v50 = vpop.f32.mrf.mxu0  ;;  %v13791_v61 = vadd.f32 %v13508_v33, %v2605_v58  ;;  %2702 = vmax.xlane.f32.xlu1 %v2701_v37  ;;  %v2717_v30 = vsub.f32 %v13579_v45, %v2643_v52 }
 0x464   : > { %v11557_v8 = vpop.f32.mrf.mxu1 }
 0x465   : > { %v2759_v28 = vmul.f32 1.442695, %v2717_v30  ;;  %v11552_v19 = vpop.f32.mrf.mxu0  ;;  %v2704_v21 = vsel %vm1028_vm2, %v13791_v61, -inf }
 0x466   : > { %v2608_v29 = vpop.f32.mrf.mxu1  ;;  %v2646_v40 = vpop.xlane.xlu1 %2645  ;;  %2705 = vmax.xlane.f32.xlu0 %v2704_v21 }
 0x467   : > { %12390 = vpow2.f32 %v2759_v28  ;;  %v2718_v36 = vsub.f32 %v13588_v2, %v2646_v40 }
 0x468   : > { %v11558_v15 = vpop.f32.mrf.mxu1 }
 0x469   : > { %v2761_v20 = vmul.f32 1.442695, %v2718_v36 }
 0x46a   : > { %v2649_v49 = vpop.xlane.xlu0 %2648 }
 0x46b   : > { %12392 = vpow2.f32 %v2761_v20  ;;  %v2719_v33 = vsub.f32 %v13597_v59, %v2649_v49 }
 0x46d   : > { %v13798_v58 = vpop.eup %12386  ;;  %v2763_v45 = vmul.f32 1.442695, %v2719_v33 }
 0x46e   : > { %v2652_v37 = vpop.xlane.xlu1 %2651  ;;  %v2827_v52 = vsel %vm1028_vm2, %v13798_v58, 0.0 }
 0x46f   : > { %12394 = vpow2.f32 %v2763_v45  ;;  %v2720_v50 = vsub.f32 %v13602_v41, %v2652_v37  ;;  %2828 = vadd.xlane.f32.xlu0 %v2827_v52 }
 0x470   : > { %v13803_v30 = vpop.eup %12388 }
 0x471   : > { %v2765_v2 = vmul.f32 1.442695, %v2720_v50  ;;  %v2830_v8 = vsel %vm1028_vm2, %v13803_v30, 0.0 }
 0x472   : > { %2831 = vadd.xlane.f32.xlu1 %v2830_v8  ;;  %v2655_v28 = vpop.xlane.xlu0 %2654  ;;  %v13828_v45 = vpop.permute.xlu1 %4196 }
 0x473   : > { %12396 = vpow2.f32 %v2765_v2  ;;  %v2721_v59 = vsub.f32 %v13611_v31, %v2655_v28  ;;  %16000 = vst [vmem:[#allocation19_spill] sm:$0xff] %v13828_v45 }
 0x474   : > { %v13808_v19 = vpop.eup %12390 }
 0x475   : > { %v2767_v21 = vmul.f32 1.442695, %v2721_v59  ;;  %v2833_v29 = vsel %vm1028_vm2, %v13808_v19, 0.0 }
 0x476   : > { %2834 = vadd.xlane.f32.xlu1 %v2833_v29  ;;  %v13830_v37 = vpop.permute.xlu1 %4244  ;;  %v13832_v52 = vpop.permute.xlu0 %4148 }
 0x477   : > { %12398 = vpow2.f32 %v2767_v21  ;;  %16001 = vst [vmem:[#allocation20_spill] sm:$0xff] %v13830_v37  ;;  %16002 = vst [vmem:[#allocation21_spill] sm:$0xff] %v13832_v52 }
 0x478   : > { %v13812_v41 = vpop.eup %12392 }
 0x479   : > { %v2836_v40 = vsel %vm1028_vm2, %v13812_v41, 0.0 }
 0x47a   : > { %2837 = vadd.xlane.f32.xlu0 %v2836_v40  ;;  %v13834_v50 = vpop.permute.xlu1 %4292 }
 0x47b   : > { %16003 = vst [vmem:[#allocation22_spill] sm:$0xff] %v13834_v50 }
 0x47c   : > { %v13816_v36 = vpop.eup %12394 }
 0x47d   : > { %v2839_v15 = vsel %vm1028_vm2, %v13816_v36, 0.0 }
 0x47e   : > { %2840 = vadd.xlane.f32.xlu1 %v2839_v15 }
 0x480   : > { %v13820_v31 = vpop.eup %12396 }
 0x481   : > { %v2842_v20 = vsel %vm1028_vm2, %v13820_v31, 0.0 }
 0x482   : > { %2843 = vadd.xlane.f32.xlu0 %v2842_v20 }
 0x484   : > { %v13824_v49 = vpop.eup %12398 }
 0x485   : > { %v2845_v33 = vsel %vm1028_vm2, %v13824_v49, 0.0 }
 0x486   : > { %2846 = vadd.xlane.f32.xlu1 %v2845_v33 }
 0x4a7   : > { %v2661_v2 = vpop.xlane.xlu0 %2660 }
 0x4a8   : > { %v2723_v8 = vsub.f32 %v13665_v46, %v2661_v2 }
 0x4aa   : > { %v2771_v28 = vmul.f32 1.442695, %v2723_v8 }
 0x4ab   : > { %v2658_v59 = vpop.xlane.xlu1 %2657  ;;  %v2811_v21 = vpop.xlane.xlu0 %2810 }
 0x4ac   : > { %12400 = vpow2.f32 %v2771_v28  ;;  %v2722_v29 = vsub.f32 %v13670_v23, %v2658_v59 }
 0x4ae   : > { %v2769_v40 = vmul.f32 1.442695, %v2722_v29 }
 0x4af   : > { %v2664_v15 = vpop.xlane.xlu1 %2663  ;;  %v2667_v20 = vpop.xlane.xlu0 %2666 }
 0x4b0   : > { %12402 = vpow2.f32 %v2769_v40  ;;  %v2724_v33 = vsub.f32 %v13679_v22, %v2664_v15  ;;  %v2725_v37 = vsub.f32 %v13682_v60, %v2667_v20 }
 0x4b2   : > { %v2773_v45 = vmul.f32 1.442695, %v2724_v33  ;;  %v2775_v52 = vmul.f32 1.442695, %v2725_v37 }
 0x4b3   : > { %v2670_v50 = vpop.xlane.xlu1 %2669  ;;  %v2805_v44 = vpop.xlane.xlu0 %2804 }
 0x4b4   : > { %12404 = vpow2.f32 %v2773_v45  ;;  %v2726_v46 = vsub.f32 %v13691_v0, %v2670_v50 }
 0x4b5   : > { %12406 = vpow2.f32 %v2775_v52 }
 0x4b6   : > { %v2777_v2 = vmul.f32 1.442695, %v2726_v46  ;;  %12408 = vrcp.f32 %v2805_v44 }
 0x4b7   : > { %v2808_v8 = vpop.xlane.xlu1 %2807  ;;  %v2673_v23 = vpop.xlane.xlu0 %2672 }
 0x4b8   : > { %12410 = vpow2.f32 %v2777_v2  ;;  %v2727_v28 = vsub.f32 %v13704_v53, %v2673_v23 }
 0x4b9   : > { %v13842_v59 = vpop.eup %12400  ;;  %12412 = vrcp.f32 %v2808_v8 }
 0x4ba   : > { %12414 = vrcp.f32 %v2811_v21  ;;  %v2779_v22 = vmul.f32 1.442695, %v2727_v28  ;;  %v2851_v60 = vsel %vm1028_vm2, %v13842_v59, 0.0 }
 0x4bb   : > { %v2676_v37 = vpop.xlane.xlu1 %2675  ;;  %2852 = vadd.xlane.f32.xlu1 %v2851_v60  ;;  %v2817_v45 = vpop.xlane.xlu0 %2816 }
 0x4bc   : > { %12416 = vpow2.f32 %v2779_v22  ;;  %v2728_v0 = vsub.f32 %v13712_v38, %v2676_v37 }
 0x4bd   : > { %v13847_v44 = vpop.eup %12402 }
 0x4be   : > { %v2781_v52 = vmul.f32 1.442695, %v2728_v0  ;;  %v2848_v53 = vsel %vm1028_vm2, %v13847_v44, 0.0 }
 0x4bf   : > { %v2814_v50 = vpop.xlane.xlu1 %2813  ;;  %2849 = vadd.xlane.f32.xlu0 %v2848_v53  ;;  %v2679_v29 = vpop.xlane.xlu0 %2678 }
 0x4c0   : > { %12418 = vpow2.f32 %v2781_v52  ;;  %v2729_v21 = vsub.f32 %v13722_v12, %v2679_v29  ;;  %v16004_v29 = vmov 0.0  }
 0x4c1   : > { %v13852_v40 = vpop.eup %12404  ;;  %12420 = vrcp.f32 %v2814_v50 }
 0x4c2   : > { %v13854_v15 = vpop.eup %12406  ;;  %12422 = vrcp.f32 %v2817_v45  ;;  %v2783_v20 = vmul.f32 1.442695, %v2729_v21  ;;  %v2854_v38 = vsel %vm1028_vm2, %v13852_v40, 0.0 }
 0x4c3   : > { %v12409_v33 = vpop.eup %12408  ;;  %v2682_v46 = vpop.xlane.xlu1 %2681  ;;  %2855 = vadd.xlane.f32.xlu0 %v2854_v38  ;;  %v2857_v2 = vsel %vm1028_vm2, %v13854_v15, 0.0 }
 0x4c4   : > { %12424 = vpow2.f32 %v2783_v20  ;;  %v2730_v8 = vsub.f32 %v13732_v63, %v2682_v46  ;;  %2858 = vadd.xlane.f32.xlu1 %v2857_v2  ;;  %v2931_v12 = vmul.f32 %v12409_v33, %v13698_v55  ;;  %v2823_v0 = vpop.xlane.xlu0 %2822  ;;  %v3098_v63 = vsel %vm3000_vm3, %v13560_v47, 0 }
 0x4c5   : > { %v13862_v23 = vpop.eup %12410  ;;  %v3146_v47 = vsel %vm3000_vm3, %v13569_v6, 0  ;;  %v3194_v2 = vsel %vm3000_vm3, %v13562_v13, 0 }
 0x4c6   : > { %v12413_v28 = vpop.eup %12412  ;;  %v2785_v22 = vmul.f32 1.442695, %v2730_v8  ;;  %v2963_v60 = vpack.c.bf16 %v2931_v12, %v2931_v12  ;;  %v2860_v37 = vsel %vm1028_vm2, %v13862_v23, 0.0 }
 0x4c7   : > { %v12415_v45 = vpop.eup %12414  ;;  %v2820_v52 = vpop.xlane.xlu1 %2819  ;;  %2861 = vadd.xlane.f32.xlu0 %v2860_v37  ;;  %v2932_v53 = vmul.f32 %v12413_v28, %v13708_v48 }
 0x4c8   : > { %12426 = vpow2.f32 %v2785_v22  ;;  %11562 = vmatmul.mubr.msk.bf16.vlgmr.msra.gmra.mxu0 %vm1028_vm2, %v2963_v60  ;;  %v2933_v48 = vmul.f32 %v12415_v45, %v13675_v1 }
 0x4c9   : > { %v13870_v55 = vpop.eup %12416  ;;  %11572 = vmatpush3.bf16.msra.mxu0 %v3098_v63  ;;  %12428 = vrcp.f32 %v2820_v52  ;;  %v2964_v50 = vpack.c.bf16 %v2932_v53, %v2932_v53  ;;  %11573 = vmatprep.mubr.msk.bf16.mxu0 %vm12742_vm1, %v16004_v29 }
 0x4ca   : > { %12430 = vrcp.f32 %v2823_v0  ;;  %v2863_v21 = vsel %vm1028_vm2, %v13870_v55, 0.0  ;;  %11583 = vmatprep.subr.bf16.mxu0 %v16004_v29  ;;  %v2965_v33 = vpack.c.bf16 %v2933_v48, %v2933_v48 }
 0x4cb   : > { %11568 = vmatmul.mubr.msk.bf16.vlgmr.msra.gmra.mxu1 %vm1028_vm2, %v2964_v50  ;;  %2864 = vadd.xlane.f32.xlu1 %v2863_v21 }
 0x4cc   : > { %11578 = vmatpush3.bf16.msra.mxu1 %v3146_v47  ;;  %11579 = vmatprep.mubr.msk.bf16.mxu1 %vm12742_vm1, %v16004_v29 }
 0x4cd   : > { %v13883_v20 = vpop.eup %12418  ;;  %11589 = vmatprep.subr.bf16.mxu1 %v16004_v29 }
 0x4ce   : > { %v12421_v38 = vpop.eup %12420  ;;  %v2866_v46 = vsel %vm1028_vm2, %v13883_v20, 0.0 }
 0x4cf   : > { %v12423_v1 = vpop.eup %12422  ;;  %2867 = vadd.xlane.f32.xlu0 %v2866_v46  ;;  %v2934_v6 = vmul.f32 %v12421_v38, %v13728_v4  ;;  %v3242_v4 = vsel %vm3000_vm3, %v13581_v16, 0 }
 0x4d0   : > { %11574 = vmatmul.mubr.msk.bf16.vlgmr.msra.gmra.mxu0 %vm1028_vm2, %v2965_v33  ;;  %v2935_v22 = vmul.f32 %v12423_v1, %v13718_v57 }
 0x4d1   : > { %v13892_v8 = vpop.eup %12424  ;;  %11584 = vmatpush3.bf16.msra.mxu0 %v3194_v2  ;;  %v2966_v12 = vpack.c.bf16 %v2934_v6, %v2934_v6  ;;  %11585 = vmatprep.mubr.msk.bf16.mxu0 %vm12742_vm1, %v16004_v29 }
 0x4d2   : > { %v2869_v28 = vsel %vm1028_vm2, %v13892_v8, 0.0  ;;  %11595 = vmatprep.subr.bf16.mxu0 %v16004_v29  ;;  %v2967_v57 = vpack.c.bf16 %v2935_v22, %v2935_v22 }
 0x4d3   : > { %11580 = vmatmul.mubr.msk.bf16.vlgmr.msra.gmra.mxu1 %vm1028_vm2, %v2966_v12  ;;  %2870 = vadd.xlane.f32.xlu1 %v2869_v28  ;;  %v2685_v13 = vpop.xlane.xlu0 %2684 }
 0x4d4   : > { %11590 = vmatpush3.bf16.msra.mxu1 %v3242_v4  ;;  %v2731_v60 = vsub.f32 %v13750_v35, %v2685_v13  ;;  %11591 = vmatprep.mubr.msk.bf16.mxu1 %vm12742_vm1, %v16004_v29  ;;  %v3290_v35 = vsel %vm3000_vm3, %v13571_v10, 0 }
 0x4d5   : > { %v13906_v37 = vpop.eup %12426  ;;  %11601 = vmatprep.subr.bf16.mxu1 %v16004_v29 }
 0x4d6   : > { %v12429_v45 = vpop.eup %12428  ;;  %v2787_v0 = vmul.f32 1.442695, %v2731_v60  ;;  %v2872_v16 = vsel %vm1028_vm2, %v13906_v37, 0.0  ;;  %v3434_v60 = vsel %vm3000_vm3, %v13604_v9, 0 }
 0x4d7   : > { %v12431_v52 = vpop.eup %12430  ;;  %v2688_v53 = vpop.xlane.xlu1 %2687  ;;  %2873 = vadd.xlane.f32.xlu0 %v2872_v16  ;;  %v2936_v63 = vmul.f32 %v12429_v45, %v13745_v42  ;;  %v3338_v42 = vsel %vm3000_vm3, %v13592_v24, 0  ;;  %v3386_v24 = vsel %vm3000_vm3, %v13583_v17, 0 }
 0x4d8   : > { %12432 = vpow2.f32 %v2787_v0  ;;  %11586 = vmatmul.mubr.msk.bf16.vlgmr.msra.gmra.mxu0 %vm1028_vm2, %v2967_v57  ;;  %v2732_v50 = vsub.f32 %v13755_v3, %v2688_v53  ;;  %v2937_v47 = vmul.f32 %v12431_v52, %v13738_v7 }
 0x4d9   : > { %11596 = vmatpush3.bf16.msra.mxu0 %v3290_v35  ;;  %v2968_v21 = vpack.c.bf16 %v2936_v63, %v2936_v63  ;;  %11597 = vmatprep.mubr.msk.bf16.mxu0 %vm12742_vm1, %v16004_v29 }
 0x4da   : > { %v2789_v48 = vmul.f32 1.442695, %v2732_v50  ;;  %11607 = vmatprep.subr.bf16.mxu0 %v16004_v29  ;;  %v2969_v46 = vpack.c.bf16 %v2937_v47, %v2937_v47 }
 0x4db   : > { %11592 = vmatmul.mubr.msk.bf16.vlgmr.msra.gmra.mxu1 %vm1028_vm2, %v2968_v21  ;;  %v2826_v10 = vpop.xlane.xlu1 %2825  ;;  %v2691_v38 = vpop.xlane.xlu0 %2690 }
 0x4dc   : > { %12434 = vpow2.f32 %v2789_v48  ;;  %11602 = vmatpush3.bf16.msra.mxu1 %v3338_v42  ;;  %v2733_v3 = vsub.f32 %v13762_v27, %v2691_v38  ;;  %11603 = vmatprep.mubr.msk.bf16.mxu1 %vm12742_vm1, %v16004_v29  ;;  %v3482_v38 = vsel %vm3000_vm3, %v13594_v39, 0 }
 0x4dd   : > { %12436 = vrcp.f32 %v2826_v10  ;;  %11613 = vmatprep.subr.bf16.mxu1 %v16004_v29 }
 0x4de   : > { %v2791_v33 = vmul.f32 1.442695, %v2733_v3 }
 0x4df   : > { %v2694_v7 = vpop.xlane.xlu1 %2693 }
 0x4e0   : > { %12438 = vpow2.f32 %v2791_v33  ;;  %11598 = vmatmul.mubr.msk.bf16.vlgmr.msra.gmra.mxu0 %vm1028_vm2, %v2969_v46  ;;  %v2734_v1 = vsub.f32 %v13769_v43, %v2694_v7 }
 0x4e1   : > { %11608 = vmatpush3.bf16.msra.mxu0 %v3386_v24  ;;  %11609 = vmatprep.mubr.msk.bf16.mxu0 %vm12742_vm1, %v16004_v29 }
 0x4e2   : > { %v2793_v27 = vmul.f32 1.442695, %v2734_v1  ;;  %11619 = vmatprep.subr.bf16.mxu0 %v16004_v29 }
 0x4e3   : > { %v2697_v45 = vpop.xlane.xlu0 %2696 }
 0x4e4   : > { %12440 = vpow2.f32 %v2793_v27  ;;  %v2735_v3 = vsub.f32 %v13774_v34, %v2697_v45  ;;  %v3578_v27 = vsel %vm3000_vm3, %v13606_v11, 0 }
 0x4e5   : > { %v13934_v6 = vpop.eup %12432 }
 0x4e6   : > { %v2875_v2 = vsel %vm1028_vm2, %v13934_v6, 0.0  ;;  %v2795_v34 = vmul.f32 1.442695, %v2735_v3 }
 0x4e7   : > { %2876 = vadd.xlane.f32.xlu1 %v2875_v2 }
 0x4e9   : > { %v13938_v17 = vpop.eup %12434 }
 0x4ea   : > { %v12437_v12 = vpop.eup %12436  ;;  %v2878_v43 = vsel %vm1028_vm2, %v13938_v17, 0.0 }
 0x4eb   : > { %2879 = vadd.xlane.f32.xlu0 %v2878_v43  ;;  %v2938_v28 = vmul.f32 %v12437_v12, %v13759_v51  ;;  %v2700_v51 = vpop.xlane.xlu1 %2699 }
 0x4ed   : > { %v13943_v22 = vpop.eup %12438  ;;  %v2970_v4 = vpack.c.bf16 %v2938_v28, %v2938_v28 }
 0x4ee   : > { %v2881_v13 = vsel %vm1028_vm2, %v13943_v22, 0.0 }
 0x4ef   : > { %11604 = vmatmul.mubr.msk.bf16.vlgmr.msra.gmra.mxu1 %vm1028_vm2, %v2970_v4  ;;  %2882 = vadd.xlane.f32.xlu1 %v2881_v13  ;;  %v2706_v16 = vpop.xlane.xlu0 %2705  ;;  %v2703_v52 = vpop.xlane.xlu1 %2702 }
 0x4f0   : > { %11614 = vmatpush3.bf16.msra.mxu1 %v3434_v60  ;;  %11615 = vmatprep.mubr.msk.bf16.mxu1 %vm12742_vm1, %v16004_v29  ;;  %v2737_v46 = vsub.f32 %v13786_v32, %v2703_v52  ;;  %v2738_v32 = vsub.f32 %v13791_v61, %v2706_v16  ;;  %v3722_v60 = vsel %vm3000_vm3, %v13621_v26, 0 }
 0x4f1   : > { %v13952_v0 = vpop.eup %12440  ;;  %11625 = vmatprep.subr.bf16.mxu1 %v16004_v29 }
 0x4f2   : > { %v2884_v57 = vsel %vm1028_vm2, %v13952_v0, 0.0  ;;  %v2801_v61 = vmul.f32 1.442695, %v2738_v32 }
 0x4f3   : > { %2885 = vadd.xlane.f32.xlu0 %v2884_v57  ;;  %v3770_v57 = vsel %vm3000_vm3, %v13623_v18, 0 }
 0x4f8   : > { %v2829_v9 = vpop.xlane.xlu0 %2828 }
 0x4f9   : > { %12442 = vrcp.f32 %v2829_v9 }
 0x4fb   : > { %v2832_v53 = vpop.xlane.xlu1 %2831 }
 0x4fc   : > { %12444 = vrcp.f32 %v2832_v53  ;;  %v16005_v53 = vld [vmem:[#allocation11_spill] sm:$0xff] }
 0x4ff   : > { %v2835_v63 = vpop.xlane.xlu1 %2834 }
 0x500   : > { %12446 = vrcp.f32 %v2835_v63  ;;  %4388 = vrot.lane.b32.xlu1 %v13302_v62, %s15959_s21  ;;  %v16006_v63 = vld [vmem:[#allocation10_spill] sm:$0xff] }
 0x503   : > { %v2838_v35 = vpop.xlane.xlu0 %2837 }
 0x504   : > { %12448 = vrcp.f32 %v2838_v35 }
 0x506   : > { %v12443_v50 = vpop.eup %12442 }
 0x507   : > { %v2841_v21 = vpop.xlane.xlu1 %2840  ;;  %v2939_v48 = vmul.f32 %v12443_v50, %v13798_v58 }
 0x508   : > { %12450 = vrcp.f32 %v2841_v21 }
 0x509   : > { %v12445_v47 = vpop.eup %12444  ;;  %4340 = vrot.lane.b32.xlu0 %v13289_v54, %s15959_s21  ;;  %v2971_v42 = vpack.c.bf16 %v2939_v48, %v2939_v48  ;;  %v3530_v54 = vsel %vm3000_vm3, %v13617_v5, 0 }
 0x50a   : > { %v2940_v10 = vmul.f32 %v12445_v47, %v13803_v30  ;;  %v2736_v30 = vsub.f32 %v13779_v14, %v2700_v51 }
 0x50b   : > { %11610 = vmatmul.mubr.msk.bf16.vlgmr.msra.gmra.mxu0 %vm1028_vm2, %v2971_v42  ;;  %v2844_v62 = vpop.xlane.xlu0 %2843 }
 0x50c   : > { %11620 = vmatpush3.bf16.msra.mxu0 %v3482_v38  ;;  %12452 = vrcp.f32 %v2844_v62  ;;  %v2972_v33 = vpack.c.bf16 %v2940_v10, %v2940_v10  ;;  %11621 = vmatprep.mubr.msk.bf16.mxu0 %vm12742_vm1, %v16004_v29  ;;  %v2797_v5 = vmul.f32 1.442695, %v2736_v30 }
 0x50d   : > { %v12447_v58 = vpop.eup %12446  ;;  %11631 = vmatprep.subr.bf16.mxu0 %v16004_v29 }
 0x50e   : > { %11616 = vmatmul.mubr.msk.bf16.vlgmr.msra.gmra.mxu1 %vm1028_vm2, %v2972_v33  ;;  %v2941_v39 = vmul.f32 %v12447_v58, %v13808_v19  ;;  %v2799_v19 = vmul.f32 1.442695, %v2737_v46  ;;  %v16007_v33 = vld [vmem:[#allocation13_spill] sm:$0xff]  ;;  %v16008_v46 = vld [vmem:[#allocation12_spill] sm:$0xff] }
 0x50f   : > { %11626 = vmatpush3.bf16.msra.mxu1 %v3530_v54  ;;  %v2847_v7 = vpop.xlane.xlu1 %2846  ;;  %11627 = vmatprep.mubr.msk.bf16.mxu1 %vm12742_vm1, %v16004_v29  ;;  %v3866_v58 = vsel %vm3000_vm3, %v16007_v33, 0 }
 0x510   : > { %12454 = vrcp.f32 %v2847_v7  ;;  %v2973_v24 = vpack.c.bf16 %v2941_v39, %v2941_v39  ;;  %11637 = vmatprep.subr.bf16.mxu1 %v16004_v29  ;;  %v3818_v7 = vsel %vm3000_vm3, %v16008_v46, 0 }
 0x511   : > { %v12449_v1 = vpop.eup %12448  ;;  %12456 = vpow2.f32 %v2795_v34 }
 0x512   : > { %v2942_v14 = vmul.f32 %v12449_v1, %v13812_v41  ;;  %v3626_v41 = vsel %vm3000_vm3, %v13655_v56, 0  ;;  %12458 = vpow2.f32 %v2797_v5  ;;  %v3674_v56 = vsel %vm3000_vm3, %v13619_v25, 0 }
 0x513   : > { %11622 = vmatmul.mubr.msk.bf16.vlgmr.msra.gmra.mxu0 %vm1028_vm2, %v2973_v24  ;;  %12460 = vpow2.f32 %v2799_v19 }
 0x514   : > { %11632 = vmatpush3.bf16.msra.mxu0 %v3578_v27  ;;  %v2974_v2 = vpack.c.bf16 %v2942_v14, %v2942_v14  ;;  %11633 = vmatprep.mubr.msk.bf16.mxu0 %vm12742_vm1, %v16004_v29  ;;  %12462 = vpow2.f32 %v2801_v61  ;;  %v16009_v14 = vld [vmem:[#allocation15_spill] sm:$0xff] }
 0x515   : > { %v12451_v12 = vpop.eup %12450  ;;  %11643 = vmatprep.subr.bf16.mxu0 %v16004_v29  ;;  %v3962_v27 = vsel %vm3000_vm3, %v16009_v14, 0 }
 0x516   : > { %11628 = vmatmul.mubr.msk.bf16.vlgmr.msra.gmra.mxu1 %vm1028_vm2, %v2974_v2  ;;  %v2943_v11 = vmul.f32 %v12451_v12, %v13816_v36  ;;  %v16010_v12 = vld [vmem:[#allocation14_spill] sm:$0xff] }
 0x517   : > { %11638 = vmatpush3.bf16.msra.mxu1 %v3626_v41  ;;  %11639 = vmatprep.mubr.msk.bf16.mxu1 %vm12742_vm1, %v16004_v29  ;;  %v3914_v41 = vsel %vm3000_vm3, %v16010_v12, 0 }
 0x518   : > { %v2975_v43 = vpack.c.bf16 %v2943_v11, %v2943_v11  ;;  %11649 = vmatprep.subr.bf16.mxu1 %v16004_v29 }
 0x519   : > { %v12453_v28 = vpop.eup %12452 }
 0x51a   : > { %v2944_v4 = vmul.f32 %v12453_v28, %v13820_v31 }
 0x51b   : > { %11634 = vmatmul.mubr.msk.bf16.vlgmr.msra.gmra.mxu0 %vm1028_vm2, %v2975_v43  ;;  %v16011_v43 = vld [vmem:[#allocation17_spill] sm:$0xff] }
 0x51c   : > { %11644 = vmatpush3.bf16.msra.mxu0 %v3674_v56  ;;  %v2976_v36 = vpack.c.bf16 %v2944_v4, %v2944_v4  ;;  %11645 = vmatprep.mubr.msk.bf16.mxu0 %vm12742_vm1, %v16004_v29  ;;  %v4058_v28 = vsel %vm3000_vm3, %v16011_v43, 0 }
 0x51d   : > { %v12455_v13 = vpop.eup %12454  ;;  %11655 = vmatprep.subr.bf16.mxu0 %v16004_v29 }
 0x51e   : > { %11640 = vmatmul.mubr.msk.bf16.vlgmr.msra.gmra.mxu1 %vm1028_vm2, %v2976_v36  ;;  %v2945_v31 = vmul.f32 %v12455_v13, %v13824_v49  ;;  %v14007_v25 = vpop.eup %12456  ;;  %v16012_v36 = vld [vmem:[#allocation18_spill] sm:$0xff] }
 0x51f   : > { %11650 = vmatpush3.bf16.msra.mxu1 %v3722_v60  ;;  %11651 = vmatprep.mubr.msk.bf16.mxu1 %vm12742_vm1, %v16004_v29  ;;  %v14010_v51 = vpop.eup %12458  ;;  %v2887_v26 = vsel %vm1028_vm2, %v14007_v25, 0.0  ;;  %v4010_v13 = vsel %vm3000_vm3, %v16012_v36, 0 }
 0x520   : > { %v2977_v45 = vpack.c.bf16 %v2945_v31, %v2945_v31  ;;  %11661 = vmatprep.subr.bf16.mxu1 %v16004_v29  ;;  %v14017_v49 = vpop.eup %12460  ;;  %v2890_v16 = vsel %vm1028_vm2, %v14010_v51, 0.0 }
 0x521   : > { %v2893_v18 = vsel %vm1028_vm2, %v14017_v49, 0.0  ;;  %v14026_v52 = vpop.eup %12462 }
 0x522   : > { %v2896_v9 = vsel %vm1028_vm2, %v14026_v52, 0.0 }
 0x523   : > { %11646 = vmatmul.mubr.msk.bf16.vlgmr.msra.gmra.mxu0 %vm1028_vm2, %v2977_v45  ;;  %v16013_v45 = vld [vmem:[#allocation21_spill] sm:$0xff] }
 0x524   : > { %11656 = vmatpush3.bf16.msra.mxu0 %v3770_v57  ;;  %2888 = vadd.xlane.f32.xlu1 %v2887_v26  ;;  %v4154_v57 = vsel %vm3000_vm3, %v16013_v45, 0 }
 0x525   : > { %11657 = vmatprep.mubr.msk.bf16.mxu0 %vm12742_vm1, %v16004_v29  ;;  %11667 = vmatprep.subr.bf16.mxu0 %v16004_v29 }
 0x528   : > { %2891 = vadd.xlane.f32.xlu0 %v2890_v16  ;;  %2894 = vadd.xlane.f32.xlu1 %v2893_v18  ;;  %v16014_v18 = vld [vmem:[#allocation16_spill] sm:$0xff] }
 0x52c   : > { %2897 = vadd.xlane.f32.xlu0 %v2896_v9  ;;  %v4106_v9 = vsel %vm3000_vm3, %v16014_v18, 0 }
 0x539   : > { %4484 = vrot.lane.b32.xlu1 %v16005_v53, %s15959_s21 }
 0x542   : > { %4436 = vrot.lane.b32.xlu0 %v16006_v63, %s15959_s21 }
 0x544   : > { %v2853_v35 = vpop.xlane.xlu1 %2852 }
 0x545   : > { %12464 = vrcp.f32 %v2853_v35 }
 0x548   : > { %v2850_v50 = vpop.xlane.xlu0 %2849 }
 0x549   : > { %12466 = vrcp.f32 %v2850_v50  ;;  %v16015_v50 = vld [vmem:[#allocation19_spill] sm:$0xff] }
 0x54c   : > { %v2856_v21 = vpop.xlane.xlu0 %2855 }
 0x54d   : > { %v2859_v48 = vpop.xlane.xlu1 %2858  ;;  %12468 = vrcp.f32 %v2856_v21  ;;  %v4202_v21 = vsel %vm3000_vm3, %v16015_v50, 0 }
 0x54e   : > { %12470 = vrcp.f32 %v2859_v48 }
 0x550   : > { %v2862_v47 = vpop.xlane.xlu0 %2861 }
 0x551   : > { %12472 = vrcp.f32 %v2862_v47 }
 0x552   : > { %v12465_v42 = vpop.eup %12464 }
 0x553   : > { %v2947_v10 = vmul.f32 %v12465_v42, %v13842_v59 }
 0x554   : > { %v2865_v38 = vpop.xlane.xlu1 %2864 }
 0x555   : > { %12474 = vrcp.f32 %v2865_v38  ;;  %v2979_v3 = vpack.c.bf16 %v2947_v10, %v2947_v10  ;;  %v16016_v38 = vld [vmem:[#allocation20_spill] sm:$0xff] }
 0x556   : > { %v12467_v62 = vpop.eup %12466 }
 0x557   : > { %11658 = vmatmul.mubr.msk.bf16.vlgmr.msra.gmra.mxu0 %vm1028_vm2, %v2979_v3  ;;  %v2946_v54 = vmul.f32 %v12467_v62, %v13847_v44  ;;  %v4250_v3 = vsel %vm3000_vm3, %v16016_v38, 0 }
 0x558   : > { %11668 = vmatpush3.bf16.msra.mxu0 %v3866_v58  ;;  %11669 = vmatprep.mubr.msk.bf16.mxu0 %vm12742_vm1, %v16004_v29  ;;  %v2868_v30 = vpop.xlane.xlu0 %2867 }
 0x559   : > { %v2978_v39 = vpack.c.bf16 %v2946_v54, %v2946_v54  ;;  %11679 = vmatprep.subr.bf16.mxu0 %v16004_v29  ;;  %12476 = vrcp.f32 %v2868_v30  ;;  %v16017_v54 = vld [vmem:[#allocation22_spill] sm:$0xff] }
 0x55a   : > { %v12469_v59 = vpop.eup %12468 }
 0x55b   : > { %v12471_v34 = vpop.eup %12470  ;;  %11652 = vmatmul.mubr.msk.bf16.vlgmr.msra.gmra.mxu1 %vm1028_vm2, %v2978_v39  ;;  %v2948_v1 = vmul.f32 %v12469_v59, %v13852_v40 }
 0x55c   : > { %11662 = vmatpush3.bf16.msra.mxu1 %v3818_v7  ;;  %v2871_v24 = vpop.xlane.xlu1 %2870  ;;  %v2949_v44 = vmul.f32 %v12471_v34, %v13854_v15  ;;  %11663 = vmatprep.mubr.msk.bf16.mxu1 %vm12742_vm1, %v16004_v29 }
 0x55d   : > { %12478 = vrcp.f32 %v2871_v24  ;;  %11673 = vmatprep.subr.bf16.mxu1 %v16004_v29  ;;  %v2980_v32 = vpack.c.bf16 %v2948_v1, %v2948_v1 }
 0x55e   : > { %v2981_v5 = vpack.c.bf16 %v2949_v44, %v2949_v44  ;;  %v12473_v19 = vpop.eup %12472 }
 0x55f   : > { %v2950_v61 = vmul.f32 %v12473_v19, %v13862_v23 }
 0x560   : > { %11670 = vmatmul.mubr.msk.bf16.vlgmr.msra.gmra.mxu0 %vm1028_vm2, %v2981_v5  ;;  %v2874_v2 = vpop.xlane.xlu0 %2873 }
 0x561   : > { %11680 = vmatpush3.bf16.msra.mxu0 %v3962_v27  ;;  %11681 = vmatprep.mubr.msk.bf16.mxu0 %vm12742_vm1, %v16004_v29  ;;  %12480 = vrcp.f32 %v2874_v2  ;;  %v2982_v56 = vpack.c.bf16 %v2950_v61, %v2950_v61 }
 0x562   : > { %v12475_v15 = vpop.eup %12474  ;;  %11691 = vmatprep.subr.bf16.mxu0 %v16004_v29 }
 0x563   : > { %11664 = vmatmul.mubr.msk.bf16.vlgmr.msra.gmra.mxu1 %vm1028_vm2, %v2980_v32  ;;  %v2951_v40 = vmul.f32 %v12475_v15, %v13870_v55 }
 0x564   : > { %11674 = vmatpush3.bf16.msra.mxu1 %v3914_v41  ;;  %11675 = vmatprep.mubr.msk.bf16.mxu1 %vm12742_vm1, %v16004_v29 }
 0x565   : > { %v2983_v11 = vpack.c.bf16 %v2951_v40, %v2951_v40  ;;  %11685 = vmatprep.subr.bf16.mxu1 %v16004_v29 }
 0x566   : > { %v12477_v4 = vpop.eup %12476 }
 0x567   : > { %v2952_v31 = vmul.f32 %v12477_v4, %v13883_v20 }
 0x568   : > { %11682 = vmatmul.mubr.msk.bf16.vlgmr.msra.gmra.mxu0 %vm1028_vm2, %v2983_v11 }
 0x569   : > { %11692 = vmatpush3.bf16.msra.mxu0 %v4058_v28  ;;  %11693 = vmatprep.mubr.msk.bf16.mxu0 %vm12742_vm1, %v16004_v29 }
 0x56a   : > { %v12479_v55 = vpop.eup %12478  ;;  %11703 = vmatprep.subr.bf16.mxu0 %v16004_v29 }
 0x56b   : > { %v2953_v60 = vmul.f32 %v12479_v55, %v13892_v8  ;;  %11676 = vmatmul.mubr.msk.bf16.vlgmr.msra.gmra.mxu1 %vm1028_vm2, %v2982_v56  ;;  %v2984_v8 = vpack.c.bf16 %v2952_v31, %v2952_v31 }
 0x56c   : > { %11686 = vmatpush3.bf16.msra.mxu1 %v4010_v13  ;;  %11687 = vmatprep.mubr.msk.bf16.mxu1 %vm12742_vm1, %v16004_v29 }
 0x56d   : > { %v2985_v23 = vpack.c.bf16 %v2953_v60, %v2953_v60  ;;  %11697 = vmatprep.subr.bf16.mxu1 %v16004_v29 }
 0x56e   : > { %v12481_v16 = vpop.eup %12480 }
 0x56f   : > { %v2954_v53 = vmul.f32 %v12481_v16, %v13906_v37 }
 0x570   : > { %11694 = vmatmul.mubr.msk.bf16.vlgmr.msra.gmra.mxu0 %vm1028_vm2, %v2985_v23  ;;  %v2877_v26 = vpop.xlane.xlu1 %2876 }
 0x571   : > { %11704 = vmatpush3.bf16.msra.mxu0 %v4154_v57  ;;  %12482 = vrcp.f32 %v2877_v26  ;;  %11705 = vmatprep.mubr.msk.bf16.mxu0 %vm12742_vm1, %v16004_v29  ;;  %v2986_v35 = vpack.c.bf16 %v2954_v53, %v2954_v53 }
 0x572   : > { %11715 = vmatprep.subr.bf16.mxu0 %v16004_v29 }
 0x573   : > { %11688 = vmatmul.mubr.msk.bf16.vlgmr.msra.gmra.mxu1 %vm1028_vm2, %v2984_v8 }
 0x574   : > { %11698 = vmatpush3.bf16.msra.mxu1 %v4106_v9  ;;  %v2880_v20 = vpop.xlane.xlu0 %2879  ;;  %11699 = vmatprep.mubr.msk.bf16.mxu1 %vm12742_vm1, %v16004_v29 }
 0x575   : > { %12484 = vrcp.f32 %v2880_v20  ;;  %11709 = vmatprep.subr.bf16.mxu1 %v16004_v29 }
 0x578   : > { %v2883_v63 = vpop.xlane.xlu1 %2882 }
 0x579   : > { %12486 = vrcp.f32 %v2883_v63 }
 0x57b   : > { %11700 = vmatmul.mubr.msk.bf16.vlgmr.msra.gmra.mxu1 %vm1028_vm2, %v2986_v35 }
 0x57c   : > { %11710 = vmatpush3.bf16.msra.mxu1 %v4202_v21  ;;  %v2886_v48 = vpop.xlane.xlu0 %2885  ;;  %11711 = vmatprep.mubr.msk.bf16.mxu1 %vm12742_vm1, %v16004_v29 }
 0x57d   : > { %12488 = vrcp.f32 %v2886_v48  ;;  %11721 = vmatprep.subr.bf16.mxu1 %v16004_v29 }
 0x57e   : > { %v12483_v37 = vpop.eup %12482 }
 0x57f   : > { %v2955_v47 = vmul.f32 %v12483_v37, %v13934_v6  ;;  %v4298_v6 = vsel %vm3000_vm3, %v16017_v54, 0  ;;  %v4565_v54 = vld [vmem:[%s15931_s6 + $0x4] sm:$0xf] }
 0x580   : > { %v4341_v39 = vpop.permute.xlu0 %4340 }
 0x581   : > { %v2987_v42 = vpack.c.bf16 %v2955_v47, %v2955_v47  ;;  %v4346_v24 = vsel %vm3000_vm3, %v4341_v39, 0 }
 0x582   : > { %v12485_v10 = vpop.eup %12484 }
 0x583   : > { %v2956_v62 = vmul.f32 %v12485_v10, %v13938_v17  ;;  %11706 = vmatmul.mubr.msk.bf16.vlgmr.msra.gmra.mxu0 %vm1028_vm2, %v2987_v42  ;;  %v4564_v42 = vld [vmem:[%s15931_s6] sm:$0xf] }
 0x584   : > { %11716 = vmatpush3.bf16.msra.mxu0 %v4250_v3  ;;  %11717 = vmatprep.mubr.msk.bf16.mxu0 %vm12742_vm1, %v16004_v29 }
 0x585   : > { %v2988_v33 = vpack.c.bf16 %v2956_v62, %v2956_v62  ;;  %11727 = vmatprep.subr.bf16.mxu0 %v16004_v29 }
 0x586   : > { %v12487_v58 = vpop.eup %12486 }
 0x587   : > { %v2957_v30 = vmul.f32 %v12487_v58, %v13943_v22  ;;  %11712 = vmatmul.mubr.msk.bf16.vlgmr.msra.gmra.mxu1 %vm1028_vm2, %v2988_v33  ;;  %v4389_v22 = vpop.permute.xlu1 %4388 }
 0x588   : > { %v14109_v59 = vpop.f32.mrf.mxu0  ;;  %11722 = vmatpush3.bf16.msra.mxu1 %v4298_v6  ;;  %11723 = vmatprep.mubr.msk.bf16.mxu1 %vm12742_vm1, %v16004_v29  ;;  %v4394_v19 = vsel %vm3000_vm3, %v4389_v22, 0 }
 0x589   : > { %v2989_v17 = vpack.c.bf16 %v2957_v30, %v2957_v30  ;;  %11733 = vmatprep.subr.bf16.mxu1 %v16004_v29 }
 0x58a   : > { %v12489_v34 = vpop.eup %12488  ;;  %v11563_v46 = vpop.f32.mrf.mxu0 }
 0x58b   : > { %v2958_v7 = vmul.f32 %v12489_v34, %v13952_v0  ;;  %v14116_v44 = vpop.f32.mrf.mxu1  ;;  %11718 = vmatmul.mubr.msk.bf16.vlgmr.msra.gmra.mxu0 %vm1028_vm2, %v2989_v17  ;;  %v4566_v17 = vld [vmem:[%s15931_s6 + $0x8] sm:$0xf] }
 0x58c   : > { %v3041_v1 = vpop.f32.mrf.mxu0  ;;  %11728 = vmatpush3.bf16.msra.mxu0 %v4346_v24  ;;  %11729 = vmatprep.mubr.msk.bf16.mxu0 %vm12742_vm1, %v16004_v29  ;;  %v10968_v30 = vpack.c.bf16 %v14116_v44, %v14109_v59 }
 0x58d   : > { %v2990_v5 = vpack.c.bf16 %v2958_v7, %v2958_v7  ;;  %v11569_v14 = vpop.f32.mrf.mxu1  ;;  %11739 = vmatprep.subr.bf16.mxu0 %v16004_v29  ;;  %v4701_v7 = vsel %vm3000_vm3, %v4565_v54, 0 }
 0x58e   : > { %v11564_v27 = vpop.f32.mrf.mxu0  ;;  %v4801_v14 = vsel %vm3000_vm3, %v4566_v17, 0 }
 0x58f   : > { %v3089_v0 = vpop.f32.mrf.mxu1  ;;  %11724 = vmatmul.mubr.msk.bf16.vlgmr.msra.gmra.mxu1 %vm1028_vm2, %v2990_v5 }
 0x590   : > { %v14124_v32 = vpop.f32.mrf.mxu0  ;;  %11734 = vmatpush3.bf16.msra.mxu1 %v4394_v19  ;;  %11735 = vmatprep.mubr.msk.bf16.mxu1 %vm12742_vm1, %v16004_v29 }
 0x591   : > { %v11570_v15 = vpop.f32.mrf.mxu1  ;;  %11745 = vmatprep.subr.bf16.mxu1 %v16004_v29 }
 0x592   : > { %v11575_v2 = vpop.f32.mrf.mxu0 }
 0x593   : > { %v14129_v12 = vpop.f32.mrf.mxu1 }
 0x594   : > { %v3137_v41 = vpop.f32.mrf.mxu0  ;;  %v10969_v24 = vpack.c.bf16 %v14129_v12, %v14124_v32 }
 0x595   : > { %v11581_v40 = vpop.f32.mrf.mxu1 }
 0x596   : > { %v11576_v11 = vpop.f32.mrf.mxu0 }
 0x597   : > { %v3185_v61 = vpop.f32.mrf.mxu1 }
 0x598   : > { %v14131_v43 = vpop.f32.mrf.mxu0 }
 0x599   : > { %v11582_v28 = vpop.f32.mrf.mxu1 }
 0x59a   : > { %v11587_v4 = vpop.f32.mrf.mxu0 }
 0x59b   : > { %v14133_v56 = vpop.f32.mrf.mxu1 }
 0x59c   : > { %v3233_v55 = vpop.f32.mrf.mxu0  ;;  %v10970_v22 = vpack.c.bf16 %v14133_v56, %v14131_v43 }
 0x59d   : > { %v11593_v36 = vpop.f32.mrf.mxu1 }
 0x59e   : > { %v11588_v13 = vpop.f32.mrf.mxu0 }
 0x59f   : > { %v3281_v60 = vpop.f32.mrf.mxu1 }
 0x5a0   : > { %v14135_v23 = vpop.f32.mrf.mxu0 }
 0x5a1   : > { %v11594_v31 = vpop.f32.mrf.mxu1 }
 0x5a2   : > { %v11599_v45 = vpop.f32.mrf.mxu0 }
 0x5a4   : > { %v3329_v57 = vpop.f32.mrf.mxu0 }
 0x5a6   : > { %v11600_v26 = vpop.f32.mrf.mxu0 }
 0x5ad   : > { %v2889_v8 = vpop.xlane.xlu1 %2888 }
 0x5ae   : > { %12490 = vrcp.f32 %v2889_v8 }
 0x5af   : > { %v14137_v16 = vpop.f32.mrf.mxu1 }
 0x5b0   : > { %v10971_v12 = vpack.c.bf16 %v14137_v16, %v14135_v23 }
 0x5b1   : > { %v11605_v18 = vpop.f32.mrf.mxu1  ;;  %v2895_v9 = vpop.xlane.xlu1 %2894 }
 0x5b2   : > { %12492 = vrcp.f32 %v2895_v9  ;;  %v2892_v20 = vpop.xlane.xlu0 %2891 }
 0x5b3   : > { %12494 = vrcp.f32 %v2892_v20  ;;  %v3377_v53 = vpop.f32.mrf.mxu1 }
 0x5b5   : > { %v11606_v63 = vpop.f32.mrf.mxu1  ;;  %v4485_v62 = vpop.permute.xlu1 %4484 }
 0x5b6   : > { %v2898_v35 = vpop.xlane.xlu0 %2897  ;;  %v4490_v6 = vsel %vm3000_vm3, %v4485_v62, 0 }
 0x5b7   : > { %12496 = vrcp.f32 %v2898_v35 }
 0x5ba   : > { %v4437_v48 = vpop.permute.xlu0 %4436 }
 0x5bb   : > { %v12491_v50 = vpop.eup %12490  ;;  %v4442_v38 = vsel %vm3000_vm3, %v4437_v48, 0 }
 0x5bc   : > { %v2959_v21 = vmul.f32 %v12491_v50, %v14007_v25 }
 0x5be   : > { %v2991_v37 = vpack.c.bf16 %v2959_v21, %v2959_v21 }
 0x5bf   : > { %v12493_v47 = vpop.eup %12492 }
 0x5c0   : > { %v12495_v10 = vpop.eup %12494  ;;  %11730 = vmatmul.mubr.msk.bf16.vlgmr.msra.gmra.mxu0 %vm1028_vm2, %v2991_v37  ;;  %v2961_v25 = vmul.f32 %v12493_v47, %v14017_v49  ;;  %v4601_v49 = vsel %vm3000_vm3, %v4564_v42, 0 }
 0x5c1   : > { %v2960_v3 = vmul.f32 %v12495_v10, %v14010_v51  ;;  %11740 = vmatpush3.bf16.msra.mxu0 %v4442_v38  ;;  %11741 = vmatprep.mubr.msk.bf16.mxu0 %vm12742_vm1, %v16004_v29 }
 0x5c2   : > { %12311 = vmatprep.subr.msk.bf16.mxu0 %vm3000_vm3, %v4564_v42  ;;  %v2993_v51 = vpack.c.bf16 %v2961_v25, %v2961_v25 }
 0x5c3   : > { %v2992_v33 = vpack.c.bf16 %v2960_v3, %v2960_v3 }
 0x5c4   : > { %v12497_v58 = vpop.eup %12496 }
 0x5c5   : > { %11736 = vmatmul.mubr.msk.bf16.vlgmr.msra.gmra.mxu1 %vm1028_vm2, %v2992_v33  ;;  %v2962_v39 = vmul.f32 %v12497_v58, %v14026_v52  ;;  %v4567_v52 = vld [vmem:[%s15931_s6 + $0xc] sm:$0xf] }
 0x5c6   : > { %11746 = vmatpush3.bf16.msra.mxu1 %v4490_v6  ;;  %11747 = vmatprep.mubr.msk.bf16.mxu1 %vm12742_vm1, %v16004_v29  ;;  %v4901_v61 = vsel %vm3000_vm3, %v4567_v52, 0 }
 0x5c7   : > { %12312 = vmatprep.subr.msk.bf16.mxu1 %vm3000_vm3, %v4565_v54  ;;  %v2994_v34 = vpack.c.bf16 %v2962_v39, %v2962_v39 }
 0x5c8   : > { %11742 = vmatmul.mubr.msk.bf16.vlgmr.msra.gmra.mxu0 %vm1028_vm2, %v2993_v51 }
 0x5c9   : > { %11753 = vmatprep.mubr.msk.bf16.mxu0 %vm1028_vm2, %v10968_v30  ;;  %11752 = vmatpush3.bf16.msra.mxu0 %v4601_v49 }
 0x5ca   : > { %12313 = vmatprep.subr.msk.bf16.mxu0 %vm3000_vm3, %v4566_v17 }
 0x5cb   : > { %v3422_v46 = vpop.f32.mrf.mxu0 }
 0x5cd   : > { %v11611_v59 = vpop.f32.mrf.mxu0  ;;  %11748 = vmatmul.mubr.msk.bf16.vlgmr.msra.gmra.mxu1 %vm1028_vm2, %v2994_v34 }
 0x5ce   : > { %v3470_v44 = vpop.f32.mrf.mxu1  ;;  %11762 = vmatpush3.bf16.msra.mxu1 %v4701_v7 }
 0x5cf   : > { %v3425_v1 = vpop.f32.mrf.mxu0  ;;  %v10972_v5 = vpack.c.bf16 %v3470_v44, %v3422_v46  ;;  %12314 = vmatprep.subr.msk.bf16.mxu1 %vm3000_vm3, %v4567_v52 }
 0x5d0   : > { %v11617_v27 = vpop.f32.mrf.mxu1  ;;  %11754 = vmatmul.mubr.msk.bf16.vlgmr.msra.gmra.mxu0 %vm1028_vm2, %v10969_v24 }
 0x5d1   : > { %v11612_v19 = vpop.f32.mrf.mxu0  ;;  %11757 = vmatprep.mubr.msk.bf16.mxu0 %vm1028_vm2, %v10970_v22  ;;  %11763 = vmatprep.mubr.msk.bf16.mxu1 %vm1028_vm2, %v10972_v5 }
 0x5d2   : > { %v3473_v0 = vpop.f32.mrf.mxu1  ;;  %11772 = vmatpush3.bf16.msra.mxu0 %v4801_v14 }
 0x5d3   : > { %v3518_v32 = vpop.f32.mrf.mxu0 }
 0x5d4   : > { %v11618_v15 = vpop.f32.mrf.mxu1 }
 0x5d5   : > { %v11623_v2 = vpop.f32.mrf.mxu0 }
 0x5d6   : > { %v3566_v41 = vpop.f32.mrf.mxu1 }
 0x5d7   : > { %v3521_v40 = vpop.f32.mrf.mxu0  ;;  %v10973_v11 = vpack.c.bf16 %v3566_v41, %v3518_v32 }
 0x5d8   : > { %v11629_v43 = vpop.f32.mrf.mxu1  ;;  %11758 = vmatmul.mubr.msk.bf16.gmra.mxu0 %vm1028_vm2, %v10971_v12 }
 0x5d9   : > { %v11624_v28 = vpop.f32.mrf.mxu0  ;;  %11764 = vmatmul.mubr.msk.bf16.vlgmr.msra.gmra.mxu1 %vm1028_vm2, %v10973_v11 }
 0x5da   : > { %v3569_v4 = vpop.f32.mrf.mxu1  ;;  %11782 = vmatpush3.bf16.msra.mxu1 %v4901_v61 }
 0x5db   : > { %v3614_v56 = vpop.f32.mrf.mxu0 }
 0x5dc   : > { %v11630_v55 = vpop.f32.mrf.mxu1 }
 0x5dd   : > { %v11635_v36 = vpop.f32.mrf.mxu0 }
 0x5de   : > { %v3662_v13 = vpop.f32.mrf.mxu1 }
 0x5df   : > { %v3617_v60 = vpop.f32.mrf.mxu0  ;;  %v10974_v31 = vpack.c.bf16 %v3662_v13, %v3614_v56 }
 0x5e0   : > { %v11641_v23 = vpop.f32.mrf.mxu1 }
 0x5e1   : > { %v11636_v45 = vpop.f32.mrf.mxu0  ;;  %11767 = vmatprep.mubr.msk.bf16.mxu1 %vm1028_vm2, %v10974_v31 }
 0x5e2   : > { %v3665_v57 = vpop.f32.mrf.mxu1 }
 0x5e3   : > { %v3710_v26 = vpop.f32.mrf.mxu0 }
 0x5e4   : > { %v11642_v8 = vpop.f32.mrf.mxu1 }
 0x5e5   : > { %v11647_v16 = vpop.f32.mrf.mxu0 }
 0x5e7   : > { %v3713_v18 = vpop.f32.mrf.mxu0 }
 0x5e9   : > { %v11648_v9 = vpop.f32.mrf.mxu0 }
 0x617   : > { %v3806_v20 = vpop.f32.mrf.mxu0 }
 0x619   : > { %v11659_v53 = vpop.f32.mrf.mxu0 }
 0x61b   : > { %v3758_v63 = vpop.f32.mrf.mxu1  ;;  %v3809_v35 = vpop.f32.mrf.mxu0 }
 0x61c   : > { %v10975_v50 = vpack.c.bf16 %v3758_v63, %v3710_v26 }
 0x61d   : > { %v11653_v21 = vpop.f32.mrf.mxu1  ;;  %v11660_v48 = vpop.f32.mrf.mxu0 }
 0x61e   : > { %11768 = vmatmul.mubr.msk.bf16.gmra.mxu1 %vm1028_vm2, %v10975_v50 }
 0x61f   : > { %v3761_v37 = vpop.f32.mrf.mxu1 }
 0x620   : > { %v3902_v47 = vpop.f32.mrf.mxu0 }
 0x621   : > { %v11654_v42 = vpop.f32.mrf.mxu1 }
 0x622   : > { %v11671_v10 = vpop.f32.mrf.mxu0 }
 0x623   : > { %v3854_v38 = vpop.f32.mrf.mxu1 }
 0x624   : > { %v10976_v3 = vpack.c.bf16 %v3854_v38, %v3806_v20  ;;  %v3905_v25 = vpop.f32.mrf.mxu0 }
 0x625   : > { %v11665_v62 = vpop.f32.mrf.mxu1 }
 0x626   : > { %v11672_v33 = vpop.f32.mrf.mxu0  ;;  %11773 = vmatprep.mubr.msk.bf16.mxu0 %vm1028_vm2, %v10976_v3 }
 0x627   : > { %v3857_v58 = vpop.f32.mrf.mxu1 }
 0x628   : > { %v3998_v54 = vpop.f32.mrf.mxu0 }
 0x629   : > { %v11666_v6 = vpop.f32.mrf.mxu1 }
 0x62a   : > { %v11683_v51 = vpop.f32.mrf.mxu0 }
 0x62b   : > { %v3950_v49 = vpop.f32.mrf.mxu1 }
 0x62c   : > { %v10977_v30 = vpack.c.bf16 %v3950_v49, %v3902_v47  ;;  %v4001_v39 = vpop.f32.mrf.mxu0 }
 0x62d   : > { %v11677_v17 = vpop.f32.mrf.mxu1 }
 0x62e   : > { %v11684_v34 = vpop.f32.mrf.mxu0  ;;  %11774 = vmatmul.mubr.msk.bf16.vlgmr.msra.gmra.mxu0 %vm1028_vm2, %v10977_v30 }
 0x62f   : > { %v3953_v46 = vpop.f32.mrf.mxu1 }
 0x630   : > { %v4094_v7 = vpop.f32.mrf.mxu0 }
 0x631   : > { %v11678_v59 = vpop.f32.mrf.mxu1 }
 0x632   : > { %v11695_v52 = vpop.f32.mrf.mxu0 }
 0x633   : > { %v4046_v24 = vpop.f32.mrf.mxu1 }
 0x634   : > { %v10978_v44 = vpack.c.bf16 %v4046_v24, %v3998_v54  ;;  %v4097_v22 = vpop.f32.mrf.mxu0 }
 0x635   : > { %v11689_v1 = vpop.f32.mrf.mxu1 }
 0x636   : > { %v11696_v5 = vpop.f32.mrf.mxu0  ;;  %11777 = vmatprep.mubr.msk.bf16.mxu0 %vm1028_vm2, %v10978_v44 }
 0x637   : > { %v4049_v14 = vpop.f32.mrf.mxu1 }
 0x639   : > { %v11690_v27 = vpop.f32.mrf.mxu1 }
 0x63b   : > { %v4142_v19 = vpop.f32.mrf.mxu1 }
 0x63c   : > { %v10979_v0 = vpack.c.bf16 %v4142_v19, %v4094_v7 }
 0x63d   : > { %v11701_v32 = vpop.f32.mrf.mxu1 }
 0x63e   : > { %11778 = vmatmul.mubr.msk.bf16.gmra.mxu0 %vm1028_vm2, %v10979_v0 }
 0x63f   : > { %v4145_v15 = vpop.f32.mrf.mxu1 }
 0x641   : > { %v11702_v2 = vpop.f32.mrf.mxu1 }
 0x643   : > { %v4190_v12 = vpop.f32.mrf.mxu0 }
 0x645   : > { %v11707_v41 = vpop.f32.mrf.mxu0 }
 0x647   : > { %v4193_v40 = vpop.f32.mrf.mxu0  ;;  %v4238_v11 = vpop.f32.mrf.mxu1 }
 0x648   : > { %v10980_v61 = vpack.c.bf16 %v4238_v11, %v4190_v12  ;;  %v10743_v12 = vld [vmem:[%s15932_s7] ss:$0 sm:$0xff] }
 0x649   : > { %v11708_v43 = vpop.f32.mrf.mxu0  ;;  %v11713_v28 = vpop.f32.mrf.mxu1 }
 0x64a   : > { %11783 = vmatprep.mubr.msk.bf16.mxu1 %vm1028_vm2, %v10980_v61 }
 0x64b   : > { %v4241_v4 = vpop.f32.mrf.mxu1  ;;  %v4286_v56 = vpop.f32.mrf.mxu0 }
 0x64d   : > { %v11714_v55 = vpop.f32.mrf.mxu1  ;;  %v11719_v36 = vpop.f32.mrf.mxu0 }
 0x64f   : > { %v4289_v13 = vpop.f32.mrf.mxu0  ;;  %v4334_v60 = vpop.f32.mrf.mxu1 }
 0x650   : > { %v10981_v31 = vpack.c.bf16 %v4334_v60, %v4286_v56  ;;  %v16018_v60 = vld [vmem:[#allocation2_spill] sm:$0xff] }
 0x651   : > { %v11720_v23 = vpop.f32.mrf.mxu0  ;;  %v11725_v45 = vpop.f32.mrf.mxu1 }
 0x652   : > { %11784 = vmatmul.mubr.msk.bf16.vlgmr.msra.gmra.mxu1 %vm1028_vm2, %v10981_v31 }
 0x653   : > { %v4337_v57 = vpop.f32.mrf.mxu1 }
 0x655   : > { %v11726_v26 = vpop.f32.mrf.mxu1 }
 0x656   : > { %v16019_v26 = vld [vmem:[#allocation4_spill] sm:$0xff] }
 0x680   : > { %v4382_v8 = vpop.f32.mrf.mxu0 }
 0x682   : > { %v11731_v16 = vpop.f32.mrf.mxu0 }
 0x683   : > { %v16020_v16 = vld [vmem:[#allocation3_spill] sm:$0xff] }
 0x684   : > { %v4385_v18 = vpop.f32.mrf.mxu0 }
 0x685   : > { %v4430_v9 = vpop.f32.mrf.mxu1 }
 0x686   : > { %v10982_v20 = vpack.c.bf16 %v4430_v9, %v4382_v8  ;;  %v11732_v53 = vpop.f32.mrf.mxu0 }
 0x687   : > { %v11737_v63 = vpop.f32.mrf.mxu1  ;;  %v16021_v53 = vld [vmem:[#allocation5_spill] sm:$0xff] }
 0x688   : > { %11787 = vmatprep.mubr.msk.bf16.mxu1 %vm1028_vm2, %v10982_v20  ;;  %v4478_v35 = vpop.f32.mrf.mxu0 }
 0x689   : > { %v4433_v50 = vpop.f32.mrf.mxu1 }
 0x68a   : > { %v11743_v21 = vpop.f32.mrf.mxu0 }
 0x68b   : > { %v11738_v48 = vpop.f32.mrf.mxu1 }
 0x68c   : > { %v4481_v37 = vpop.f32.mrf.mxu0 }
 0x68d   : > { %v4526_v47 = vpop.f32.mrf.mxu1 }
 0x68e   : > { %v10983_v42 = vpack.c.bf16 %v4526_v47, %v4478_v35  ;;  %v11744_v10 = vpop.f32.mrf.mxu0 }
 0x68f   : > { %v11749_v38 = vpop.f32.mrf.mxu1 }
 0x690   : > { %11788 = vmatmul.mubr.msk.bf16.gmra.mxu1 %vm1028_vm2, %v10983_v42  ;;  %v11755_v62 = vpop.f32.mrf.mxu0 }
 0x691   : > { %v4529_v3 = vpop.f32.mrf.mxu1 }
 0x692   : > { %v4637_v33 = vpop.f32.mrf.mxu0 }
 0x693   : > { %v11750_v25 = vpop.f32.mrf.mxu1 }
 0x694   : > { %v11756_v58 = vpop.f32.mrf.mxu0 }
 0x696   : > { %v4640_v54 = vpop.f32.mrf.mxu0 }
 0x698   : > { %v11759_v51 = vpop.f32.mrf.mxu0 }
 0x699   : > { %v11765_v6 = vpop.f32.mrf.mxu1 }
 0x69a   : > { %v4653_v30 = vpop.f32.mrf.mxu0  ;;  %v4970_v22 = vadd.f32 %v11765_v6, %v11755_v62 }
 0x69b   : > { %v4737_v49 = vpop.f32.mrf.mxu1 }
 0x69c   : > { %v11760_v17 = vpop.f32.mrf.mxu0  ;;  %v4968_v14 = vadd.f32 %v4737_v49, %v4637_v33 }
 0x69d   : > { %v11766_v39 = vpop.f32.mrf.mxu1 }
 0x69e   : > { %v4656_v7 = vpop.f32.mrf.mxu0  ;;  %v4971_v0 = vadd.f32 %v11766_v39, %v11756_v58 }
 0x69f   : > { %v4740_v34 = vpop.f32.mrf.mxu1 }
 0x6a0   : > { %v4969_v40 = vadd.f32 %v4740_v34, %v4640_v54 }
 0x6de   : > { %v11769_v46 = vpop.f32.mrf.mxu1 }
 0x6df   : > { %v4974_v48 = vadd.f32 %v11769_v46, %v11759_v51  ;;  %v16022_v51 = vld [vmem:[#allocation6_spill] sm:$0xff] }
 0x6e0   : > { %v4753_v59 = vpop.f32.mrf.mxu1 }
 0x6e1   : > { %v4972_v47 = vadd.f32 %v4753_v59, %v4653_v30 }
 0x6e2   : > { %v11770_v24 = vpop.f32.mrf.mxu1 }
 0x6e3   : > { %v4975_v38 = vadd.f32 %v11770_v24, %v11760_v17  ;;  %v16023_v24 = vld [vmem:[#allocation8_spill] sm:$0xff] }
 0x6e4   : > { %v4756_v1 = vpop.f32.mrf.mxu1 }
 0x6e5   : > { %v4973_v58 = vadd.f32 %v4756_v1, %v4656_v7 }
 0x6ee   : > { %v11775_v52 = vpop.f32.mrf.mxu0 }
 0x6ef   : > { %v4978_v27 = vadd.f32 %v11775_v52, %v4970_v22 }
 0x6f0   : > { %v4837_v44 = vpop.f32.mrf.mxu0 }
 0x6f1   : > { %v4976_v32 = vadd.f32 %v4968_v14, %v4837_v44 }
 0x6f2   : > { %v11776_v5 = vpop.f32.mrf.mxu0 }
 0x6f3   : > { %v4979_v11 = vadd.f32 %v11776_v5, %v4971_v0  ;;  %v16025_v0 = vld [vmem:[#allocation9_spill] sm:$0xff] }
 0x6f4   : > { %v4840_v2 = vpop.f32.mrf.mxu0 }
 0x6f5   : > { %v4977_v28 = vadd.f32 %v4969_v40, %v4840_v2 }
 0x6fe   : > { %v11779_v50 = vpop.f32.mrf.mxu0 }
 0x6ff   : > { %v4982_v42 = vadd.f32 %v11779_v50, %v4974_v48 }
 0x700   : > { %v4853_v21 = vpop.f32.mrf.mxu0 }
 0x701   : > { %v4980_v3 = vadd.f32 %v4972_v47, %v4853_v21 }
 0x702   : > { %v11780_v37 = vpop.f32.mrf.mxu0 }
 0x703   : > { %v4983_v54 = vadd.f32 %v11780_v37, %v4975_v38 }
 0x704   : > { %v4856_v62 = vpop.f32.mrf.mxu0 }
 0x705   : > { %v4981_v39 = vadd.f32 %v4973_v58, %v4856_v62 }
 0x712   : > { %v11785_v19 = vpop.f32.mrf.mxu1 }
 0x713   : > { %v4986_v15 = vadd.f32 %v11785_v19, %v4978_v27  ;;  %v16024_v27 = vld [vmem:[#allocation7_spill] sm:$0xff] }
 0x714   : > { %v4937_v41 = vpop.f32.mrf.mxu1 }
 0x715   : > { %v4984_v61 = vadd.f32 %v4976_v32, %v4937_v41  ;;  %v5001_v4 = vadd.f32 %v10743_v12, %v4986_v15 }
 0x716   : > { %v11786_v43 = vpop.f32.mrf.mxu1 }
 0x717   : > { %v4999_v56 = vadd.f32 %v10743_v12, %v4984_v61  ;;  %v4987_v55 = vadd.f32 %v11786_v43, %v4979_v11  ;;  %v5009_v8 = vadd.f32 %v5001_v4, %v16019_v26 }
 0x718   : > { %v4940_v36 = vpop.f32.mrf.mxu1 }
 0x719   : > { %v4985_v13 = vadd.f32 %v4977_v28, %v4940_v36  ;;  %v5007_v31 = vadd.f32 %v4999_v56, %v16018_v60  ;;  %v5002_v23 = vadd.f32 %v10743_v12, %v4987_v55  ;;  %v5023_v9 = vsel %vm660_vm0, %v5009_v8, 0.0 }
 0x71b   : > { %v5000_v45 = vadd.f32 %v10743_v12, %v4985_v13  ;;  %v5017_v57 = vsel %vm660_vm0, %v5007_v31, 0.0  ;;  %v5010_v63 = vadd.f32 %v5002_v23, %v16021_v53 }
 0x71c   : > { %5018 = vadd.xlane.f32.xlu0 %v5017_v57 }
 0x71d   : > { %v5008_v18 = vadd.f32 %v5000_v45, %v16020_v16  ;;  %v5026_v35 = vsel %vm660_vm0, %v5010_v63, 0.0  ;;  %v12336_v16 = vld [vmem:[%s15935_s10 + $0x8] sm:$0xff]  }
 0x71e   : > { %11791 = vmatprep.subr.bf16.mxu0 %v12336_v16 }
 0x71f   : > { %v5020_v20 = vsel %vm660_vm0, %v5008_v18, 0.0  ;;  %11792 = vmatpush3.bf16.msra.mxu0 %v12336_v16 }
 0x720   : > { %5024 = vadd.xlane.f32.xlu0 %v5023_v9  ;;  %5021 = vadd.xlane.f32.xlu1 %v5020_v20 }
 0x724   : > { %5027 = vadd.xlane.f32.xlu0 %v5026_v35 }
 0x750   : > { %v11789_v10 = vpop.f32.mrf.mxu1 }
 0x751   : > { %v4990_v25 = vadd.f32 %v11789_v10, %v4982_v42 }
 0x752   : > { %v4953_v33 = vpop.f32.mrf.mxu1 }
 0x753   : > { %v4988_v6 = vadd.f32 %v4980_v3, %v4953_v33  ;;  %v5005_v34 = vadd.f32 %v10743_v12, %v4990_v25 }
 0x754   : > { %v11790_v49 = vpop.f32.mrf.mxu1 }
 0x755   : > { %v5003_v52 = vadd.f32 %v10743_v12, %v4988_v6  ;;  %v4991_v44 = vadd.f32 %v11790_v49, %v4983_v54  ;;  %v5013_v14 = vadd.f32 %v5005_v34, %v16023_v24 }
 0x756   : > { %v4956_v22 = vpop.f32.mrf.mxu1 }
 0x757   : > { %v4989_v5 = vadd.f32 %v4981_v39, %v4956_v22  ;;  %v5011_v46 = vadd.f32 %v5003_v52, %v16022_v51  ;;  %v5006_v30 = vadd.f32 %v10743_v12, %v4991_v44  ;;  %v5035_v1 = vsel %vm660_vm0, %v5013_v14, 0.0 }
 0x759   : > { %v5004_v59 = vadd.f32 %v10743_v12, %v4989_v5  ;;  %v5029_v17 = vsel %vm660_vm0, %v5011_v46, 0.0  ;;  %v5014_v32 = vadd.f32 %v5006_v30, %v16025_v0 }
 0x75a   : > { %5030 = vadd.xlane.f32.xlu0 %v5029_v17 }
 0x75b   : > { %v5012_v7 = vadd.f32 %v5004_v59, %v16024_v27  ;;  %v5038_v15 = vsel %vm660_vm0, %v5014_v32, 0.0  ;;  %v10744_v27 = vld [vmem:[%s15933_s8] ss:$0 sm:$0xff] }
 0x75d   : > { %v5032_v19 = vsel %vm660_vm0, %v5012_v7, 0.0 }
 0x75e   : > { %5036 = vadd.xlane.f32.xlu0 %v5035_v1  ;;  %5033 = vadd.xlane.f32.xlu1 %v5032_v19 }
 0x762   : > { %5039 = vadd.xlane.f32.xlu1 %v5038_v15  ;;  %v10745_v15 = vld [vmem:[%s15934_s9] ss:$0 sm:$0xff] }
 0x7a5   : > { %v5019_v2 = vpop.xlane.xlu0 %5018 }
 0x7a6   : > { %v5041_v12 = vmul.f32 0.03125, %v5019_v2 }
 0x7a8   : > { %v14216_v41 = vsub.f32 %v5007_v31, %v5041_v12 }
 0x7a9   : > { %v5025_v40 = vpop.xlane.xlu0 %5024  ;;  %v5022_v11 = vpop.xlane.xlu1 %5021 }
 0x7aa   : > { %v5043_v61 = vmul.f32 0.03125, %v5025_v40  ;;  %v5042_v43 = vmul.f32 0.03125, %v5022_v11  ;;  %v5057_v28 = vmul.f32 %v14216_v41, %v14216_v41 }
 0x7ac   : > { %v14220_v4 = vsub.f32 %v5009_v8, %v5043_v61  ;;  %v14222_v56 = vsub.f32 %v5008_v18, %v5042_v43  ;;  %v5065_v55 = vsel %vm660_vm0, %v5057_v28, 0.0  ;;  %v12337_v18 = vld [vmem:[%s15935_s10] sm:$0xff]  }
 0x7ad   : > { %v5028_v36 = vpop.xlane.xlu0 %5027  ;;  %5066 = vadd.xlane.f32.xlu0 %v5065_v55  ;;  %11793 = vmatprep.subr.bf16.mxu0 %v12337_v18 }
 0x7ae   : > { %v5044_v13 = vmul.f32 0.03125, %v5028_v36  ;;  %v5059_v60 = vmul.f32 %v14220_v4, %v14220_v4  ;;  %v5058_v31 = vmul.f32 %v14222_v56, %v14222_v56  ;;  %11794 = vmatpush3.bf16.msra.mxu0 %v12337_v18 }
 0x7b0   : > { %v14229_v23 = vsub.f32 %v5010_v63, %v5044_v13  ;;  %v5071_v45 = vsel %vm660_vm0, %v5059_v60, 0.0  ;;  %v5068_v57 = vsel %vm660_vm0, %v5058_v31, 0.0 }
 0x7b1   : > { %5072 = vadd.xlane.f32.xlu0 %v5071_v45  ;;  %5069 = vadd.xlane.f32.xlu1 %v5068_v57 }
 0x7b2   : > { %v5060_v26 = vmul.f32 %v14229_v23, %v14229_v23 }
 0x7b4   : > { %v5074_v8 = vsel %vm660_vm0, %v5060_v26, 0.0 }
 0x7b5   : > { %5075 = vadd.xlane.f32.xlu1 %v5074_v8 }
 0x7e3   : > { %v5031_v9 = vpop.xlane.xlu0 %5030 }
 0x7e4   : > { %v5045_v20 = vmul.f32 0.03125, %v5031_v9 }
 0x7e6   : > { %v14242_v53 = vsub.f32 %v5011_v46, %v5045_v20 }
 0x7e7   : > { %v5037_v63 = vpop.xlane.xlu0 %5036  ;;  %v5034_v35 = vpop.xlane.xlu1 %5033 }
 0x7e8   : > { %v5047_v50 = vmul.f32 0.03125, %v5037_v63  ;;  %v5046_v21 = vmul.f32 0.03125, %v5034_v35  ;;  %v5061_v48 = vmul.f32 %v14242_v53, %v14242_v53 }
 0x7ea   : > { %v14246_v37 = vsub.f32 %v5013_v14, %v5047_v50  ;;  %v14248_v47 = vsub.f32 %v5012_v7, %v5046_v21  ;;  %v5077_v42 = vsel %vm660_vm0, %v5061_v48, 0.0 }
 0x7eb   : > { %5078 = vadd.xlane.f32.xlu0 %v5077_v42  ;;  %v5040_v10 = vpop.xlane.xlu1 %5039 }
 0x7ec   : > { %v5048_v38 = vmul.f32 0.03125, %v5040_v10  ;;  %v5063_v3 = vmul.f32 %v14246_v37, %v14246_v37  ;;  %v5062_v25 = vmul.f32 %v14248_v47, %v14248_v47 }
 0x7ee   : > { %v14255_v62 = vsub.f32 %v5014_v32, %v5048_v38  ;;  %v5083_v33 = vsel %vm660_vm0, %v5063_v3, 0.0  ;;  %v5080_v58 = vsel %vm660_vm0, %v5062_v25, 0.0 }
 0x7ef   : > { %5084 = vadd.xlane.f32.xlu0 %v5083_v33  ;;  %5081 = vadd.xlane.f32.xlu1 %v5080_v58 }
 0x7f0   : > { %v5064_v54 = vmul.f32 %v14255_v62, %v14255_v62 }
 0x7f2   : > { %v5086_v6 = vsel %vm660_vm0, %v5064_v54, 0.0 }
 0x7f3   : > { %5087 = vadd.xlane.f32.xlu1 %v5086_v6 }
 0x836   : > { %v5067_v49 = vpop.xlane.xlu0 %5066 }
 0x837   : > { %v5089_v39 = vmul.f32 0.03125, %v5067_v49 }
 0x839   : > { %v5097_v34 = vadd.f32 1e-05, %v5089_v39  ;;  %v12340_v39 = vld [vmem:[%s15937_s12 + $0x8] sm:$0xff]  }
 0x83a   : > { %v5073_v52 = vpop.xlane.xlu0 %5072  ;;  %v5070_v44 = vpop.xlane.xlu1 %5069 }
 0x83b   : > { %12498 = vrsqrt.f32 %v5097_v34  ;;  %v5091_v22 = vmul.f32 0.03125, %v5073_v52  ;;  %v5090_v5 = vmul.f32 0.03125, %v5070_v44  ;;  %v12341_v34 = vld [vmem:[%s15937_s12] sm:$0xff]  }
 0x83c   : > { %v14320_v52 = vld [vmem:[%s15936_s11] ss:$0 sm:$0xff] }
 0x83d   : > { %v5099_v51 = vadd.f32 1e-05, %v5091_v22  ;;  %v5098_v46 = vadd.f32 1e-05, %v5090_v5 }
 0x83e   : > { %v5076_v30 = vpop.xlane.xlu1 %5075 }
 0x83f   : > { %12500 = vrsqrt.f32 %v5099_v51  ;;  %v5092_v59 = vmul.f32 0.03125, %v5076_v30 }
 0x840   : > { %12502 = vrsqrt.f32 %v5098_v46 }
 0x841   : > { %v5100_v17 = vadd.f32 1e-05, %v5092_v59 }
 0x843   : > { %12504 = vrsqrt.f32 %v5100_v17 }
 0x848   : > { %v12499_v24 = vpop.eup %12498 }
 0x849   : > { %v5113_v14 = vmul.f32 %v12499_v24, %v14216_v41 }
 0x84b   : > { %v5127_v32 = vmul.f32 %v10744_v27, %v5113_v14 }
 0x84c   : > { %v12501_v7 = vpop.eup %12500 }
 0x84d   : > { %v12503_v1 = vpop.eup %12502  ;;  %v5115_v19 = vmul.f32 %v12501_v7, %v14220_v4  ;;  %v14272_v11 = vadd.f32 %v10745_v15, %v5127_v32 }
 0x84e   : > { %v5114_v0 = vmul.f32 %v12503_v1, %v14222_v56 }
 0x84f   : > { %v5129_v40 = vmul.f32 %v10744_v27, %v5115_v19 }
 0x850   : > { %v12505_v2 = vpop.eup %12504  ;;  %v5128_v12 = vmul.f32 %v10744_v27, %v5114_v0 }
 0x851   : > { %v5116_v41 = vmul.f32 %v12505_v2, %v14229_v23  ;;  %v14278_v4 = vadd.f32 %v10745_v15, %v5129_v40 }
 0x852   : > { %v14274_v61 = vadd.f32 %v10745_v15, %v5128_v12 }
 0x853   : > { %v5130_v43 = vmul.f32 %v10744_v27, %v5116_v41 }
 0x854   : > { %v5149_v28 = vpack.c.bf16 %v14274_v61, %v14272_v11 }
 0x855   : > { %v14280_v56 = vadd.f32 %v10745_v15, %v5130_v43 }
 0x856   : > { %11795 = vmatprep.mubr.msk.bf16.mxu0 %vm660_vm0, %v5149_v28 }
 0x857   : > { %v5150_v55 = vpack.c.bf16 %v14280_v56, %v14278_v4 }
 0x859   : > { %11796 = vmatmul.mubr.msk.bf16.vlgmr.msra.gmra.mxu0 %vm660_vm0, %v5150_v55 }
 0x874   : > { %v5079_v36 = vpop.xlane.xlu0 %5078 }
 0x875   : > { %v5093_v13 = vmul.f32 0.03125, %v5079_v36 }
 0x877   : > { %v5101_v60 = vadd.f32 1e-05, %v5093_v13 }
 0x878   : > { %v5085_v31 = vpop.xlane.xlu0 %5084  ;;  %v5082_v23 = vpop.xlane.xlu1 %5081 }
 0x879   : > { %12506 = vrsqrt.f32 %v5101_v60  ;;  %v5095_v45 = vmul.f32 0.03125, %v5085_v31  ;;  %v5094_v57 = vmul.f32 0.03125, %v5082_v23 }
 0x87b   : > { %v5103_v26 = vadd.f32 1e-05, %v5095_v45  ;;  %v5102_v8 = vadd.f32 1e-05, %v5094_v57 }
 0x87c   : > { %v5088_v16 = vpop.xlane.xlu1 %5087 }
 0x87d   : > { %12508 = vrsqrt.f32 %v5103_v26  ;;  %v5096_v18 = vmul.f32 0.03125, %v5088_v16 }
 0x87e   : > { %12510 = vrsqrt.f32 %v5102_v8 }
 0x87f   : > { %v5104_v9 = vadd.f32 1e-05, %v5096_v18 }
 0x881   : > { %12512 = vrsqrt.f32 %v5104_v9 }
 0x886   : > { %v12507_v20 = vpop.eup %12506 }
 0x887   : > { %v5117_v63 = vmul.f32 %v12507_v20, %v14242_v53 }
 0x889   : > { %v5131_v42 = vmul.f32 %v10744_v27, %v5117_v63 }
 0x88a   : > { %v12509_v35 = vpop.eup %12508 }
 0x88b   : > { %v12511_v50 = vpop.eup %12510  ;;  %v5119_v21 = vmul.f32 %v12509_v35, %v14246_v37  ;;  %v14290_v33 = vadd.f32 %v10745_v15, %v5131_v42 }
 0x88c   : > { %v5118_v48 = vmul.f32 %v12511_v50, %v14248_v47  ;;  %v12338_v47 = vld [vmem:[%s15937_s12 + $0x18] sm:$0xff]  }
 0x88d   : > { %v5133_v25 = vmul.f32 %v10744_v27, %v5119_v21  ;;  %11803 = vmatprep.subr.bf16.mxu1 %v12338_v47 }
 0x88e   : > { %v12513_v10 = vpop.eup %12512  ;;  %v5132_v38 = vmul.f32 %v10744_v27, %v5118_v48  ;;  %11804 = vmatpush3.bf16.msra.mxu1 %v12338_v47 }
 0x88f   : > { %v5120_v3 = vmul.f32 %v12513_v10, %v14255_v62  ;;  %v14296_v6 = vadd.f32 %v10745_v15, %v5133_v25  ;;  %v12339_v62 = vld [vmem:[%s15937_s12 + $0x10] sm:$0xff]  }
 0x890   : > { %v14292_v58 = vadd.f32 %v10745_v15, %v5132_v38  ;;  %11805 = vmatprep.subr.bf16.mxu1 %v12339_v62 }
 0x891   : > { %v5134_v54 = vmul.f32 %v10744_v27, %v5120_v3 }
 0x892   : > { %v5151_v53 = vpack.c.bf16 %v14292_v58, %v14290_v33  ;;  %11806 = vmatpush3.bf16.msra.mxu1 %v12339_v62 }
 0x893   : > { %v14298_v49 = vadd.f32 %v10745_v15, %v5134_v54  ;;  %11807 = vmatprep.subr.bf16.mxu1 %v12340_v39 }
 0x894   : > { %11799 = vmatprep.mubr.msk.bf16.mxu0 %vm660_vm0, %v5151_v53 }
 0x895   : > { %v5152_v37 = vpack.c.bf16 %v14298_v49, %v14296_v6 }
 0x896   : > { %11808 = vmatpush3.bf16.msra.mxu1 %v12340_v39 }
 0x897   : > { %11800 = vmatmul.mubr.msk.bf16.gmra.mxu0 %vm660_vm0, %v5152_v37  ;;  %11809 = vmatprep.subr.bf16.mxu1 %v12341_v34 }
 0x89a   : > { %11810 = vmatpush3.bf16.msra.mxu1 %v12341_v34 }
 0x89b   : > { %11831 = vmatprep.subr.bf16.mxu1 %v16004_v29 }
 0x919   : > { %v11797_v44 = vpop.f32.mrf.mxu0 }
 0x91a   : > { %v5231_v22 = vadd.f32 %v11797_v44, %v14320_v52 }
 0x91b   : > { %v5222_v5 = vpop.f32.mrf.mxu0 }
 0x91c   : > { %v5255_v51 = vmul.f32 %v5231_v22, %v5231_v22  ;;  %v5223_v46 = vadd.f32 %v14320_v52, %v5222_v5 }
 0x91d   : > { %v11798_v30 = vpop.f32.mrf.mxu0 }
 0x91e   : > { %v5263_v59 = vmul.f32 %v5255_v51, %v5231_v22  ;;  %v5253_v17 = vmul.f32 %v5223_v46, %v5223_v46  ;;  %v5234_v24 = vadd.f32 %v11798_v30, %v14320_v52 }
 0x91f   : > { %v5225_v14 = vpop.f32.mrf.mxu0 }
 0x920   : > { %v5271_v27 = vmul.f32 0.044715, %v5263_v59  ;;  %v5261_v7 = vmul.f32 %v5253_v17, %v5223_v46  ;;  %v5256_v1 = vmul.f32 %v5234_v24, %v5234_v24  ;;  %v5226_v19 = vadd.f32 %v14320_v52, %v5225_v14 }
 0x922   : > { %v5279_v0 = vadd.f32 %v5271_v27, %v5231_v22  ;;  %v5269_v32 = vmul.f32 0.044715, %v5261_v7  ;;  %v5264_v15 = vmul.f32 %v5256_v1, %v5234_v24  ;;  %v5254_v2 = vmul.f32 %v5226_v19, %v5226_v19 }
 0x924   : > { %v5287_v12 = vmul.f32 0.7978846, %v5279_v0  ;;  %v5277_v40 = vadd.f32 %v5269_v32, %v5223_v46  ;;  %v5272_v41 = vmul.f32 0.044715, %v5264_v15  ;;  %v5262_v43 = vmul.f32 %v5254_v2, %v5226_v19 }
 0x926   : > { %v5285_v28 = vmul.f32 0.7978846, %v5277_v40  ;;  %v5280_v55 = vadd.f32 %v5272_v41, %v5234_v24  ;;  %v5270_v36 = vmul.f32 0.044715, %v5262_v43  ;;  %12514 = vtanh.f32 %v5287_v12 }
 0x928   : > { %12516 = vtanh.f32 %v5285_v28  ;;  %v5288_v13 = vmul.f32 0.7978846, %v5280_v55  ;;  %v5278_v60 = vadd.f32 %v5270_v36, %v5226_v19 }
 0x92a   : > { %12518 = vtanh.f32 %v5288_v13  ;;  %v5286_v31 = vmul.f32 0.7978846, %v5278_v60 }
 0x92c   : > { %12520 = vtanh.f32 %v5286_v31 }
 0x933   : > { %v12515_v23 = vpop.eup %12514 }
 0x934   : > { %v5303_v8 = vadd.f32 1.0, %v12515_v23 }
 0x935   : > { %v12517_v45 = vpop.eup %12516 }
 0x936   : > { %v5301_v57 = vadd.f32 1.0, %v12517_v45  ;;  %v5311_v35 = vmul.f32 0.5, %v5303_v8 }
 0x937   : > { %v12519_v26 = vpop.eup %12518 }
 0x938   : > { %v5304_v16 = vadd.f32 1.0, %v12519_v26  ;;  %v5309_v9 = vmul.f32 0.5, %v5301_v57  ;;  %v5319_v10 = vmul.f32 %v5311_v35, %v5231_v22  ;;  %v10753_v35 = vld [vmem:[%s15938_s13] ss:$0 sm:$0xff] }
 0x939   : > { %v12521_v18 = vpop.eup %12520 }
 0x93a   : > { %v5312_v20 = vmul.f32 0.5, %v5304_v16  ;;  %v5302_v63 = vadd.f32 1.0, %v12521_v18  ;;  %v5317_v48 = vmul.f32 %v5309_v9, %v5223_v46 }
 0x93c   : > { %v5310_v50 = vmul.f32 0.5, %v5302_v63  ;;  %v5320_v21 = vmul.f32 %v5312_v20, %v5234_v24 }
 0x93e   : > { %v5318_v42 = vmul.f32 %v5310_v50, %v5226_v19  ;;  %v5326_v3 = vpack.c.bf16 %v5320_v21, %v5319_v10 }
 0x940   : > { %v5325_v38 = vpack.c.bf16 %v5318_v42, %v5317_v48 }
 0x942   : > { %11811 = vmatprep.mubr.msk.bf16.mxu1 %vm5368_vm4, %v5325_v38 }
 0x943   : > { %11812 = vmatmul.mubr.msk.bf16.vlgmr.msra.gmra.mxu1 %vm5368_vm4, %v5326_v3 }
 0x957   : > { %v11801_v25 = vpop.f32.mrf.mxu0 }
 0x958   : > { %v5247_v54 = vadd.f32 %v11801_v25, %v14320_v52 }
 0x959   : > { %v5238_v53 = vpop.f32.mrf.mxu0 }
 0x95a   : > { %v5259_v37 = vmul.f32 %v5247_v54, %v5247_v54  ;;  %v5239_v47 = vadd.f32 %v14320_v52, %v5238_v53 }
 0x95b   : > { %v11802_v62 = vpop.f32.mrf.mxu0 }
 0x95c   : > { %v5267_v39 = vmul.f32 %v5259_v37, %v5247_v54  ;;  %v5257_v34 = vmul.f32 %v5239_v47, %v5239_v47  ;;  %v5250_v44 = vadd.f32 %v11802_v62, %v14320_v52 }
 0x95d   : > { %v5241_v22 = vpop.f32.mrf.mxu0 }
 0x95e   : > { %v5275_v5 = vmul.f32 0.044715, %v5267_v39  ;;  %v5265_v51 = vmul.f32 %v5257_v34, %v5239_v47  ;;  %v5260_v46 = vmul.f32 %v5250_v44, %v5250_v44  ;;  %v5242_v30 = vadd.f32 %v14320_v52, %v5241_v22 }
 0x960   : > { %v5283_v59 = vadd.f32 %v5275_v5, %v5247_v54  ;;  %v5273_v17 = vmul.f32 0.044715, %v5265_v51  ;;  %v5268_v24 = vmul.f32 %v5260_v46, %v5250_v44  ;;  %v5258_v14 = vmul.f32 %v5242_v30, %v5242_v30 }
 0x962   : > { %v5291_v27 = vmul.f32 0.7978846, %v5283_v59  ;;  %v5281_v7 = vadd.f32 %v5273_v17, %v5239_v47  ;;  %v5276_v1 = vmul.f32 0.044715, %v5268_v24  ;;  %v5266_v19 = vmul.f32 %v5258_v14, %v5242_v30 }
 0x964   : > { %v5289_v0 = vmul.f32 0.7978846, %v5281_v7  ;;  %v5284_v32 = vadd.f32 %v5276_v1, %v5250_v44  ;;  %v5274_v15 = vmul.f32 0.044715, %v5266_v19  ;;  %12522 = vtanh.f32 %v5291_v27 }
 0x966   : > { %12524 = vtanh.f32 %v5289_v0  ;;  %v5292_v2 = vmul.f32 0.7978846, %v5284_v32  ;;  %v5282_v12 = vadd.f32 %v5274_v15, %v5242_v30 }
 0x968   : > { %12526 = vtanh.f32 %v5292_v2  ;;  %v5290_v40 = vmul.f32 0.7978846, %v5282_v12 }
 0x96a   : > { %12528 = vtanh.f32 %v5290_v40 }
 0x971   : > { %v12523_v41 = vpop.eup %12522 }
 0x972   : > { %v5307_v55 = vadd.f32 1.0, %v12523_v41 }
 0x973   : > { %v12525_v52 = vpop.eup %12524 }
 0x974   : > { %v5305_v43 = vadd.f32 1.0, %v12525_v52  ;;  %v5315_v45 = vmul.f32 0.5, %v5307_v55 }
 0x975   : > { %v12527_v28 = vpop.eup %12526 }
 0x976   : > { %v5308_v36 = vadd.f32 1.0, %v12527_v28  ;;  %v5313_v60 = vmul.f32 0.5, %v5305_v43  ;;  %v5323_v18 = vmul.f32 %v5315_v45, %v5247_v54 }
 0x977   : > { %v12529_v13 = vpop.eup %12528 }
 0x978   : > { %v5316_v31 = vmul.f32 0.5, %v5308_v36  ;;  %v5306_v23 = vadd.f32 1.0, %v12529_v13  ;;  %v5321_v8 = vmul.f32 %v5313_v60, %v5239_v47 }
 0x97a   : > { %v5314_v57 = vmul.f32 0.5, %v5306_v23  ;;  %v5324_v26 = vmul.f32 %v5316_v31, %v5250_v44  ;;  %v12342_v31 = vld [vmem:[%s15979_s4 + $0x18] sm:$0xff]   ;;  %v12343_v23 = vld [vmem:[%s15979_s4 + $0x10] sm:$0xff]  }
 0x97b   : > { %11819 = vmatprep.subr.bf16.mxu0 %v12342_v31 }
 0x97c   : > { %v5322_v16 = vmul.f32 %v5314_v57, %v5242_v30  ;;  %v5328_v20 = vpack.c.bf16 %v5324_v26, %v5323_v18  ;;  %11820 = vmatpush3.bf16.msra.mxu0 %v12342_v31 }
 0x97d   : > { %11821 = vmatprep.subr.bf16.mxu0 %v12343_v23 }
 0x97e   : > { %v5327_v9 = vpack.c.bf16 %v5322_v16, %v5321_v8 }
 0x980   : > { %11815 = vmatprep.mubr.msk.bf16.mxu1 %vm5368_vm4, %v5327_v9  ;;  %11822 = vmatpush3.bf16.msra.mxu0 %v12343_v23 }
 0x981   : > { %11816 = vmatmul.mubr.msk.bf16.gmra.mxu1 %vm5368_vm4, %v5328_v20  ;;  %11843 = vmatprep.subr.bf16.mxu0 %v16004_v29 }
 0x982   : > { %11833 = vmatprep.mubr.msk.bf16.mxu1 %vm12742_vm1, %v16004_v29 }
 0xa03   : > { %v11813_v63 = vpop.f32.mrf.mxu1 }
 0xa04   : > { %v5424_v21 = vadd.f32 %v11813_v63, %v10753_v35 }
 0xa05   : > { %v5415_v50 = vpop.f32.mrf.mxu1 }
 0xa06   : > { %v5416_v48 = vadd.f32 %v10753_v35, %v5415_v50  ;;  %v5448_v3 = vadd.f32 %v5424_v21, %v14278_v4 }
 0xa07   : > { %v11814_v42 = vpop.f32.mrf.mxu1 }
 0xa08   : > { %v5446_v10 = vadd.f32 %v5416_v48, %v14272_v11  ;;  %v5427_v25 = vadd.f32 %v11814_v42, %v10753_v35  ;;  %v5462_v39 = vsel %vm660_vm0, %v5448_v3, 0.0 }
 0xa09   : > { %v5418_v38 = vpop.f32.mrf.mxu1 }
 0xa0a   : > { %v5419_v54 = vadd.f32 %v10753_v35, %v5418_v38  ;;  %v5456_v53 = vsel %vm660_vm0, %v5446_v10, 0.0  ;;  %v5449_v47 = vadd.f32 %v5427_v25, %v14280_v56 }
 0xa0b   : > { %5457 = vadd.xlane.f32.xlu0 %v5456_v53 }
 0xa0c   : > { %v5447_v37 = vadd.f32 %v5419_v54, %v14274_v61  ;;  %v5465_v11 = vsel %vm660_vm0, %v5449_v47, 0.0 }
 0xa0e   : > { %v5459_v62 = vsel %vm660_vm0, %v5447_v37, 0.0 }
 0xa0f   : > { %5460 = vadd.xlane.f32.xlu1 %v5459_v62  ;;  %5463 = vadd.xlane.f32.xlu0 %v5462_v39 }
 0xa13   : > { %5466 = vadd.xlane.f32.xlu1 %v5465_v11 }
 0xa41   : > { %v11817_v34 = vpop.f32.mrf.mxu1 }
 0xa42   : > { %v5440_v44 = vadd.f32 %v11817_v34, %v10753_v35 }
 0xa43   : > { %v5431_v4 = vpop.f32.mrf.mxu1 }
 0xa44   : > { %v5432_v22 = vadd.f32 %v10753_v35, %v5431_v4  ;;  %v5452_v61 = vadd.f32 %v5440_v44, %v14296_v6 }
 0xa45   : > { %v11818_v5 = vpop.f32.mrf.mxu1 }
 0xa46   : > { %v5450_v51 = vadd.f32 %v5432_v22, %v14290_v33  ;;  %v5443_v56 = vadd.f32 %v11818_v5, %v10753_v35  ;;  %v5474_v27 = vsel %vm660_vm0, %v5452_v61, 0.0 }
 0xa47   : > { %v5434_v46 = vpop.f32.mrf.mxu1 }
 0xa48   : > { %v5435_v30 = vadd.f32 %v10753_v35, %v5434_v46  ;;  %v5468_v59 = vsel %vm660_vm0, %v5450_v51, 0.0  ;;  %v5453_v24 = vadd.f32 %v5443_v56, %v14298_v49 }
 0xa49   : > { %5469 = vadd.xlane.f32.xlu0 %v5468_v59 }
 0xa4a   : > { %v5451_v17 = vadd.f32 %v5435_v30, %v14292_v58  ;;  %v5477_v33 = vsel %vm660_vm0, %v5453_v24, 0.0  ;;  %v10762_v30 = vld [vmem:[%s15939_s14] ss:$0 sm:$0xff] }
 0xa4c   : > { %v5471_v14 = vsel %vm660_vm0, %v5451_v17, 0.0 }
 0xa4d   : > { %5472 = vadd.xlane.f32.xlu1 %v5471_v14  ;;  %5475 = vadd.xlane.f32.xlu0 %v5474_v27 }
 0xa51   : > { %5478 = vadd.xlane.f32.xlu1 %v5477_v33  ;;  %v10763_v33 = vld [vmem:[%s15940_s15] ss:$0 sm:$0xff] }
 0xa94   : > { %v5458_v7 = vpop.xlane.xlu0 %5457 }
 0xa95   : > { %v5480_v6 = vmul.f32 0.03125, %v5458_v7 }
 0xa97   : > { %v14355_v1 = vsub.f32 %v5446_v10, %v5480_v6 }
 0xa98   : > { %v5464_v19 = vpop.xlane.xlu0 %5463  ;;  %v5461_v0 = vpop.xlane.xlu1 %5460 }
 0xa99   : > { %v5482_v32 = vmul.f32 0.03125, %v5464_v19  ;;  %v5481_v15 = vmul.f32 0.03125, %v5461_v0  ;;  %v5496_v58 = vmul.f32 %v14355_v1, %v14355_v1 }
 0xa9b   : > { %v14359_v49 = vsub.f32 %v5448_v3, %v5482_v32  ;;  %v14361_v2 = vsub.f32 %v5447_v37, %v5481_v15  ;;  %v5504_v12 = vsel %vm660_vm0, %v5496_v58, 0.0 }
 0xa9c   : > { %5505 = vadd.xlane.f32.xlu0 %v5504_v12  ;;  %v5467_v40 = vpop.xlane.xlu1 %5466 }
 0xa9d   : > { %v5483_v41 = vmul.f32 0.03125, %v5467_v40  ;;  %v5498_v52 = vmul.f32 %v14359_v49, %v14359_v49  ;;  %v5497_v43 = vmul.f32 %v14361_v2, %v14361_v2 }
 0xa9f   : > { %v14368_v28 = vsub.f32 %v5449_v47, %v5483_v41  ;;  %v5510_v55 = vsel %vm660_vm0, %v5498_v52, 0.0  ;;  %v5507_v36 = vsel %vm660_vm0, %v5497_v43, 0.0 }
 0xaa0   : > { %5511 = vadd.xlane.f32.xlu0 %v5510_v55  ;;  %5508 = vadd.xlane.f32.xlu1 %v5507_v36 }
 0xaa1   : > { %v5499_v13 = vmul.f32 %v14368_v28, %v14368_v28 }
 0xaa3   : > { %v5513_v60 = vsel %vm660_vm0, %v5499_v13, 0.0 }
 0xaa4   : > { %5514 = vadd.xlane.f32.xlu1 %v5513_v60 }
 0xad2   : > { %v5470_v45 = vpop.xlane.xlu0 %5469 }
 0xad3   : > { %v5484_v57 = vmul.f32 0.03125, %v5470_v45 }
 0xad5   : > { %v14382_v26 = vsub.f32 %v5450_v51, %v5484_v57 }
 0xad6   : > { %v5476_v8 = vpop.xlane.xlu0 %5475  ;;  %v5473_v16 = vpop.xlane.xlu1 %5472 }
 0xad7   : > { %v5486_v18 = vmul.f32 0.03125, %v5476_v8  ;;  %v5485_v9 = vmul.f32 0.03125, %v5473_v16  ;;  %v5500_v20 = vmul.f32 %v14382_v26, %v14382_v26 }
 0xad9   : > { %v14386_v63 = vsub.f32 %v5452_v61, %v5486_v18  ;;  %v14388_v35 = vsub.f32 %v5451_v17, %v5485_v9  ;;  %v5516_v50 = vsel %vm660_vm0, %v5500_v20, 0.0 }
 0xada   : > { %5517 = vadd.xlane.f32.xlu0 %v5516_v50  ;;  %v5479_v21 = vpop.xlane.xlu1 %5478 }
 0xadb   : > { %v5487_v48 = vmul.f32 0.03125, %v5479_v21  ;;  %v5502_v42 = vmul.f32 %v14386_v63, %v14386_v63  ;;  %v5501_v10 = vmul.f32 %v14388_v35, %v14388_v35 }
 0xadd   : > { %v14395_v38 = vsub.f32 %v5453_v24, %v5487_v48  ;;  %v5522_v3 = vsel %vm660_vm0, %v5502_v42, 0.0  ;;  %v5519_v25 = vsel %vm660_vm0, %v5501_v10, 0.0 }
 0xade   : > { %5523 = vadd.xlane.f32.xlu0 %v5522_v3  ;;  %5520 = vadd.xlane.f32.xlu1 %v5519_v25 }
 0xadf   : > { %v5503_v54 = vmul.f32 %v14395_v38, %v14395_v38 }
 0xae1   : > { %v5525_v53 = vsel %vm660_vm0, %v5503_v54, 0.0 }
 0xae2   : > { %5526 = vadd.xlane.f32.xlu1 %v5525_v53 }
 0xb25   : > { %v5506_v37 = vpop.xlane.xlu0 %5505 }
 0xb26   : > { %v5528_v47 = vmul.f32 0.03125, %v5506_v37 }
 0xb28   : > { %v5536_v62 = vadd.f32 1e-05, %v5528_v47 }
 0xb29   : > { %v5512_v39 = vpop.xlane.xlu0 %5511  ;;  %v5509_v11 = vpop.xlane.xlu1 %5508 }
 0xb2a   : > { %12530 = vrsqrt.f32 %v5536_v62  ;;  %v5530_v34 = vmul.f32 0.03125, %v5512_v39  ;;  %v5529_v4 = vmul.f32 0.03125, %v5509_v11 }
 0xb2c   : > { %v5538_v44 = vadd.f32 1e-05, %v5530_v34  ;;  %v5537_v22 = vadd.f32 1e-05, %v5529_v4 }
 0xb2d   : > { %v5515_v5 = vpop.xlane.xlu1 %5514 }
 0xb2e   : > { %12532 = vrsqrt.f32 %v5538_v44  ;;  %v5531_v51 = vmul.f32 0.03125, %v5515_v5 }
 0xb2f   : > { %12534 = vrsqrt.f32 %v5537_v22 }
 0xb30   : > { %v5539_v46 = vadd.f32 1e-05, %v5531_v51 }
 0xb32   : > { %12536 = vrsqrt.f32 %v5539_v46 }
 0xb37   : > { %v12531_v61 = vpop.eup %12530 }
 0xb38   : > { %v5552_v56 = vmul.f32 %v12531_v61, %v14355_v1 }
 0xb3a   : > { %v5566_v27 = vmul.f32 %v10762_v30, %v5552_v56 }
 0xb3b   : > { %v12533_v59 = vpop.eup %12532 }
 0xb3c   : > { %v12535_v17 = vpop.eup %12534  ;;  %v5554_v24 = vmul.f32 %v12533_v59, %v14359_v49  ;;  %v14412_v0 = vadd.f32 %v10763_v33, %v5566_v27 }
 0xb3d   : > { %v5553_v14 = vmul.f32 %v12535_v17, %v14361_v2 }
 0xb3e   : > { %v5568_v19 = vmul.f32 %v10762_v30, %v5554_v24  ;;  %16026 = vst [vmem:[#allocation11_spill] sm:$0xff] %v14412_v0 }
 0xb3f   : > { %v12537_v7 = vpop.eup %12536  ;;  %v5567_v6 = vmul.f32 %v10762_v30, %v5553_v14 }
 0xb40   : > { %v5555_v1 = vmul.f32 %v12537_v7, %v14368_v28  ;;  %v14418_v49 = vadd.f32 %v10763_v33, %v5568_v19 }
 0xb41   : > { %v14414_v32 = vadd.f32 %v10763_v33, %v5567_v6 }
 0xb42   : > { %v5569_v15 = vmul.f32 %v10762_v30, %v5555_v1  ;;  %16028 = vst [vmem:[#allocation13_spill] sm:$0xff] %v14418_v49 }
 0xb43   : > { %16027 = vst [vmem:[#allocation10_spill] sm:$0xff] %v14414_v32  ;;  %v5588_v58 = vpack.c.bf16 %v14414_v32, %v14412_v0 }
 0xb44   : > { %v14420_v2 = vadd.f32 %v10763_v33, %v5569_v15 }
 0xb45   : > { %11823 = vmatprep.mubr.msk.bf16.mxu0 %vm660_vm0, %v5588_v58 }
 0xb46   : > { %16029 = vst [vmem:[#allocation12_spill] sm:$0xff] %v14420_v2  ;;  %v5589_v12 = vpack.c.bf16 %v14420_v2, %v14418_v49 }
 0xb48   : > { %11824 = vmatmul.mubr.msk.bf16.vlgmr.msra.gmra.mxu0 %vm660_vm0, %v5589_v12 }
 0xb63   : > { %v5518_v40 = vpop.xlane.xlu0 %5517 }
 0xb64   : > { %v5532_v41 = vmul.f32 0.03125, %v5518_v40 }
 0xb66   : > { %v5540_v52 = vadd.f32 1e-05, %v5532_v41 }
 0xb67   : > { %v5524_v43 = vpop.xlane.xlu0 %5523  ;;  %v5521_v28 = vpop.xlane.xlu1 %5520 }
 0xb68   : > { %12538 = vrsqrt.f32 %v5540_v52  ;;  %v5534_v55 = vmul.f32 0.03125, %v5524_v43  ;;  %v5533_v36 = vmul.f32 0.03125, %v5521_v28 }
 0xb6a   : > { %v5542_v13 = vadd.f32 1e-05, %v5534_v55  ;;  %v5541_v60 = vadd.f32 1e-05, %v5533_v36 }
 0xb6b   : > { %v5527_v31 = vpop.xlane.xlu1 %5526 }
 0xb6c   : > { %12540 = vrsqrt.f32 %v5542_v13  ;;  %v5535_v23 = vmul.f32 0.03125, %v5527_v31 }
 0xb6d   : > { %12542 = vrsqrt.f32 %v5541_v60 }
 0xb6e   : > { %v5543_v45 = vadd.f32 1e-05, %v5535_v23 }
 0xb70   : > { %12544 = vrsqrt.f32 %v5543_v45 }
 0xb75   : > { %v12539_v57 = vpop.eup %12538 }
 0xb76   : > { %v5556_v8 = vmul.f32 %v12539_v57, %v14382_v26 }
 0xb78   : > { %v5570_v50 = vmul.f32 %v10762_v30, %v5556_v8 }
 0xb79   : > { %v12541_v16 = vpop.eup %12540 }
 0xb7a   : > { %v12543_v18 = vpop.eup %12542  ;;  %v5558_v9 = vmul.f32 %v12541_v16, %v14386_v63  ;;  %v14430_v3 = vadd.f32 %v10763_v33, %v5570_v50 }
 0xb7b   : > { %v5557_v20 = vmul.f32 %v12543_v18, %v14388_v35 }
 0xb7c   : > { %v5572_v10 = vmul.f32 %v10762_v30, %v5558_v9  ;;  %16030 = vst [vmem:[#allocation15_spill] sm:$0xff] %v14430_v3 }
 0xb7d   : > { %v12545_v21 = vpop.eup %12544  ;;  %v5571_v48 = vmul.f32 %v10762_v30, %v5557_v20 }
 0xb7e   : > { %v5559_v42 = vmul.f32 %v12545_v21, %v14395_v38  ;;  %v14436_v53 = vadd.f32 %v10763_v33, %v5572_v10  ;;  %v10769_v38 = vld [vmem:[%s15930_s5 + $0x1] ss:$0 sm:$0xff] }
 0xb7f   : > { %v14432_v25 = vadd.f32 %v10763_v33, %v5571_v48 }
 0xb80   : > { %v5573_v54 = vmul.f32 %v10762_v30, %v5559_v42  ;;  %16032 = vst [vmem:[#allocation17_spill] sm:$0xff] %v14436_v53 }
 0xb81   : > { %16031 = vst [vmem:[#allocation14_spill] sm:$0xff] %v14432_v25  ;;  %v5590_v26 = vpack.c.bf16 %v14432_v25, %v14430_v3 }
 0xb82   : > { %v14438_v37 = vadd.f32 %v10763_v33, %v5573_v54 }
 0xb83   : > { %11827 = vmatprep.mubr.msk.bf16.mxu0 %vm660_vm0, %v5590_v26 }
 0xb84   : > { %16033 = vst [vmem:[#allocation18_spill] sm:$0xff] %v14438_v37  ;;  %v5591_v63 = vpack.c.bf16 %v14438_v37, %v14436_v53 }
 0xb86   : > { %11828 = vmatmul.mubr.msk.bf16.gmra.mxu0 %vm660_vm0, %v5591_v63 }
 0xb87   : > { %11845 = vmatprep.mubr.msk.bf16.mxu0 %vm12742_vm1, %v16004_v29 }
 0xc08   : > { %v11825_v35 = vpop.f32.mrf.mxu0 }
 0xc09   : > { %v5672_v44 = vadd.f32 %v11825_v35, %v10769_v38 }
 0xc0a   : > { %v5663_v47 = vpop.f32.mrf.mxu0 }
 0xc0b   : > { %v5664_v62 = vadd.f32 %v10769_v38, %v5663_v47  ;;  %v14457_v5 = vpack.c.bf16 %v5672_v44, %v5672_v44 }
 0xc0c   : > { %v11826_v39 = vpop.f32.mrf.mxu0 }
 0xc0d   : > { %v14449_v11 = vpack.c.bf16 %v5664_v62, %v5664_v62  ;;  %v5675_v51 = vadd.f32 %v11826_v39, %v10769_v38 }
 0xc0e   : > { %v5666_v34 = vpop.f32.mrf.mxu0 }
 0xc0f   : > { %v5667_v4 = vadd.f32 %v10769_v38, %v5666_v34  ;;  %5718 = vrot.lane.b32.xlu0 %v14449_v11, %s12740_s28  ;;  %v14461_v46 = vpack.c.bf16 %v5675_v51, %v5675_v51 }
 0xc11   : > { %v14453_v22 = vpack.c.bf16 %v5667_v4, %v5667_v4 }
 0xc13   : > { %5720 = vrot.lane.b32.xlu1 %v14453_v22, %s12740_s28 }
 0xc17   : > { %5722 = vrot.lane.b32.xlu1 %v14457_v5, %s12740_s28 }
 0xc1b   : > { %5724 = vrot.lane.b32.xlu1 %v14461_v46, %s12740_s28 }
 0xc46   : > { %v11829_v61 = vpop.f32.mrf.mxu0 }
 0xc47   : > { %v5688_v27 = vadd.f32 %v11829_v61, %v10769_v38 }
 0xc48   : > { %v5679_v56 = vpop.f32.mrf.mxu0 }
 0xc49   : > { %v5680_v30 = vadd.f32 %v10769_v38, %v5679_v56  ;;  %v14475_v6 = vpack.c.bf16 %v5688_v27, %v5688_v27 }
 0xc4a   : > { %v11830_v59 = vpop.f32.mrf.mxu0 }
 0xc4b   : > { %v14465_v17 = vpack.c.bf16 %v5680_v30, %v5680_v30  ;;  %v5691_v33 = vadd.f32 %v11830_v59, %v10769_v38 }
 0xc4c   : > { %v5682_v24 = vpop.f32.mrf.mxu0 }
 0xc4d   : > { %v5683_v14 = vadd.f32 %v10769_v38, %v5682_v24  ;;  %5726 = vrot.lane.b32.xlu0 %v14465_v17, %s12740_s28  ;;  %v14477_v19 = vpack.c.bf16 %v5691_v33, %v5691_v33 }
 0xc4f   : > { %v14469_v7 = vpack.c.bf16 %v5683_v14, %v5683_v14 }
 0xc51   : > { %5728 = vrot.lane.b32.xlu1 %v14469_v7, %s12740_s28  ;;  %5766 = vrot.lane.b32.xlu0 %v14449_v11, %s12743_s29 }
 0xc55   : > { %5730 = vrot.lane.b32.xlu1 %v14475_v6, %s12740_s28  ;;  %5732 = vrot.lane.b32.xlu0 %v14477_v19, %s12740_s28  ;;  %s16034_s28 = smov 104  }
 0xc59   : > { %5814 = vrot.lane.b32.xlu1 %v14453_v22, %s12743_s29  ;;  %5734 = vrot.lane.b32.xlu0 %v14449_v11, %s12744_s30 }
 0xc5d   : > { %5736 = vrot.lane.b32.xlu1 %v14453_v22, %s12744_s30  ;;  %5862 = vrot.lane.b32.xlu0 %v14457_v5, %s12743_s29 }
 0xc61   : > { %5910 = vrot.lane.b32.xlu1 %v14461_v46, %s12743_s29  ;;  %5738 = vrot.lane.b32.xlu0 %v14457_v5, %s12744_s30 }
 0xc65   : > { %5740 = vrot.lane.b32.xlu1 %v14461_v46, %s12744_s30  ;;  %5958 = vrot.lane.b32.xlu0 %v14465_v17, %s12743_s29 }
 0xc69   : > { %6006 = vrot.lane.b32.xlu1 %v14469_v7, %s12743_s29  ;;  %5742 = vrot.lane.b32.xlu0 %v14465_v17, %s12744_s30 }
 0xc6d   : > { %5744 = vrot.lane.b32.xlu1 %v14469_v7, %s12744_s30  ;;  %6054 = vrot.lane.b32.xlu0 %v14475_v6, %s12743_s29 }
 0xc71   : > { %6102 = vrot.lane.b32.xlu1 %v14477_v19, %s12743_s29  ;;  %5746 = vrot.lane.b32.xlu0 %v14475_v6, %s12744_s30 }
 0xc75   : > { %5748 = vrot.lane.b32.xlu1 %v14477_v19, %s12744_s30  ;;  %s16037_s30 = smov 64  }
 0xc81   : > { %v14513_v1 = vpop.permute.xlu0 %5718 }
 0xc82   : > { %v14517_v15 = vcombine.low %v14513_v1, %v14513_v1 }
 0xc84   : > { %6152 = vrot.lane.b32.xlu0 %v14517_v15, %s12743_s29 }
 0xc85   : > { %v14521_v58 = vpop.permute.xlu1 %5720 }
 0xc86   : > { %v14525_v12 = vcombine.low %v14521_v58, %v14521_v58 }
 0xc88   : > { %5750 = vrot.lane.b32.xlu0 %v14449_v11, %s16034_s28  ;;  %6202 = vrot.lane.b32.xlu1 %v14525_v12, %s12743_s29 }
 0xc89   : > { %v14531_v40 = vpop.permute.xlu1 %5722 }
 0xc8a   : > { %v14535_v41 = vcombine.low %v14531_v40, %v14531_v40 }
 0xc8c   : > { %5752 = vrot.lane.b32.xlu1 %v14453_v22, %s16034_s28  ;;  %6252 = vrot.lane.b32.xlu0 %v14535_v41, %s12743_s29 }
 0xc8d   : > { %v14541_v52 = vpop.permute.xlu1 %5724 }
 0xc8e   : > { %v14545_v43 = vcombine.low %v14541_v52, %v14541_v52 }
 0xc90   : > { %5754 = vrot.lane.b32.xlu0 %v14457_v5, %s16034_s28  ;;  %6302 = vrot.lane.b32.xlu1 %v14545_v43, %s12743_s29 }
 0xc94   : > { %5756 = vrot.lane.b32.xlu1 %v14461_v46, %s16034_s28 }
 0xcbf   : > { %v14553_v28 = vpop.permute.xlu0 %5726 }
 0xcc0   : > { %v14557_v55 = vcombine.low %v14553_v28, %v14553_v28 }
 0xcc2   : > { %6352 = vrot.lane.b32.xlu0 %v14557_v55, %s12743_s29 }
 0xcc3   : > { %v5767_v36 = vpop.permute.xlu0 %5766  ;;  %v14561_v13 = vpop.permute.xlu1 %5728 }
 0xcc4   : > { %v5772_v60 = vsel %vm1028_vm2, %v5767_v36, 0  ;;  %v14566_v31 = vcombine.low %v14561_v13, %v14561_v13 }
 0xcc5   : > { %11832 = vmatpush3.bf16.xpose.msra.mxu1 %v5772_v60 }
 0xcc6   : > { %5758 = vrot.lane.b32.xlu0 %v14465_v17, %s16034_s28  ;;  %6402 = vrot.lane.b32.xlu1 %v14566_v31, %s12743_s29 }
 0xcc7   : > { %v14572_v23 = vpop.permute.xlu0 %5732  ;;  %v14574_v45 = vpop.permute.xlu1 %5730  ;;  %11837 = vmatprep.subr.bf16.mxu1 %v16004_v29 }
 0xcc8   : > { %v14579_v57 = vcombine.low %v14574_v45, %v14574_v45  ;;  %v14589_v18 = vcombine.low %v14572_v23, %v14572_v23 }
 0xcca   : > { %5760 = vrot.lane.b32.xlu1 %v14469_v7, %s16034_s28  ;;  %6452 = vrot.lane.b32.xlu0 %v14579_v57, %s12743_s29 }
 0xccb   : > { %v14585_v8 = vpop.permute.xlu0 %5734  ;;  %v5815_v16 = vpop.permute.xlu1 %5814 }
 0xccc   : > { %v5820_v9 = vsel %vm1028_vm2, %v5815_v16, 0  ;;  %11834 = vmatmul.mubr.msk.bf16.vlgmr.msra.gmra.mxu1 %vm1028_vm2, %v14449_v11  ;;  %v14605_v21 = vcombine.low %v14585_v8, %v14585_v8 }
 0xccd   : > { %11838 = vmatpush3.bf16.xpose.msra.mxu1 %v5820_v9  ;;  %11839 = vmatprep.mubr.msk.bf16.mxu1 %vm12742_vm1, %v16004_v29 }
 0xcce   : > { %6502 = vrot.lane.b32.xlu1 %v14589_v18, %s12743_s29  ;;  %5762 = vrot.lane.b32.xlu0 %v14475_v6, %s16034_s28 }
 0xccf   : > { %v5863_v20 = vpop.permute.xlu0 %5862  ;;  %v14600_v50 = vpop.permute.xlu1 %5736  ;;  %11849 = vmatprep.subr.bf16.mxu1 %v16004_v29 }
 0xcd0   : > { %v5868_v48 = vsel %vm1028_vm2, %v5863_v20, 0  ;;  %v14617_v54 = vcombine.low %v14600_v50, %v14600_v50 }
 0xcd1   : > { %11844 = vmatpush3.bf16.xpose.msra.mxu0 %v5868_v48 }
 0xcd2   : > { %5764 = vrot.lane.b32.xlu1 %v14477_v19, %s16034_s28  ;;  %6552 = vrot.lane.b32.xlu0 %v14605_v21, %s12743_s29 }
 0xcd3   : > { %v14612_v42 = vpop.permute.xlu0 %5738  ;;  %v5911_v10 = vpop.permute.xlu1 %5910  ;;  %11855 = vmatprep.subr.bf16.mxu0 %v16004_v29 }
 0xcd4   : > { %v14621_v26 = vcombine.low %v14612_v42, %v14612_v42  ;;  %v5916_v63 = vsel %vm1028_vm2, %v5911_v10, 0  ;;  %11840 = vmatmul.mubr.msk.bf16.vlgmr.msra.gmra.mxu1 %vm1028_vm2, %v14453_v22 }
 0xcd5   : > { %11850 = vmatpush3.bf16.xpose.msra.mxu1 %v5916_v63  ;;  %11851 = vmatprep.mubr.msk.bf16.mxu1 %vm12742_vm1, %v16004_v29 }
 0xcd6   : > { %6652 = vrot.lane.b32.xlu0 %v14621_v26, %s12743_s29  ;;  %6602 = vrot.lane.b32.xlu1 %v14617_v54, %s12743_s29 }
 0xcd7   : > { %v5959_v35 = vpop.permute.xlu0 %5958  ;;  %v14632_v38 = vpop.permute.xlu1 %5740  ;;  %11861 = vmatprep.subr.bf16.mxu1 %v16004_v29 }
 0xcd8   : > { %v5964_v47 = vsel %vm1028_vm2, %v5959_v35, 0  ;;  %v14638_v62 = vcombine.low %v14632_v38, %v14632_v38  ;;  %11846 = vmatmul.mubr.msk.bf16.vlgmr.msra.gmra.mxu0 %vm1028_vm2, %v14457_v5 }
 0xcd9   : > { %11856 = vmatpush3.bf16.xpose.msra.mxu0 %v5964_v47  ;;  %11857 = vmatprep.mubr.msk.bf16.mxu0 %vm12742_vm1, %v16004_v29 }
 0xcda   : > { %6702 = vrot.lane.b32.xlu1 %v14638_v62, %s12743_s29  ;;  %11867 = vmatprep.subr.bf16.mxu0 %v16004_v29 }
 0xcdb   : > { %v14647_v39 = vpop.permute.xlu0 %5742  ;;  %v6007_v34 = vpop.permute.xlu1 %6006 }
 0xcdc   : > { %v14651_v4 = vcombine.low %v14647_v39, %v14647_v39  ;;  %v6012_v44 = vsel %vm1028_vm2, %v6007_v34, 0  ;;  %11852 = vmatmul.mubr.msk.bf16.vlgmr.msra.gmra.mxu1 %vm1028_vm2, %v14461_v46 }
 0xcdd   : > { %11862 = vmatpush3.bf16.xpose.msra.mxu1 %v6012_v44  ;;  %11863 = vmatprep.mubr.msk.bf16.mxu1 %vm12742_vm1, %v16004_v29 }
 0xcde   : > { %6752 = vrot.lane.b32.xlu0 %v14651_v4, %s12743_s29  ;;  %11873 = vmatprep.subr.bf16.mxu1 %v16004_v29 }
 0xcdf   : > { %v6055_v51 = vpop.permute.xlu0 %6054  ;;  %v14661_v61 = vpop.permute.xlu1 %5744 }
 0xce0   : > { %v6060_v56 = vsel %vm1028_vm2, %v6055_v51, 0  ;;  %v14666_v30 = vcombine.low %v14661_v61, %v14661_v61  ;;  %11858 = vmatmul.mubr.msk.bf16.vlgmr.msra.gmra.mxu0 %vm1028_vm2, %v14465_v17 }
 0xce1   : > { %11868 = vmatpush3.bf16.xpose.msra.mxu0 %v6060_v56  ;;  %11869 = vmatprep.mubr.msk.bf16.mxu0 %vm12742_vm1, %v16004_v29 }
 0xce2   : > { %6802 = vrot.lane.b32.xlu1 %v14666_v30, %s12743_s29  ;;  %11879 = vmatprep.subr.bf16.mxu0 %v16004_v29 }
 0xce3   : > { %v14675_v59 = vpop.permute.xlu0 %5746  ;;  %v6103_v24 = vpop.permute.xlu1 %6102 }
 0xce4   : > { %v14679_v14 = vcombine.low %v14675_v59, %v14675_v59  ;;  %v6108_v27 = vsel %vm1028_vm2, %v6103_v24, 0  ;;  %11864 = vmatmul.mubr.msk.bf16.vlgmr.msra.gmra.mxu1 %vm1028_vm2, %v14469_v7 }
 0xce5   : > { %11874 = vmatpush3.bf16.xpose.msra.mxu1 %v6108_v27  ;;  %11875 = vmatprep.mubr.msk.bf16.mxu1 %vm12742_vm1, %v16004_v29 }
 0xce6   : > { %6852 = vrot.lane.b32.xlu0 %v14679_v14, %s12743_s29  ;;  %11885 = vmatprep.subr.bf16.mxu1 %v16004_v29 }
 0xce7   : > { %v14689_v33 = vpop.permute.xlu1 %5748 }
 0xce8   : > { %v14693_v36 = vcombine.low %v14689_v33, %v14689_v33  ;;  %11870 = vmatmul.mubr.msk.bf16.vlgmr.msra.gmra.mxu0 %vm1028_vm2, %v14475_v6 }
 0xce9   : > { %11881 = vmatprep.mubr.msk.bf16.mxu0 %vm12742_vm1, %v16004_v29 }
 0xcea   : > { %6902 = vrot.lane.b32.xlu1 %v14693_v36, %s12743_s29 }
 0xcec   : > { %11876 = vmatmul.mubr.msk.bf16.vlgmr.msra.gmra.mxu1 %vm1028_vm2, %v14477_v19 }
 0xced   : > { %11887 = vmatprep.mubr.msk.bf16.mxu1 %vm12742_vm1, %v16004_v29 }
 0xcf6   : > { %v6153_v60 = vpop.permute.xlu0 %6152 }
 0xcf7   : > { %v6158_v16 = vsel %vm1028_vm2, %v6153_v60, 0 }
 0xcf8   : > { %11880 = vmatpush3.bf16.xpose.msra.mxu0 %v6158_v16 }
 0xcf9   : > { %11891 = vmatprep.subr.bf16.mxu0 %v16004_v29 }
 0xcfa   : > { %v14707_v9 = vpop.permute.xlu0 %5750  ;;  %v6203_v20 = vpop.permute.xlu1 %6202 }
 0xcfb   : > { %v14711_v48 = vcombine.low %v14707_v9, %v14707_v9  ;;  %v6208_v10 = vsel %vm1028_vm2, %v6203_v20, 0 }
 0xcfc   : > { %11886 = vmatpush3.bf16.xpose.msra.mxu1 %v6208_v10 }
 0xcfd   : > { %6952 = vrot.lane.b32.xlu0 %v14711_v48, %s12743_s29  ;;  %11897 = vmatprep.subr.bf16.mxu1 %v16004_v29 }
 0xcfe   : > { %v6253_v63 = vpop.permute.xlu0 %6252  ;;  %v14717_v35 = vpop.permute.xlu1 %5752 }
 0xcff   : > { %v6258_v47 = vsel %vm1028_vm2, %v6253_v63, 0  ;;  %v14722_v34 = vcombine.low %v14717_v35, %v14717_v35  ;;  %11882 = vmatmul.mubr.msk.bf16.vlgmr.msra.gmra.mxu0 %vm1028_vm2, %v14513_v1 }
 0xd00   : > { %11892 = vmatpush3.bf16.xpose.msra.mxu0 %v6258_v47  ;;  %11893 = vmatprep.mubr.msk.bf16.mxu0 %vm12742_vm1, %v16004_v29 }
 0xd01   : > { %7002 = vrot.lane.b32.xlu1 %v14722_v34, %s12743_s29  ;;  %11903 = vmatprep.subr.bf16.mxu0 %v16004_v29 }
 0xd02   : > { %v14731_v44 = vpop.permute.xlu0 %5754  ;;  %v6303_v51 = vpop.permute.xlu1 %6302 }
 0xd03   : > { %v14735_v56 = vcombine.low %v14731_v44, %v14731_v44  ;;  %v6308_v24 = vsel %vm1028_vm2, %v6303_v51, 0  ;;  %11888 = vmatmul.mubr.msk.bf16.vlgmr.msra.gmra.mxu1 %vm1028_vm2, %v14521_v58 }
 0xd04   : > { %11898 = vmatpush3.bf16.xpose.msra.mxu1 %v6308_v24  ;;  %11899 = vmatprep.mubr.msk.bf16.mxu1 %vm12742_vm1, %v16004_v29 }
 0xd05   : > { %7052 = vrot.lane.b32.xlu0 %v14735_v56, %s12743_s29  ;;  %11909 = vmatprep.subr.bf16.mxu1 %v16004_v29 }
 0xd06   : > { %v14745_v1 = vpop.permute.xlu1 %5756 }
 0xd07   : > { %v14749_v27 = vcombine.low %v14745_v1, %v14745_v1  ;;  %11894 = vmatmul.mubr.msk.bf16.vlgmr.msra.gmra.mxu0 %vm1028_vm2, %v14531_v40 }
 0xd08   : > { %11905 = vmatprep.mubr.msk.bf16.mxu0 %vm12742_vm1, %v16004_v29 }
 0xd09   : > { %7102 = vrot.lane.b32.xlu1 %v14749_v27, %s12743_s29 }
 0xd0b   : > { %11900 = vmatmul.mubr.msk.bf16.vlgmr.msra.gmra.mxu1 %vm1028_vm2, %v14541_v52 }
 0xd0c   : > { %11911 = vmatprep.mubr.msk.bf16.mxu1 %vm12742_vm1, %v16004_v29 }
 0xd34   : > { %v6353_v58 = vpop.permute.xlu0 %6352 }
 0xd35   : > { %v6358_v60 = vsel %vm1028_vm2, %v6353_v58, 0 }
 0xd36   : > { %11904 = vmatpush3.bf16.xpose.msra.mxu0 %v6358_v60 }
 0xd37   : > { %11915 = vmatprep.subr.bf16.mxu0 %v16004_v29 }
 0xd38   : > { %v14763_v16 = vpop.permute.xlu0 %5758  ;;  %v6403_v40 = vpop.permute.xlu1 %6402 }
 0xd39   : > { %v14767_v20 = vcombine.low %v14763_v16, %v14763_v16  ;;  %v6408_v10 = vsel %vm1028_vm2, %v6403_v40, 0 }
 0xd3a   : > { %11910 = vmatpush3.bf16.xpose.msra.mxu1 %v6408_v10 }
 0xd3b   : > { %7152 = vrot.lane.b32.xlu0 %v14767_v20, %s12743_s29  ;;  %11921 = vmatprep.subr.bf16.mxu1 %v16004_v29 }
 0xd3c   : > { %v6453_v52 = vpop.permute.xlu0 %6452  ;;  %v14773_v63 = vpop.permute.xlu1 %5760 }
 0xd3d   : > { %v6458_v47 = vsel %vm1028_vm2, %v6453_v52, 0  ;;  %v14778_v51 = vcombine.low %v14773_v63, %v14773_v63  ;;  %11906 = vmatmul.mubr.msk.bf16.vlgmr.msra.gmra.mxu0 %vm1028_vm2, %v14553_v28 }
 0xd3e   : > { %11916 = vmatpush3.bf16.xpose.msra.mxu0 %v6458_v47  ;;  %11917 = vmatprep.mubr.msk.bf16.mxu0 %vm12742_vm1, %v16004_v29 }
 0xd3f   : > { %7202 = vrot.lane.b32.xlu1 %v14778_v51, %s12743_s29  ;;  %11927 = vmatprep.subr.bf16.mxu0 %v16004_v29 }
 0xd40   : > { %v14787_v24 = vpop.permute.xlu0 %5762  ;;  %v6503_v58 = vpop.permute.xlu1 %6502 }
 0xd41   : > { %v14791_v60 = vcombine.low %v14787_v24, %v14787_v24  ;;  %v6508_v40 = vsel %vm1028_vm2, %v6503_v58, 0  ;;  %11912 = vmatmul.mubr.msk.bf16.vlgmr.msra.gmra.mxu1 %vm1028_vm2, %v14561_v13 }
 0xd42   : > { %11922 = vmatpush3.bf16.xpose.msra.mxu1 %v6508_v40  ;;  %11923 = vmatprep.mubr.msk.bf16.mxu1 %vm12742_vm1, %v16004_v29 }
 0xd43   : > { %16035 = vst [vmem:[#allocation21_spill] sm:$0xff] %v14791_v60  ;;  %7252 = vrot.lane.b32.xlu0 %v14791_v60, %s12743_s29  ;;  %11933 = vmatprep.subr.bf16.mxu1 %v16004_v29 }
 0xd44   : > { %v6553_v28 = vpop.permute.xlu0 %6552  ;;  %v14801_v10 = vpop.permute.xlu1 %5764 }
 0xd45   : > { %v6558_v52 = vsel %vm1028_vm2, %v6553_v28, 0  ;;  %v14806_v47 = vcombine.low %v14801_v10, %v14801_v10  ;;  %11918 = vmatmul.mubr.msk.bf16.vlgmr.msra.gmra.mxu0 %vm1028_vm2, %v14574_v45 }
 0xd46   : > { %11928 = vmatpush3.bf16.xpose.msra.mxu0 %v6558_v52  ;;  %11929 = vmatprep.mubr.msk.bf16.mxu0 %vm12742_vm1, %v16004_v29 }
 0xd47   : > { %16036 = vst [vmem:[#allocation16_spill] sm:$0xff] %v14806_v47  ;;  %7734 = vrot.lane.b32.xlu0 %v14449_v11, %s16037_s30  ;;  %7302 = vrot.lane.b32.xlu1 %v14806_v47, %s12743_s29 }
 0xd48   : > { %v6603_v13 = vpop.permute.xlu1 %6602  ;;  %11939 = vmatprep.subr.bf16.mxu0 %v16004_v29  ;;  %v6653_v40 = vpop.permute.xlu0 %6652 }
 0xd49   : > { %v6608_v58 = vsel %vm1028_vm2, %v6603_v13, 0  ;;  %11924 = vmatmul.mubr.msk.bf16.vlgmr.msra.gmra.mxu1 %vm1028_vm2, %v14572_v23  ;;  %v6658_v11 = vsel %vm1028_vm2, %v6653_v40, 0 }
 0xd4a   : > { %11934 = vmatpush3.bf16.xpose.msra.mxu1 %v6608_v58  ;;  %11935 = vmatprep.mubr.msk.bf16.mxu1 %vm12742_vm1, %v16004_v29  ;;  %v14960_v58 = vld [vmem:[%s13442_s3 + $0x3] ss:$0 sm:$0xff] }
 0xd4b   : > { %7830 = vrot.lane.b32.xlu0 %v14457_v5, %s16037_s30  ;;  %7782 = vrot.lane.b32.xlu1 %v14453_v22, %s16037_s30 }
 0xd4c   : > { %11945 = vmatprep.subr.bf16.mxu1 %v16004_v29  ;;  %v6703_v45 = vpop.permute.xlu1 %6702 }
 0xd4d   : > { %11930 = vmatmul.mubr.msk.bf16.vlgmr.msra.gmra.mxu0 %vm1028_vm2, %v14585_v8  ;;  %v6708_v22 = vsel %vm1028_vm2, %v6703_v45, 0 }
 0xd4e   : > { %11940 = vmatpush3.bf16.xpose.msra.mxu0 %v6658_v11  ;;  %11941 = vmatprep.mubr.msk.bf16.mxu0 %vm12742_vm1, %v16004_v29 }
 0xd4f   : > { %7926 = vrot.lane.b32.xlu0 %v14465_v17, %s16037_s30  ;;  %7878 = vrot.lane.b32.xlu1 %v14461_v46, %s16037_s30 }
 0xd50   : > { %11951 = vmatprep.subr.bf16.mxu0 %v16004_v29  ;;  %v6753_v5 = vpop.permute.xlu0 %6752 }
 0xd51   : > { %11936 = vmatmul.mubr.msk.bf16.vlgmr.msra.gmra.mxu1 %vm1028_vm2, %v14600_v50  ;;  %v6758_v46 = vsel %vm1028_vm2, %v6753_v5, 0 }
 0xd52   : > { %11946 = vmatpush3.bf16.xpose.msra.mxu1 %v6708_v22  ;;  %11947 = vmatprep.mubr.msk.bf16.mxu1 %vm12742_vm1, %v16004_v29 }
 0xd53   : > { %8022 = vrot.lane.b32.xlu0 %v14475_v6, %s16037_s30  ;;  %7974 = vrot.lane.b32.xlu1 %v14469_v7, %s16037_s30 }
 0xd54   : > { %11957 = vmatprep.subr.bf16.mxu1 %v16004_v29  ;;  %v6803_v17 = vpop.permute.xlu1 %6802 }
 0xd55   : > { %11942 = vmatmul.mubr.msk.bf16.vlgmr.msra.gmra.mxu0 %vm1028_vm2, %v14612_v42  ;;  %v6808_v7 = vsel %vm1028_vm2, %v6803_v17, 0  ;;  %v14968_v17 = vld [vmem:[%s13442_s3 + $0x4] ss:$0 sm:$0xff] }
 0xd56   : > { %11952 = vmatpush3.bf16.xpose.msra.mxu0 %v6758_v46  ;;  %11953 = vmatprep.mubr.msk.bf16.mxu0 %vm12742_vm1, %v16004_v29 }
 0xd57   : > { %8118 = vrot.lane.b32.xlu0 %v14517_v15, %s16037_s30  ;;  %8070 = vrot.lane.b32.xlu1 %v14477_v19, %s16037_s30 }
 0xd58   : > { %11963 = vmatprep.subr.bf16.mxu0 %v16004_v29  ;;  %v6853_v6 = vpop.permute.xlu0 %6852 }
 0xd59   : > { %11948 = vmatmul.mubr.msk.bf16.vlgmr.msra.gmra.mxu1 %vm1028_vm2, %v14632_v38  ;;  %v6858_v19 = vsel %vm1028_vm2, %v6853_v6, 0  ;;  %v14938_v38 = vld [vmem:[%s13442_s3 + $0x1] ss:$0 sm:$0xff] }
 0xd5a   : > { %11958 = vmatpush3.bf16.xpose.msra.mxu1 %v6808_v7  ;;  %11959 = vmatprep.mubr.msk.bf16.mxu1 %vm12742_vm1, %v16004_v29 }
 0xd5b   : > { %8214 = vrot.lane.b32.xlu0 %v14535_v41, %s16037_s30  ;;  %8166 = vrot.lane.b32.xlu1 %v14525_v12, %s16037_s30 }
 0xd5c   : > { %11969 = vmatprep.subr.bf16.mxu1 %v16004_v29  ;;  %v6903_v15 = vpop.permute.xlu1 %6902 }
 0xd5d   : > { %11954 = vmatmul.mubr.msk.bf16.vlgmr.msra.gmra.mxu0 %vm1028_vm2, %v14647_v39  ;;  %v6908_v12 = vsel %vm1028_vm2, %v6903_v15, 0 }
 0xd5e   : > { %11964 = vmatpush3.bf16.xpose.msra.mxu0 %v6858_v19  ;;  %11965 = vmatprep.mubr.msk.bf16.mxu0 %vm12742_vm1, %v16004_v29 }
 0xd5f   : > { %8310 = vrot.lane.b32.xlu0 %v14557_v55, %s16037_s30  ;;  %8262 = vrot.lane.b32.xlu1 %v14545_v43, %s16037_s30 }
 0xd60   : > { %11975 = vmatprep.subr.bf16.mxu0 %v16004_v29 }
 0xd61   : > { %11960 = vmatmul.mubr.msk.bf16.vlgmr.msra.gmra.mxu1 %vm1028_vm2, %v14661_v61 }
 0xd62   : > { %11970 = vmatpush3.bf16.xpose.msra.mxu1 %v6908_v12  ;;  %11971 = vmatprep.mubr.msk.bf16.mxu1 %vm12742_vm1, %v16004_v29  ;;  %v14976_v12 = vld [vmem:[%s13442_s3 + $0x5] ss:$0 sm:$0xff] }
 0xd63   : > { %8406 = vrot.lane.b32.xlu0 %v14579_v57, %s16037_s30  ;;  %8454 = vrot.lane.b32.xlu1 %v14589_v18, %s16037_s30 }
 0xd64   : > { %11981 = vmatprep.subr.bf16.mxu1 %v16004_v29 }
 0xd65   : > { %11966 = vmatmul.mubr.msk.bf16.vlgmr.msra.gmra.mxu0 %vm1028_vm2, %v14675_v59 }
 0xd66   : > { %11977 = vmatprep.mubr.msk.bf16.mxu0 %vm12742_vm1, %v16004_v29 }
 0xd67   : > { %8502 = vrot.lane.b32.xlu0 %v14605_v21, %s16037_s30  ;;  %8550 = vrot.lane.b32.xlu1 %v14617_v54, %s16037_s30 }
 0xd69   : > { %11972 = vmatmul.mubr.msk.bf16.vlgmr.msra.gmra.mxu1 %vm1028_vm2, %v14689_v33 }
 0xd6a   : > { %11983 = vmatprep.mubr.msk.bf16.mxu1 %vm12742_vm1, %v16004_v29 }
 0xd6b   : > { %8598 = vrot.lane.b32.xlu0 %v14621_v26, %s16037_s30  ;;  %8646 = vrot.lane.b32.xlu1 %v14638_v62, %s16037_s30 }
 0xd6f   : > { %8694 = vrot.lane.b32.xlu0 %v14651_v4, %s16037_s30  ;;  %8838 = vrot.lane.b32.xlu1 %v14693_v36, %s16037_s30  ;;  %v6953_v41 = vpop.permute.xlu0 %6952 }
 0xd70   : > { %v6958_v43 = vsel %vm1028_vm2, %v6953_v41, 0 }
 0xd71   : > { %11976 = vmatpush3.bf16.xpose.msra.mxu0 %v6958_v43 }
 0xd72   : > { %11987 = vmatprep.subr.bf16.mxu0 %v16004_v29 }
 0xd73   : > { %8790 = vrot.lane.b32.xlu0 %v14679_v14, %s16037_s30  ;;  %8358 = vrot.lane.b32.xlu1 %v14566_v31, %s16037_s30  ;;  %v7003_v55 = vpop.permute.xlu1 %7002 }
 0xd74   : > { %v7008_v23 = vsel %vm1028_vm2, %v7003_v55, 0 }
 0xd75   : > { %11982 = vmatpush3.bf16.xpose.msra.mxu1 %v7008_v23 }
 0xd76   : > { %11993 = vmatprep.subr.bf16.mxu1 %v16004_v29 }
 0xd77   : > { %8742 = vrot.lane.b32.xlu1 %v14666_v30, %s16037_s30  ;;  %v7053_v57 = vpop.permute.xlu0 %7052  ;;  %v14944_v30 = vld [vmem:[%s13442_s3 + $0x2] ss:$0 sm:$0xff] }
 0xd78   : > { %v7058_v8 = vsel %vm1028_vm2, %v7053_v57, 0  ;;  %11978 = vmatmul.mubr.msk.bf16.vlgmr.msra.gmra.mxu0 %vm1028_vm2, %v14707_v9  ;;  %v14952_v9 = vld [vmem:[%s13442_s3] ss:$0 sm:$0xff] }
 0xd79   : > { %11988 = vmatpush3.bf16.xpose.msra.mxu0 %v7058_v8  ;;  %11989 = vmatprep.mubr.msk.bf16.mxu0 %vm12742_vm1, %v16004_v29 }
 0xd7a   : > { %11999 = vmatprep.subr.bf16.mxu0 %v16004_v29 }
 0xd7b   : > { %v7103_v31 = vpop.permute.xlu1 %7102 }
 0xd7c   : > { %v7108_v18 = vsel %vm1028_vm2, %v7103_v31, 0  ;;  %11984 = vmatmul.mubr.msk.bf16.vlgmr.msra.gmra.mxu1 %vm1028_vm2, %v14717_v35 }
 0xd7d   : > { %11994 = vmatpush3.bf16.xpose.msra.mxu1 %v7108_v18  ;;  %11995 = vmatprep.mubr.msk.bf16.mxu1 %vm12742_vm1, %v16004_v29  ;;  %v14986_v18 = vld [vmem:[%s13442_s3 + $0x6] ss:$0 sm:$0xff] }
 0xd7e   : > { %12005 = vmatprep.subr.bf16.mxu1 %v16004_v29 }
 0xd80   : > { %11990 = vmatmul.mubr.msk.bf16.vlgmr.msra.gmra.mxu0 %vm1028_vm2, %v14731_v44 }
 0xd81   : > { %12001 = vmatprep.mubr.msk.bf16.mxu0 %vm12742_vm1, %v16004_v29 }
 0xd84   : > { %11996 = vmatmul.mubr.msk.bf16.vlgmr.msra.gmra.mxu1 %vm1028_vm2, %v14745_v1 }
 0xd85   : > { %12007 = vmatprep.mubr.msk.bf16.mxu1 %vm12742_vm1, %v16004_v29 }
 0xd8c   : > { %v5808_v50 = vpop.f32.mrf.mxu1 }
 0xd8d   : > { %v14955_v35 = vadd.f32 %v14952_v9, %v5808_v50 }
 0xd8e   : > { %v11835_v21 = vpop.f32.mrf.mxu1 }
 0xd8f   : > { %v7350_v11 = vsel %vm1028_vm2, %v14955_v35, -inf }
 0xd90   : > { %v5811_v42 = vpop.f32.mrf.mxu1 }
 0xd92   : > { %v11836_v54 = vpop.f32.mrf.mxu1 }
 0xd94   : > { %v5856_v26 = vpop.f32.mrf.mxu1 }
 0xd95   : > { %v14941_v62 = vadd.f32 %v14938_v38, %v5856_v26 }
 0xd96   : > { %v11841_v39 = vpop.f32.mrf.mxu1 }
 0xd97   : > { %v7353_v36 = vsel %vm1028_vm2, %v14941_v62, -inf }
 0xd98   : > { %v5859_v4 = vpop.f32.mrf.mxu1  ;;  %v5904_v61 = vpop.f32.mrf.mxu0 }
 0xd99   : > { %v14947_v59 = vadd.f32 %v14944_v30, %v5904_v61  ;;  %v14994_v4 = vld [vmem:[%s13442_s3 + $0x7] ss:$0 sm:$0xff]  ;;  %s648_s3 = scalar_lea.vmem %s15945_s20, %s10597_s27 }
 0xd9a   : > { %v11842_v14 = vpop.f32.mrf.mxu1  ;;  %v11847_v33 = vpop.f32.mrf.mxu0 }
 0xd9b   : > { %7354 = vmax.xlane.f32.xlu1 %v7353_v36  ;;  %v7356_v44 = vsel %vm1028_vm2, %v14947_v59, -inf }
 0xd9c   : > { %v5907_v1 = vpop.f32.mrf.mxu0  ;;  %7357 = vmax.xlane.f32.xlu0 %v7356_v44  ;;  %v5952_v28 = vpop.f32.mrf.mxu1 }
 0xd9d   : > { %v14963_v40 = vadd.f32 %v14960_v58, %v5952_v28 }
 0xd9e   : > { %v11848_v52 = vpop.f32.mrf.mxu0  ;;  %v11853_v13 = vpop.f32.mrf.mxu1 }
 0xd9f   : > { %v7359_v6 = vsel %vm1028_vm2, %v14963_v40, -inf }
 0xda0   : > { %v6000_v45 = vpop.f32.mrf.mxu0  ;;  %7351 = vmax.xlane.f32.xlu0 %v7350_v11  ;;  %v5955_v22 = vpop.f32.mrf.mxu1 }
 0xda1   : > { %v14971_v7 = vadd.f32 %v14968_v17, %v6000_v45 }
 0xda2   : > { %v11854_v5 = vpop.f32.mrf.mxu1  ;;  %v11859_v46 = vpop.f32.mrf.mxu0 }
 0xda3   : > { %v7362_v23 = vsel %vm1028_vm2, %v14971_v7, -inf }
 0xda4   : > { %v6003_v19 = vpop.f32.mrf.mxu0  ;;  %7360 = vmax.xlane.f32.xlu0 %v7359_v6  ;;  %v6048_v15 = vpop.f32.mrf.mxu1 }
 0xda5   : > { %v14979_v41 = vadd.f32 %v14976_v12, %v6048_v15 }
 0xda6   : > { %v11860_v43 = vpop.f32.mrf.mxu0  ;;  %v11865_v55 = vpop.f32.mrf.mxu1 }
 0xda7   : > { %v7365_v57 = vsel %vm1028_vm2, %v14979_v41, -inf }
 0xda8   : > { %v6096_v8 = vpop.f32.mrf.mxu0  ;;  %7363 = vmax.xlane.f32.xlu0 %v7362_v23  ;;  %v6051_v31 = vpop.f32.mrf.mxu1  ;;  %7366 = vmax.xlane.f32.xlu1 %v7365_v57 }
 0xda9   : > { %v14989_v50 = vadd.f32 %v14986_v18, %v6096_v8 }
 0xdaa   : > { %v11866_v21 = vpop.f32.mrf.mxu1  ;;  %v11871_v42 = vpop.f32.mrf.mxu0 }
 0xdab   : > { %v7368_v54 = vsel %vm1028_vm2, %v14989_v50, -inf }
 0xdac   : > { %v6099_v26 = vpop.f32.mrf.mxu0  ;;  %7369 = vmax.xlane.f32.xlu0 %v7368_v54  ;;  %v6144_v39 = vpop.f32.mrf.mxu1 }
 0xdad   : > { %v14997_v61 = vadd.f32 %v14994_v4, %v6144_v39  ;;  %v7153_v14 = vpop.permute.xlu0 %7152 }
 0xdae   : > { %v7158_v33 = vsel %vm1028_vm2, %v7153_v14, 0  ;;  %v11872_v36 = vpop.f32.mrf.mxu0  ;;  %v11877_v44 = vpop.f32.mrf.mxu1 }
 0xdaf   : > { %12000 = vmatpush3.bf16.xpose.msra.mxu0 %v7158_v33  ;;  %v7371_v1 = vsel %vm1028_vm2, %v14997_v61, -inf }
 0xdb0   : > { %v6147_v28 = vpop.f32.mrf.mxu1  ;;  %7372 = vmax.xlane.f32.xlu1 %v7371_v1  ;;  %12011 = vmatprep.subr.bf16.mxu0 %v16004_v29 }
 0xdb1   : > { %v7203_v52 = vpop.permute.xlu1 %7202 }
 0xdb2   : > { %v7208_v13 = vsel %vm1028_vm2, %v7203_v52, 0  ;;  %v11878_v11 = vpop.f32.mrf.mxu1 }
 0xdb3   : > { %12006 = vmatpush3.bf16.xpose.msra.mxu1 %v7208_v13 }
 0xdb4   : > { %12017 = vmatprep.subr.bf16.mxu1 %v16004_v29 }
 0xdb5   : > { %v7253_v45 = vpop.permute.xlu0 %7252 }
 0xdb6   : > { %v7258_v22 = vsel %vm1028_vm2, %v7253_v45, 0  ;;  %12002 = vmatmul.mubr.msk.bf16.vlgmr.msra.gmra.mxu0 %vm1028_vm2, %v14763_v16 }
 0xdb7   : > { %12012 = vmatpush3.bf16.xpose.msra.mxu0 %v7258_v22  ;;  %12013 = vmatprep.mubr.msk.bf16.mxu0 %vm12742_vm1, %v16004_v29 }
 0xdb8   : > { %12023 = vmatprep.subr.bf16.mxu0 %v16004_v29 }
 0xdb9   : > { %v7303_v5 = vpop.permute.xlu1 %7302  ;;  %v7735_v6 = vpop.permute.xlu0 %7734 }
 0xdba   : > { %v7308_v46 = vsel %vm1028_vm2, %v7303_v5, 0  ;;  %12008 = vmatmul.mubr.msk.bf16.vlgmr.msra.gmra.mxu1 %vm1028_vm2, %v14773_v63  ;;  %v7740_v16 = vsel %vm3000_vm3, %v7735_v6, 0 }
 0xdbb   : > { %12018 = vmatpush3.bf16.xpose.msra.mxu1 %v7308_v46  ;;  %12019 = vmatprep.mubr.msk.bf16.mxu1 %vm12742_vm1, %v16004_v29 }
 0xdbc   : > { %12029 = vmatprep.subr.bf16.mxu1 %v16004_v29 }
 0xdbd   : > { %v7783_v19 = vpop.permute.xlu1 %7782  ;;  %v15049_v22 = vpop.permute.xlu0 %7830 }
 0xdbe   : > { %12014 = vmatmul.mubr.msk.bf16.vlgmr.msra.gmra.mxu0 %vm1028_vm2, %v14787_v24  ;;  %v7788_v43 = vsel %vm3000_vm3, %v7783_v19, 0 }
 0xdbf   : > { %12024 = vmatpush3.bf16.msra.mxu0 %v7740_v16  ;;  %v6194_v15 = vpop.f32.mrf.mxu0  ;;  %12025 = vmatprep.mubr.msk.bf16.mxu0 %vm12742_vm1, %v16004_v29 }
 0xdc0   : > { %v15023_v63 = vadd.f32 %v14952_v9, %v6194_v15  ;;  %12035 = vmatprep.subr.bf16.mxu0 %v16004_v29 }
 0xdc1   : > { %v11883_v55 = vpop.f32.mrf.mxu0  ;;  %v15051_v5 = vpop.permute.xlu0 %7926 }
 0xdc2   : > { %12020 = vmatmul.mubr.msk.bf16.vlgmr.msra.gmra.mxu1 %vm1028_vm2, %v14801_v10  ;;  %v7374_v24 = vsel %vm1028_vm2, %v15023_v63, -inf  ;;  %v15053_v46 = vpop.permute.xlu1 %7878 }
 0xdc3   : > { %12030 = vmatpush3.bf16.msra.mxu1 %v7788_v43  ;;  %7375 = vmax.xlane.f32.xlu0 %v7374_v24  ;;  %v6244_v23 = vpop.f32.mrf.mxu1  ;;  %v6197_v57 = vpop.f32.mrf.mxu0 }
 0xdc4   : > { %v15032_v8 = vadd.f32 %v14938_v38, %v6244_v23  ;;  %12031 = vmatprep.mubr.msk.bf16.mxu1 %vm12742_vm1, %v16004_v29  ;;  %12041 = vmatprep.subr.bf16.mxu1 %v16004_v29 }
 0xdc5   : > { %v11884_v31 = vpop.f32.mrf.mxu0  ;;  %v11889_v21 = vpop.f32.mrf.mxu1 }
 0xdc6   : > { %v7377_v10 = vsel %vm1028_vm2, %v15032_v8, -inf  ;;  %v15055_v6 = vpop.permute.xlu0 %8022  ;;  %v15057_v16 = vpop.permute.xlu1 %7974 }
 0xdc7   : > { %7378 = vmax.xlane.f32.xlu1 %v7377_v10  ;;  %v6247_v42 = vpop.f32.mrf.mxu1  ;;  %v6294_v54 = vpop.f32.mrf.mxu0 }
 0xdc8   : > { %v15040_v26 = vadd.f32 %v14944_v30, %v6294_v54 }
 0xdc9   : > { %v11890_v39 = vpop.f32.mrf.mxu1  ;;  %v11895_v14 = vpop.f32.mrf.mxu0 }
 0xdca   : > { %v7380_v33 = vsel %vm1028_vm2, %v15040_v26, -inf  ;;  %v15059_v19 = vpop.permute.xlu0 %8118  ;;  %v15061_v15 = vpop.permute.xlu1 %8070 }
 0xdcb   : > { %v6297_v36 = vpop.f32.mrf.mxu0  ;;  %7381 = vmax.xlane.f32.xlu0 %v7380_v33  ;;  %v6344_v44 = vpop.f32.mrf.mxu1 }
 0xdcc   : > { %v15045_v1 = vadd.f32 %v14960_v58, %v6344_v44 }
 0xdcd   : > { %v11896_v28 = vpop.f32.mrf.mxu0  ;;  %v11901_v52 = vpop.f32.mrf.mxu1 }
 0xdce   : > { %v7383_v13 = vsel %vm1028_vm2, %v15045_v1, -inf  ;;  %v15063_v55 = vpop.permute.xlu0 %8214  ;;  %v15070_v10 = vpop.permute.xlu1 %8166 }
 0xdcf   : > { %v6347_v11 = vpop.f32.mrf.mxu1  ;;  %7384 = vmax.xlane.f32.xlu1 %v7383_v13 }
 0xdd1   : > { %v11902_v45 = vpop.f32.mrf.mxu1 }
 0xdd2   : > { %v15075_v14 = vpop.permute.xlu0 %8310  ;;  %v15082_v11 = vpop.permute.xlu1 %8262 }
 0xdfd   : > { %v6394_v43 = vpop.f32.mrf.mxu0 }
 0xdfe   : > { %v15066_v24 = vadd.f32 %v14968_v17, %v6394_v43 }
 0xdff   : > { %v11907_v23 = vpop.f32.mrf.mxu0 }
 0xe00   : > { %v7386_v57 = vsel %vm1028_vm2, %v15066_v24, -inf }
 0xe01   : > { %v6397_v31 = vpop.f32.mrf.mxu0  ;;  %7387 = vmax.xlane.f32.xlu0 %v7386_v57  ;;  %v6444_v21 = vpop.f32.mrf.mxu1 }
 0xe02   : > { %v15073_v42 = vadd.f32 %v14976_v12, %v6444_v21  ;;  %v15088_v57 = vpop.permute.xlu0 %8406 }
 0xe03   : > { %v11908_v54 = vpop.f32.mrf.mxu0  ;;  %v11913_v39 = vpop.f32.mrf.mxu1 }
 0xe04   : > { %v7389_v33 = vsel %vm1028_vm2, %v15073_v42, -inf }
 0xe05   : > { %v6447_v36 = vpop.f32.mrf.mxu1  ;;  %v6494_v44 = vpop.f32.mrf.mxu0  ;;  %7390 = vmax.xlane.f32.xlu1 %v7389_v33 }
 0xe06   : > { %v15080_v28 = vadd.f32 %v14986_v18, %v6494_v44  ;;  %v15090_v33 = vpop.permute.xlu1 %8454 }
 0xe07   : > { %v11914_v52 = vpop.f32.mrf.mxu1  ;;  %v11919_v13 = vpop.f32.mrf.mxu0 }
 0xe08   : > { %v7392_v45 = vsel %vm1028_vm2, %v15080_v28, -inf  ;;  %v15092_v52 = vpop.permute.xlu0 %8502 }
 0xe09   : > { %v6497_v43 = vpop.f32.mrf.mxu0  ;;  %7393 = vmax.xlane.f32.xlu0 %v7392_v45  ;;  %v15086_v23 = vpop.f32.mrf.mxu1  ;;  %16038 = vst [vmem:[#allocation19_spill] sm:$0xff] %v15092_v52 }
 0xe0a   : > { %v15096_v45 = vpop.permute.xlu1 %8550 }
 0xe0b   : > { %v11920_v31 = vpop.f32.mrf.mxu0  ;;  %v11925_v21 = vpop.f32.mrf.mxu1  ;;  %16039 = vst [vmem:[#allocation20_spill] sm:$0xff] %v15096_v45 }
 0xe0c   : > { %v15100_v31 = vpop.permute.xlu0 %8598 }
 0xe0d   : > { %v6547_v54 = vpop.f32.mrf.mxu1  ;;  %v6594_v39 = vpop.f32.mrf.mxu0  ;;  %16040 = vst [vmem:[#allocation22_spill] sm:$0xff] %v15100_v31 }
 0xe0f   : > { %v11926_v36 = vpop.f32.mrf.mxu1  ;;  %v11931_v44 = vpop.f32.mrf.mxu0 }
 0xe11   : > { %v6597_v13 = vpop.f32.mrf.mxu0  ;;  %v15094_v37 = vpop.f32.mrf.mxu1 }
 0xe12   : > { %v15106_v13 = vpop.permute.xlu1 %8646 }
 0xe13   : > { %v11932_v25 = vpop.f32.mrf.mxu0  ;;  %v11937_v43 = vpop.f32.mrf.mxu1  ;;  %16041 = vst [vmem:[#allocation2_spill] sm:$0xff] %v15106_v13 }
 0xe15   : > { %v6647_v53 = vpop.f32.mrf.mxu1  ;;  %v15098_v3 = vpop.f32.mrf.mxu0 }
 0xe16   : > { %8934 = vrot.lane.b32.xlu1 %v14722_v34, %s16037_s30  ;;  %v15110_v53 = vpop.permute.xlu0 %8694 }
 0xe17   : > { %v11938_v21 = vpop.f32.mrf.mxu1  ;;  %v11943_v54 = vpop.f32.mrf.mxu0  ;;  %16042 = vst [vmem:[#allocation4_spill] sm:$0xff] %v15110_v53 }
 0xe18   : > { %v15118_v54 = vpop.permute.xlu1 %8838 }
 0xe19   : > { %v6697_v36 = vpop.f32.mrf.mxu0  ;;  %v15104_v44 = vpop.f32.mrf.mxu1  ;;  %16043 = vst [vmem:[#allocation3_spill] sm:$0xff] %v15118_v54 }
 0xe1a   : > { %8982 = vrot.lane.b32.xlu1 %v14735_v56, %s16037_s30  ;;  %v15122_v56 = vpop.permute.xlu0 %8790 }
 0xe1b   : > { %v11944_v25 = vpop.f32.mrf.mxu0  ;;  %v11949_v43 = vpop.f32.mrf.mxu1  ;;  %16044 = vst [vmem:[#allocation5_spill] sm:$0xff] %v15122_v56 }
 0xe1c   : > { %v15126_v53 = vpop.permute.xlu1 %8358 }
 0xe1d   : > { %v6747_v2 = vpop.f32.mrf.mxu1  ;;  %v15112_v32 = vpop.f32.mrf.mxu0 }
 0xe1e   : > { %9030 = vrot.lane.b32.xlu1 %v14749_v27, %s16037_s30 }
 0xe1f   : > { %v11955_v34 = vpop.f32.mrf.mxu0  ;;  %8886 = vrot.lane.b32.xlu0 %v14711_v48, %s16037_s30  ;;  %v11950_v21 = vpop.f32.mrf.mxu1 }
 0xe20   : > { %v15131_v31 = vpop.permute.xlu1 %8742 }
 0xe21   : > { %v6797_v36 = vpop.f32.mrf.mxu0  ;;  %v15120_v49 = vpop.f32.mrf.mxu1  ;;  %16045 = vst [vmem:[#allocation6_spill] sm:$0xff] %v15131_v31 }
 0xe23   : > { %v11956_v25 = vpop.f32.mrf.mxu0  ;;  %v11961_v43 = vpop.f32.mrf.mxu1 }
 0xe24   : > { %v7355_v47 = vpop.xlane.xlu1 %7354 }
 0xe25   : > { %v15124_v2 = vpop.f32.mrf.mxu0  ;;  %v7358_v0 = vpop.xlane.xlu0 %7357 }
 0xe26   : > { %v6847_v13 = vpop.f32.mrf.mxu1  ;;  %v7448_v48 = vsub.f32 %v14947_v59, %v7358_v0  ;;  %v15138_v59 = vadd.f32 %v14952_v9, %v6594_v39 }
 0xe27   : > { %v11967_v27 = vpop.f32.mrf.mxu0 }
 0xe28   : > { %v11962_v34 = vpop.f32.mrf.mxu1  ;;  %v7482_v56 = vmul.f32 1.442695, %v7448_v48  ;;  %v7447_v27 = vsub.f32 %v14941_v62, %v7355_v47  ;;  %v7398_v62 = vsel %vm1028_vm2, %v15138_v59, -inf }
 0xe29   : > { %v6897_v21 = vpop.f32.mrf.mxu0  ;;  %v7352_v25 = vpop.xlane.xlu0 %7351 }
 0xe2a   : > { %v15129_v45 = vpop.f32.mrf.mxu1  ;;  %12546 = vpow2.f32 %v7482_v56  ;;  %v7446_v13 = vsub.f32 %v14955_v35, %v7352_v25  ;;  %v15145_v35 = vadd.f32 %v14994_v4, %v15086_v23  ;;  %v15160_v23 = vadd.f32 %v14944_v30, %v15098_v3 }
 0xe2b   : > { %v11968_v36 = vpop.f32.mrf.mxu0 }
 0xe2c   : > { %v11973_v54 = vpop.f32.mrf.mxu1  ;;  %v7478_v34 = vmul.f32 1.442695, %v7446_v13 }
 0xe2d   : > { %v7361_v52 = vpop.xlane.xlu0 %7360  ;;  %v7480_v54 = vmul.f32 1.442695, %v7447_v27 }
 0xe2e   : > { %v6947_v43 = vpop.f32.mrf.mxu1  ;;  %12548 = vpow2.f32 %v7478_v34  ;;  %v7449_v36 = vsub.f32 %v14963_v40, %v7361_v52  ;;  %v15154_v40 = vadd.f32 %v14938_v38, %v15094_v37 }
 0xe2f   : > { %12550 = vpow2.f32 %v7480_v54 }
 0xe30   : > { %v11974_v60 = vpop.f32.mrf.mxu1  ;;  %v7484_v52 = vmul.f32 1.442695, %v7449_v36  ;;  %v7401_v3 = vsel %vm1028_vm2, %v15154_v40, -inf }
 0xe31   : > { %v7364_v21 = vpop.xlane.xlu0 %7363  ;;  %v7367_v34 = vpop.xlane.xlu1 %7366 }
 0xe32   : > { %v7450_v47 = vsub.f32 %v14971_v7, %v7364_v21  ;;  %12552 = vpow2.f32 %v7484_v52 }
 0xe34   : > { %v7486_v7 = vmul.f32 1.442695, %v7450_v47  ;;  %v15171_v47 = vadd.f32 %v14960_v58, %v15104_v44 }
 0xe35   : > { %v7370_v54 = vpop.xlane.xlu0 %7369 }
 0xe36   : > { %12554 = vpow2.f32 %v7486_v7 }
 0xe37   : > { %v15150_v39 = vpop.eup %12546 }
 0xe38   : > { %v15135_v0 = vpop.f32.mrf.mxu0  ;;  %v7548_v21 = vsel %vm1028_vm2, %v15150_v39, 0.0 }
 0xe3a   : > { %v11979_v48 = vpop.f32.mrf.mxu0 }
 0xe3b   : > { %v7395_v48 = vsel %vm1028_vm2, %v15145_v35, -inf }
 0xe3c   : > { %v6997_v60 = vpop.f32.mrf.mxu0  ;;  %v15141_v56 = vpop.f32.mrf.mxu1 }
 0xe3d   : > { %v7451_v60 = vsub.f32 %v14979_v41, %v7367_v34  ;;  %v15180_v34 = vadd.f32 %v14968_v17, %v15112_v32 }
 0xe3e   : > { %7399 = vmax.xlane.f32.xlu0 %v7398_v62  ;;  %v11980_v25 = vpop.f32.mrf.mxu0  ;;  %v11985_v43 = vpop.f32.mrf.mxu1 }
 0xe3f   : > { %v7452_v43 = vsub.f32 %v14989_v50, %v7370_v54  ;;  %v7407_v50 = vsel %vm1028_vm2, %v15171_v47, -inf  ;;  %v7410_v32 = vsel %vm1028_vm2, %v15180_v34, -inf }
 0xe40   : > { %v7047_v13 = vpop.f32.mrf.mxu1  ;;  %v15156_v27 = vpop.f32.mrf.mxu0 }
 0xe41   : > { %v7404_v13 = vsel %vm1028_vm2, %v15160_v23, -inf  ;;  %v7490_v44 = vmul.f32 1.442695, %v7452_v43 }
 0xe42   : > { %7549 = vadd.xlane.f32.xlu0 %v7548_v21  ;;  %7396 = vmax.xlane.f32.xlu1 %v7395_v48  ;;  %v11986_v37 = vpop.f32.mrf.mxu1  ;;  %v11991_v36 = vpop.f32.mrf.mxu0  ;;  %v7488_v48 = vmul.f32 1.442695, %v7451_v60  ;;  %v15196_v60 = vadd.f32 %v14986_v18, %v15124_v2  ;;  %v15215_v2 = vadd.f32 %v14952_v9, %v15135_v0  ;;  %v15231_v9 = vadd.f32 %v14938_v38, %v15141_v56 }
 0xe43   : > { %v15176_v21 = vpop.eup %12548  ;;  %v7373_v36 = vpop.xlane.xlu1 %7372  ;;  %v15235_v0 = vadd.f32 %v14944_v30, %v15156_v27 }
 0xe44   : > { %v7097_v62 = vpop.f32.mrf.mxu0  ;;  %v7144_v25 = vpop.f32.mrf.mxu1  ;;  %v7542_v7 = vsel %vm1028_vm2, %v15176_v21, 0.0  ;;  %12556 = vpow2.f32 %v7488_v48  ;;  %v7453_v43 = vsub.f32 %v14997_v61, %v7373_v36  ;;  %v15211_v61 = vadd.f32 %v14994_v4, %v15129_v45 }
 0xe45   : > { %v15186_v54 = vpop.eup %12550  ;;  %12558 = vpow2.f32 %v7490_v44  ;;  %v7422_v36 = vsel %vm1028_vm2, %v15215_v2, -inf  ;;  %v15248_v30 = vadd.f32 %v14960_v58, %v7144_v25 }
 0xe46   : > { %7405 = vmax.xlane.f32.xlu0 %v7404_v13  ;;  %7402 = vmax.xlane.f32.xlu1 %v7401_v3  ;;  %v11992_v41 = vpop.f32.mrf.mxu0  ;;  %v11997_v52 = vpop.f32.mrf.mxu1  ;;  %v15190_v3 = vadd.f32 %v14976_v12, %v15120_v49  ;;  %v7545_v13 = vsel %vm1028_vm2, %v15186_v54, 0.0  ;;  %v7492_v49 = vmul.f32 1.442695, %v7453_v43  ;;  %v7419_v45 = vsel %vm1028_vm2, %v15211_v61, -inf }
 0xe47   : > { %v15201_v41 = vpop.eup %12552  ;;  %v7416_v52 = vsel %vm1028_vm2, %v15196_v60, -inf  ;;  %v7431_v27 = vsel %vm1028_vm2, %v15248_v30, -inf }
 0xe48   : > { %v7147_v37 = vpop.f32.mrf.mxu1  ;;  %v7413_v48 = vsel %vm1028_vm2, %v15190_v3, -inf  ;;  %12560 = vpow2.f32 %v7492_v49  ;;  %v7425_v49 = vsel %vm1028_vm2, %v15231_v9, -inf }
 0xe49   : > { %v15207_v37 = vpop.eup %12554 }
 0xe4a   : > { %7543 = vadd.xlane.f32.xlu0 %v7542_v7  ;;  %7408 = vmax.xlane.f32.xlu1 %v7407_v50  ;;  %v11998_v62 = vpop.f32.mrf.mxu1  ;;  %v7554_v44 = vsel %vm1028_vm2, %v15207_v37, 0.0  ;;  %v7551_v7 = vsel %vm1028_vm2, %v15201_v41, 0.0 }
 0xe4e   : > { %7411 = vmax.xlane.f32.xlu0 %v7410_v32  ;;  %7546 = vadd.xlane.f32.xlu1 %v7545_v13  ;;  %v7428_v13 = vsel %vm1028_vm2, %v15235_v0, -inf }
 0xe51   : > { %v15221_v50 = vpop.eup %12556 }
 0xe52   : > { %7417 = vmax.xlane.f32.xlu0 %v7416_v52  ;;  %7414 = vmax.xlane.f32.xlu1 %v7413_v48  ;;  %v15227_v62 = vpop.eup %12558  ;;  %v7557_v43 = vsel %vm1028_vm2, %v15221_v50, 0.0  ;;  %v7376_v52 = vpop.xlane.xlu0 %7375 }
 0xe53   : > { %v7560_v32 = vsel %vm1028_vm2, %v15227_v62, 0.0  ;;  %v7379_v48 = vpop.xlane.xlu1 %7378 }
 0xe55   : > { %v15245_v38 = vpop.eup %12560 }
 0xe56   : > { %7555 = vadd.xlane.f32.xlu0 %v7554_v44  ;;  %7552 = vadd.xlane.f32.xlu1 %v7551_v7  ;;  %v7563_v56 = vsel %vm1028_vm2, %v15245_v38, 0.0  ;;  %v7455_v44 = vsub.f32 %v15032_v8, %v7379_v48  ;;  %v7382_v7 = vpop.xlane.xlu0 %7381 }
 0xe58   : > { %v7385_v58 = vpop.xlane.xlu1 %7384 }
 0xe5a   : > { %7423 = vmax.xlane.f32.xlu0 %v7422_v36  ;;  %7420 = vmax.xlane.f32.xlu1 %v7419_v45  ;;  %v7454_v36 = vsub.f32 %v15023_v63, %v7376_v52  ;;  %v7496_v45 = vmul.f32 1.442695, %v7455_v44 }
 0xe5c   : > { %v7494_v25 = vmul.f32 1.442695, %v7454_v36  ;;  %12562 = vpow2.f32 %v7496_v45 }
 0xe5e   : > { %7561 = vadd.xlane.f32.xlu0 %v7560_v32  ;;  %7558 = vadd.xlane.f32.xlu1 %v7557_v43  ;;  %v7456_v32 = vsub.f32 %v15040_v26, %v7382_v7  ;;  %12564 = vpow2.f32 %v7494_v25 }
 0xe60   : > { %v7498_v43 = vmul.f32 1.442695, %v7456_v32 }
 0xe62   : > { %7429 = vmax.xlane.f32.xlu0 %v7428_v13  ;;  %7426 = vmax.xlane.f32.xlu1 %v7425_v49  ;;  %v7457_v13 = vsub.f32 %v15045_v1, %v7385_v58  ;;  %12566 = vpow2.f32 %v7498_v43 }
 0xe64   : > { %v7500_v8 = vmul.f32 1.442695, %v7457_v13 }
 0xe66   : > { %7564 = vadd.xlane.f32.xlu1 %v7563_v56  ;;  %12568 = vpow2.f32 %v7500_v8 }
 0xe69   : > { %v15273_v43 = vpop.eup %12562 }
 0xe6a   : > { %7432 = vmax.xlane.f32.xlu1 %v7431_v27 }
 0xe76   : > { %v7194_v49 = vpop.f32.mrf.mxu0 }
 0xe77   : > { %v15259_v56 = vadd.f32 %v14968_v17, %v7194_v49 }
 0xe78   : > { %v12003_v27 = vpop.f32.mrf.mxu0 }
 0xe79   : > { %v7434_v63 = vsel %vm1028_vm2, %v15259_v56, -inf }
 0xe7a   : > { %v7197_v52 = vpop.f32.mrf.mxu0  ;;  %7435 = vmax.xlane.f32.xlu0 %v7434_v63  ;;  %v7244_v26 = vpop.f32.mrf.mxu1 }
 0xe7b   : > { %v15264_v48 = vadd.f32 %v14976_v12, %v7244_v26  ;;  %v15278_v63 = vpop.eup %12564  ;;  %v7569_v52 = vsel %vm1028_vm2, %v15273_v43, 0.0 }
 0xe7c   : > { %v12004_v44 = vpop.f32.mrf.mxu0  ;;  %v12009_v7 = vpop.f32.mrf.mxu1 }
 0xe7d   : > { %v7437_v17 = vsel %vm1028_vm2, %v15264_v48, -inf  ;;  %v15284_v26 = vpop.eup %12566 }
 0xe7e   : > { %v7247_v1 = vpop.f32.mrf.mxu1  ;;  %v7294_v36 = vpop.f32.mrf.mxu0  ;;  %7438 = vmax.xlane.f32.xlu1 %v7437_v17  ;;  %v7572_v17 = vsel %vm1028_vm2, %v15284_v26, 0.0 }
 0xe7f   : > { %v15269_v45 = vadd.f32 %v14986_v18, %v7294_v36  ;;  %v15290_v1 = vpop.eup %12568 }
 0xe80   : > { %v12010_v32 = vpop.f32.mrf.mxu1  ;;  %v12015_v58 = vpop.f32.mrf.mxu0 }
 0xe81   : > { %v7440_v25 = vsel %vm1028_vm2, %v15269_v45, -inf }
 0xe82   : > { %v7297_v12 = vpop.f32.mrf.mxu0  ;;  %v7344_v13 = vpop.f32.mrf.mxu1  ;;  %7441 = vmax.xlane.f32.xlu1 %v7440_v25  ;;  %v7575_v25 = vsel %vm1028_vm2, %v15290_v1, 0.0 }
 0xe83   : > { %v15276_v49 = vadd.f32 %v14994_v4, %v7344_v13  ;;  %v7566_v4 = vsel %vm1028_vm2, %v15278_v63, 0.0 }
 0xe84   : > { %v12016_v27 = vpop.f32.mrf.mxu0  ;;  %v12021_v8 = vpop.f32.mrf.mxu1 }
 0xe85   : > { %v7443_v18 = vsel %vm1028_vm2, %v15276_v49, -inf }
 0xe86   : > { %7444 = vmax.xlane.f32.xlu0 %v7443_v18  ;;  %v7347_v44 = vpop.f32.mrf.mxu1  ;;  %7570 = vadd.xlane.f32.xlu1 %v7569_v52 }
 0xe88   : > { %v12022_v7 = vpop.f32.mrf.mxu1 }
 0xe8a   : > { %v7388_v36 = vpop.xlane.xlu0 %7387  ;;  %7567 = vadd.xlane.f32.xlu0 %v7566_v4  ;;  %7573 = vadd.xlane.f32.xlu1 %v7572_v17 }
 0xe8b   : > { %v7458_v32 = vsub.f32 %v15066_v24, %v7388_v36 }
 0xe8d   : > { %v7502_v58 = vmul.f32 1.442695, %v7458_v32 }
 0xe8e   : > { %7576 = vadd.xlane.f32.xlu0 %v7575_v25  ;;  %v7391_v12 = vpop.xlane.xlu1 %7390 }
 0xe8f   : > { %12570 = vpow2.f32 %v7502_v58  ;;  %v7459_v13 = vsub.f32 %v15073_v42, %v7391_v12 }
 0xe91   : > { %v7504_v27 = vmul.f32 1.442695, %v7459_v13 }
 0xe92   : > { %v7394_v8 = vpop.xlane.xlu0 %7393 }
 0xe93   : > { %12572 = vpow2.f32 %v7504_v27  ;;  %v7460_v18 = vsub.f32 %v15080_v28, %v7394_v8  ;;  %v15309_v28 = vpop.permute.xlu1 %8934 }
 0xe94   : > { %16046 = vst [vmem:[#allocation8_spill] sm:$0xff] %v15309_v28 }
 0xe95   : > { %v7506_v52 = vmul.f32 1.442695, %v7460_v18 }
 0xe96   : > { %v15313_v32 = vpop.permute.xlu0 %8886 }
 0xe97   : > { %12574 = vpow2.f32 %v7506_v52  ;;  %v15311_v36 = vpop.permute.xlu1 %8982  ;;  %16048 = vst [vmem:[#allocation9_spill] sm:$0xff] %v15313_v32 }
 0xe98   : > { %16047 = vst [vmem:[#allocation7_spill] sm:$0xff] %v15311_v36 }
 0xe9b   : > { %v15315_v58 = vpop.permute.xlu1 %9030 }
 0xe9c   : > { %v15297_v44 = vpop.eup %12570  ;;  %16049 = vst [vmem:[#allocation23_spill] sm:$0xff] %v15315_v58 }
 0xe9d   : > { %v7578_v24 = vsel %vm1028_vm2, %v15297_v44, 0.0 }
 0xe9e   : > { %7579 = vadd.xlane.f32.xlu1 %v7578_v24 }
 0xea0   : > { %v15301_v7 = vpop.eup %12572 }
 0xea1   : > { %v7581_v4 = vsel %vm1028_vm2, %v15301_v7, 0.0 }
 0xea2   : > { %7582 = vadd.xlane.f32.xlu0 %v7581_v4 }
 0xea4   : > { %v15305_v42 = vpop.eup %12574 }
 0xea5   : > { %v7584_v17 = vsel %vm1028_vm2, %v15305_v42, 0.0 }
 0xea6   : > { %7585 = vadd.xlane.f32.xlu1 %v7584_v17 }
 0xec7   : > { %v7400_v25 = vpop.xlane.xlu0 %7399 }
 0xec8   : > { %v7462_v12 = vsub.f32 %v15138_v59, %v7400_v25 }
 0xeca   : > { %v7510_v13 = vmul.f32 1.442695, %v7462_v12 }
 0xecb   : > { %v7550_v27 = vpop.xlane.xlu0 %7549  ;;  %v7397_v8 = vpop.xlane.xlu1 %7396 }
 0xecc   : > { %12576 = vpow2.f32 %v7510_v13  ;;  %v7461_v18 = vsub.f32 %v15145_v35, %v7397_v8 }
 0xece   : > { %v7508_v52 = vmul.f32 1.442695, %v7461_v18 }
 0xecf   : > { %v7406_v24 = vpop.xlane.xlu0 %7405  ;;  %v7403_v4 = vpop.xlane.xlu1 %7402 }
 0xed0   : > { %12578 = vpow2.f32 %v7508_v52  ;;  %v7464_v17 = vsub.f32 %v15160_v23, %v7406_v24  ;;  %v7463_v28 = vsub.f32 %v15154_v40, %v7403_v4 }
 0xed2   : > { %v7514_v36 = vmul.f32 1.442695, %v7464_v17  ;;  %v7512_v32 = vmul.f32 1.442695, %v7463_v28 }
 0xed3   : > { %v7544_v58 = vpop.xlane.xlu0 %7543  ;;  %v7409_v31 = vpop.xlane.xlu1 %7408 }
 0xed4   : > { %12580 = vpow2.f32 %v7514_v36  ;;  %v7465_v59 = vsub.f32 %v15171_v47, %v7409_v31 }
 0xed5   : > { %12582 = vpow2.f32 %v7512_v32 }
 0xed6   : > { %12584 = vrcp.f32 %v7544_v58  ;;  %v7516_v25 = vmul.f32 1.442695, %v7465_v59 }
 0xed7   : > { %v7412_v12 = vpop.xlane.xlu0 %7411  ;;  %v7547_v35 = vpop.xlane.xlu1 %7546 }
 0xed8   : > { %12586 = vpow2.f32 %v7516_v25  ;;  %v7466_v13 = vsub.f32 %v15180_v34, %v7412_v12 }
 0xed9   : > { %v15323_v8 = vpop.eup %12576  ;;  %12588 = vrcp.f32 %v7547_v35 }
 0xeda   : > { %12590 = vrcp.f32 %v7550_v27  ;;  %v7518_v40 = vmul.f32 1.442695, %v7466_v13  ;;  %v7590_v23 = vsel %vm1028_vm2, %v15323_v8, 0.0 }
 0xedb   : > { %v7418_v28 = vpop.xlane.xlu0 %7417  ;;  %7591 = vadd.xlane.f32.xlu1 %v7590_v23  ;;  %v7415_v36 = vpop.xlane.xlu1 %7414 }
 0xedc   : > { %12592 = vpow2.f32 %v7518_v40  ;;  %v7468_v31 = vsub.f32 %v15196_v60, %v7418_v28  ;;  %v7467_v47 = vsub.f32 %v15190_v3, %v7415_v36 }
 0xedd   : > { %v15329_v32 = vpop.eup %12578 }
 0xede   : > { %v7522_v58 = vmul.f32 1.442695, %v7468_v31  ;;  %v7520_v34 = vmul.f32 1.442695, %v7467_v47  ;;  %v7587_v18 = vsel %vm1028_vm2, %v15329_v32, 0.0 }
 0xedf   : > { %v7556_v27 = vpop.xlane.xlu0 %7555  ;;  %7588 = vadd.xlane.f32.xlu0 %v7587_v18  ;;  %v7553_v52 = vpop.xlane.xlu1 %7552 }
 0xee0   : > { %12594 = vpow2.f32 %v7522_v58 }
 0xee1   : > { %v15333_v24 = vpop.eup %12580  ;;  %12596 = vpow2.f32 %v7520_v34 }
 0xee2   : > { %v15335_v4 = vpop.eup %12582  ;;  %12598 = vrcp.f32 %v7556_v27  ;;  %v7596_v3 = vsel %vm1028_vm2, %v15333_v24, 0.0 }
 0xee3   : > { %v12585_v60 = vpop.eup %12584  ;;  %12600 = vrcp.f32 %v7553_v52  ;;  %v7424_v17 = vpop.xlane.xlu0 %7423  ;;  %7597 = vadd.xlane.f32.xlu1 %v7596_v3  ;;  %v7593_v59 = vsel %vm1028_vm2, %v15335_v4, 0.0 }
 0xee4   : > { %v7421_v25 = vpop.xlane.xlu1 %7420  ;;  %v7670_v12 = vmul.f32 %v12585_v60, %v15176_v21  ;;  %v7470_v35 = vsub.f32 %v15215_v2, %v7424_v17  ;;  %7594 = vadd.xlane.f32.xlu0 %v7593_v59  ;;  %v7836_v21 = vsel %vm3000_vm3, %v15049_v22, 0  ;;  %v7884_v22 = vsel %vm3000_vm3, %v15053_v46, 0 }
 0xee5   : > { %v7469_v13 = vsub.f32 %v15211_v61, %v7421_v25  ;;  %v15344_v40 = vpop.eup %12586 }
 0xee6   : > { %v12589_v23 = vpop.eup %12588  ;;  %v7702_v28 = vpack.c.bf16 %v7670_v12, %v7670_v12  ;;  %v7526_v36 = vmul.f32 1.442695, %v7470_v35  ;;  %v7599_v47 = vsel %vm1028_vm2, %v15344_v40, 0.0 }
 0xee7   : > { %v7524_v31 = vmul.f32 1.442695, %v7469_v13  ;;  %v12591_v58 = vpop.eup %12590  ;;  %v7671_v34 = vmul.f32 %v12589_v23, %v15186_v54  ;;  %v7562_v18 = vpop.xlane.xlu0 %7561 }
 0xee8   : > { %v7559_v27 = vpop.xlane.xlu1 %7558  ;;  %12602 = vpow2.f32 %v7526_v36  ;;  %12026 = vmatmul.mubr.msk.bf16.vlgmr.msra.gmra.mxu0 %vm1028_vm2, %v7702_v28  ;;  %7600 = vadd.xlane.f32.xlu0 %v7599_v47  ;;  %v7672_v52 = vmul.f32 %v12591_v58, %v15150_v39  ;;  %v7932_v36 = vsel %vm3000_vm3, %v15051_v5, 0 }
 0xee9   : > { %v15352_v61 = vpop.eup %12592  ;;  %v7703_v2 = vpack.c.bf16 %v7671_v34, %v7671_v34  ;;  %12604 = vpow2.f32 %v7524_v31  ;;  %12036 = vmatpush3.bf16.msra.mxu0 %v7836_v21  ;;  %12037 = vmatprep.mubr.msk.bf16.mxu0 %vm12742_vm1, %v16004_v29 }
 0xeea   : > { %12606 = vrcp.f32 %v7562_v18  ;;  %v7602_v54 = vsel %vm1028_vm2, %v15352_v61, 0.0  ;;  %12047 = vmatprep.subr.bf16.mxu0 %v16004_v29  ;;  %v7704_v46 = vpack.c.bf16 %v7672_v52, %v7672_v52 }
 0xeeb   : > { %12608 = vrcp.f32 %v7559_v27  ;;  %12032 = vmatmul.mubr.msk.bf16.vlgmr.msra.gmra.mxu1 %vm1028_vm2, %v7703_v2  ;;  %v7430_v3 = vpop.xlane.xlu0 %7429  ;;  %7603 = vadd.xlane.f32.xlu1 %v7602_v54  ;;  %v7980_v27 = vsel %vm3000_vm3, %v15057_v16, 0  ;;  %v8028_v54 = vsel %vm3000_vm3, %v15055_v6, 0  ;;  %v8076_v6 = vsel %vm3000_vm3, %v15061_v15, 0 }
 0xeec   : > { %v7427_v60 = vpop.xlane.xlu1 %7426  ;;  %12042 = vmatpush3.bf16.msra.mxu1 %v7884_v22  ;;  %v7472_v17 = vsub.f32 %v15235_v0, %v7430_v3  ;;  %12043 = vmatprep.mubr.msk.bf16.mxu1 %vm12742_vm1, %v16004_v29  ;;  %v8124_v15 = vsel %vm3000_vm3, %v15059_v19, 0 }
 0xeed   : > { %v7471_v39 = vsub.f32 %v15231_v9, %v7427_v60  ;;  %v15367_v59 = vpop.eup %12594  ;;  %12053 = vmatprep.subr.bf16.mxu1 %v16004_v29 }
 0xeee   : > { %v15370_v25 = vpop.eup %12596  ;;  %v7530_v12 = vmul.f32 1.442695, %v7472_v17  ;;  %v7608_v13 = vsel %vm1028_vm2, %v15367_v59, 0.0 }
 0xeef   : > { %v7528_v35 = vmul.f32 1.442695, %v7471_v39  ;;  %v12599_v23 = vpop.eup %12598  ;;  %7609 = vadd.xlane.f32.xlu1 %v7608_v13  ;;  %v7605_v9 = vsel %vm1028_vm2, %v15370_v25, 0.0 }
 0xef0   : > { %v7565_v0 = vpop.xlane.xlu1 %7564  ;;  %v12601_v28 = vpop.eup %12600  ;;  %12610 = vpow2.f32 %v7530_v12  ;;  %12038 = vmatmul.mubr.msk.bf16.vlgmr.msra.gmra.mxu0 %vm1028_vm2, %v7704_v46  ;;  %7606 = vadd.xlane.f32.xlu0 %v7605_v9  ;;  %v7674_v47 = vmul.f32 %v12599_v23, %v15207_v37  ;;  %v8172_v9 = vsel %vm3000_vm3, %v15070_v10, 0 }
 0xef1   : > { %v7673_v31 = vmul.f32 %v12601_v28, %v15201_v41  ;;  %12612 = vpow2.f32 %v7528_v35  ;;  %12048 = vmatpush3.bf16.msra.mxu0 %v7932_v36  ;;  %12049 = vmatprep.mubr.msk.bf16.mxu0 %vm12742_vm1, %v16004_v29 }
 0xef2   : > { %12614 = vrcp.f32 %v7565_v0  ;;  %12059 = vmatprep.subr.bf16.mxu0 %v16004_v29  ;;  %v7706_v21 = vpack.c.bf16 %v7674_v47, %v7674_v47 }
 0xef3   : > { %v7705_v58 = vpack.c.bf16 %v7673_v31, %v7673_v31 }
 0xef4   : > { %v7433_v34 = vpop.xlane.xlu1 %7432 }
 0xef5   : > { %v7473_v5 = vsub.f32 %v15248_v30, %v7433_v34  ;;  %v15385_v18 = vpop.eup %12602  ;;  %12044 = vmatmul.mubr.msk.bf16.vlgmr.msra.gmra.mxu1 %vm1028_vm2, %v7705_v58 }
 0xef6   : > { %v15390_v41 = vpop.eup %12604  ;;  %12054 = vmatpush3.bf16.msra.mxu1 %v7980_v27  ;;  %v7614_v37 = vsel %vm1028_vm2, %v15385_v18, 0.0  ;;  %12055 = vmatprep.mubr.msk.bf16.mxu1 %vm12742_vm1, %v16004_v29 }
 0xef7   : > { %v7532_v2 = vmul.f32 1.442695, %v7473_v5  ;;  %v12607_v52 = vpop.eup %12606  ;;  %7615 = vadd.xlane.f32.xlu1 %v7614_v37  ;;  %v7611_v30 = vsel %vm1028_vm2, %v15390_v41, 0.0  ;;  %12065 = vmatprep.subr.bf16.mxu1 %v16004_v29 }
 0xef8   : > { %v12609_v16 = vpop.eup %12608  ;;  %12050 = vmatmul.mubr.msk.bf16.vlgmr.msra.gmra.mxu0 %vm1028_vm2, %v7706_v21  ;;  %7612 = vadd.xlane.f32.xlu0 %v7611_v30  ;;  %v7676_v3 = vmul.f32 %v12607_v52, %v15227_v62  ;;  %v8268_v52 = vsel %vm3000_vm3, %v15082_v11, 0  ;;  %v8220_v11 = vsel %vm3000_vm3, %v15063_v55, 0  ;;  %v8364_v55 = vsel %vm3000_vm3, %v15126_v53, 0 }
 0xef9   : > { %12616 = vpow2.f32 %v7532_v2  ;;  %v7675_v22 = vmul.f32 %v12609_v16, %v15221_v50  ;;  %12060 = vmatpush3.bf16.msra.mxu0 %v8028_v54  ;;  %12061 = vmatprep.mubr.msk.bf16.mxu0 %vm12742_vm1, %v16004_v29 }
 0xefa   : > { %12071 = vmatprep.subr.bf16.mxu0 %v16004_v29  ;;  %v7708_v46 = vpack.c.bf16 %v7676_v3, %v7676_v3 }
 0xefb   : > { %v7707_v60 = vpack.c.bf16 %v7675_v22, %v7675_v22 }
 0xefd   : > { %v15407_v17 = vpop.eup %12610  ;;  %12056 = vmatmul.mubr.msk.bf16.vlgmr.msra.gmra.mxu1 %vm1028_vm2, %v7707_v60 }
 0xefe   : > { %v15412_v39 = vpop.eup %12612  ;;  %12066 = vmatpush3.bf16.msra.mxu1 %v8076_v6  ;;  %v7620_v50 = vsel %vm1028_vm2, %v15407_v17, 0.0  ;;  %12067 = vmatprep.mubr.msk.bf16.mxu1 %vm12742_vm1, %v16004_v29 }
 0xeff   : > { %v12615_v62 = vpop.eup %12614  ;;  %7621 = vadd.xlane.f32.xlu1 %v7620_v50  ;;  %v7617_v12 = vsel %vm1028_vm2, %v15412_v39, 0.0  ;;  %12077 = vmatprep.subr.bf16.mxu1 %v16004_v29 }
 0xf00   : > { %v7677_v35 = vmul.f32 %v12615_v62, %v15245_v38  ;;  %12062 = vmatmul.mubr.msk.bf16.vlgmr.msra.gmra.mxu0 %vm1028_vm2, %v7708_v46  ;;  %7618 = vadd.xlane.f32.xlu0 %v7617_v12 }
 0xf01   : > { %12072 = vmatpush3.bf16.msra.mxu0 %v8124_v15  ;;  %12073 = vmatprep.mubr.msk.bf16.mxu0 %vm12742_vm1, %v16004_v29 }
 0xf02   : > { %v7709_v13 = vpack.c.bf16 %v7677_v35, %v7677_v35  ;;  %12083 = vmatprep.subr.bf16.mxu0 %v16004_v29 }
 0xf03   : > { %v7436_v0 = vpop.xlane.xlu0 %7435 }
 0xf04   : > { %v7474_v34 = vsub.f32 %v15259_v56, %v7436_v0 }
 0xf05   : > { %12068 = vmatmul.mubr.msk.bf16.vlgmr.msra.gmra.mxu1 %vm1028_vm2, %v7709_v13 }
 0xf06   : > { %v15428_v23 = vpop.eup %12616  ;;  %12078 = vmatpush3.bf16.msra.mxu1 %v8172_v9  ;;  %12079 = vmatprep.mubr.msk.bf16.mxu1 %vm12742_vm1, %v16004_v29  ;;  %v7534_v27 = vmul.f32 1.442695, %v7474_v34 }
 0xf07   : > { %v7623_v19 = vsel %vm1028_vm2, %v15428_v23, 0.0  ;;  %v7439_v38 = vpop.xlane.xlu1 %7438  ;;  %12089 = vmatprep.subr.bf16.mxu1 %v16004_v29 }
 0xf08   : > { %7624 = vadd.xlane.f32.xlu0 %v7623_v19  ;;  %v7475_v30 = vsub.f32 %v15264_v48, %v7439_v38  ;;  %v8412_v19 = vsel %vm3000_vm3, %v15088_v57, 0  ;;  %v8460_v57 = vsel %vm3000_vm3, %v15090_v33, 0  ;;  %v16051_v33 = vld [vmem:[#allocation16_spill] sm:$0xff] }
 0xf0a   : > { %v7536_v48 = vmul.f32 1.442695, %v7475_v30 }
 0xf0b   : > { %v7442_v28 = vpop.xlane.xlu1 %7441 }
 0xf0c   : > { %v7476_v21 = vsub.f32 %v15269_v45, %v7442_v28 }
 0xf0e   : > { %v7538_v16 = vmul.f32 1.442695, %v7476_v21 }
 0xf0f   : > { %v7445_v36 = vpop.xlane.xlu0 %7444  ;;  %v7571_v31 = vpop.xlane.xlu1 %7570 }
 0xf10   : > { %9126 = vrot.lane.b32.xlu1 %v14778_v51, %s16037_s30  ;;  %12618 = vrcp.f32 %v7571_v31 }
 0xf13   : > { %v7568_v10 = vpop.xlane.xlu0 %7567  ;;  %v7574_v47 = vpop.xlane.xlu1 %7573 }
 0xf14   : > { %12620 = vrcp.f32 %v7568_v10 }
 0xf17   : > { %v7577_v58 = vpop.xlane.xlu0 %7576 }
 0xf18   : > { %12622 = vrcp.f32 %v7577_v58 }
 0xf19   : > { %12624 = vrcp.f32 %v7574_v47  ;;  %v16050_v47 = vld [vmem:[#allocation19_spill] sm:$0xff] }
 0xf1a   : > { %12626 = vpow2.f32 %v7534_v27  ;;  %v8508_v58 = vsel %vm3000_vm3, %v16050_v47, 0 }
 0xf1b   : > { %12628 = vpow2.f32 %v7538_v16 }
 0xf1d   : > { %v12619_v5 = vpop.eup %12618 }
 0xf1e   : > { %9078 = vrot.lane.b32.xlu0 %v14767_v20, %s16037_s30  ;;  %v7679_v2 = vmul.f32 %v12619_v5, %v15273_v43 }
 0xf20   : > { %v7711_v37 = vpack.c.bf16 %v7679_v2, %v7679_v2 }
 0xf21   : > { %v12621_v51 = vpop.eup %12620 }
 0xf22   : > { %v7678_v56 = vmul.f32 %v12621_v51, %v15278_v63  ;;  %12080 = vmatmul.mubr.msk.bf16.vlgmr.msra.gmra.mxu1 %vm1028_vm2, %v7711_v37  ;;  %v7477_v63 = vsub.f32 %v15276_v49, %v7445_v36 }
 0xf23   : > { %12090 = vmatpush3.bf16.msra.mxu1 %v8268_v52  ;;  %12091 = vmatprep.mubr.msk.bf16.mxu1 %vm12742_vm1, %v16004_v29 }
 0xf24   : > { %v7710_v45 = vpack.c.bf16 %v7678_v56, %v7678_v56  ;;  %12101 = vmatprep.subr.bf16.mxu1 %v16004_v29  ;;  %v16053_v56 = vld [vmem:[#allocation22_spill] sm:$0xff] }
 0xf25   : > { %v12623_v20 = vpop.eup %12622 }
 0xf26   : > { %v12625_v43 = vpop.eup %12624  ;;  %v7681_v54 = vmul.f32 %v12623_v20, %v15290_v1  ;;  %12074 = vmatmul.mubr.msk.bf16.vlgmr.msra.gmra.mxu0 %vm1028_vm2, %v7710_v45  ;;  %v7540_v1 = vmul.f32 1.442695, %v7477_v63  ;;  %v8604_v20 = vsel %vm3000_vm3, %v16053_v56, 0  ;;  %v16054_v63 = vld [vmem:[#allocation20_spill] sm:$0xff] }
 0xf27   : > { %v7580_v22 = vpop.xlane.xlu1 %7579  ;;  %12084 = vmatpush3.bf16.msra.mxu0 %v8220_v11  ;;  %12085 = vmatprep.mubr.msk.bf16.mxu0 %vm12742_vm1, %v16004_v29  ;;  %v7680_v60 = vmul.f32 %v12625_v43, %v15284_v26  ;;  %v8316_v26 = vsel %vm3000_vm3, %v15075_v14, 0  ;;  %v15471_v46 = vpop.eup %12626 }
 0xf28   : > { %v7713_v3 = vpack.c.bf16 %v7681_v54, %v7681_v54  ;;  %12630 = vrcp.f32 %v7580_v22  ;;  %12095 = vmatprep.subr.bf16.mxu0 %v16004_v29  ;;  %v7626_v50 = vsel %vm1028_vm2, %v15471_v46, 0.0  ;;  %v15478_v62 = vpop.eup %12628  ;;  %v8556_v22 = vsel %vm3000_vm3, %v16054_v63, 0 }
 0xf29   : > { %12632 = vpow2.f32 %v7536_v48  ;;  %v7712_v6 = vpack.c.bf16 %v7680_v60, %v7680_v60  ;;  %v7632_v15 = vsel %vm1028_vm2, %v15478_v62, 0.0 }
 0xf2a   : > { %12092 = vmatmul.mubr.msk.bf16.vlgmr.msra.gmra.mxu1 %vm1028_vm2, %v7713_v3 }
 0xf2b   : > { %v7583_v49 = vpop.xlane.xlu0 %7582  ;;  %12102 = vmatpush3.bf16.msra.mxu1 %v8364_v55  ;;  %12103 = vmatprep.mubr.msk.bf16.mxu1 %vm12742_vm1, %v16004_v29  ;;  %v16055_v55 = vld [vmem:[#allocation4_spill] sm:$0xff] }
 0xf2c   : > { %12634 = vrcp.f32 %v7583_v49  ;;  %12113 = vmatprep.subr.bf16.mxu1 %v16004_v29 }
 0xf2d   : > { %12636 = vpow2.f32 %v7540_v1  ;;  %v8700_v1 = vsel %vm3000_vm3, %v16055_v55, 0 }
 0xf2e   : > { %12086 = vmatmul.mubr.msk.bf16.vlgmr.msra.gmra.mxu0 %vm1028_vm2, %v7712_v6 }
 0xf2f   : > { %v7586_v53 = vpop.xlane.xlu1 %7585  ;;  %12096 = vmatpush3.bf16.msra.mxu0 %v8316_v26  ;;  %12097 = vmatprep.mubr.msk.bf16.mxu0 %vm12742_vm1, %v16004_v29 }
 0xf30   : > { %12638 = vrcp.f32 %v7586_v53  ;;  %12107 = vmatprep.subr.bf16.mxu0 %v16004_v29  ;;  %v16056_v53 = vld [vmem:[#allocation2_spill] sm:$0xff] }
 0xf34   : > { %7627 = vadd.xlane.f32.xlu1 %v7626_v50  ;;  %v8652_v50 = vsel %vm3000_vm3, %v16056_v53, 0 }
 0xf35   : > { %v12631_v14 = vpop.eup %12630 }
 0xf36   : > { %v7682_v12 = vmul.f32 %v12631_v14, %v15297_v44  ;;  %v15483_v35 = vpop.eup %12632 }
 0xf37   : > { %v7629_v0 = vsel %vm1028_vm2, %v15483_v35, 0.0 }
 0xf38   : > { %v7714_v13 = vpack.c.bf16 %v7682_v12, %v7682_v12  ;;  %7633 = vadd.xlane.f32.xlu1 %v7632_v15 }
 0xf39   : > { %v12635_v9 = vpop.eup %12634 }
 0xf3a   : > { %v7683_v38 = vmul.f32 %v12635_v9, %v15301_v7  ;;  %12098 = vmatmul.mubr.msk.bf16.vlgmr.msra.gmra.mxu0 %vm1028_vm2, %v7714_v13  ;;  %v15493_v44 = vpop.eup %12636  ;;  %v16057_v9 = vld [vmem:[#allocation5_spill] sm:$0xff] }
 0xf3b   : > { %12108 = vmatpush3.bf16.msra.mxu0 %v8412_v19  ;;  %12109 = vmatprep.mubr.msk.bf16.mxu0 %vm12742_vm1, %v16004_v29  ;;  %v7635_v31 = vsel %vm1028_vm2, %v15493_v44, 0.0  ;;  %v8796_v19 = vsel %vm3000_vm3, %v16057_v9, 0 }
 0xf3c   : > { %v7715_v28 = vpack.c.bf16 %v7683_v38, %v7683_v38  ;;  %12119 = vmatprep.subr.bf16.mxu0 %v16004_v29 }
 0xf3d   : > { %7630 = vadd.xlane.f32.xlu0 %v7629_v0  ;;  %v12639_v36 = vpop.eup %12638 }
 0xf3e   : > { %v7684_v7 = vmul.f32 %v12639_v36, %v15305_v42  ;;  %12104 = vmatmul.mubr.msk.bf16.vlgmr.msra.gmra.mxu1 %vm1028_vm2, %v7715_v28  ;;  %v16052_v42 = vld [vmem:[#allocation21_spill] sm:$0xff]  ;;  %v16058_v36 = vld [vmem:[#allocation6_spill] sm:$0xff] }
 0xf3f   : > { %12114 = vmatpush3.bf16.msra.mxu1 %v8460_v57  ;;  %12115 = vmatprep.mubr.msk.bf16.mxu1 %vm12742_vm1, %v16004_v29  ;;  %v8748_v57 = vsel %vm3000_vm3, %v16058_v36, 0 }
 0xf40   : > { %v7716_v10 = vpack.c.bf16 %v7684_v7, %v7684_v7  ;;  %12125 = vmatprep.subr.bf16.mxu1 %v16004_v29 }
 0xf41   : > { %7636 = vadd.xlane.f32.xlu0 %v7635_v31 }
 0xf42   : > { %12110 = vmatmul.mubr.msk.bf16.vlgmr.msra.gmra.mxu0 %vm1028_vm2, %v7716_v10  ;;  %v16059_v10 = vld [vmem:[#allocation9_spill] sm:$0xff] }
 0xf43   : > { %12120 = vmatpush3.bf16.msra.mxu0 %v8508_v58  ;;  %12121 = vmatprep.mubr.msk.bf16.mxu0 %vm12742_vm1, %v16004_v29  ;;  %v8892_v47 = vsel %vm3000_vm3, %v16059_v10, 0 }
 0xf44   : > { %12131 = vmatprep.subr.bf16.mxu0 %v16004_v29 }
 0xf49   : > { %9222 = vrot.lane.b32.xlu1 %v16051_v33, %s16037_s30 }
 0xf57   : > { %9174 = vrot.lane.b32.xlu0 %v16052_v42, %s16037_s30 }
 0xf64   : > { %v7592_v34 = vpop.xlane.xlu1 %7591 }
 0xf65   : > { %12640 = vrcp.f32 %v7592_v34  ;;  %v16060_v34 = vld [vmem:[#allocation3_spill] sm:$0xff] }
 0xf68   : > { %v7589_v5 = vpop.xlane.xlu0 %7588 }
 0xf69   : > { %12642 = vrcp.f32 %v7589_v5  ;;  %v8844_v5 = vsel %vm3000_vm3, %v16060_v34, 0 }
 0xf6c   : > { %v7598_v27 = vpop.xlane.xlu1 %7597 }
 0xf6d   : > { %v7595_v21 = vpop.xlane.xlu0 %7594  ;;  %12644 = vrcp.f32 %v7598_v27 }
 0xf6e   : > { %12646 = vrcp.f32 %v7595_v21 }
 0xf71   : > { %v7601_v2 = vpop.xlane.xlu0 %7600 }
 0xf72   : > { %v12641_v37 = vpop.eup %12640  ;;  %12648 = vrcp.f32 %v7601_v2  ;;  %v16061_v2 = vld [vmem:[#allocation7_spill] sm:$0xff] }
 0xf73   : > { %v7686_v51 = vmul.f32 %v12641_v37, %v15323_v8  ;;  %v8988_v37 = vsel %vm3000_vm3, %v16061_v2, 0 }
 0xf74   : > { %v7604_v52 = vpop.xlane.xlu1 %7603 }
 0xf75   : > { %v7718_v30 = vpack.c.bf16 %v7686_v51, %v7686_v51  ;;  %12650 = vrcp.f32 %v7604_v52 }
 0xf76   : > { %v12643_v16 = vpop.eup %12642 }
 0xf77   : > { %v7685_v45 = vmul.f32 %v12643_v16, %v15329_v32  ;;  %12122 = vmatmul.mubr.msk.bf16.vlgmr.msra.gmra.mxu0 %vm1028_vm2, %v7718_v30  ;;  %v16062_v30 = vld [vmem:[#allocation8_spill] sm:$0xff] }
 0xf78   : > { %12132 = vmatpush3.bf16.msra.mxu0 %v8604_v20  ;;  %v7610_v43 = vpop.xlane.xlu1 %7609  ;;  %12133 = vmatprep.mubr.msk.bf16.mxu0 %vm12742_vm1, %v16004_v29  ;;  %v8940_v16 = vsel %vm3000_vm3, %v16062_v30, 0 }
 0xf79   : > { %v7717_v54 = vpack.c.bf16 %v7685_v45, %v7685_v45  ;;  %12652 = vrcp.f32 %v7610_v43  ;;  %12143 = vmatprep.subr.bf16.mxu0 %v16004_v29  ;;  %v7607_v11 = vpop.xlane.xlu0 %7606 }
 0xf7a   : > { %v12645_v8 = vpop.eup %12644  ;;  %12654 = vrcp.f32 %v7607_v11 }
 0xf7b   : > { %v12647_v48 = vpop.eup %12646  ;;  %v7688_v3 = vmul.f32 %v12645_v8, %v15333_v24  ;;  %12116 = vmatmul.mubr.msk.bf16.vlgmr.msra.gmra.mxu1 %vm1028_vm2, %v7717_v54  ;;  %v16063_v8 = vld [vmem:[#allocation23_spill] sm:$0xff] }
 0xf7c   : > { %12126 = vmatpush3.bf16.msra.mxu1 %v8556_v22  ;;  %12127 = vmatprep.mubr.msk.bf16.mxu1 %vm12742_vm1, %v16004_v29  ;;  %v7687_v32 = vmul.f32 %v12647_v48, %v15335_v4  ;;  %v9036_v11 = vsel %vm3000_vm3, %v16063_v8, 0 }
 0xf7d   : > { %v7720_v60 = vpack.c.bf16 %v7688_v3, %v7688_v3  ;;  %12137 = vmatprep.subr.bf16.mxu1 %v16004_v29 }
 0xf7e   : > { %v7719_v6 = vpack.c.bf16 %v7687_v32, %v7687_v32 }
 0xf7f   : > { %12134 = vmatmul.mubr.msk.bf16.vlgmr.msra.gmra.mxu0 %vm1028_vm2, %v7720_v60  ;;  %v12649_v24 = vpop.eup %12648 }
 0xf80   : > { %12144 = vmatpush3.bf16.msra.mxu0 %v8700_v1  ;;  %v7616_v49 = vpop.xlane.xlu1 %7615  ;;  %12145 = vmatprep.mubr.msk.bf16.mxu0 %vm12742_vm1, %v16004_v29  ;;  %v7689_v12 = vmul.f32 %v12649_v24, %v15344_v40 }
 0xf81   : > { %12656 = vrcp.f32 %v7616_v49  ;;  %12155 = vmatprep.subr.bf16.mxu0 %v16004_v29  ;;  %v7613_v26 = vpop.xlane.xlu0 %7612 }
 0xf82   : > { %v12651_v4 = vpop.eup %12650  ;;  %12658 = vrcp.f32 %v7613_v26  ;;  %v7721_v38 = vpack.c.bf16 %v7689_v12, %v7689_v12 }
 0xf83   : > { %v7690_v14 = vmul.f32 %v12651_v4, %v15352_v61  ;;  %12128 = vmatmul.mubr.msk.bf16.vlgmr.msra.gmra.mxu1 %vm1028_vm2, %v7719_v6 }
 0xf84   : > { %12138 = vmatpush3.bf16.msra.mxu1 %v8652_v50  ;;  %12139 = vmatprep.mubr.msk.bf16.mxu1 %vm12742_vm1, %v16004_v29 }
 0xf85   : > { %v7722_v15 = vpack.c.bf16 %v7690_v14, %v7690_v14  ;;  %12149 = vmatprep.subr.bf16.mxu1 %v16004_v29 }
 0xf86   : > { %v12653_v13 = vpop.eup %12652 }
 0xf87   : > { %12146 = vmatmul.mubr.msk.bf16.vlgmr.msra.gmra.mxu0 %vm1028_vm2, %v7722_v15  ;;  %v7692_v0 = vmul.f32 %v12653_v13, %v15367_v59  ;;  %v12655_v40 = vpop.eup %12654 }
 0xf88   : > { %12156 = vmatpush3.bf16.msra.mxu0 %v8796_v19  ;;  %v7622_v61 = vpop.xlane.xlu1 %7621  ;;  %12157 = vmatprep.mubr.msk.bf16.mxu0 %vm12742_vm1, %v16004_v29  ;;  %v7691_v7 = vmul.f32 %v12655_v40, %v15370_v25 }
 0xf89   : > { %12660 = vrcp.f32 %v7622_v61  ;;  %12167 = vmatprep.subr.bf16.mxu0 %v16004_v29  ;;  %v7619_v28 = vpop.xlane.xlu0 %7618  ;;  %v7724_v31 = vpack.c.bf16 %v7692_v0, %v7692_v0 }
 0xf8a   : > { %12662 = vrcp.f32 %v7619_v28  ;;  %v7723_v58 = vpack.c.bf16 %v7691_v7, %v7691_v7 }
 0xf8b   : > { %12140 = vmatmul.mubr.msk.bf16.vlgmr.msra.gmra.mxu1 %vm1028_vm2, %v7721_v38 }
 0xf8c   : > { %12150 = vmatpush3.bf16.msra.mxu1 %v8748_v57  ;;  %12151 = vmatprep.mubr.msk.bf16.mxu1 %vm12742_vm1, %v16004_v29  ;;  %v9127_v48 = vpop.permute.xlu1 %9126 }
 0xf8d   : > { %12161 = vmatprep.subr.bf16.mxu1 %v16004_v29  ;;  %v9132_v32 = vsel %vm3000_vm3, %v9127_v48, 0 }
 0xf8e   : > { %v12657_v59 = vpop.eup %12656 }
 0xf8f   : > { %12158 = vmatmul.mubr.msk.bf16.vlgmr.msra.gmra.mxu0 %vm1028_vm2, %v7724_v31  ;;  %v7694_v33 = vmul.f32 %v12657_v59, %v15385_v18  ;;  %v12659_v25 = vpop.eup %12658 }
 0xf90   : > { %12168 = vmatpush3.bf16.msra.mxu0 %v8892_v47  ;;  %12169 = vmatprep.mubr.msk.bf16.mxu0 %vm12742_vm1, %v16004_v29  ;;  %v7693_v27 = vmul.f32 %v12659_v25, %v15390_v41 }
 0xf91   : > { %12179 = vmatprep.subr.bf16.mxu0 %v16004_v29  ;;  %v7625_v42 = vpop.xlane.xlu0 %7624  ;;  %v7726_v21 = vpack.c.bf16 %v7694_v33, %v7694_v33 }
 0xf92   : > { %12664 = vrcp.f32 %v7625_v42  ;;  %v7725_v51 = vpack.c.bf16 %v7693_v27, %v7693_v27 }
 0xf93   : > { %12152 = vmatmul.mubr.msk.bf16.vlgmr.msra.gmra.mxu1 %vm1028_vm2, %v7723_v58 }
 0xf94   : > { %12162 = vmatpush3.bf16.msra.mxu1 %v8844_v5  ;;  %12163 = vmatprep.mubr.msk.bf16.mxu1 %vm12742_vm1, %v16004_v29 }
 0xf95   : > { %12173 = vmatprep.subr.bf16.mxu1 %v16004_v29  ;;  %v9079_v56 = vpop.permute.xlu0 %9078 }
 0xf96   : > { %v12661_v18 = vpop.eup %12660 }
 0xf97   : > { %12170 = vmatmul.mubr.msk.bf16.vlgmr.msra.gmra.mxu0 %vm1028_vm2, %v7726_v21  ;;  %v7696_v52 = vmul.f32 %v12661_v18, %v15407_v17  ;;  %v12663_v41 = vpop.eup %12662  ;;  %v9084_v17 = vsel %vm3000_vm3, %v9079_v56, 0 }
 0xf98   : > { %12180 = vmatpush3.bf16.msra.mxu0 %v8988_v37  ;;  %12181 = vmatprep.mubr.msk.bf16.mxu0 %vm12742_vm1, %v16004_v29  ;;  %v7695_v20 = vmul.f32 %v12663_v41, %v15412_v39 }
 0xf99   : > { %12191 = vmatprep.subr.bf16.mxu0 %v16004_v29  ;;  %v7728_v45 = vpack.c.bf16 %v7696_v52, %v7696_v52 }
 0xf9a   : > { %v7727_v43 = vpack.c.bf16 %v7695_v20, %v7695_v20 }
 0xf9b   : > { %12164 = vmatmul.mubr.msk.bf16.vlgmr.msra.gmra.mxu1 %vm1028_vm2, %v7725_v51  ;;  %v10872_v51 = vld [vmem:[%s15931_s6 + $0x10] sm:$0xf] }
 0xf9c   : > { %12174 = vmatpush3.bf16.msra.mxu1 %v8940_v16  ;;  %12175 = vmatprep.mubr.msk.bf16.mxu1 %vm12742_vm1, %v16004_v29 }
 0xf9d   : > { %12185 = vmatprep.subr.bf16.mxu1 %v16004_v29 }
 0xf9f   : > { %12182 = vmatmul.mubr.msk.bf16.vlgmr.msra.gmra.mxu0 %vm1028_vm2, %v7728_v45  ;;  %v12665_v54 = vpop.eup %12664 }
 0xfa0   : > { %12192 = vmatpush3.bf16.msra.mxu0 %v9084_v17  ;;  %12193 = vmatprep.mubr.msk.bf16.mxu0 %vm12742_vm1, %v16004_v29  ;;  %v7697_v39 = vmul.f32 %v12665_v54, %v15428_v23  ;;  %v9340_v17 = vsel %vm3000_vm3, %v10872_v51, 0 }
 0xfa1   : > { %12203 = vmatprep.subr.bf16.mxu0 %v16004_v29 }
 0xfa2   : > { %v7729_v22 = vpack.c.bf16 %v7697_v39, %v7697_v39 }
 0xfa3   : > { %12176 = vmatmul.mubr.msk.bf16.vlgmr.msra.gmra.mxu1 %vm1028_vm2, %v7727_v43 }
 0xfa4   : > { %12186 = vmatpush3.bf16.msra.mxu1 %v9036_v11  ;;  %12187 = vmatprep.mubr.msk.bf16.mxu1 %vm12742_vm1, %v16004_v29 }
 0xfa5   : > { %12197 = vmatprep.subr.bf16.mxu1 %v16004_v29 }
 0xfa8   : > { %v15599_v63 = vpop.f32.mrf.mxu0 }
 0xfaa   : > { %v12027_v3 = vpop.f32.mrf.mxu0 }
 0xfab   : > { %v15602_v60 = vpop.f32.mrf.mxu1  ;;  %12188 = vmatmul.mubr.msk.bf16.vlgmr.msra.gmra.mxu1 %vm1028_vm2, %v7729_v22 }
 0xfac   : > { %v7779_v55 = vpop.f32.mrf.mxu0  ;;  %12198 = vmatpush3.bf16.msra.mxu1 %v9132_v32  ;;  %12199 = vmatprep.mubr.msk.bf16.mxu1 %vm12742_vm1, %v16004_v29  ;;  %v10992_v45 = vpack.c.bf16 %v15602_v60, %v15599_v63 }
 0xfad   : > { %v12033_v1 = vpop.f32.mrf.mxu1  ;;  %12209 = vmatprep.subr.bf16.mxu1 %v16004_v29 }
 0xfae   : > { %v12028_v23 = vpop.f32.mrf.mxu0 }
 0xfaf   : > { %v7827_v49 = vpop.f32.mrf.mxu1 }
 0xfb0   : > { %v15608_v24 = vpop.f32.mrf.mxu0  ;;  %v10875_v49 = vld [vmem:[%s15931_s6 + $0x1c] sm:$0xf] }
 0xfb1   : > { %v12034_v6 = vpop.f32.mrf.mxu1 }
 0xfb2   : > { %v12039_v4 = vpop.f32.mrf.mxu0 }
 0xfb4   : > { %v7875_v26 = vpop.f32.mrf.mxu0 }
 0xfb5   : > { %v15610_v53 = vpop.f32.mrf.mxu1 }
 0xfb6   : > { %v12040_v50 = vpop.f32.mrf.mxu0  ;;  %v10993_v8 = vpack.c.bf16 %v15610_v53, %v15608_v24 }
 0xfb7   : > { %v12045_v14 = vpop.f32.mrf.mxu1 }
 0xfb8   : > { %v15612_v12 = vpop.f32.mrf.mxu0 }
 0xfb9   : > { %v7923_v15 = vpop.f32.mrf.mxu1 }
 0xfba   : > { %v12051_v13 = vpop.f32.mrf.mxu0 }
 0xfbb   : > { %v12046_v9 = vpop.f32.mrf.mxu1 }
 0xfbc   : > { %v7971_v19 = vpop.f32.mrf.mxu0 }
 0xfbd   : > { %v8016_v61 = vpop.f32.mrf.mxu1  ;;  %v7628_v38 = vpop.xlane.xlu1 %7627 }
 0xfbe   : > { %v12052_v0 = vpop.f32.mrf.mxu0  ;;  %12666 = vrcp.f32 %v7628_v38  ;;  %v10994_v48 = vpack.c.bf16 %v8016_v61, %v15612_v12  ;;  %v9640_v12 = vsel %vm3000_vm3, %v10875_v49, 0 }
 0xfbf   : > { %v12057_v40 = vpop.f32.mrf.mxu1 }
 0xfc0   : > { %v15614_v28 = vpop.f32.mrf.mxu0 }
 0xfc1   : > { %v8019_v36 = vpop.f32.mrf.mxu1  ;;  %v7634_v57 = vpop.xlane.xlu1 %7633 }
 0xfc2   : > { %v12063_v7 = vpop.f32.mrf.mxu0  ;;  %12668 = vrcp.f32 %v7634_v57 }
 0xfc3   : > { %v12058_v31 = vpop.f32.mrf.mxu1 }
 0xfc4   : > { %v8067_v59 = vpop.f32.mrf.mxu0 }
 0xfc5   : > { %v8112_v10 = vpop.f32.mrf.mxu1  ;;  %v9223_v30 = vpop.permute.xlu1 %9222 }
 0xfc6   : > { %v7631_v47 = vpop.xlane.xlu0 %7630  ;;  %v12064_v58 = vpop.f32.mrf.mxu0  ;;  %v9228_v43 = vsel %vm3000_vm3, %v9223_v30, 0  ;;  %v10995_v3 = vpack.c.bf16 %v8112_v10, %v15614_v28 }
 0xfc7   : > { %12670 = vrcp.f32 %v7631_v47  ;;  %v12069_v33 = vpop.f32.mrf.mxu1 }
 0xfc9   : > { %v8115_v25 = vpop.f32.mrf.mxu1 }
 0xfca   : > { %v7637_v42 = vpop.xlane.xlu0 %7636 }
 0xfcb   : > { %12672 = vrcp.f32 %v7637_v42  ;;  %v12667_v34 = vpop.eup %12666  ;;  %v12070_v5 = vpop.f32.mrf.mxu1 }
 0xfcc   : > { %v7698_v27 = vmul.f32 %v12667_v34, %v15471_v46 }
 0xfce   : > { %v9175_v21 = vpop.permute.xlu0 %9174  ;;  %v7730_v18 = vpack.c.bf16 %v7698_v27, %v7698_v27 }
 0xfcf   : > { %v9180_v2 = vsel %vm3000_vm3, %v9175_v21, 0  ;;  %v12669_v37 = vpop.eup %12668 }
 0xfd0   : > { %12194 = vmatmul.mubr.msk.bf16.vlgmr.msra.gmra.mxu0 %vm1028_vm2, %v7730_v18  ;;  %v7700_v52 = vmul.f32 %v12669_v37, %v15478_v62  ;;  %v10873_v62 = vld [vmem:[%s15931_s6 + $0x14] sm:$0xf] }
 0xfd1   : > { %12204 = vmatpush3.bf16.msra.mxu0 %v9180_v2  ;;  %12205 = vmatprep.mubr.msk.bf16.mxu0 %vm12742_vm1, %v16004_v29  ;;  %v9440_v39 = vsel %vm3000_vm3, %v10873_v62, 0 }
 0xfd2   : > { %12315 = vmatprep.subr.msk.bf16.mxu0 %vm3000_vm3, %v10872_v51  ;;  %v7732_v16 = vpack.c.bf16 %v7700_v52, %v7700_v52 }
 0xfd4   : > { %v12671_v46 = vpop.eup %12670 }
 0xfd5   : > { %v7699_v41 = vmul.f32 %v12671_v46, %v15483_v35  ;;  %v10874_v35 = vld [vmem:[%s15931_s6 + $0x18] sm:$0xf] }
 0xfd6   : > { %v9540_v63 = vsel %vm3000_vm3, %v10874_v35, 0 }
 0xfd7   : > { %v7731_v56 = vpack.c.bf16 %v7699_v41, %v7699_v41 }
 0xfd8   : > { %v12673_v20 = vpop.eup %12672  ;;  %12206 = vmatmul.mubr.msk.bf16.vlgmr.msra.gmra.mxu0 %vm1028_vm2, %v7732_v16 }
 0xfd9   : > { %12200 = vmatmul.mubr.msk.bf16.vlgmr.msra.gmra.mxu1 %vm1028_vm2, %v7731_v56  ;;  %12217 = vmatprep.mubr.msk.bf16.mxu0 %vm1028_vm2, %v10992_v45  ;;  %v7701_v54 = vmul.f32 %v12673_v20, %v15493_v44 }
 0xfda   : > { %12210 = vmatpush3.bf16.msra.mxu1 %v9228_v43  ;;  %12216 = vmatpush3.bf16.msra.mxu0 %v9340_v17 }
 0xfdb   : > { %12211 = vmatprep.mubr.msk.bf16.mxu1 %vm12742_vm1, %v16004_v29  ;;  %12316 = vmatprep.subr.msk.bf16.mxu1 %vm3000_vm3, %v10873_v62  ;;  %v7733_v11 = vpack.c.bf16 %v7701_v54, %v7701_v54 }
 0xfdc   : > { %12317 = vmatprep.subr.msk.bf16.mxu0 %vm3000_vm3, %v10874_v35 }
 0xfe0   : > { %12218 = vmatmul.mubr.msk.bf16.vlgmr.msra.gmra.mxu0 %vm1028_vm2, %v10993_v8 }
 0xfe1   : > { %12212 = vmatmul.mubr.msk.bf16.vlgmr.msra.gmra.mxu1 %vm1028_vm2, %v7733_v11  ;;  %12221 = vmatprep.mubr.msk.bf16.mxu0 %vm1028_vm2, %v10994_v48 }
 0xfe2   : > { %12226 = vmatpush3.bf16.msra.mxu1 %v9440_v39  ;;  %12236 = vmatpush3.bf16.msra.mxu0 %v9540_v63  ;;  %v8208_v44 = vpop.f32.mrf.mxu1 }
 0xfe3   : > { %12318 = vmatprep.subr.msk.bf16.mxu1 %vm3000_vm3, %v10875_v49 }
 0xfe4   : > { %v12081_v22 = vpop.f32.mrf.mxu1 }
 0xfe6   : > { %v8160_v32 = vpop.f32.mrf.mxu0  ;;  %v8211_v60 = vpop.f32.mrf.mxu1 }
 0xfe7   : > { %v10996_v55 = vpack.c.bf16 %v8208_v44, %v8160_v32 }
 0xfe8   : > { %12222 = vmatmul.mubr.msk.bf16.gmra.mxu0 %vm1028_vm2, %v10995_v3  ;;  %v12075_v1 = vpop.f32.mrf.mxu0  ;;  %v12082_v23 = vpop.f32.mrf.mxu1 }
 0xfe9   : > { %12227 = vmatprep.mubr.msk.bf16.mxu1 %vm1028_vm2, %v10996_v55 }
 0xfea   : > { %v8163_v24 = vpop.f32.mrf.mxu0  ;;  %v8304_v6 = vpop.f32.mrf.mxu1 }
 0xfec   : > { %v12076_v4 = vpop.f32.mrf.mxu0  ;;  %v12093_v26 = vpop.f32.mrf.mxu1 }
 0xfee   : > { %v8256_v53 = vpop.f32.mrf.mxu0  ;;  %v8307_v50 = vpop.f32.mrf.mxu1 }
 0xfef   : > { %v10997_v14 = vpack.c.bf16 %v8304_v6, %v8256_v53 }
 0xff0   : > { %v12087_v15 = vpop.f32.mrf.mxu0  ;;  %v12094_v13 = vpop.f32.mrf.mxu1 }
 0xff1   : > { %12228 = vmatmul.mubr.msk.bf16.vlgmr.msra.gmra.mxu1 %vm1028_vm2, %v10997_v14 }
 0xff2   : > { %v8259_v9 = vpop.f32.mrf.mxu0  ;;  %12246 = vmatpush3.bf16.msra.mxu1 %v9640_v12 }
 0xff4   : > { %v12088_v19 = vpop.f32.mrf.mxu0 }
 0xffa   : > { %v8352_v61 = vpop.f32.mrf.mxu0 }
 0xffc   : > { %v12099_v38 = vpop.f32.mrf.mxu0 }
 0xffe   : > { %v8355_v0 = vpop.f32.mrf.mxu0  ;;  %v8400_v40 = vpop.f32.mrf.mxu1 }
 0xfff   : > { %v10998_v28 = vpack.c.bf16 %v8400_v40, %v8352_v61 }
0x1000   : > { %v12100_v36 = vpop.f32.mrf.mxu0  ;;  %v12105_v57 = vpop.f32.mrf.mxu1 }
0x1001   : > { %12231 = vmatprep.mubr.msk.bf16.mxu1 %vm1028_vm2, %v10998_v28 }
0x1002   : > { %v8403_v7 = vpop.f32.mrf.mxu1  ;;  %v8448_v31 = vpop.f32.mrf.mxu0 }
0x1004   : > { %v12106_v59 = vpop.f32.mrf.mxu1  ;;  %v12111_v10 = vpop.f32.mrf.mxu0 }
0x1006   : > { %v8451_v47 = vpop.f32.mrf.mxu0 }
0x1008   : > { %v12112_v58 = vpop.f32.mrf.mxu0 }
0x1037   : > { %v8544_v33 = vpop.f32.mrf.mxu0 }
0x1039   : > { %v12123_v25 = vpop.f32.mrf.mxu0 }
0x103b   : > { %v8496_v42 = vpop.f32.mrf.mxu1  ;;  %v8547_v34 = vpop.f32.mrf.mxu0 }
0x103c   : > { %v10999_v5 = vpack.c.bf16 %v8496_v42, %v8448_v31 }
0x103d   : > { %v12117_v27 = vpop.f32.mrf.mxu1  ;;  %v12124_v21 = vpop.f32.mrf.mxu0 }
0x103e   : > { %12232 = vmatmul.mubr.msk.bf16.gmra.mxu1 %vm1028_vm2, %v10999_v5 }
0x103f   : > { %v8499_v18 = vpop.f32.mrf.mxu1  ;;  %v8640_v2 = vpop.f32.mrf.mxu0 }
0x1041   : > { %v12118_v37 = vpop.f32.mrf.mxu1  ;;  %v12135_v51 = vpop.f32.mrf.mxu0 }
0x1043   : > { %v8592_v52 = vpop.f32.mrf.mxu1  ;;  %v8643_v46 = vpop.f32.mrf.mxu0 }
0x1044   : > { %v11000_v41 = vpack.c.bf16 %v8592_v52, %v8544_v33 }
0x1045   : > { %v12129_v30 = vpop.f32.mrf.mxu1  ;;  %v12136_v16 = vpop.f32.mrf.mxu0 }
0x1046   : > { %12237 = vmatprep.mubr.msk.bf16.mxu0 %vm1028_vm2, %v11000_v41 }
0x1047   : > { %v8595_v56 = vpop.f32.mrf.mxu1  ;;  %v8736_v20 = vpop.f32.mrf.mxu0 }
0x1049   : > { %v12130_v45 = vpop.f32.mrf.mxu1  ;;  %v12147_v17 = vpop.f32.mrf.mxu0 }
0x104b   : > { %v8688_v43 = vpop.f32.mrf.mxu1  ;;  %v8739_v62 = vpop.f32.mrf.mxu0 }
0x104c   : > { %v11001_v35 = vpack.c.bf16 %v8688_v43, %v8640_v2 }
0x104d   : > { %v12141_v54 = vpop.f32.mrf.mxu1  ;;  %v12148_v8 = vpop.f32.mrf.mxu0 }
0x104e   : > { %12238 = vmatmul.mubr.msk.bf16.vlgmr.msra.gmra.mxu0 %vm1028_vm2, %v11001_v35 }
0x104f   : > { %v8691_v11 = vpop.f32.mrf.mxu1  ;;  %v8832_v39 = vpop.f32.mrf.mxu0 }
0x1051   : > { %v12142_v48 = vpop.f32.mrf.mxu1  ;;  %v12159_v63 = vpop.f32.mrf.mxu0 }
0x1053   : > { %v8784_v44 = vpop.f32.mrf.mxu1  ;;  %v8835_v22 = vpop.f32.mrf.mxu0 }
0x1054   : > { %v11002_v3 = vpack.c.bf16 %v8784_v44, %v8736_v20 }
0x1055   : > { %v12153_v32 = vpop.f32.mrf.mxu1  ;;  %v12160_v60 = vpop.f32.mrf.mxu0 }
0x1056   : > { %12241 = vmatprep.mubr.msk.bf16.mxu0 %vm1028_vm2, %v11002_v3 }
0x1057   : > { %v8787_v55 = vpop.f32.mrf.mxu1  ;;  %v8928_v1 = vpop.f32.mrf.mxu0 }
0x1059   : > { %v12154_v23 = vpop.f32.mrf.mxu1  ;;  %v12171_v49 = vpop.f32.mrf.mxu0 }
0x105b   : > { %v8880_v24 = vpop.f32.mrf.mxu1  ;;  %v8931_v6 = vpop.f32.mrf.mxu0 }
0x105c   : > { %v11003_v4 = vpack.c.bf16 %v8880_v24, %v8832_v39 }
0x105d   : > { %v12165_v26 = vpop.f32.mrf.mxu1  ;;  %v12172_v53 = vpop.f32.mrf.mxu0 }
0x105e   : > { %12242 = vmatmul.mubr.msk.bf16.gmra.mxu0 %vm1028_vm2, %v11003_v4  ;;  %v10909_v26 = vld [vmem:[%s15932_s7 + $0x1] ss:$0 sm:$0xff] }
0x105f   : > { %v8883_v50 = vpop.f32.mrf.mxu1  ;;  %v9024_v14 = vpop.f32.mrf.mxu0 }
0x1061   : > { %v12166_v12 = vpop.f32.mrf.mxu1  ;;  %v12183_v15 = vpop.f32.mrf.mxu0 }
0x1063   : > { %v8976_v13 = vpop.f32.mrf.mxu1  ;;  %v9027_v9 = vpop.f32.mrf.mxu0 }
0x1064   : > { %v11004_v19 = vpack.c.bf16 %v8976_v13, %v8928_v1 }
0x1065   : > { %v12177_v61 = vpop.f32.mrf.mxu1  ;;  %v12184_v38 = vpop.f32.mrf.mxu0 }
0x1066   : > { %12247 = vmatprep.mubr.msk.bf16.mxu1 %vm1028_vm2, %v11004_v19 }
0x1067   : > { %v8979_v0 = vpop.f32.mrf.mxu1 }
0x1069   : > { %v12178_v40 = vpop.f32.mrf.mxu1 }
0x106a   : > { %v16064_v40 = vld [vmem:[#allocation11_spill] sm:$0xff] }
0x106b   : > { %v9072_v28 = vpop.f32.mrf.mxu1 }
0x106c   : > { %v11005_v36 = vpack.c.bf16 %v9072_v28, %v9024_v14 }
0x106d   : > { %v12189_v57 = vpop.f32.mrf.mxu1 }
0x106e   : > { %12248 = vmatmul.mubr.msk.bf16.vlgmr.msra.gmra.mxu1 %vm1028_vm2, %v11005_v36 }
0x106f   : > { %v9075_v7 = vpop.f32.mrf.mxu1 }
0x1071   : > { %v12190_v31 = vpop.f32.mrf.mxu1 }
0x1072   : > { %v16065_v31 = vld [vmem:[#allocation13_spill] sm:$0xff] }
0x1090   : > { %v9120_v59 = vpop.f32.mrf.mxu0 }
0x1092   : > { %v12195_v10 = vpop.f32.mrf.mxu0 }
0x1093   : > { %v16066_v10 = vld [vmem:[#allocation10_spill] sm:$0xff] }
0x1094   : > { %v9123_v47 = vpop.f32.mrf.mxu0 }
0x1096   : > { %v12196_v58 = vpop.f32.mrf.mxu0 }
0x1098   : > { %v9216_v25 = vpop.f32.mrf.mxu0 }
0x1099   : > { %v9168_v33 = vpop.f32.mrf.mxu1 }
0x109a   : > { %v11006_v42 = vpack.c.bf16 %v9168_v33, %v9120_v59  ;;  %v12207_v5 = vpop.f32.mrf.mxu0 }
0x109b   : > { %v12201_v34 = vpop.f32.mrf.mxu1 }
0x109c   : > { %12251 = vmatprep.mubr.msk.bf16.mxu1 %vm1028_vm2, %v11006_v42  ;;  %v9219_v21 = vpop.f32.mrf.mxu0 }
0x109d   : > { %v9171_v27 = vpop.f32.mrf.mxu1 }
0x109e   : > { %v12208_v2 = vpop.f32.mrf.mxu0 }
0x109f   : > { %v12202_v18 = vpop.f32.mrf.mxu1 }
0x10a0   : > { %v12219_v30 = vpop.f32.mrf.mxu0 }
0x10a1   : > { %v9264_v37 = vpop.f32.mrf.mxu1 }
0x10a2   : > { %v11007_v51 = vpack.c.bf16 %v9264_v37, %v9216_v25  ;;  %v9376_v16 = vpop.f32.mrf.mxu0  ;;  %v16067_v25 = vld [vmem:[#allocation12_spill] sm:$0xff] }
0x10a3   : > { %v12213_v52 = vpop.f32.mrf.mxu1 }
0x10a4   : > { %12252 = vmatmul.mubr.msk.bf16.gmra.mxu1 %vm1028_vm2, %v11007_v51  ;;  %v12220_v56 = vpop.f32.mrf.mxu0 }
0x10a5   : > { %v9267_v46 = vpop.f32.mrf.mxu1 }
0x10a6   : > { %v9379_v20 = vpop.f32.mrf.mxu0 }
0x10a7   : > { %v12214_v41 = vpop.f32.mrf.mxu1 }
0x10a8   : > { %v12223_v17 = vpop.f32.mrf.mxu0 }
0x10aa   : > { %v9392_v62 = vpop.f32.mrf.mxu0 }
0x10ac   : > { %v12224_v54 = vpop.f32.mrf.mxu0 }
0x10ae   : > { %v9395_v39 = vpop.f32.mrf.mxu0 }
0x10b1   : > { %v12229_v45 = vpop.f32.mrf.mxu1 }
0x10b2   : > { %v9709_v3 = vadd.f32 %v12229_v45, %v12219_v30 }
0x10b3   : > { %v9476_v43 = vpop.f32.mrf.mxu1 }
0x10b4   : > { %v9707_v55 = vadd.f32 %v9476_v43, %v9376_v16 }
0x10b5   : > { %v12230_v35 = vpop.f32.mrf.mxu1 }
0x10b6   : > { %v9710_v49 = vadd.f32 %v12230_v35, %v12220_v56 }
0x10b7   : > { %v9479_v8 = vpop.f32.mrf.mxu1 }
0x10b8   : > { %v9708_v50 = vadd.f32 %v9479_v8, %v9379_v20 }
0x10fe   : > { %v12233_v11 = vpop.f32.mrf.mxu1 }
0x10ff   : > { %v9713_v21 = vadd.f32 %v12233_v11, %v12223_v17  ;;  %v16068_v17 = vld [vmem:[#allocation15_spill] sm:$0xff] }
0x1100   : > { %v9492_v48 = vpop.f32.mrf.mxu1 }
0x1101   : > { %v9711_v2 = vadd.f32 %v9492_v48, %v9392_v62 }
0x1102   : > { %v12234_v44 = vpop.f32.mrf.mxu1 }
0x1103   : > { %v9714_v52 = vadd.f32 %v12234_v44, %v12224_v54  ;;  %v16069_v44 = vld [vmem:[#allocation17_spill] sm:$0xff] }
0x1104   : > { %v9495_v32 = vpop.f32.mrf.mxu1 }
0x1105   : > { %v9712_v56 = vadd.f32 %v9495_v32, %v9395_v39 }
0x110e   : > { %v12239_v63 = vpop.f32.mrf.mxu0 }
0x110f   : > { %v9717_v1 = vadd.f32 %v12239_v63, %v9709_v3 }
0x1110   : > { %v9576_v22 = vpop.f32.mrf.mxu0 }
0x1111   : > { %v9715_v24 = vadd.f32 %v9707_v55, %v9576_v22 }
0x1112   : > { %v12240_v60 = vpop.f32.mrf.mxu0 }
0x1113   : > { %v9718_v14 = vadd.f32 %v12240_v60, %v9710_v49  ;;  %v16071_v49 = vld [vmem:[#allocation18_spill] sm:$0xff] }
0x1114   : > { %v9579_v4 = vpop.f32.mrf.mxu0 }
0x1115   : > { %v9716_v13 = vadd.f32 %v9708_v50, %v9579_v4 }
0x111e   : > { %v12243_v5 = vpop.f32.mrf.mxu0 }
0x111f   : > { %v9721_v37 = vadd.f32 %v12243_v5, %v9713_v21 }
0x1120   : > { %v9592_v27 = vpop.f32.mrf.mxu0 }
0x1121   : > { %v9719_v46 = vadd.f32 %v9711_v2, %v9592_v27 }
0x1122   : > { %v12244_v18 = vpop.f32.mrf.mxu0 }
0x1123   : > { %v9722_v20 = vadd.f32 %v12244_v18, %v9714_v52 }
0x1124   : > { %v9595_v30 = vpop.f32.mrf.mxu0 }
0x1125   : > { %v9720_v35 = vadd.f32 %v9712_v56, %v9595_v30 }
0x112e   : > { %v12249_v23 = vpop.f32.mrf.mxu1 }
0x112f   : > { %v9725_v6 = vadd.f32 %v12249_v23, %v9717_v1  ;;  %v16070_v1 = vld [vmem:[#allocation14_spill] sm:$0xff] }
0x1130   : > { %v9676_v53 = vpop.f32.mrf.mxu1 }
0x1131   : > { %v9723_v12 = vadd.f32 %v9715_v24, %v9676_v53  ;;  %v9741_v9 = vadd.f32 %v10909_v26, %v9725_v6 }
0x1132   : > { %v12250_v15 = vpop.f32.mrf.mxu1 }
0x1133   : > { %v9739_v19 = vadd.f32 %v10909_v26, %v9723_v12  ;;  %v9726_v61 = vadd.f32 %v12250_v15, %v9718_v14  ;;  %v9749_v59 = vadd.f32 %v9741_v9, %v16065_v31 }
0x1134   : > { %v9679_v38 = vpop.f32.mrf.mxu1 }
0x1135   : > { %v9724_v0 = vadd.f32 %v9716_v13, %v9679_v38  ;;  %v9747_v28 = vadd.f32 %v9739_v19, %v16064_v40  ;;  %v9742_v36 = vadd.f32 %v10909_v26, %v9726_v61  ;;  %v9765_v58 = vsel %vm660_vm0, %v9749_v59, 0.0 }
0x1137   : > { %v9740_v57 = vadd.f32 %v10909_v26, %v9724_v0  ;;  %v9759_v7 = vsel %vm660_vm0, %v9747_v28, 0.0  ;;  %v9750_v42 = vadd.f32 %v9742_v36, %v16067_v25 }
0x1138   : > { %9760 = vadd.xlane.f32.xlu0 %v9759_v7 }
0x1139   : > { %v9748_v47 = vadd.f32 %v9740_v57, %v16066_v10  ;;  %v9768_v34 = vsel %vm660_vm0, %v9750_v42, 0.0  ;;  %v12344_v10 = vld [vmem:[%s15935_s10 + $0x18] sm:$0xff]  }
0x113a   : > { %12255 = vmatprep.subr.bf16.mxu0 %v12344_v10 }
0x113b   : > { %v9762_v33 = vsel %vm660_vm0, %v9748_v47, 0.0  ;;  %12256 = vmatpush3.bf16.msra.mxu0 %v12344_v10 }
0x113c   : > { %9766 = vadd.xlane.f32.xlu0 %v9765_v58  ;;  %9763 = vadd.xlane.f32.xlu1 %v9762_v33 }
0x1140   : > { %9769 = vadd.xlane.f32.xlu0 %v9768_v34 }
0x1164   : > { %v12253_v51 = vpop.f32.mrf.mxu1 }
0x1165   : > { %v9729_v41 = vadd.f32 %v12253_v51, %v9721_v37 }
0x1166   : > { %v9692_v16 = vpop.f32.mrf.mxu1 }
0x1167   : > { %v9727_v45 = vadd.f32 %v9719_v46, %v9692_v16  ;;  %v9745_v8 = vadd.f32 %v10909_v26, %v9729_v41 }
0x1168   : > { %v12254_v43 = vpop.f32.mrf.mxu1 }
0x1169   : > { %v9743_v63 = vadd.f32 %v10909_v26, %v9727_v45  ;;  %v9730_v22 = vadd.f32 %v12254_v43, %v9722_v20  ;;  %v9753_v55 = vadd.f32 %v9745_v8, %v16069_v44 }
0x116a   : > { %v9695_v3 = vpop.f32.mrf.mxu1 }
0x116b   : > { %v9728_v60 = vadd.f32 %v9720_v35, %v9695_v3  ;;  %v9751_v11 = vadd.f32 %v9743_v63, %v16068_v17  ;;  %v9746_v62 = vadd.f32 %v10909_v26, %v9730_v22  ;;  %v9777_v32 = vsel %vm660_vm0, %v9753_v55, 0.0 }
0x116d   : > { %v9744_v48 = vadd.f32 %v10909_v26, %v9728_v60  ;;  %v9771_v54 = vsel %vm660_vm0, %v9751_v11, 0.0  ;;  %v9754_v24 = vadd.f32 %v9746_v62, %v16071_v49 }
0x116e   : > { %9772 = vadd.xlane.f32.xlu0 %v9771_v54 }
0x116f   : > { %v9752_v39 = vadd.f32 %v9744_v48, %v16070_v1  ;;  %v9780_v6 = vsel %vm660_vm0, %v9754_v24, 0.0  ;;  %v10912_v1 = vld [vmem:[%s15933_s8 + $0x1] ss:$0 sm:$0xff] }
0x1171   : > { %v9774_v23 = vsel %vm660_vm0, %v9752_v39, 0.0 }
0x1172   : > { %9778 = vadd.xlane.f32.xlu0 %v9777_v32  ;;  %9775 = vadd.xlane.f32.xlu1 %v9774_v23 }
0x1176   : > { %9781 = vadd.xlane.f32.xlu1 %v9780_v6  ;;  %v10913_v6 = vld [vmem:[%s15934_s9 + $0x1] ss:$0 sm:$0xff] }
0x11c1   : > { %v9761_v4 = vpop.xlane.xlu0 %9760 }
0x11c2   : > { %v9783_v26 = vmul.f32 0.03125, %v9761_v4 }
0x11c4   : > { %v15691_v53 = vsub.f32 %v9747_v28, %v9783_v26 }
0x11c5   : > { %v9767_v50 = vpop.xlane.xlu0 %9766  ;;  %v9764_v14 = vpop.xlane.xlu1 %9763 }
0x11c6   : > { %v9785_v12 = vmul.f32 0.03125, %v9767_v50  ;;  %v9784_v15 = vmul.f32 0.03125, %v9764_v14  ;;  %v9799_v13 = vmul.f32 %v15691_v53, %v15691_v53 }
0x11c8   : > { %v15695_v9 = vsub.f32 %v9749_v59, %v9785_v12  ;;  %v15697_v19 = vsub.f32 %v9748_v47, %v9784_v15  ;;  %v9807_v61 = vsel %vm660_vm0, %v9799_v13, 0.0  ;;  %v12345_v47 = vld [vmem:[%s15935_s10 + $0x10] sm:$0xff]  }
0x11c9   : > { %v9770_v38 = vpop.xlane.xlu0 %9769  ;;  %9808 = vadd.xlane.f32.xlu0 %v9807_v61  ;;  %12257 = vmatprep.subr.bf16.mxu0 %v12345_v47 }
0x11ca   : > { %v9786_v0 = vmul.f32 0.03125, %v9770_v38  ;;  %v9801_v40 = vmul.f32 %v15695_v9, %v15695_v9  ;;  %v9800_v28 = vmul.f32 %v15697_v19, %v15697_v19  ;;  %12258 = vmatpush3.bf16.msra.mxu0 %v12345_v47 }
0x11cb   : > { %12283 = vmatprep.subr.bf16.mxu0 %v16004_v29 }
0x11cc   : > { %v15704_v36 = vsub.f32 %v9750_v42, %v9786_v0  ;;  %v9813_v57 = vsel %vm660_vm0, %v9801_v40, 0.0  ;;  %v9810_v7 = vsel %vm660_vm0, %v9800_v28, 0.0 }
0x11cd   : > { %9814 = vadd.xlane.f32.xlu0 %v9813_v57  ;;  %9811 = vadd.xlane.f32.xlu1 %v9810_v7 }
0x11ce   : > { %v9802_v31 = vmul.f32 %v15704_v36, %v15704_v36 }
0x11d0   : > { %v9816_v59 = vsel %vm660_vm0, %v9802_v31, 0.0 }
0x11d1   : > { %9817 = vadd.xlane.f32.xlu1 %v9816_v59 }
0x11f7   : > { %v9773_v58 = vpop.xlane.xlu0 %9772 }
0x11f8   : > { %v9787_v33 = vmul.f32 0.03125, %v9773_v58 }
0x11fa   : > { %v15718_v25 = vsub.f32 %v9751_v11, %v9787_v33 }
0x11fb   : > { %v9779_v42 = vpop.xlane.xlu0 %9778  ;;  %v9776_v34 = vpop.xlane.xlu1 %9775 }
0x11fc   : > { %v9789_v5 = vmul.f32 0.03125, %v9779_v42  ;;  %v9788_v27 = vmul.f32 0.03125, %v9776_v34  ;;  %v9803_v21 = vmul.f32 %v15718_v25, %v15718_v25 }
0x11fe   : > { %v15722_v18 = vsub.f32 %v9753_v55, %v9789_v5  ;;  %v15724_v2 = vsub.f32 %v9752_v39, %v9788_v27  ;;  %v9819_v37 = vsel %vm660_vm0, %v9803_v21, 0.0 }
0x11ff   : > { %9820 = vadd.xlane.f32.xlu0 %v9819_v37  ;;  %v9782_v51 = vpop.xlane.xlu1 %9781 }
0x1200   : > { %v9790_v52 = vmul.f32 0.03125, %v9782_v51  ;;  %v9805_v46 = vmul.f32 %v15722_v18, %v15722_v18  ;;  %v9804_v41 = vmul.f32 %v15724_v2, %v15724_v2 }
0x1202   : > { %v15731_v30 = vsub.f32 %v9754_v24, %v9790_v52  ;;  %v9825_v16 = vsel %vm660_vm0, %v9805_v46, 0.0  ;;  %v9822_v56 = vsel %vm660_vm0, %v9804_v41, 0.0 }
0x1203   : > { %9826 = vadd.xlane.f32.xlu0 %v9825_v16  ;;  %9823 = vadd.xlane.f32.xlu1 %v9822_v56 }
0x1204   : > { %v9806_v20 = vmul.f32 %v15731_v30, %v15731_v30 }
0x1206   : > { %v9828_v45 = vsel %vm660_vm0, %v9806_v20, 0.0 }
0x1207   : > { %9829 = vadd.xlane.f32.xlu1 %v9828_v45 }
0x1252   : > { %v9809_v43 = vpop.xlane.xlu0 %9808 }
0x1253   : > { %v9831_v35 = vmul.f32 0.03125, %v9809_v43 }
0x1255   : > { %v9839_v8 = vadd.f32 1e-05, %v9831_v35  ;;  %v12348_v35 = vld [vmem:[%s15937_s12 + $0x28] sm:$0xff]  }
0x1256   : > { %v9815_v63 = vpop.xlane.xlu0 %9814  ;;  %v9812_v22 = vpop.xlane.xlu1 %9811 }
0x1257   : > { %12674 = vrsqrt.f32 %v9839_v8  ;;  %v9833_v3 = vmul.f32 0.03125, %v9815_v63  ;;  %v9832_v60 = vmul.f32 0.03125, %v9812_v22  ;;  %v12349_v8 = vld [vmem:[%s15937_s12 + $0x20] sm:$0xff]  }
0x1258   : > { %v15798_v63 = vld [vmem:[%s15936_s11 + $0x1] ss:$0 sm:$0xff] }
0x1259   : > { %v9841_v17 = vadd.f32 1e-05, %v9833_v3  ;;  %v9840_v11 = vadd.f32 1e-05, %v9832_v60 }
0x125a   : > { %v9818_v62 = vpop.xlane.xlu1 %9817 }
0x125b   : > { %12676 = vrsqrt.f32 %v9841_v17  ;;  %v9834_v48 = vmul.f32 0.03125, %v9818_v62 }
0x125c   : > { %12678 = vrsqrt.f32 %v9840_v11 }
0x125d   : > { %v9842_v54 = vadd.f32 1e-05, %v9834_v48 }
0x125f   : > { %12680 = vrsqrt.f32 %v9842_v54 }
0x1264   : > { %v12675_v44 = vpop.eup %12674 }
0x1265   : > { %v9855_v55 = vmul.f32 %v12675_v44, %v15691_v53 }
0x1267   : > { %v9869_v24 = vmul.f32 %v10912_v1, %v9855_v55 }
0x1268   : > { %v12677_v39 = vpop.eup %12676 }
0x1269   : > { %v12679_v32 = vpop.eup %12678  ;;  %v9857_v23 = vmul.f32 %v12677_v39, %v15695_v9  ;;  %v15748_v14 = vadd.f32 %v10913_v6, %v9869_v24 }
0x126a   : > { %v9856_v49 = vmul.f32 %v12679_v32, %v15697_v19 }
0x126b   : > { %v9871_v50 = vmul.f32 %v10912_v1, %v9857_v23 }
0x126c   : > { %v12681_v4 = vpop.eup %12680  ;;  %v9870_v26 = vmul.f32 %v10912_v1, %v9856_v49 }
0x126d   : > { %v9858_v53 = vmul.f32 %v12681_v4, %v15704_v36  ;;  %v15754_v9 = vadd.f32 %v10913_v6, %v9871_v50 }
0x126e   : > { %v15750_v12 = vadd.f32 %v10913_v6, %v9870_v26 }
0x126f   : > { %v9872_v15 = vmul.f32 %v10912_v1, %v9858_v53 }
0x1270   : > { %v9891_v13 = vpack.c.bf16 %v15750_v12, %v15748_v14 }
0x1271   : > { %v15756_v19 = vadd.f32 %v10913_v6, %v9872_v15 }
0x1272   : > { %12259 = vmatprep.mubr.msk.bf16.mxu0 %vm660_vm0, %v9891_v13 }
0x1273   : > { %v9892_v61 = vpack.c.bf16 %v15756_v19, %v15754_v9 }
0x1275   : > { %12260 = vmatmul.mubr.msk.bf16.vlgmr.msra.gmra.mxu0 %vm660_vm0, %v9892_v61 }
0x1288   : > { %v9821_v38 = vpop.xlane.xlu0 %9820 }
0x1289   : > { %v9835_v0 = vmul.f32 0.03125, %v9821_v38 }
0x128b   : > { %v9843_v40 = vadd.f32 1e-05, %v9835_v0 }
0x128c   : > { %v9827_v28 = vpop.xlane.xlu0 %9826  ;;  %v9824_v36 = vpop.xlane.xlu1 %9823 }
0x128d   : > { %12682 = vrsqrt.f32 %v9843_v40  ;;  %v9837_v57 = vmul.f32 0.03125, %v9827_v28  ;;  %v9836_v7 = vmul.f32 0.03125, %v9824_v36 }
0x128f   : > { %v9845_v31 = vadd.f32 1e-05, %v9837_v57  ;;  %v9844_v59 = vadd.f32 1e-05, %v9836_v7 }
0x1290   : > { %v9830_v10 = vpop.xlane.xlu1 %9829 }
0x1291   : > { %12684 = vrsqrt.f32 %v9845_v31  ;;  %v9838_v47 = vmul.f32 0.03125, %v9830_v10 }
0x1292   : > { %12686 = vrsqrt.f32 %v9844_v59 }
0x1293   : > { %v9846_v58 = vadd.f32 1e-05, %v9838_v47 }
0x1295   : > { %12688 = vrsqrt.f32 %v9846_v58 }
0x129a   : > { %v12683_v33 = vpop.eup %12682 }
0x129b   : > { %v9859_v42 = vmul.f32 %v12683_v33, %v15718_v25 }
0x129d   : > { %v9873_v37 = vmul.f32 %v10912_v1, %v9859_v42 }
0x129e   : > { %v12685_v34 = vpop.eup %12684 }
0x129f   : > { %v12687_v5 = vpop.eup %12686  ;;  %v9861_v27 = vmul.f32 %v12685_v34, %v15722_v18  ;;  %v15766_v16 = vadd.f32 %v10913_v6, %v9873_v37 }
0x12a0   : > { %v9860_v21 = vmul.f32 %v12687_v5, %v15724_v2  ;;  %v12346_v2 = vld [vmem:[%s15937_s12 + $0x38] sm:$0xff]  }
0x12a1   : > { %v9875_v41 = vmul.f32 %v10912_v1, %v9861_v27  ;;  %12267 = vmatprep.subr.bf16.mxu1 %v12346_v2 }
0x12a2   : > { %v12689_v51 = vpop.eup %12688  ;;  %v9874_v52 = vmul.f32 %v10912_v1, %v9860_v21  ;;  %12268 = vmatpush3.bf16.msra.mxu1 %v12346_v2 }
0x12a3   : > { %v9862_v46 = vmul.f32 %v12689_v51, %v15731_v30  ;;  %v15772_v45 = vadd.f32 %v10913_v6, %v9875_v41  ;;  %v12347_v30 = vld [vmem:[%s15937_s12 + $0x30] sm:$0xff]  }
0x12a4   : > { %v15768_v56 = vadd.f32 %v10913_v6, %v9874_v52  ;;  %12269 = vmatprep.subr.bf16.mxu1 %v12347_v30 }
0x12a5   : > { %v9876_v20 = vmul.f32 %v10912_v1, %v9862_v46 }
0x12a6   : > { %v9893_v25 = vpack.c.bf16 %v15768_v56, %v15766_v16  ;;  %12270 = vmatpush3.bf16.msra.mxu1 %v12347_v30 }
0x12a7   : > { %v15774_v43 = vadd.f32 %v10913_v6, %v9876_v20  ;;  %12271 = vmatprep.subr.bf16.mxu1 %v12348_v35 }
0x12a8   : > { %12263 = vmatprep.mubr.msk.bf16.mxu0 %vm660_vm0, %v9893_v25 }
0x12a9   : > { %v9894_v18 = vpack.c.bf16 %v15774_v43, %v15772_v45 }
0x12aa   : > { %12272 = vmatpush3.bf16.msra.mxu1 %v12348_v35 }
0x12ab   : > { %12264 = vmatmul.mubr.msk.bf16.gmra.mxu0 %vm660_vm0, %v9894_v18  ;;  %12273 = vmatprep.subr.bf16.mxu1 %v12349_v8 }
0x12ac   : > { %12291 = vmatprep.mubr.msk.bf16.mxu0 %vm12742_vm1, %v16004_v29 }
0x12ae   : > { %12274 = vmatpush3.bf16.msra.mxu1 %v12349_v8 }
0x12af   : > { %12295 = vmatprep.subr.bf16.mxu1 %v16004_v29 }
0x1335   : > { %v12261_v22 = vpop.f32.mrf.mxu0 }
0x1336   : > { %v9975_v3 = vadd.f32 %v12261_v22, %v15798_v63 }
0x1337   : > { %v9966_v60 = vpop.f32.mrf.mxu0 }
0x1338   : > { %v9999_v17 = vmul.f32 %v9975_v3, %v9975_v3  ;;  %v9967_v11 = vadd.f32 %v15798_v63, %v9966_v60 }
0x1339   : > { %v12262_v62 = vpop.f32.mrf.mxu0 }
0x133a   : > { %v10007_v48 = vmul.f32 %v9999_v17, %v9975_v3  ;;  %v9997_v54 = vmul.f32 %v9967_v11, %v9967_v11  ;;  %v9978_v44 = vadd.f32 %v12262_v62, %v15798_v63 }
0x133b   : > { %v9969_v55 = vpop.f32.mrf.mxu0 }
0x133c   : > { %v10015_v1 = vmul.f32 0.044715, %v10007_v48  ;;  %v10005_v39 = vmul.f32 %v9997_v54, %v9967_v11  ;;  %v10000_v32 = vmul.f32 %v9978_v44, %v9978_v44  ;;  %v9970_v23 = vadd.f32 %v15798_v63, %v9969_v55 }
0x133e   : > { %v10023_v49 = vadd.f32 %v10015_v1, %v9975_v3  ;;  %v10013_v24 = vmul.f32 0.044715, %v10005_v39  ;;  %v10008_v6 = vmul.f32 %v10000_v32, %v9978_v44  ;;  %v9998_v4 = vmul.f32 %v9970_v23, %v9970_v23 }
0x1340   : > { %v10031_v26 = vmul.f32 0.7978846, %v10023_v49  ;;  %v10021_v50 = vadd.f32 %v10013_v24, %v9967_v11  ;;  %v10016_v53 = vmul.f32 0.044715, %v10008_v6  ;;  %v10006_v15 = vmul.f32 %v9998_v4, %v9970_v23 }
0x1342   : > { %v10029_v13 = vmul.f32 0.7978846, %v10021_v50  ;;  %v10024_v61 = vadd.f32 %v10016_v53, %v9978_v44  ;;  %v10014_v38 = vmul.f32 0.044715, %v10006_v15  ;;  %12690 = vtanh.f32 %v10031_v26 }
0x1344   : > { %12692 = vtanh.f32 %v10029_v13  ;;  %v10032_v0 = vmul.f32 0.7978846, %v10024_v61  ;;  %v10022_v40 = vadd.f32 %v10014_v38, %v9970_v23 }
0x1346   : > { %12694 = vtanh.f32 %v10032_v0  ;;  %v10030_v28 = vmul.f32 0.7978846, %v10022_v40 }
0x1348   : > { %12696 = vtanh.f32 %v10030_v28 }
0x134f   : > { %v12691_v36 = vpop.eup %12690 }
0x1350   : > { %v10047_v59 = vadd.f32 1.0, %v12691_v36 }
0x1351   : > { %v12693_v57 = vpop.eup %12692 }
0x1352   : > { %v10045_v7 = vadd.f32 1.0, %v12693_v57  ;;  %v10055_v34 = vmul.f32 0.5, %v10047_v59 }
0x1353   : > { %v12695_v31 = vpop.eup %12694 }
0x1354   : > { %v10048_v10 = vadd.f32 1.0, %v12695_v31  ;;  %v10053_v58 = vmul.f32 0.5, %v10045_v7  ;;  %v10063_v51 = vmul.f32 %v10055_v34, %v9975_v3 }
0x1355   : > { %v12697_v47 = vpop.eup %12696 }
0x1356   : > { %v10056_v33 = vmul.f32 0.5, %v10048_v10  ;;  %v10046_v42 = vadd.f32 1.0, %v12697_v47  ;;  %v10061_v21 = vmul.f32 %v10053_v58, %v9967_v11 }
0x1358   : > { %v10054_v5 = vmul.f32 0.5, %v10046_v42  ;;  %v10064_v27 = vmul.f32 %v10056_v33, %v9978_v44 }
0x135a   : > { %v10062_v37 = vmul.f32 %v10054_v5, %v9970_v23  ;;  %v10070_v46 = vpack.c.bf16 %v10064_v27, %v10063_v51 }
0x135c   : > { %v10069_v52 = vpack.c.bf16 %v10062_v37, %v10061_v21  ;;  %v10935_v21 = vld [vmem:[%s15938_s13 + $0x1] ss:$0 sm:$0xff] }
0x135e   : > { %12275 = vmatprep.mubr.msk.bf16.mxu1 %vm5368_vm4, %v10069_v52 }
0x135f   : > { %12276 = vmatmul.mubr.msk.bf16.vlgmr.msra.gmra.mxu1 %vm5368_vm4, %v10070_v46 }
0x136b   : > { %v12265_v41 = vpop.f32.mrf.mxu0 }
0x136c   : > { %v9991_v20 = vadd.f32 %v12265_v41, %v15798_v63 }
0x136d   : > { %v9982_v25 = vpop.f32.mrf.mxu0 }
0x136e   : > { %v10003_v18 = vmul.f32 %v9991_v20, %v9991_v20  ;;  %v9983_v2 = vadd.f32 %v15798_v63, %v9982_v25 }
0x136f   : > { %v12266_v30 = vpop.f32.mrf.mxu0 }
0x1370   : > { %v10011_v35 = vmul.f32 %v10003_v18, %v9991_v20  ;;  %v10001_v8 = vmul.f32 %v9983_v2, %v9983_v2  ;;  %v9994_v22 = vadd.f32 %v12266_v30, %v15798_v63 }
0x1371   : > { %v9985_v60 = vpop.f32.mrf.mxu0 }
0x1372   : > { %v10019_v3 = vmul.f32 0.044715, %v10011_v35  ;;  %v10009_v17 = vmul.f32 %v10001_v8, %v9983_v2  ;;  %v10004_v11 = vmul.f32 %v9994_v22, %v9994_v22  ;;  %v9986_v62 = vadd.f32 %v15798_v63, %v9985_v60 }
0x1374   : > { %v10027_v48 = vadd.f32 %v10019_v3, %v9991_v20  ;;  %v10017_v54 = vmul.f32 0.044715, %v10009_v17  ;;  %v10012_v44 = vmul.f32 %v10004_v11, %v9994_v22  ;;  %v10002_v55 = vmul.f32 %v9986_v62, %v9986_v62 }
0x1376   : > { %v10035_v1 = vmul.f32 0.7978846, %v10027_v48  ;;  %v10025_v39 = vadd.f32 %v10017_v54, %v9983_v2  ;;  %v10020_v32 = vmul.f32 0.044715, %v10012_v44  ;;  %v10010_v23 = vmul.f32 %v10002_v55, %v9986_v62 }
0x1378   : > { %v10033_v49 = vmul.f32 0.7978846, %v10025_v39  ;;  %v10028_v24 = vadd.f32 %v10020_v32, %v9994_v22  ;;  %v10018_v6 = vmul.f32 0.044715, %v10010_v23  ;;  %12698 = vtanh.f32 %v10035_v1 }
0x137a   : > { %12700 = vtanh.f32 %v10033_v49  ;;  %v10036_v4 = vmul.f32 0.7978846, %v10028_v24  ;;  %v10026_v26 = vadd.f32 %v10018_v6, %v9986_v62 }
0x137c   : > { %12702 = vtanh.f32 %v10036_v4  ;;  %v10034_v50 = vmul.f32 0.7978846, %v10026_v26 }
0x137e   : > { %12704 = vtanh.f32 %v10034_v50 }
0x1385   : > { %v12699_v53 = vpop.eup %12698 }
0x1386   : > { %v10051_v61 = vadd.f32 1.0, %v12699_v53 }
0x1387   : > { %v12701_v63 = vpop.eup %12700 }
0x1388   : > { %v10049_v15 = vadd.f32 1.0, %v12701_v63  ;;  %v10059_v57 = vmul.f32 0.5, %v10051_v61 }
0x1389   : > { %v12703_v13 = vpop.eup %12702 }
0x138a   : > { %v10052_v38 = vadd.f32 1.0, %v12703_v13  ;;  %v10057_v40 = vmul.f32 0.5, %v10049_v15  ;;  %v10067_v47 = vmul.f32 %v10059_v57, %v9991_v20 }
0x138b   : > { %v12705_v0 = vpop.eup %12704 }
0x138c   : > { %v10060_v28 = vmul.f32 0.5, %v10052_v38  ;;  %v10050_v36 = vadd.f32 1.0, %v12705_v0  ;;  %v10065_v59 = vmul.f32 %v10057_v40, %v9983_v2 }
0x138e   : > { %v10058_v7 = vmul.f32 0.5, %v10050_v36  ;;  %v10068_v31 = vmul.f32 %v10060_v28, %v9994_v22 }
0x1390   : > { %v10066_v10 = vmul.f32 %v10058_v7, %v9986_v62  ;;  %v10072_v33 = vpack.c.bf16 %v10068_v31, %v10067_v47 }
0x1392   : > { %v10071_v58 = vpack.c.bf16 %v10066_v10, %v10065_v59 }
0x1394   : > { %12279 = vmatprep.mubr.msk.bf16.mxu1 %vm5368_vm4, %v10071_v58 }
0x1395   : > { %12280 = vmatmul.mubr.msk.bf16.gmra.mxu1 %vm5368_vm4, %v10072_v33 }
0x1396   : > { %12299 = vmatprep.mubr.msk.bf16.mxu1 %vm12742_vm1, %v16004_v29 }
0x141f   : > { %v12277_v42 = vpop.f32.mrf.mxu1 }
0x1420   : > { %v10169_v20 = vadd.f32 %v12277_v42, %v10935_v21 }
0x1421   : > { %v10160_v34 = vpop.f32.mrf.mxu1 }
0x1422   : > { %v10193_v60 = vadd.f32 %v10169_v20, %v15754_v9  ;;  %v10161_v3 = vadd.f32 %v10935_v21, %v10160_v34  ;;  %v12350_v20 = vld [vmem:[%s15941_s16 + $0x8] sm:$0xff]  }
0x1423   : > { %v12278_v5 = vpop.f32.mrf.mxu1  ;;  %12296 = vmatpush3.bf16.msra.mxu1 %v12350_v20 }
0x1424   : > { %v10172_v17 = vadd.f32 %v12278_v5, %v10935_v21  ;;  %v10209_v44 = vsel %vm660_vm0, %v10193_v60, 0.0  ;;  %12297 = vmatprep.subr.bf16.mxu1 %v16004_v29 }
0x1425   : > { %v10163_v27 = vpop.f32.mrf.mxu1 }
0x1426   : > { %v10194_v48 = vadd.f32 %v10172_v17, %v15756_v19  ;;  %v10164_v54 = vadd.f32 %v10935_v21, %v10163_v27 }
0x1428   : > { %v10192_v9 = vadd.f32 %v10164_v54, %v15750_v12 }
0x142a   : > { %v10206_v1 = vsel %vm660_vm0, %v10192_v9, 0.0 }
0x1455   : > { %v12281_v37 = vpop.f32.mrf.mxu1 }
0x1456   : > { %v10185_v51 = vadd.f32 %v12281_v37, %v10935_v21 }
0x1457   : > { %v10176_v52 = vpop.f32.mrf.mxu1 }
0x1458   : > { %v10197_v46 = vadd.f32 %v10185_v51, %v15772_v45  ;;  %v10177_v41 = vadd.f32 %v10935_v21, %v10176_v52 }
0x1459   : > { %v12282_v25 = vpop.f32.mrf.mxu1 }
0x145a   : > { %v10195_v18 = vadd.f32 %v10177_v41, %v15766_v16  ;;  %v10188_v2 = vadd.f32 %v12282_v25, %v10935_v21  ;;  %v10221_v30 = vsel %vm660_vm0, %v10197_v46, 0.0  ;;  %v10191_v16 = vadd.f32 %v10161_v3, %v15748_v14  ;;  %v12351_v25 = vld [vmem:[%s15941_s16] sm:$0xff]  }
0x145b   : > { %10222 = vadd.xlane.f32.xlu0 %v10221_v30  ;;  %v10179_v35 = vpop.f32.mrf.mxu1  ;;  %12298 = vmatpush3.bf16.msra.mxu1 %v12351_v25 }
0x145c   : > { %v10198_v8 = vadd.f32 %v10188_v2, %v15774_v43  ;;  %v10180_v22 = vadd.f32 %v10935_v21, %v10179_v35  ;;  %v10215_v62 = vsel %vm660_vm0, %v10195_v18, 0.0  ;;  %v10203_v55 = vsel %vm660_vm0, %v10191_v16, 0.0 }
0x145e   : > { %v10196_v11 = vadd.f32 %v10180_v22, %v15768_v56  ;;  %v10224_v45 = vsel %vm660_vm0, %v10198_v8, 0.0  ;;  %v10212_v56 = vsel %vm660_vm0, %v10194_v48, 0.0 }
0x145f   : > { %10225 = vadd.xlane.f32.xlu1 %v10224_v45  ;;  %10216 = vadd.xlane.f32.xlu0 %v10215_v62 }
0x1460   : > { %v10218_v43 = vsel %vm660_vm0, %v10196_v11, 0.0 }
0x1463   : > { %10219 = vadd.xlane.f32.xlu1 %v10218_v43  ;;  %10210 = vadd.xlane.f32.xlu0 %v10209_v44 }
0x1467   : > { %10213 = vadd.xlane.f32.xlu1 %v10212_v56  ;;  %10204 = vadd.xlane.f32.xlu0 %v10203_v55 }
0x146b   : > { %10207 = vadd.xlane.f32.xlu1 %v10206_v1 }
0x14e4   : > { %v10223_v14 = vpop.xlane.xlu0 %10222 }
0x14e5   : > { %v10233_v19 = vmul.f32 0.03125, %v10223_v14 }
0x14e7   : > { %v15833_v39 = vsub.f32 %v10197_v46, %v10233_v19 }
0x14e8   : > { %v10226_v32 = vpop.xlane.xlu1 %10225  ;;  %v10217_v23 = vpop.xlane.xlu0 %10216 }
0x14e9   : > { %v10234_v49 = vmul.f32 0.03125, %v10226_v32  ;;  %v10231_v24 = vmul.f32 0.03125, %v10217_v23  ;;  %v10249_v12 = vmul.f32 %v15833_v39, %v15833_v39 }
0x14eb   : > { %v15837_v6 = vsub.f32 %v10198_v8, %v10234_v49  ;;  %v15839_v4 = vsub.f32 %v10195_v18, %v10231_v24  ;;  %v10269_v26 = vsel %vm660_vm0, %v10249_v12, 0.0  ;;  %v10946_v24 = vld [vmem:[%s15939_s14 + $0x1] ss:$0 sm:$0xff] }
0x14ec   : > { %v10220_v50 = vpop.xlane.xlu1 %10219  ;;  %10270 = vadd.xlane.f32.xlu0 %v10269_v26  ;;  %v10211_v53 = vpop.xlane.xlu0 %10210 }
0x14ed   : > { %v10232_v63 = vmul.f32 0.03125, %v10220_v50  ;;  %v10229_v15 = vmul.f32 0.03125, %v10211_v53  ;;  %v10250_v13 = vmul.f32 %v15837_v6, %v15837_v6  ;;  %v10247_v61 = vmul.f32 %v15839_v4, %v15839_v4 }
0x14ef   : > { %v15846_v38 = vsub.f32 %v10196_v11, %v10232_v63  ;;  %v15848_v0 = vsub.f32 %v10193_v60, %v10229_v15  ;;  %v10272_v40 = vsel %vm660_vm0, %v10250_v13, 0.0  ;;  %v10263_v28 = vsel %vm660_vm0, %v10247_v61, 0.0  ;;  %v10947_v63 = vld [vmem:[%s15940_s15 + $0x1] ss:$0 sm:$0xff] }
0x14f0   : > { %10273 = vadd.xlane.f32.xlu1 %v10272_v40  ;;  %v10214_v36 = vpop.xlane.xlu1 %10213  ;;  %10264 = vadd.xlane.f32.xlu0 %v10263_v28  ;;  %v10205_v57 = vpop.xlane.xlu0 %10204  ;;  %v10335_v13 = vlaneseq }
0x14f1   : > { %v10230_v7 = vmul.f32 0.03125, %v10214_v36  ;;  %v10227_v31 = vmul.f32 0.03125, %v10205_v57  ;;  %v10248_v59 = vmul.f32 %v15846_v38, %v15846_v38  ;;  %v10245_v10 = vmul.f32 %v15848_v0, %v15848_v0 }
0x14f3   : > { %v15856_v47 = vsub.f32 %v10194_v48, %v10230_v7  ;;  %v15858_v58 = vsub.f32 %v10191_v16, %v10227_v31  ;;  %v10266_v33 = vsel %vm660_vm0, %v10248_v59, 0.0  ;;  %v10257_v42 = vsel %vm660_vm0, %v10245_v10, 0.0 }
0x14f4   : > { %10267 = vadd.xlane.f32.xlu1 %v10266_v33  ;;  %v10208_v34 = vpop.xlane.xlu1 %10207  ;;  %10258 = vadd.xlane.f32.xlu0 %v10257_v42  ;;  %v10338_v59 = vshrl.u32 %v10335_v13, 7 }
0x14f5   : > { %v10228_v5 = vmul.f32 0.03125, %v10208_v34  ;;  %v10246_v27 = vmul.f32 %v15856_v47, %v15856_v47  ;;  %v10243_v21 = vmul.f32 %v15858_v58, %v15858_v58 }
0x14f7   : > { %v15866_v37 = vsub.f32 %v10192_v9, %v10228_v5  ;;  %v10260_v51 = vsel %vm660_vm0, %v10246_v27, 0.0  ;;  %v10251_v52 = vsel %vm660_vm0, %v10243_v21, 0.0 }
0x14f8   : > { %10261 = vadd.xlane.f32.xlu1 %v10260_v51  ;;  %10252 = vadd.xlane.f32.xlu0 %v10251_v52  ;;  %v10336_v51 = vand.u32 127, %v10335_v13 }
0x14f9   : > { %v10244_v46 = vmul.f32 %v15866_v37, %v15866_v37 }
0x14fb   : > { %v10254_v41 = vsel %vm660_vm0, %v10244_v46, 0.0 }
0x14fc   : > { %10255 = vadd.xlane.f32.xlu1 %v10254_v41 }
0x1575   : > { %v10271_v18 = vpop.xlane.xlu0 %10270 }
0x1576   : > { %v10281_v2 = vmul.f32 0.03125, %v10271_v18 }
0x1578   : > { %v10289_v30 = vadd.f32 1e-05, %v10281_v2 }
0x1579   : > { %v10274_v35 = vpop.xlane.xlu1 %10273  ;;  %v10265_v8 = vpop.xlane.xlu0 %10264 }
0x157a   : > { %12706 = vrsqrt.f32 %v10289_v30  ;;  %v10282_v22 = vmul.f32 0.03125, %v10274_v35  ;;  %v10279_v60 = vmul.f32 0.03125, %v10265_v8 }
0x157c   : > { %v10290_v3 = vadd.f32 1e-05, %v10282_v22  ;;  %v10287_v17 = vadd.f32 1e-05, %v10279_v60 }
0x157d   : > { %v10268_v11 = vpop.xlane.xlu1 %10267  ;;  %v10259_v45 = vpop.xlane.xlu0 %10258 }
0x157e   : > { %12708 = vrsqrt.f32 %v10290_v3  ;;  %v10280_v62 = vmul.f32 0.03125, %v10268_v11  ;;  %v10277_v16 = vmul.f32 0.03125, %v10259_v45  ;;  %v12352_v45 = vld [vmem:[%s15943_s18 + $0x8] sm:$0xff]  }
0x157f   : > { %12710 = vrsqrt.f32 %v10287_v17 }
0x1580   : > { %v10288_v48 = vadd.f32 1e-05, %v10280_v62  ;;  %v10285_v54 = vadd.f32 1e-05, %v10277_v16  ;;  %v12353_v62 = vld [vmem:[%s15943_s18] sm:$0xff]  }
0x1581   : > { %v10262_v43 = vpop.xlane.xlu1 %10261  ;;  %v10253_v44 = vpop.xlane.xlu0 %10252  ;;  %v10950_v16 = vld [vmem:[%s15942_s17] ss:$0 sm:$0xff] }
0x1582   : > { %12712 = vrsqrt.f32 %v10288_v48  ;;  %v10278_v9 = vmul.f32 0.03125, %v10262_v43  ;;  %v10275_v56 = vmul.f32 0.03125, %v10253_v44 }
0x1583   : > { %12714 = vrsqrt.f32 %v10285_v54 }
0x1584   : > { %v10286_v55 = vadd.f32 1e-05, %v10278_v9  ;;  %v10283_v1 = vadd.f32 1e-05, %v10275_v56 }
0x1585   : > { %v10256_v14 = vpop.xlane.xlu1 %10255 }
0x1586   : > { %12716 = vrsqrt.f32 %v10286_v55  ;;  %v10276_v19 = vmul.f32 0.03125, %v10256_v14 }
0x1587   : > { %v12707_v32 = vpop.eup %12706  ;;  %12718 = vrsqrt.f32 %v10283_v1 }
0x1588   : > { %v10284_v23 = vadd.f32 1e-05, %v10276_v19  ;;  %v10305_v49 = vmul.f32 %v12707_v32, %v15833_v39 }
0x158a   : > { %12720 = vrsqrt.f32 %v10284_v23  ;;  %v10319_v53 = vmul.f32 %v10946_v24, %v10305_v49 }
0x158b   : > { %v12709_v12 = vpop.eup %12708 }
0x158c   : > { %v12711_v26 = vpop.eup %12710  ;;  %v10306_v50 = vmul.f32 %v12709_v12, %v15837_v6  ;;  %v10333_v28 = vadd.f32 %v10947_v63, %v10319_v53 }
0x158d   : > { %v10303_v15 = vmul.f32 %v12711_v26, %v15839_v4 }
0x158e   : > { %v10320_v61 = vmul.f32 %v10946_v24, %v10306_v50 }
0x158f   : > { %v12713_v40 = vpop.eup %12712  ;;  %v10317_v7 = vmul.f32 %v10946_v24, %v10303_v15 }
0x1590   : > { %v12715_v39 = vpop.eup %12714  ;;  %v10334_v36 = vadd.f32 %v10947_v63, %v10320_v61  ;;  %v10304_v57 = vmul.f32 %v12713_v40, %v15846_v38  ;;  %v10339_v38 = vmul.u32 8, %v10338_v59 }
0x1591   : > { %v10301_v31 = vmul.f32 %v12715_v39, %v15848_v0  ;;  %v10331_v34 = vadd.f32 %v10947_v63, %v10317_v7 }
0x1592   : > { %v10347_v6 = vpack.c.bf16 %v10334_v36, %v10333_v28  ;;  %v10318_v10 = vmul.f32 %v10946_v24, %v10304_v57  ;;  %vm10340_vm5 = vcmp.eq.s32.totalorder %v10336_v51, %v10339_v38 }
0x1593   : > { %v12717_v33 = vpop.eup %12716  ;;  %v10315_v27 = vmul.f32 %v10946_v24, %v10301_v31 }
0x1594   : > { %v12719_v42 = vpop.eup %12718  ;;  %12284 = vmatpush3.bf16.msra.mxu0 %v10347_v6  ;;  %v10332_v5 = vadd.f32 %v10947_v63, %v10318_v10  ;;  %v10302_v4 = vmul.f32 %v12717_v33, %v15856_v47 }
0x1595   : > { %12285 = vmatprep.subr.bf16.mxu0 %v16004_v29  ;;  %v10299_v21 = vmul.f32 %v12719_v42, %v15858_v58  ;;  %v10329_v41 = vadd.f32 %v10947_v63, %v10315_v27  ;;  %v10948_v58 = vsel %vm10340_vm5, 1.0, %v16004_v29 }
0x1596   : > { %v10346_v52 = vpack.c.bf16 %v10332_v5, %v10331_v34  ;;  %v10316_v46 = vmul.f32 %v10946_v24, %v10302_v4  ;;  %v10343_v22 = vpack.c.bf16 %v10948_v58, %v10948_v58 }
0x1597   : > { %v12721_v0 = vpop.eup %12720  ;;  %v10313_v18 = vmul.f32 %v10946_v24, %v10299_v21 }
0x1598   : > { %12286 = vmatpush3.bf16.msra.mxu0 %v10346_v52  ;;  %v10330_v20 = vadd.f32 %v10947_v63, %v10316_v46  ;;  %v10300_v25 = vmul.f32 %v12721_v0, %v15866_v37 }
0x1599   : > { %12287 = vmatprep.subr.bf16.mxu0 %v16004_v29  ;;  %v10327_v30 = vadd.f32 %v10947_v63, %v10313_v18 }
0x159a   : > { %v10345_v47 = vpack.c.bf16 %v10330_v20, %v10329_v41  ;;  %v10314_v2 = vmul.f32 %v10946_v24, %v10300_v25 }
0x159c   : > { %12288 = vmatpush3.bf16.msra.mxu0 %v10345_v47  ;;  %v10328_v35 = vadd.f32 %v10947_v63, %v10314_v2 }
0x159d   : > { %12289 = vmatprep.subr.bf16.mxu0 %v16004_v29 }
0x159e   : > { %v10344_v8 = vpack.c.bf16 %v10328_v35, %v10327_v30 }
0x15a0   : > { %12290 = vmatpush3.bf16.msra.mxu0 %v10344_v8 }
0x15a1   : > { %12303 = vmatprep.subr.bf16.mxu0 %v16004_v29 }
0x15a3   : > { %12292 = vmatmul.mubr.msk.bf16.vlgmr.msra.gmra.mxu0 %vm5368_vm4, %v10343_v22 }
0x15a4   : > { %12307 = vmatprep.mubr.msk.bf16.mxu0 %vm12742_vm1, %v16004_v29  ;;  %12304 = vmatpush3.bf16.msra.mxu0 %v12352_v45 }
0x15a5   : > { %12305 = vmatprep.subr.bf16.mxu0 %v16004_v29  ;;  %v10954_v29 = vld [vmem:[%s15944_s19] ss:$0 sm:$0xff] }
0x15a8   : > { %12306 = vmatpush3.bf16.msra.mxu0 %v12353_v62 }
0x1663   : > { %v10385_v37 = vpop.f32.mrf.mxu0 }
0x1664   : > { %v10391_v60 = vpack.c.bf16 %v10385_v37, %v10385_v37 }
0x1665   : > { %v12293_v3 = vpop.f32.mrf.mxu0 }
0x1666   : > { %12300 = vmatmul.mubr.msk.bf16.vlgmr.msra.gmra.mxu1 %vm660_vm0, %v10391_v60 }
0x1667   : > { %v10388_v17 = vpop.f32.mrf.mxu0 }
0x1669   : > { %v12294_v11 = vpop.f32.mrf.mxu0 }
0x1726   : > { %v10452_v48 = vpop.f32.mrf.mxu1 }
0x1727   : > { %v10453_v54 = vadd.f32 %v10950_v16, %v10452_v48 }
0x1728   : > { %v12301_v43 = vpop.f32.mrf.mxu1 }
0x1729   : > { %12722 = vtanh.f32 %v10453_v54 }
0x172a   : > { %v10455_v44 = vpop.f32.mrf.mxu1 }
0x172c   : > { %v12302_v9 = vpop.f32.mrf.mxu1 }
0x1736   : > { %v12723_v56 = vpop.eup %12722 }
0x1737   : > { %v10459_v55 = vpack.c.bf16 %v12723_v56, %v12723_v56 }
0x1739   : > { %12308 = vmatmul.mubr.msk.bf16.vlgmr.msra.gmra.mxu0 %vm660_vm0, %v10459_v55 }
0x17f9   : > { %v10520_v1 = vpop.f32.mrf.mxu0 }
0x17fa   : > { %v10521_v14 = vadd.f32 %v10954_v29, %v10520_v1 }
0x17fb   : > { %v12309_v19 = vpop.f32.mrf.mxu0 }
0x17fc   : > { %10526 = vst [vmem:[%s648_s3] sm:$0xff] %v10521_v14 }
0x17fd   : > { %v10523_v32 = vpop.f32.mrf.mxu0 }
0x17ff   : > { %v12310_v23 = vpop.f32.mrf.mxu0 }
0x1800 PF: > { %s30_s1 = sadd.s32 1, %s12738_s1  }
0x1801   : > { %p27_p5 = scmp.ge.s32.totalorder %s30_s1, 4  }
0x1803   :  { %29 = sbr.rel (!%p27_p5) target bundleno = 6 (0x6), region = 145 }

</bundles_post_ra>
